<compile_context>
chip_gen: v5e
topology: v5e:2x2
jax: 0.10.0
libtpu: 0.0.40
codegen_flags: <defaults>
</compile_context>

<pallas_src>
import math

import jax
import jax.numpy as jnp
from jax import lax
from jax.experimental import pallas as pl
from jax.experimental.pallas import tpu as pltpu

H = 128            # hidden size (small stand-in for DeBERTa's 768; multiple of nhead)
NHEAD = 8
DHEAD = H // NHEAD
DFF = 2048         # nn.TransformerEncoderLayer default dim_feedforward
NUM_LAYERS = 2
EPS = 1e-5         # nn.LayerNorm default eps
H2 = H // 2


def _layernorm(x, g, b):
    mu = jnp.mean(x, axis=-1, keepdims=True)
    var = jnp.mean((x - mu) ** 2, axis=-1, keepdims=True)   # biased var, like PyTorch
    return (x - mu) * lax.rsqrt(var + EPS) * g + b


def _gelu_exact(x):
    # PyTorch F.gelu default (erf form), used by activation='gelu'.
    return 0.5 * x * (1.0 + lax.erf(x * (1.0 / math.sqrt(2.0))))


def _make_model_kernel(B, S):
    """Whole-model kernel: prologue + both encoder layers + classifier, one invocation."""
    BS = B * S

    def kernel(audio_ref, wa_ref, ba_ref, ga_ref, bta_ref,
               embd_ref, we_ref, be_ref, ge_ref, bte_ref,
               text_ref,
               wqkv_ref, bqkv_ref, wo_ref, bo_ref,
               g1_ref, b1_ref, w1_ref, bf1_ref, w2_ref, bf2_ref,
               g2_ref, b2_ref,
               wc1_ref, bc1_ref, wc2_ref, bc2_ref,
               logits_ref,
               xs_ref):
        # ---- prologue: audio_fc / embedding_fc (runs exactly once)
        a = jnp.dot(audio_ref[...], wa_ref[...],
                    preferred_element_type=jnp.float32) + ba_ref[...]
        a = jnp.maximum(_layernorm(a, ga_ref[...], bta_ref[...]), 0.0)
        e = jnp.dot(embd_ref[...], we_ref[...],
                    preferred_element_type=jnp.float32) + be_ref[...]
        e = jnp.maximum(_layernorm(e, ge_ref[...], bte_ref[...]), 0.0)

        # Assemble sequence-major flattened activation: row = s*B + b
        # (s=0 -> audio, s=1 -> embedding, s>=2 -> text tokens), same ordering PyTorch
        # gets after permute(1, 0, 2).
        xs_ref[0:B, :] = a
        xs_ref[B:2 * B, :] = e
        xs_ref[2 * B:, :] = text_ref[...]
        x = xs_ref[...]                                   # (BS, H) f32

        # Block-diagonal additive mask generated in-kernel: row i (batch i % B) only
        # attends to same-batch columns — no O((B*S)^2) HBM input.
        ridx = lax.broadcasted_iota(jnp.int32, (BS, BS), 0) % B
        cidx = lax.broadcasted_iota(jnp.int32, (BS, BS), 1) % B
        neg = jnp.where(ridx == cidx, 0.0, -1e30).astype(jnp.float32)

        scale = 1.0 / math.sqrt(DHEAD)

        # ---- both encoder layers unrolled in-kernel (weights stacked on axis 0)
        for l in range(NUM_LAYERS):
            xb = x.astype(jnp.bfloat16)

            # fused QKV projection over all batches & positions (M = B*S)
            qkv = jnp.dot(xb, wqkv_ref[l],
                          preferred_element_type=jnp.float32) + bqkv_ref[l]   # (BS, 3H)
            q = qkv[:, 0:H]
            k = qkv[:, H:2 * H]
            v = qkv[:, 2 * H:3 * H]
            kt = k.T                      # K^T materialized once per layer (one XLU transpose)

            # multi-head attention: (BS, BS) scores with block-diagonal mask; per-head
            # outputs stay in registers and are concatenated along lanes.
            heads = []
            for h in range(NHEAD):
                sl = slice(h * DHEAD, (h + 1) * DHEAD)
                qh = q[:, sl]
                kh_t = kt[sl, :]
                vh = v[:, sl]
                s = jnp.dot(qh, kh_t,
                            preferred_element_type=jnp.float32) * scale + neg
                s = s - jnp.max(s, axis=-1, keepdims=True)
                p = jnp.exp(s)
                p = p * pl.reciprocal(jnp.sum(p, axis=-1, keepdims=True), approx=True)
                heads.append(jnp.dot(p, vh, preferred_element_type=jnp.float32))
            attn_cat = jnp.concatenate(heads, axis=-1)    # (BS, H), in vregs

            # single output projection (Wo outside the head loop)
            attn = jnp.dot(attn_cat.astype(jnp.bfloat16), wo_ref[l],
                           preferred_element_type=jnp.float32) + bo_ref[l]

            # post-norm residual 1
            x1 = _layernorm(x + attn, g1_ref[l], b1_ref[l])

            # FFN with exact GELU
            h1 = jnp.dot(x1.astype(jnp.bfloat16), w1_ref[l],
                         preferred_element_type=jnp.float32) + bf1_ref[l]
            h1 = _gelu_exact(h1)
            ffn = jnp.dot(h1.astype(jnp.bfloat16), w2_ref[l],
                          preferred_element_type=jnp.float32) + bf2_ref[l]

            # post-norm residual 2, carried (in registers) to the next layer
            x = _layernorm(x1 + ffn, g2_ref[l], b2_ref[l])

        # ---- classifier head (runs exactly once)
        pooled = x[0:B, :]                                # sequence position 0 of each batch
        c = jnp.dot(pooled, wc1_ref[...],
                    preferred_element_type=jnp.float32) + bc1_ref[...]
        c = jnp.maximum(c, 0.0)
        logits_ref[...] = jnp.dot(c, wc2_ref[...],
                                  preferred_element_type=jnp.float32) + bc2_ref[...]

    return kernel


# -------------------------- parameter construction (deterministic) --------------------------
def _dense(key, fan_in, fan_out):
    kw, kb = jax.random.split(key)
    bound = 1.0 / math.sqrt(fan_in)
    w = jax.random.uniform(kw, (fan_in, fan_out), jnp.float32, -bound, bound)  # stored (in, out)
    b = jax.random.uniform(kb, (1, fan_out), jnp.float32, -bound, bound)
    return w, b


def init_params(key, num_audio_features, num_embedding_features, vocab_size):
    keys = jax.random.split(key, 8)
    wa, ba = _dense(keys[0], num_audio_features, H)
    we, be = _dense(keys[1], num_embedding_features, H)
    ones = jnp.ones((1, H), jnp.float32)
    zeros = jnp.zeros((1, H), jnp.float32)

    wqkv_l, bqkv_l, wo_l, bo_l, w1_l, bf1_l, w2_l, bf2_l = ([] for _ in range(8))
    for i in range(NUM_LAYERS):
        lk = jax.random.split(keys[2 + i], 4)
        wqkv, bqkv = _dense(lk[0], H, 3 * H)
        wo, bo = _dense(lk[1], H, H)
        w1, bf1 = _dense(lk[2], H, DFF)
        w2, bf2 = _dense(lk[3], DFF, H)
        wqkv_l.append(wqkv); bqkv_l.append(bqkv); wo_l.append(wo); bo_l.append(bo)
        w1_l.append(w1); bf1_l.append(bf1); w2_l.append(w2); bf2_l.append(bf2)

    ln_ones = jnp.ones((NUM_LAYERS, 1, H), jnp.float32)
    ln_zeros = jnp.zeros((NUM_LAYERS, 1, H), jnp.float32)
    # Per-layer weights stacked on a leading axis; matmul weights in bf16
    # (f32 MXU accumulation), biases / LayerNorm params stay f32.
    encoder_layers = (
        jnp.stack(wqkv_l).astype(jnp.bfloat16),
        jnp.stack(bqkv_l),
        jnp.stack(wo_l).astype(jnp.bfloat16),
        jnp.stack(bo_l),
        ln_ones, ln_zeros,
        jnp.stack(w1_l).astype(jnp.bfloat16),
        jnp.stack(bf1_l),
        jnp.stack(w2_l).astype(jnp.bfloat16),
        jnp.stack(bf2_l),
        ln_ones, ln_zeros,
    )

    wc1, bc1 = _dense(keys[4], H, H2)
    wc2, bc2 = _dense(keys[5], H2, 1)
    emb_table = 0.02 * jax.random.normal(keys[6], (vocab_size, H), jnp.float32)

    return {
        "audio_fc": (wa, ba, ones, zeros),
        "embedding_fc": (we, be, ones, zeros),
        "encoder_layers": encoder_layers,
        "classifier": (wc1, bc1, wc2, bc2),
        "text_emb_table": emb_table,
    }


# --------------------------------- full forward ---------------------------------
def neuroxvocal_forward(params, text_input, audio_input, embedding_input):
    input_ids = jnp.squeeze(text_input["input_ids"], axis=1)            # (B, S_text)
    _ = jnp.squeeze(text_input["attention_mask"], axis=1)               # unused (reference passes no mask to the encoder)
    # TODO(synk): DebertaV2Model.from_pretrained has no in-script Pallas equivalent;
    # replaced by a deterministic embedding-table lookup producing last_hidden_state (B, S_text, H).
    text_embeddings = params["text_emb_table"][input_ids]               # (B, S_text, H)

    B, S_text, _h = text_embeddings.shape
    S = S_text + 2

    # Sequence-major flattening (row = s*B + b), same ordering PyTorch gets after permute(1,0,2).
    text_flat = jnp.swapaxes(text_embeddings, 0, 1).reshape(S_text * B, H)

    wa, ba, ga, bta = params["audio_fc"]
    we, be, ge, bte = params["embedding_fc"]
    enc = params["encoder_layers"]
    wc1, bc1, wc2, bc2 = params["classifier"]

    # Single invocation: no grid, no pipelining, every input resident in VMEM once
    # (everything is tiny at these sizes; all per-layer weights fit easily).
    logits = pl.pallas_call(
        _make_model_kernel(B, S),
        out_shape=jax.ShapeDtypeStruct((B, 1), jnp.float32),
        scratch_shapes=[pltpu.VMEM((B * S, H), jnp.float32)],   # combined-sequence assembly buffer
    )(audio_input, wa, ba, ga, bta,
      embedding_input, we, be, ge, bte, text_flat,
      *enc, wc1, bc1, wc2, bc2)

    return logits[:, 0]                                      # squeeze(-1)


if __name__ == "__main__":
    key = jax.random.PRNGKey(0)
    B, S_TEXT, VOCAB = 2, 6, 100
    F_AUDIO, F_EMB = 20, 40

    k_param, k_ids, k_audio, k_emb = jax.random.split(key, 4)
    params = init_params(k_param, F_AUDIO, F_EMB, VOCAB)

    text_input = {
        "input_ids": jax.random.randint(k_ids, (B, 1, S_TEXT), 0, VOCAB, dtype=jnp.int32),
        "attention_mask": jnp.ones((B, 1, S_TEXT), jnp.int32),
    }
    audio_input = jax.random.normal(k_audio, (B, F_AUDIO), jnp.float32)
    embedding_input = jax.random.normal(k_emb, (B, F_EMB), jnp.float32)

    logits = neuroxvocal_forward(params, text_input, audio_input, embedding_input)
    logits = jax.block_until_ready(logits)
    assert logits.shape == (B,), logits.shape
    print("KERNEL_OK")
</pallas_src>

<mosaic_0001>
module attributes {stable_mosaic.version = 11 : i64} {
  func.func @kernel(%arg0: memref<2x20xf32, #tpu.memory_space<vmem>>, %arg1: memref<20x128xf32, #tpu.memory_space<vmem>>, %arg2: memref<1x128xf32, #tpu.memory_space<vmem>>, %arg3: memref<1x128xf32, #tpu.memory_space<vmem>>, %arg4: memref<1x128xf32, #tpu.memory_space<vmem>>, %arg5: memref<2x40xf32, #tpu.memory_space<vmem>>, %arg6: memref<40x128xf32, #tpu.memory_space<vmem>>, %arg7: memref<1x128xf32, #tpu.memory_space<vmem>>, %arg8: memref<1x128xf32, #tpu.memory_space<vmem>>, %arg9: memref<1x128xf32, #tpu.memory_space<vmem>>, %arg10: memref<12x128xf32, #tpu.memory_space<vmem>>, %arg11: memref<2x128x384xbf16, #tpu.memory_space<vmem>>, %arg12: memref<2x1x384xf32, #tpu.memory_space<vmem>>, %arg13: memref<2x128x128xbf16, #tpu.memory_space<vmem>>, %arg14: memref<2x1x128xf32, #tpu.memory_space<vmem>>, %arg15: memref<2x1x128xf32, #tpu.memory_space<vmem>>, %arg16: memref<2x1x128xf32, #tpu.memory_space<vmem>>, %arg17: memref<2x128x2048xbf16, #tpu.memory_space<vmem>>, %arg18: memref<2x1x2048xf32, #tpu.memory_space<vmem>>, %arg19: memref<2x2048x128xbf16, #tpu.memory_space<vmem>>, %arg20: memref<2x1x128xf32, #tpu.memory_space<vmem>>, %arg21: memref<2x1x128xf32, #tpu.memory_space<vmem>>, %arg22: memref<2x1x128xf32, #tpu.memory_space<vmem>>, %arg23: memref<128x64xf32, #tpu.memory_space<vmem>>, %arg24: memref<1x64xf32, #tpu.memory_space<vmem>>, %arg25: memref<64x1xf32, #tpu.memory_space<vmem>>, %arg26: memref<1x1xf32, #tpu.memory_space<vmem>>, %arg27: memref<2x1xf32, #tpu.memory_space<vmem>>, %arg28: memref<16x128xf32, #tpu.memory_space<vmem>>) attributes {dimension_semantics = [], scalar_prefetch = 0 : i64, scratch_operands = 1 : i64, tpu.core_type = #tpu.core_type<tc>} {
    %c0 = arith.constant 0 : index
    %c0_0 = arith.constant 0 : index
    %0 = vector.load %arg0[%c0, %c0_0] : memref<2x20xf32, #tpu.memory_space<vmem>>, vector<2x20xf32>
    %c0_1 = arith.constant 0 : index
    %c0_2 = arith.constant 0 : index
    %1 = vector.load %arg1[%c0_1, %c0_2] : memref<20x128xf32, #tpu.memory_space<vmem>>, vector<20x128xf32>
    %cst = arith.constant dense<0.000000e+00> : vector<2x128xf32>
    %2 = tpu.matmul %0, %1, %cst {dimension_numbers = #tpu.dot_dimension_numbers<[1], [0], [0], [1], [0, 0, 1, 1], [], []>} : vector<2x20xf32>, vector<20x128xf32>, vector<2x128xf32> -> vector<2x128xf32>
    %c0_3 = arith.constant 0 : index
    %c0_4 = arith.constant 0 : index
    %3 = vector.load %arg2[%c0_3, %c0_4] : memref<1x128xf32, #tpu.memory_space<vmem>>, vector<1x128xf32>
    %4 = vector.broadcast %3 : vector<1x128xf32> to vector<2x128xf32>
    %5 = arith.addf %2, %4 : vector<2x128xf32>
    %c0_5 = arith.constant 0 : index
    %c0_6 = arith.constant 0 : index
    %6 = vector.load %arg3[%c0_5, %c0_6] : memref<1x128xf32, #tpu.memory_space<vmem>>, vector<1x128xf32>
    %c0_7 = arith.constant 0 : index
    %c0_8 = arith.constant 0 : index
    %7 = vector.load %arg4[%c0_7, %c0_8] : memref<1x128xf32, #tpu.memory_space<vmem>>, vector<1x128xf32>
    %cst_9 = arith.constant dense<0.000000e+00> : vector<2xf32>
    %8 = vector.multi_reduction <add>, %5, %cst_9 [1] : vector<2x128xf32> to vector<2xf32>
    %9 = vector.shape_cast %8 : vector<2xf32> to vector<2x1xf32>
    %cst_10 = arith.constant 1.280000e+02 : f32
    %10 = vector.broadcast %cst_10 : f32 to vector<2x1xf32>
    %11 = arith.divf %9, %10 : vector<2x1xf32>
    %12 = vector.broadcast %11 : vector<2x1xf32> to vector<2x128xf32>
    %13 = arith.subf %5, %12 : vector<2x128xf32>
    %14 = arith.mulf %13, %13 : vector<2x128xf32>
    %cst_11 = arith.constant dense<0.000000e+00> : vector<2xf32>
    %15 = vector.multi_reduction <add>, %14, %cst_11 [1] : vector<2x128xf32> to vector<2xf32>
    %16 = vector.shape_cast %15 : vector<2xf32> to vector<2x1xf32>
    %cst_12 = arith.constant 1.280000e+02 : f32
    %17 = vector.broadcast %cst_12 : f32 to vector<2x1xf32>
    %18 = arith.divf %16, %17 : vector<2x1xf32>
    %19 = vector.broadcast %11 : vector<2x1xf32> to vector<2x128xf32>
    %20 = arith.subf %5, %19 : vector<2x128xf32>
    %cst_13 = arith.constant 9.99999974E-6 : f32
    %21 = vector.broadcast %cst_13 : f32 to vector<2x1xf32>
    %22 = arith.addf %18, %21 : vector<2x1xf32>
    %23 = math.rsqrt %22 : vector<2x1xf32>
    %24 = vector.broadcast %23 : vector<2x1xf32> to vector<2x128xf32>
    %25 = arith.mulf %20, %24 : vector<2x128xf32>
    %26 = vector.broadcast %6 : vector<1x128xf32> to vector<2x128xf32>
    %27 = arith.mulf %25, %26 : vector<2x128xf32>
    %28 = vector.broadcast %7 : vector<1x128xf32> to vector<2x128xf32>
    %29 = arith.addf %27, %28 : vector<2x128xf32>
    %cst_14 = arith.constant 0.000000e+00 : f32
    %30 = vector.broadcast %cst_14 : f32 to vector<2x128xf32>
    %31 = arith.maximumf %29, %30 : vector<2x128xf32>
    %c0_15 = arith.constant 0 : index
    %c0_16 = arith.constant 0 : index
    %32 = vector.load %arg5[%c0_15, %c0_16] : memref<2x40xf32, #tpu.memory_space<vmem>>, vector<2x40xf32>
    %c0_17 = arith.constant 0 : index
    %c0_18 = arith.constant 0 : index
    %33 = vector.load %arg6[%c0_17, %c0_18] : memref<40x128xf32, #tpu.memory_space<vmem>>, vector<40x128xf32>
    %cst_19 = arith.constant dense<0.000000e+00> : vector<2x128xf32>
    %34 = tpu.matmul %32, %33, %cst_19 {dimension_numbers = #tpu.dot_dimension_numbers<[1], [0], [0], [1], [0, 0, 1, 1], [], []>} : vector<2x40xf32>, vector<40x128xf32>, vector<2x128xf32> -> vector<2x128xf32>
    %c0_20 = arith.constant 0 : index
    %c0_21 = arith.constant 0 : index
    %35 = vector.load %arg7[%c0_20, %c0_21] : memref<1x128xf32, #tpu.memory_space<vmem>>, vector<1x128xf32>
    %36 = vector.broadcast %35 : vector<1x128xf32> to vector<2x128xf32>
    %37 = arith.addf %34, %36 : vector<2x128xf32>
    %c0_22 = arith.constant 0 : index
    %c0_23 = arith.constant 0 : index
    %38 = vector.load %arg8[%c0_22, %c0_23] : memref<1x128xf32, #tpu.memory_space<vmem>>, vector<1x128xf32>
    %c0_24 = arith.constant 0 : index
    %c0_25 = arith.constant 0 : index
    %39 = vector.load %arg9[%c0_24, %c0_25] : memref<1x128xf32, #tpu.memory_space<vmem>>, vector<1x128xf32>
    %cst_26 = arith.constant dense<0.000000e+00> : vector<2xf32>
    %40 = vector.multi_reduction <add>, %37, %cst_26 [1] : vector<2x128xf32> to vector<2xf32>
    %41 = vector.shape_cast %40 : vector<2xf32> to vector<2x1xf32>
    %cst_27 = arith.constant 1.280000e+02 : f32
    %42 = vector.broadcast %cst_27 : f32 to vector<2x1xf32>
    %43 = arith.divf %41, %42 : vector<2x1xf32>
    %44 = vector.broadcast %43 : vector<2x1xf32> to vector<2x128xf32>
    %45 = arith.subf %37, %44 : vector<2x128xf32>
    %46 = arith.mulf %45, %45 : vector<2x128xf32>
    %cst_28 = arith.constant dense<0.000000e+00> : vector<2xf32>
    %47 = vector.multi_reduction <add>, %46, %cst_28 [1] : vector<2x128xf32> to vector<2xf32>
    %48 = vector.shape_cast %47 : vector<2xf32> to vector<2x1xf32>
    %cst_29 = arith.constant 1.280000e+02 : f32
    %49 = vector.broadcast %cst_29 : f32 to vector<2x1xf32>
    %50 = arith.divf %48, %49 : vector<2x1xf32>
    %51 = vector.broadcast %43 : vector<2x1xf32> to vector<2x128xf32>
    %52 = arith.subf %37, %51 : vector<2x128xf32>
    %cst_30 = arith.constant 9.99999974E-6 : f32
    %53 = vector.broadcast %cst_30 : f32 to vector<2x1xf32>
    %54 = arith.addf %50, %53 : vector<2x1xf32>
    %55 = math.rsqrt %54 : vector<2x1xf32>
    %56 = vector.broadcast %55 : vector<2x1xf32> to vector<2x128xf32>
    %57 = arith.mulf %52, %56 : vector<2x128xf32>
    %58 = vector.broadcast %38 : vector<1x128xf32> to vector<2x128xf32>
    %59 = arith.mulf %57, %58 : vector<2x128xf32>
    %60 = vector.broadcast %39 : vector<1x128xf32> to vector<2x128xf32>
    %61 = arith.addf %59, %60 : vector<2x128xf32>
    %cst_31 = arith.constant 0.000000e+00 : f32
    %62 = vector.broadcast %cst_31 : f32 to vector<2x128xf32>
    %63 = arith.maximumf %61, %62 : vector<2x128xf32>
    %c0_32 = arith.constant 0 : index
    %c0_33 = arith.constant 0 : index
    %64 = vector.load %arg28[%c0_32, %c0_33] : memref<16x128xf32, #tpu.memory_space<vmem>>, vector<2x128xf32>
    tpu.vector_store %arg28[%c0_32, %c0_33], %31 {strides = array<i32>} : memref<16x128xf32, #tpu.memory_space<vmem>>, vector<2x128xf32>,
    %c2 = arith.constant 2 : index
    %c0_34 = arith.constant 0 : index
    %65 = vector.load %arg28[%c2, %c0_34] : memref<16x128xf32, #tpu.memory_space<vmem>>, vector<2x128xf32>
    tpu.vector_store %arg28[%c2, %c0_34], %63 {strides = array<i32>} : memref<16x128xf32, #tpu.memory_space<vmem>>, vector<2x128xf32>,
    %c0_35 = arith.constant 0 : index
    %c0_36 = arith.constant 0 : index
    %66 = vector.load %arg10[%c0_35, %c0_36] : memref<12x128xf32, #tpu.memory_space<vmem>>, vector<12x128xf32>
    %c4 = arith.constant 4 : index
    %c0_37 = arith.constant 0 : index
    %67 = vector.load %arg28[%c4, %c0_37] : memref<16x128xf32, #tpu.memory_space<vmem>>, vector<12x128xf32>
    tpu.vector_store %arg28[%c4, %c0_37], %66 {strides = array<i32>} : memref<16x128xf32, #tpu.memory_space<vmem>>, vector<12x128xf32>,
    %c0_38 = arith.constant 0 : index
    %c0_39 = arith.constant 0 : index
    %68 = vector.load %arg28[%c0_38, %c0_39] : memref<16x128xf32, #tpu.memory_space<vmem>>, vector<16x128xf32>
    %69 = tpu.iota {dimensions = array<i32: 0>} : vector<16x16xi32>
    %c2_i32 = arith.constant 2 : i32
    %c0_i32 = arith.constant 0 : i32
    %70 = arith.cmpi eq, %c2_i32, %c0_i32 : i32
    %c1_i32 = arith.constant 1 : i32
    %71 = arith.select %70, %c1_i32, %c2_i32 : i32
    %72 = vector.broadcast %71 : i32 to vector<16x16xi32>
    %73 = arith.remsi %69, %72 : vector<16x16xi32>
    %c0_i32_40 = arith.constant 0 : i32
    %74 = vector.broadcast %c0_i32_40 : i32 to vector<16x16xi32>
    %75 = arith.cmpi ne, %73, %74 : vector<16x16xi32>
    %c0_i32_41 = arith.constant 0 : i32
    %76 = vector.broadcast %c0_i32_41 : i32 to vector<16x16xi32>
    %77 = arith.cmpi slt, %73, %76 : vector<16x16xi32>
    %c0_i32_42 = arith.constant 0 : i32
    %78 = arith.cmpi slt, %71, %c0_i32_42 : i32
    %79 = vector.broadcast %78 : i1 to vector<16x16xi1>
    %80 = vector.broadcast %79 : vector<16x16xi1> to vector<16x16xi1>
    %81 = arith.xori %77, %80 : vector<16x16xi1>
    %82 = arith.andi %81, %75 : vector<16x16xi1>
    %83 = vector.broadcast %71 : i32 to vector<16x16xi32>
    %84 = arith.addi %73, %83 : vector<16x16xi32>
    %85 = arith.select %82, %84, %73 : vector<16x16xi1>, vector<16x16xi32>
    %86 = tpu.iota {dimensions = array<i32: 1>} : vector<16x16xi32>
    %c2_i32_43 = arith.constant 2 : i32
    %c0_i32_44 = arith.constant 0 : i32
    %87 = arith.cmpi eq, %c2_i32_43, %c0_i32_44 : i32
    %c1_i32_45 = arith.constant 1 : i32
    %88 = arith.select %87, %c1_i32_45, %c2_i32_43 : i32
    %89 = vector.broadcast %88 : i32 to vector<16x16xi32>
    %90 = arith.remsi %86, %89 : vector<16x16xi32>
    %c0_i32_46 = arith.constant 0 : i32
    %91 = vector.broadcast %c0_i32_46 : i32 to vector<16x16xi32>
    %92 = arith.cmpi ne, %90, %91 : vector<16x16xi32>
    %c0_i32_47 = arith.constant 0 : i32
    %93 = vector.broadcast %c0_i32_47 : i32 to vector<16x16xi32>
    %94 = arith.cmpi slt, %90, %93 : vector<16x16xi32>
    %c0_i32_48 = arith.constant 0 : i32
    %95 = arith.cmpi slt, %88, %c0_i32_48 : i32
    %96 = vector.broadcast %95 : i1 to vector<16x16xi1>
    %97 = vector.broadcast %96 : vector<16x16xi1> to vector<16x16xi1>
    %98 = arith.xori %94, %97 : vector<16x16xi1>
    %99 = arith.andi %98, %92 : vector<16x16xi1>
    %100 = vector.broadcast %88 : i32 to vector<16x16xi32>
    %101 = arith.addi %90, %100 : vector<16x16xi32>
    %102 = arith.select %99, %101, %90 : vector<16x16xi1>, vector<16x16xi32>
    %103 = arith.cmpi eq, %85, %102 : vector<16x16xi32>
    %cst_49 = arith.constant 0.000000e+00 : f32
    %cst_50 = arith.constant -1.000000e+30 : f32
    %104 = vector.broadcast %cst_49 : f32 to vector<16x16xf32>
    %105 = vector.broadcast %cst_50 : f32 to vector<16x16xf32>
    %106 = arith.select %103, %104, %105 : vector<16x16xi1>, vector<16x16xf32>
    %107 = arith.truncf %68 : vector<16x128xf32> to vector<16x128xbf16>
    %c0_51 = arith.constant 0 : index
    %c0_52 = arith.constant 0 : index
    %c0_53 = arith.constant 0 : index
    %108 = vector.load %arg11[%c0_51, %c0_52, %c0_53] : memref<2x128x384xbf16, #tpu.memory_space<vmem>>, vector<1x128x384xbf16>
    %109 = vector.shape_cast %108 : vector<1x128x384xbf16> to vector<128x384xbf16>
    %cst_54 = arith.constant dense<0.000000e+00> : vector<16x384xf32>
    %110 = tpu.matmul %107, %109, %cst_54 {dimension_numbers = #tpu.dot_dimension_numbers<[1], [0], [0], [1], [0, 0, 1, 1], [], []>} : vector<16x128xbf16>, vector<128x384xbf16>, vector<16x384xf32> -> vector<16x384xf32>
    %c0_55 = arith.constant 0 : index
    %c0_56 = arith.constant 0 : index
    %c0_57 = arith.constant 0 : index
    %111 = vector.load %arg12[%c0_55, %c0_56, %c0_57] : memref<2x1x384xf32, #tpu.memory_space<vmem>>, vector<1x1x384xf32>
    %112 = vector.shape_cast %111 : vector<1x1x384xf32> to vector<1x384xf32>
    %113 = vector.broadcast %112 : vector<1x384xf32> to vector<16x384xf32>
    %114 = arith.addf %110, %113 : vector<16x384xf32>
    %115 = vector.extract_strided_slice %114 {offsets = [0, 0], sizes = [16, 128], strides = [1, 1]} : vector<16x384xf32> to vector<16x128xf32>
    %116 = vector.extract_strided_slice %114 {offsets = [0, 128], sizes = [16, 128], strides = [1, 1]} : vector<16x384xf32> to vector<16x128xf32>
    %117 = vector.extract_strided_slice %114 {offsets = [0, 256], sizes = [16, 128], strides = [1, 1]} : vector<16x384xf32> to vector<16x128xf32>
    %118 = tpu.transpose %116, [1, 0] : vector<16x128xf32> -> vector<128x16xf32>
    %119 = vector.extract_strided_slice %115 {offsets = [0, 0], sizes = [16, 16], strides = [1, 1]} : vector<16x128xf32> to vector<16x16xf32>
    %120 = vector.extract_strided_slice %118 {offsets = [0, 0], sizes = [16, 16], strides = [1, 1]} : vector<128x16xf32> to vector<16x16xf32>
    %121 = vector.extract_strided_slice %117 {offsets = [0, 0], sizes = [16, 16], strides = [1, 1]} : vector<16x128xf32> to vector<16x16xf32>
    %cst_58 = arith.constant dense<0.000000e+00> : vector<16x16xf32>
    %122 = tpu.matmul %119, %120, %cst_58 {dimension_numbers = #tpu.dot_dimension_numbers<[1], [0], [0], [1], [0, 0, 1, 1], [], []>} : vector<16x16xf32>, vector<16x16xf32>, vector<16x16xf32> -> vector<16x16xf32>
    %cst_59 = arith.constant 2.500000e-01 : f32
    %123 = vector.broadcast %cst_59 : f32 to vector<16x16xf32>
    %124 = arith.mulf %122, %123 : vector<16x16xf32>
    %125 = arith.addf %124, %106 : vector<16x16xf32>
    %cst_60 = arith.constant dense<0xFF800000> : vector<16xf32>
    %126 = vector.multi_reduction <maximumf>, %125, %cst_60 [1] : vector<16x16xf32> to vector<16xf32>
    %127 = vector.shape_cast %126 : vector<16xf32> to vector<16x1xf32>
    %128 = vector.broadcast %127 : vector<16x1xf32> to vector<16x16xf32>
    %129 = arith.subf %125, %128 : vector<16x16xf32>
    %130 = math.exp %129 : vector<16x16xf32>
    %cst_61 = arith.constant dense<0.000000e+00> : vector<16xf32>
    %131 = vector.multi_reduction <add>, %130, %cst_61 [1] : vector<16x16xf32> to vector<16xf32>
    %132 = vector.shape_cast %131 : vector<16xf32> to vector<16x1xf32>
    %133 = tpu.reciprocal %132 {approx = true} : vector<16x1xf32> -> vector<16x1xf32>
    %134 = vector.broadcast %133 : vector<16x1xf32> to vector<16x16xf32>
    %135 = arith.mulf %130, %134 : vector<16x16xf32>
    %cst_62 = arith.constant dense<0.000000e+00> : vector<16x16xf32>
    %136 = tpu.matmul %135, %121, %cst_62 {dimension_numbers = #tpu.dot_dimension_numbers<[1], [0], [0], [1], [0, 0, 1, 1], [], []>} : vector<16x16xf32>, vector<16x16xf32>, vector<16x16xf32> -> vector<16x16xf32>
    %137 = vector.extract_strided_slice %115 {offsets = [0, 16], sizes = [16, 16], strides = [1, 1]} : vector<16x128xf32> to vector<16x16xf32>
    %138 = vector.extract_strided_slice %118 {offsets = [16, 0], sizes = [16, 16], strides = [1, 1]} : vector<128x16xf32> to vector<16x16xf32>
    %139 = vector.extract_strided_slice %117 {offsets = [0, 16], sizes = [16, 16], strides = [1, 1]} : vector<16x128xf32> to vector<16x16xf32>
    %cst_63 = arith.constant dense<0.000000e+00> : vector<16x16xf32>
    %140 = tpu.matmul %137, %138, %cst_63 {dimension_numbers = #tpu.dot_dimension_numbers<[1], [0], [0], [1], [0, 0, 1, 1], [], []>} : vector<16x16xf32>, vector<16x16xf32>, vector<16x16xf32> -> vector<16x16xf32>
    %cst_64 = arith.constant 2.500000e-01 : f32
    %141 = vector.broadcast %cst_64 : f32 to vector<16x16xf32>
    %142 = arith.mulf %140, %141 : vector<16x16xf32>
    %143 = arith.addf %142, %106 : vector<16x16xf32>
    %cst_65 = arith.constant dense<0xFF800000> : vector<16xf32>
    %144 = vector.multi_reduction <maximumf>, %143, %cst_65 [1] : vector<16x16xf32> to vector<16xf32>
    %145 = vector.shape_cast %144 : vector<16xf32> to vector<16x1xf32>
    %146 = vector.broadcast %145 : vector<16x1xf32> to vector<16x16xf32>
    %147 = arith.subf %143, %146 : vector<16x16xf32>
    %148 = math.exp %147 : vector<16x16xf32>
    %cst_66 = arith.constant dense<0.000000e+00> : vector<16xf32>
    %149 = vector.multi_reduction <add>, %148, %cst_66 [1] : vector<16x16xf32> to vector<16xf32>
    %150 = vector.shape_cast %149 : vector<16xf32> to vector<16x1xf32>
    %151 = tpu.reciprocal %150 {approx = true} : vector<16x1xf32> -> vector<16x1xf32>
    %152 = vector.broadcast %151 : vector<16x1xf32> to vector<16x16xf32>
    %153 = arith.mulf %148, %152 : vector<16x16xf32>
    %cst_67 = arith.constant dense<0.000000e+00> : vector<16x16xf32>
    %154 = tpu.matmul %153, %139, %cst_67 {dimension_numbers = #tpu.dot_dimension_numbers<[1], [0], [0], [1], [0, 0, 1, 1], [], []>} : vector<16x16xf32>, vector<16x16xf32>, vector<16x16xf32> -> vector<16x16xf32>
    %155 = vector.extract_strided_slice %115 {offsets = [0, 32], sizes = [16, 16], strides = [1, 1]} : vector<16x128xf32> to vector<16x16xf32>
    %156 = vector.extract_strided_slice %118 {offsets = [32, 0], sizes = [16, 16], strides = [1, 1]} : vector<128x16xf32> to vector<16x16xf32>
    %157 = vector.extract_strided_slice %117 {offsets = [0, 32], sizes = [16, 16], strides = [1, 1]} : vector<16x128xf32> to vector<16x16xf32>
    %cst_68 = arith.constant dense<0.000000e+00> : vector<16x16xf32>
    %158 = tpu.matmul %155, %156, %cst_68 {dimension_numbers = #tpu.dot_dimension_numbers<[1], [0], [0], [1], [0, 0, 1, 1], [], []>} : vector<16x16xf32>, vector<16x16xf32>, vector<16x16xf32> -> vector<16x16xf32>
    %cst_69 = arith.constant 2.500000e-01 : f32
    %159 = vector.broadcast %cst_69 : f32 to vector<16x16xf32>
    %160 = arith.mulf %158, %159 : vector<16x16xf32>
    %161 = arith.addf %160, %106 : vector<16x16xf32>
    %cst_70 = arith.constant dense<0xFF800000> : vector<16xf32>
    %162 = vector.multi_reduction <maximumf>, %161, %cst_70 [1] : vector<16x16xf32> to vector<16xf32>
    %163 = vector.shape_cast %162 : vector<16xf32> to vector<16x1xf32>
    %164 = vector.broadcast %163 : vector<16x1xf32> to vector<16x16xf32>
    %165 = arith.subf %161, %164 : vector<16x16xf32>
    %166 = math.exp %165 : vector<16x16xf32>
    %cst_71 = arith.constant dense<0.000000e+00> : vector<16xf32>
    %167 = vector.multi_reduction <add>, %166, %cst_71 [1] : vector<16x16xf32> to vector<16xf32>
    %168 = vector.shape_cast %167 : vector<16xf32> to vector<16x1xf32>
    %169 = tpu.reciprocal %168 {approx = true} : vector<16x1xf32> -> vector<16x1xf32>
    %170 = vector.broadcast %169 : vector<16x1xf32> to vector<16x16xf32>
    %171 = arith.mulf %166, %170 : vector<16x16xf32>
    %cst_72 = arith.constant dense<0.000000e+00> : vector<16x16xf32>
    %172 = tpu.matmul %171, %157, %cst_72 {dimension_numbers = #tpu.dot_dimension_numbers<[1], [0], [0], [1], [0, 0, 1, 1], [], []>} : vector<16x16xf32>, vector<16x16xf32>, vector<16x16xf32> -> vector<16x16xf32>
    %173 = vector.extract_strided_slice %115 {offsets = [0, 48], sizes = [16, 16], strides = [1, 1]} : vector<16x128xf32> to vector<16x16xf32>
    %174 = vector.extract_strided_slice %118 {offsets = [48, 0], sizes = [16, 16], strides = [1, 1]} : vector<128x16xf32> to vector<16x16xf32>
    %175 = vector.extract_strided_slice %117 {offsets = [0, 48], sizes = [16, 16], strides = [1, 1]} : vector<16x128xf32> to vector<16x16xf32>
    %cst_73 = arith.constant dense<0.000000e+00> : vector<16x16xf32>
    %176 = tpu.matmul %173, %174, %cst_73 {dimension_numbers = #tpu.dot_dimension_numbers<[1], [0], [0], [1], [0, 0, 1, 1], [], []>} : vector<16x16xf32>, vector<16x16xf32>, vector<16x16xf32> -> vector<16x16xf32>
    %cst_74 = arith.constant 2.500000e-01 : f32
    %177 = vector.broadcast %cst_74 : f32 to vector<16x16xf32>
    %178 = arith.mulf %176, %177 : vector<16x16xf32>
    %179 = arith.addf %178, %106 : vector<16x16xf32>
    %cst_75 = arith.constant dense<0xFF800000> : vector<16xf32>
    %180 = vector.multi_reduction <maximumf>, %179, %cst_75 [1] : vector<16x16xf32> to vector<16xf32>
    %181 = vector.shape_cast %180 : vector<16xf32> to vector<16x1xf32>
    %182 = vector.broadcast %181 : vector<16x1xf32> to vector<16x16xf32>
    %183 = arith.subf %179, %182 : vector<16x16xf32>
    %184 = math.exp %183 : vector<16x16xf32>
    %cst_76 = arith.constant dense<0.000000e+00> : vector<16xf32>
    %185 = vector.multi_reduction <add>, %184, %cst_76 [1] : vector<16x16xf32> to vector<16xf32>
    %186 = vector.shape_cast %185 : vector<16xf32> to vector<16x1xf32>
    %187 = tpu.reciprocal %186 {approx = true} : vector<16x1xf32> -> vector<16x1xf32>
    %188 = vector.broadcast %187 : vector<16x1xf32> to vector<16x16xf32>
    %189 = arith.mulf %184, %188 : vector<16x16xf32>
    %cst_77 = arith.constant dense<0.000000e+00> : vector<16x16xf32>
    %190 = tpu.matmul %189, %175, %cst_77 {dimension_numbers = #tpu.dot_dimension_numbers<[1], [0], [0], [1], [0, 0, 1, 1], [], []>} : vector<16x16xf32>, vector<16x16xf32>, vector<16x16xf32> -> vector<16x16xf32>
    %191 = vector.extract_strided_slice %115 {offsets = [0, 64], sizes = [16, 16], strides = [1, 1]} : vector<16x128xf32> to vector<16x16xf32>
    %192 = vector.extract_strided_slice %118 {offsets = [64, 0], sizes = [16, 16], strides = [1, 1]} : vector<128x16xf32> to vector<16x16xf32>
    %193 = vector.extract_strided_slice %117 {offsets = [0, 64], sizes = [16, 16], strides = [1, 1]} : vector<16x128xf32> to vector<16x16xf32>
    %cst_78 = arith.constant dense<0.000000e+00> : vector<16x16xf32>
    %194 = tpu.matmul %191, %192, %cst_78 {dimension_numbers = #tpu.dot_dimension_numbers<[1], [0], [0], [1], [0, 0, 1, 1], [], []>} : vector<16x16xf32>, vector<16x16xf32>, vector<16x16xf32> -> vector<16x16xf32>
    %cst_79 = arith.constant 2.500000e-01 : f32
    %195 = vector.broadcast %cst_79 : f32 to vector<16x16xf32>
    %196 = arith.mulf %194, %195 : vector<16x16xf32>
    %197 = arith.addf %196, %106 : vector<16x16xf32>
    %cst_80 = arith.constant dense<0xFF800000> : vector<16xf32>
    %198 = vector.multi_reduction <maximumf>, %197, %cst_80 [1] : vector<16x16xf32> to vector<16xf32>
    %199 = vector.shape_cast %198 : vector<16xf32> to vector<16x1xf32>
    %200 = vector.broadcast %199 : vector<16x1xf32> to vector<16x16xf32>
    %201 = arith.subf %197, %200 : vector<16x16xf32>
    %202 = math.exp %201 : vector<16x16xf32>
    %cst_81 = arith.constant dense<0.000000e+00> : vector<16xf32>
    %203 = vector.multi_reduction <add>, %202, %cst_81 [1] : vector<16x16xf32> to vector<16xf32>
    %204 = vector.shape_cast %203 : vector<16xf32> to vector<16x1xf32>
    %205 = tpu.reciprocal %204 {approx = true} : vector<16x1xf32> -> vector<16x1xf32>
    %206 = vector.broadcast %205 : vector<16x1xf32> to vector<16x16xf32>
    %207 = arith.mulf %202, %206 : vector<16x16xf32>
    %cst_82 = arith.constant dense<0.000000e+00> : vector<16x16xf32>
    %208 = tpu.matmul %207, %193, %cst_82 {dimension_numbers = #tpu.dot_dimension_numbers<[1], [0], [0], [1], [0, 0, 1, 1], [], []>} : vector<16x16xf32>, vector<16x16xf32>, vector<16x16xf32> -> vector<16x16xf32>
    %209 = vector.extract_strided_slice %115 {offsets = [0, 80], sizes = [16, 16], strides = [1, 1]} : vector<16x128xf32> to vector<16x16xf32>
    %210 = vector.extract_strided_slice %118 {offsets = [80, 0], sizes = [16, 16], strides = [1, 1]} : vector<128x16xf32> to vector<16x16xf32>
    %211 = vector.extract_strided_slice %117 {offsets = [0, 80], sizes = [16, 16], strides = [1, 1]} : vector<16x128xf32> to vector<16x16xf32>
    %cst_83 = arith.constant dense<0.000000e+00> : vector<16x16xf32>
    %212 = tpu.matmul %209, %210, %cst_83 {dimension_numbers = #tpu.dot_dimension_numbers<[1], [0], [0], [1], [0, 0, 1, 1], [], []>} : vector<16x16xf32>, vector<16x16xf32>, vector<16x16xf32> -> vector<16x16xf32>
    %cst_84 = arith.constant 2.500000e-01 : f32
    %213 = vector.broadcast %cst_84 : f32 to vector<16x16xf32>
    %214 = arith.mulf %212, %213 : vector<16x16xf32>
    %215 = arith.addf %214, %106 : vector<16x16xf32>
    %cst_85 = arith.constant dense<0xFF800000> : vector<16xf32>
    %216 = vector.multi_reduction <maximumf>, %215, %cst_85 [1] : vector<16x16xf32> to vector<16xf32>
    %217 = vector.shape_cast %216 : vector<16xf32> to vector<16x1xf32>
    %218 = vector.broadcast %217 : vector<16x1xf32> to vector<16x16xf32>
    %219 = arith.subf %215, %218 : vector<16x16xf32>
    %220 = math.exp %219 : vector<16x16xf32>
    %cst_86 = arith.constant dense<0.000000e+00> : vector<16xf32>
    %221 = vector.multi_reduction <add>, %220, %cst_86 [1] : vector<16x16xf32> to vector<16xf32>
    %222 = vector.shape_cast %221 : vector<16xf32> to vector<16x1xf32>
    %223 = tpu.reciprocal %222 {approx = true} : vector<16x1xf32> -> vector<16x1xf32>
    %224 = vector.broadcast %223 : vector<16x1xf32> to vector<16x16xf32>
    %225 = arith.mulf %220, %224 : vector<16x16xf32>
    %cst_87 = arith.constant dense<0.000000e+00> : vector<16x16xf32>
    %226 = tpu.matmul %225, %211, %cst_87 {dimension_numbers = #tpu.dot_dimension_numbers<[1], [0], [0], [1], [0, 0, 1, 1], [], []>} : vector<16x16xf32>, vector<16x16xf32>, vector<16x16xf32> -> vector<16x16xf32>
    %227 = vector.extract_strided_slice %115 {offsets = [0, 96], sizes = [16, 16], strides = [1, 1]} : vector<16x128xf32> to vector<16x16xf32>
    %228 = vector.extract_strided_slice %118 {offsets = [96, 0], sizes = [16, 16], strides = [1, 1]} : vector<128x16xf32> to vector<16x16xf32>
    %229 = vector.extract_strided_slice %117 {offsets = [0, 96], sizes = [16, 16], strides = [1, 1]} : vector<16x128xf32> to vector<16x16xf32>
    %cst_88 = arith.constant dense<0.000000e+00> : vector<16x16xf32>
    %230 = tpu.matmul %227, %228, %cst_88 {dimension_numbers = #tpu.dot_dimension_numbers<[1], [0], [0], [1], [0, 0, 1, 1], [], []>} : vector<16x16xf32>, vector<16x16xf32>, vector<16x16xf32> -> vector<16x16xf32>
    %cst_89 = arith.constant 2.500000e-01 : f32
    %231 = vector.broadcast %cst_89 : f32 to vector<16x16xf32>
    %232 = arith.mulf %230, %231 : vector<16x16xf32>
    %233 = arith.addf %232, %106 : vector<16x16xf32>
    %cst_90 = arith.constant dense<0xFF800000> : vector<16xf32>
    %234 = vector.multi_reduction <maximumf>, %233, %cst_90 [1] : vector<16x16xf32> to vector<16xf32>
    %235 = vector.shape_cast %234 : vector<16xf32> to vector<16x1xf32>
    %236 = vector.broadcast %235 : vector<16x1xf32> to vector<16x16xf32>
    %237 = arith.subf %233, %236 : vector<16x16xf32>
    %238 = math.exp %237 : vector<16x16xf32>
    %cst_91 = arith.constant dense<0.000000e+00> : vector<16xf32>
    %239 = vector.multi_reduction <add>, %238, %cst_91 [1] : vector<16x16xf32> to vector<16xf32>
    %240 = vector.shape_cast %239 : vector<16xf32> to vector<16x1xf32>
    %241 = tpu.reciprocal %240 {approx = true} : vector<16x1xf32> -> vector<16x1xf32>
    %242 = vector.broadcast %241 : vector<16x1xf32> to vector<16x16xf32>
    %243 = arith.mulf %238, %242 : vector<16x16xf32>
    %cst_92 = arith.constant dense<0.000000e+00> : vector<16x16xf32>
    %244 = tpu.matmul %243, %229, %cst_92 {dimension_numbers = #tpu.dot_dimension_numbers<[1], [0], [0], [1], [0, 0, 1, 1], [], []>} : vector<16x16xf32>, vector<16x16xf32>, vector<16x16xf32> -> vector<16x16xf32>
    %245 = vector.extract_strided_slice %115 {offsets = [0, 112], sizes = [16, 16], strides = [1, 1]} : vector<16x128xf32> to vector<16x16xf32>
    %246 = vector.extract_strided_slice %118 {offsets = [112, 0], sizes = [16, 16], strides = [1, 1]} : vector<128x16xf32> to vector<16x16xf32>
    %247 = vector.extract_strided_slice %117 {offsets = [0, 112], sizes = [16, 16], strides = [1, 1]} : vector<16x128xf32> to vector<16x16xf32>
    %cst_93 = arith.constant dense<0.000000e+00> : vector<16x16xf32>
    %248 = tpu.matmul %245, %246, %cst_93 {dimension_numbers = #tpu.dot_dimension_numbers<[1], [0], [0], [1], [0, 0, 1, 1], [], []>} : vector<16x16xf32>, vector<16x16xf32>, vector<16x16xf32> -> vector<16x16xf32>
    %cst_94 = arith.constant 2.500000e-01 : f32
    %249 = vector.broadcast %cst_94 : f32 to vector<16x16xf32>
    %250 = arith.mulf %248, %249 : vector<16x16xf32>
    %251 = arith.addf %250, %106 : vector<16x16xf32>
    %cst_95 = arith.constant dense<0xFF800000> : vector<16xf32>
    %252 = vector.multi_reduction <maximumf>, %251, %cst_95 [1] : vector<16x16xf32> to vector<16xf32>
    %253 = vector.shape_cast %252 : vector<16xf32> to vector<16x1xf32>
    %254 = vector.broadcast %253 : vector<16x1xf32> to vector<16x16xf32>
    %255 = arith.subf %251, %254 : vector<16x16xf32>
    %256 = math.exp %255 : vector<16x16xf32>
    %cst_96 = arith.constant dense<0.000000e+00> : vector<16xf32>
    %257 = vector.multi_reduction <add>, %256, %cst_96 [1] : vector<16x16xf32> to vector<16xf32>
    %258 = vector.shape_cast %257 : vector<16xf32> to vector<16x1xf32>
    %259 = tpu.reciprocal %258 {approx = true} : vector<16x1xf32> -> vector<16x1xf32>
    %260 = vector.broadcast %259 : vector<16x1xf32> to vector<16x16xf32>
    %261 = arith.mulf %256, %260 : vector<16x16xf32>
    %cst_97 = arith.constant dense<0.000000e+00> : vector<16x16xf32>
    %262 = tpu.matmul %261, %247, %cst_97 {dimension_numbers = #tpu.dot_dimension_numbers<[1], [0], [0], [1], [0, 0, 1, 1], [], []>} : vector<16x16xf32>, vector<16x16xf32>, vector<16x16xf32> -> vector<16x16xf32>
    %263 = tpu.concatenate %136, %154, %172, %190, %208, %226, %244, %262 in 1 : vector<16x16xf32>, vector<16x16xf32>, vector<16x16xf32>, vector<16x16xf32>, vector<16x16xf32>, vector<16x16xf32>, vector<16x16xf32>, vector<16x16xf32> -> vector<16x128xf32>
    %264 = arith.truncf %263 : vector<16x128xf32> to vector<16x128xbf16>
    %c0_98 = arith.constant 0 : index
    %c0_99 = arith.constant 0 : index
    %c0_100 = arith.constant 0 : index
    %265 = vector.load %arg13[%c0_98, %c0_99, %c0_100] : memref<2x128x128xbf16, #tpu.memory_space<vmem>>, vector<1x128x128xbf16>
    %266 = vector.shape_cast %265 : vector<1x128x128xbf16> to vector<128x128xbf16>
    %cst_101 = arith.constant dense<0.000000e+00> : vector<16x128xf32>
    %267 = tpu.matmul %264, %266, %cst_101 {dimension_numbers = #tpu.dot_dimension_numbers<[1], [0], [0], [1], [0, 0, 1, 1], [], []>} : vector<16x128xbf16>, vector<128x128xbf16>, vector<16x128xf32> -> vector<16x128xf32>
    %c0_102 = arith.constant 0 : index
    %c0_103 = arith.constant 0 : index
    %c0_104 = arith.constant 0 : index
    %268 = vector.load %arg14[%c0_102, %c0_103, %c0_104] : memref<2x1x128xf32, #tpu.memory_space<vmem>>, vector<1x1x128xf32>
    %269 = vector.shape_cast %268 : vector<1x1x128xf32> to vector<1x128xf32>
    %270 = vector.broadcast %269 : vector<1x128xf32> to vector<16x128xf32>
    %271 = arith.addf %267, %270 : vector<16x128xf32>
    %272 = arith.addf %68, %271 : vector<16x128xf32>
    %c0_105 = arith.constant 0 : index
    %c0_106 = arith.constant 0 : index
    %c0_107 = arith.constant 0 : index
    %273 = vector.load %arg15[%c0_105, %c0_106, %c0_107] : memref<2x1x128xf32, #tpu.memory_space<vmem>>, vector<1x1x128xf32>
    %274 = vector.shape_cast %273 : vector<1x1x128xf32> to vector<1x128xf32>
    %c0_108 = arith.constant 0 : index
    %c0_109 = arith.constant 0 : index
    %c0_110 = arith.constant 0 : index
    %275 = vector.load %arg16[%c0_108, %c0_109, %c0_110] : memref<2x1x128xf32, #tpu.memory_space<vmem>>, vector<1x1x128xf32>
    %276 = vector.shape_cast %275 : vector<1x1x128xf32> to vector<1x128xf32>
    %cst_111 = arith.constant dense<0.000000e+00> : vector<16xf32>
    %277 = vector.multi_reduction <add>, %272, %cst_111 [1] : vector<16x128xf32> to vector<16xf32>
    %278 = vector.shape_cast %277 : vector<16xf32> to vector<16x1xf32>
    %cst_112 = arith.constant 1.280000e+02 : f32
    %279 = vector.broadcast %cst_112 : f32 to vector<16x1xf32>
    %280 = arith.divf %278, %279 : vector<16x1xf32>
    %281 = vector.broadcast %280 : vector<16x1xf32> to vector<16x128xf32>
    %282 = arith.subf %272, %281 : vector<16x128xf32>
    %283 = arith.mulf %282, %282 : vector<16x128xf32>
    %cst_113 = arith.constant dense<0.000000e+00> : vector<16xf32>
    %284 = vector.multi_reduction <add>, %283, %cst_113 [1] : vector<16x128xf32> to vector<16xf32>
    %285 = vector.shape_cast %284 : vector<16xf32> to vector<16x1xf32>
    %cst_114 = arith.constant 1.280000e+02 : f32
    %286 = vector.broadcast %cst_114 : f32 to vector<16x1xf32>
    %287 = arith.divf %285, %286 : vector<16x1xf32>
    %288 = vector.broadcast %280 : vector<16x1xf32> to vector<16x128xf32>
    %289 = arith.subf %272, %288 : vector<16x128xf32>
    %cst_115 = arith.constant 9.99999974E-6 : f32
    %290 = vector.broadcast %cst_115 : f32 to vector<16x1xf32>
    %291 = arith.addf %287, %290 : vector<16x1xf32>
    %292 = math.rsqrt %291 : vector<16x1xf32>
    %293 = vector.broadcast %292 : vector<16x1xf32> to vector<16x128xf32>
    %294 = arith.mulf %289, %293 : vector<16x128xf32>
    %295 = vector.broadcast %274 : vector<1x128xf32> to vector<16x128xf32>
    %296 = arith.mulf %294, %295 : vector<16x128xf32>
    %297 = vector.broadcast %276 : vector<1x128xf32> to vector<16x128xf32>
    %298 = arith.addf %296, %297 : vector<16x128xf32>
    %299 = arith.truncf %298 : vector<16x128xf32> to vector<16x128xbf16>
    %c0_116 = arith.constant 0 : index
    %c0_117 = arith.constant 0 : index
    %c0_118 = arith.constant 0 : index
    %300 = vector.load %arg17[%c0_116, %c0_117, %c0_118] : memref<2x128x2048xbf16, #tpu.memory_space<vmem>>, vector<1x128x2048xbf16>
    %301 = vector.shape_cast %300 : vector<1x128x2048xbf16> to vector<128x2048xbf16>
    %cst_119 = arith.constant dense<0.000000e+00> : vector<16x2048xf32>
    %302 = tpu.matmul %299, %301, %cst_119 {dimension_numbers = #tpu.dot_dimension_numbers<[1], [0], [0], [1], [0, 0, 1, 1], [], []>} : vector<16x128xbf16>, vector<128x2048xbf16>, vector<16x2048xf32> -> vector<16x2048xf32>
    %c0_120 = arith.constant 0 : index
    %c0_121 = arith.constant 0 : index
    %c0_122 = arith.constant 0 : index
    %303 = vector.load %arg18[%c0_120, %c0_121, %c0_122] : memref<2x1x2048xf32, #tpu.memory_space<vmem>>, vector<1x1x2048xf32>
    %304 = vector.shape_cast %303 : vector<1x1x2048xf32> to vector<1x2048xf32>
    %305 = vector.broadcast %304 : vector<1x2048xf32> to vector<16x2048xf32>
    %306 = arith.addf %302, %305 : vector<16x2048xf32>
    %cst_123 = arith.constant 5.000000e-01 : f32
    %307 = vector.broadcast %cst_123 : f32 to vector<16x2048xf32>
    %308 = arith.mulf %307, %306 : vector<16x2048xf32>
    %cst_124 = arith.constant 0.707106769 : f32
    %309 = vector.broadcast %cst_124 : f32 to vector<16x2048xf32>
    %310 = arith.mulf %306, %309 : vector<16x2048xf32>
    %311 = math.erf %310 : vector<16x2048xf32>
    %cst_125 = arith.constant 1.000000e+00 : f32
    %312 = vector.broadcast %cst_125 : f32 to vector<16x2048xf32>
    %313 = arith.addf %312, %311 : vector<16x2048xf32>
    %314 = arith.mulf %308, %313 : vector<16x2048xf32>
    %315 = arith.truncf %314 : vector<16x2048xf32> to vector<16x2048xbf16>
    %c0_126 = arith.constant 0 : index
    %c0_127 = arith.constant 0 : index
    %c0_128 = arith.constant 0 : index
    %316 = vector.load %arg19[%c0_126, %c0_127, %c0_128] : memref<2x2048x128xbf16, #tpu.memory_space<vmem>>, vector<1x2048x128xbf16>
    %317 = vector.shape_cast %316 : vector<1x2048x128xbf16> to vector<2048x128xbf16>
    %cst_129 = arith.constant dense<0.000000e+00> : vector<16x128xf32>
    %318 = tpu.matmul %315, %317, %cst_129 {dimension_numbers = #tpu.dot_dimension_numbers<[1], [0], [0], [1], [0, 0, 1, 1], [], []>} : vector<16x2048xbf16>, vector<2048x128xbf16>, vector<16x128xf32> -> vector<16x128xf32>
    %c0_130 = arith.constant 0 : index
    %c0_131 = arith.constant 0 : index
    %c0_132 = arith.constant 0 : index
    %319 = vector.load %arg20[%c0_130, %c0_131, %c0_132] : memref<2x1x128xf32, #tpu.memory_space<vmem>>, vector<1x1x128xf32>
    %320 = vector.shape_cast %319 : vector<1x1x128xf32> to vector<1x128xf32>
    %321 = vector.broadcast %320 : vector<1x128xf32> to vector<16x128xf32>
    %322 = arith.addf %318, %321 : vector<16x128xf32>
    %323 = arith.addf %298, %322 : vector<16x128xf32>
    %c0_133 = arith.constant 0 : index
    %c0_134 = arith.constant 0 : index
    %c0_135 = arith.constant 0 : index
    %324 = vector.load %arg21[%c0_133, %c0_134, %c0_135] : memref<2x1x128xf32, #tpu.memory_space<vmem>>, vector<1x1x128xf32>
    %325 = vector.shape_cast %324 : vector<1x1x128xf32> to vector<1x128xf32>
    %c0_136 = arith.constant 0 : index
    %c0_137 = arith.constant 0 : index
    %c0_138 = arith.constant 0 : index
    %326 = vector.load %arg22[%c0_136, %c0_137, %c0_138] : memref<2x1x128xf32, #tpu.memory_space<vmem>>, vector<1x1x128xf32>
    %327 = vector.shape_cast %326 : vector<1x1x128xf32> to vector<1x128xf32>
    %cst_139 = arith.constant dense<0.000000e+00> : vector<16xf32>
    %328 = vector.multi_reduction <add>, %323, %cst_139 [1] : vector<16x128xf32> to vector<16xf32>
    %329 = vector.shape_cast %328 : vector<16xf32> to vector<16x1xf32>
    %cst_140 = arith.constant 1.280000e+02 : f32
    %330 = vector.broadcast %cst_140 : f32 to vector<16x1xf32>
    %331 = arith.divf %329, %330 : vector<16x1xf32>
    %332 = vector.broadcast %331 : vector<16x1xf32> to vector<16x128xf32>
    %333 = arith.subf %323, %332 : vector<16x128xf32>
    %334 = arith.mulf %333, %333 : vector<16x128xf32>
    %cst_141 = arith.constant dense<0.000000e+00> : vector<16xf32>
    %335 = vector.multi_reduction <add>, %334, %cst_141 [1] : vector<16x128xf32> to vector<16xf32>
    %336 = vector.shape_cast %335 : vector<16xf32> to vector<16x1xf32>
    %cst_142 = arith.constant 1.280000e+02 : f32
    %337 = vector.broadcast %cst_142 : f32 to vector<16x1xf32>
    %338 = arith.divf %336, %337 : vector<16x1xf32>
    %339 = vector.broadcast %331 : vector<16x1xf32> to vector<16x128xf32>
    %340 = arith.subf %323, %339 : vector<16x128xf32>
    %cst_143 = arith.constant 9.99999974E-6 : f32
    %341 = vector.broadcast %cst_143 : f32 to vector<16x1xf32>
    %342 = arith.addf %338, %341 : vector<16x1xf32>
    %343 = math.rsqrt %342 : vector<16x1xf32>
    %344 = vector.broadcast %343 : vector<16x1xf32> to vector<16x128xf32>
    %345 = arith.mulf %340, %344 : vector<16x128xf32>
    %346 = vector.broadcast %325 : vector<1x128xf32> to vector<16x128xf32>
    %347 = arith.mulf %345, %346 : vector<16x128xf32>
    %348 = vector.broadcast %327 : vector<1x128xf32> to vector<16x128xf32>
    %349 = arith.addf %347, %348 : vector<16x128xf32>
    %350 = arith.truncf %349 : vector<16x128xf32> to vector<16x128xbf16>
    %c1 = arith.constant 1 : index
    %c0_144 = arith.constant 0 : index
    %c0_145 = arith.constant 0 : index
    %351 = vector.load %arg11[%c1, %c0_144, %c0_145] : memref<2x128x384xbf16, #tpu.memory_space<vmem>>, vector<1x128x384xbf16>
    %352 = vector.shape_cast %351 : vector<1x128x384xbf16> to vector<128x384xbf16>
    %cst_146 = arith.constant dense<0.000000e+00> : vector<16x384xf32>
    %353 = tpu.matmul %350, %352, %cst_146 {dimension_numbers = #tpu.dot_dimension_numbers<[1], [0], [0], [1], [0, 0, 1, 1], [], []>} : vector<16x128xbf16>, vector<128x384xbf16>, vector<16x384xf32> -> vector<16x384xf32>
    %c1_147 = arith.constant 1 : index
    %c0_148 = arith.constant 0 : index
    %c0_149 = arith.constant 0 : index
    %354 = vector.load %arg12[%c1_147, %c0_148, %c0_149] : memref<2x1x384xf32, #tpu.memory_space<vmem>>, vector<1x1x384xf32>
    %355 = vector.shape_cast %354 : vector<1x1x384xf32> to vector<1x384xf32>
    %356 = vector.broadcast %355 : vector<1x384xf32> to vector<16x384xf32>
    %357 = arith.addf %353, %356 : vector<16x384xf32>
    %358 = vector.extract_strided_slice %357 {offsets = [0, 0], sizes = [16, 128], strides = [1, 1]} : vector<16x384xf32> to vector<16x128xf32>
    %359 = vector.extract_strided_slice %357 {offsets = [0, 128], sizes = [16, 128], strides = [1, 1]} : vector<16x384xf32> to vector<16x128xf32>
    %360 = vector.extract_strided_slice %357 {offsets = [0, 256], sizes = [16, 128], strides = [1, 1]} : vector<16x384xf32> to vector<16x128xf32>
    %361 = tpu.transpose %359, [1, 0] : vector<16x128xf32> -> vector<128x16xf32>
    %362 = vector.extract_strided_slice %358 {offsets = [0, 0], sizes = [16, 16], strides = [1, 1]} : vector<16x128xf32> to vector<16x16xf32>
    %363 = vector.extract_strided_slice %361 {offsets = [0, 0], sizes = [16, 16], strides = [1, 1]} : vector<128x16xf32> to vector<16x16xf32>
    %364 = vector.extract_strided_slice %360 {offsets = [0, 0], sizes = [16, 16], strides = [1, 1]} : vector<16x128xf32> to vector<16x16xf32>
    %cst_150 = arith.constant dense<0.000000e+00> : vector<16x16xf32>
    %365 = tpu.matmul %362, %363, %cst_150 {dimension_numbers = #tpu.dot_dimension_numbers<[1], [0], [0], [1], [0, 0, 1, 1], [], []>} : vector<16x16xf32>, vector<16x16xf32>, vector<16x16xf32> -> vector<16x16xf32>
    %cst_151 = arith.constant 2.500000e-01 : f32
    %366 = vector.broadcast %cst_151 : f32 to vector<16x16xf32>
    %367 = arith.mulf %365, %366 : vector<16x16xf32>
    %368 = arith.addf %367, %106 : vector<16x16xf32>
    %cst_152 = arith.constant dense<0xFF800000> : vector<16xf32>
    %369 = vector.multi_reduction <maximumf>, %368, %cst_152 [1] : vector<16x16xf32> to vector<16xf32>
    %370 = vector.shape_cast %369 : vector<16xf32> to vector<16x1xf32>
    %371 = vector.broadcast %370 : vector<16x1xf32> to vector<16x16xf32>
    %372 = arith.subf %368, %371 : vector<16x16xf32>
    %373 = math.exp %372 : vector<16x16xf32>
    %cst_153 = arith.constant dense<0.000000e+00> : vector<16xf32>
    %374 = vector.multi_reduction <add>, %373, %cst_153 [1] : vector<16x16xf32> to vector<16xf32>
    %375 = vector.shape_cast %374 : vector<16xf32> to vector<16x1xf32>
    %376 = tpu.reciprocal %375 {approx = true} : vector<16x1xf32> -> vector<16x1xf32>
    %377 = vector.broadcast %376 : vector<16x1xf32> to vector<16x16xf32>
    %378 = arith.mulf %373, %377 : vector<16x16xf32>
    %cst_154 = arith.constant dense<0.000000e+00> : vector<16x16xf32>
    %379 = tpu.matmul %378, %364, %cst_154 {dimension_numbers = #tpu.dot_dimension_numbers<[1], [0], [0], [1], [0, 0, 1, 1], [], []>} : vector<16x16xf32>, vector<16x16xf32>, vector<16x16xf32> -> vector<16x16xf32>
    %380 = vector.extract_strided_slice %358 {offsets = [0, 16], sizes = [16, 16], strides = [1, 1]} : vector<16x128xf32> to vector<16x16xf32>
    %381 = vector.extract_strided_slice %361 {offsets = [16, 0], sizes = [16, 16], strides = [1, 1]} : vector<128x16xf32> to vector<16x16xf32>
    %382 = vector.extract_strided_slice %360 {offsets = [0, 16], sizes = [16, 16], strides = [1, 1]} : vector<16x128xf32> to vector<16x16xf32>
    %cst_155 = arith.constant dense<0.000000e+00> : vector<16x16xf32>
    %383 = tpu.matmul %380, %381, %cst_155 {dimension_numbers = #tpu.dot_dimension_numbers<[1], [0], [0], [1], [0, 0, 1, 1], [], []>} : vector<16x16xf32>, vector<16x16xf32>, vector<16x16xf32> -> vector<16x16xf32>
    %cst_156 = arith.constant 2.500000e-01 : f32
    %384 = vector.broadcast %cst_156 : f32 to vector<16x16xf32>
    %385 = arith.mulf %383, %384 : vector<16x16xf32>
    %386 = arith.addf %385, %106 : vector<16x16xf32>
    %cst_157 = arith.constant dense<0xFF800000> : vector<16xf32>
    %387 = vector.multi_reduction <maximumf>, %386, %cst_157 [1] : vector<16x16xf32> to vector<16xf32>
    %388 = vector.shape_cast %387 : vector<16xf32> to vector<16x1xf32>
    %389 = vector.broadcast %388 : vector<16x1xf32> to vector<16x16xf32>
    %390 = arith.subf %386, %389 : vector<16x16xf32>
    %391 = math.exp %390 : vector<16x16xf32>
    %cst_158 = arith.constant dense<0.000000e+00> : vector<16xf32>
    %392 = vector.multi_reduction <add>, %391, %cst_158 [1] : vector<16x16xf32> to vector<16xf32>
    %393 = vector.shape_cast %392 : vector<16xf32> to vector<16x1xf32>
    %394 = tpu.reciprocal %393 {approx = true} : vector<16x1xf32> -> vector<16x1xf32>
    %395 = vector.broadcast %394 : vector<16x1xf32> to vector<16x16xf32>
    %396 = arith.mulf %391, %395 : vector<16x16xf32>
    %cst_159 = arith.constant dense<0.000000e+00> : vector<16x16xf32>
    %397 = tpu.matmul %396, %382, %cst_159 {dimension_numbers = #tpu.dot_dimension_numbers<[1], [0], [0], [1], [0, 0, 1, 1], [], []>} : vector<16x16xf32>, vector<16x16xf32>, vector<16x16xf32> -> vector<16x16xf32>
    %398 = vector.extract_strided_slice %358 {offsets = [0, 32], sizes = [16, 16], strides = [1, 1]} : vector<16x128xf32> to vector<16x16xf32>
    %399 = vector.extract_strided_slice %361 {offsets = [32, 0], sizes = [16, 16], strides = [1, 1]} : vector<128x16xf32> to vector<16x16xf32>
    %400 = vector.extract_strided_slice %360 {offsets = [0, 32], sizes = [16, 16], strides = [1, 1]} : vector<16x128xf32> to vector<16x16xf32>
    %cst_160 = arith.constant dense<0.000000e+00> : vector<16x16xf32>
    %401 = tpu.matmul %398, %399, %cst_160 {dimension_numbers = #tpu.dot_dimension_numbers<[1], [0], [0], [1], [0, 0, 1, 1], [], []>} : vector<16x16xf32>, vector<16x16xf32>, vector<16x16xf32> -> vector<16x16xf32>
    %cst_161 = arith.constant 2.500000e-01 : f32
    %402 = vector.broadcast %cst_161 : f32 to vector<16x16xf32>
    %403 = arith.mulf %401, %402 : vector<16x16xf32>
    %404 = arith.addf %403, %106 : vector<16x16xf32>
    %cst_162 = arith.constant dense<0xFF800000> : vector<16xf32>
    %405 = vector.multi_reduction <maximumf>, %404, %cst_162 [1] : vector<16x16xf32> to vector<16xf32>
    %406 = vector.shape_cast %405 : vector<16xf32> to vector<16x1xf32>
    %407 = vector.broadcast %406 : vector<16x1xf32> to vector<16x16xf32>
    %408 = arith.subf %404, %407 : vector<16x16xf32>
    %409 = math.exp %408 : vector<16x16xf32>
    %cst_163 = arith.constant dense<0.000000e+00> : vector<16xf32>
    %410 = vector.multi_reduction <add>, %409, %cst_163 [1] : vector<16x16xf32> to vector<16xf32>
    %411 = vector.shape_cast %410 : vector<16xf32> to vector<16x1xf32>
    %412 = tpu.reciprocal %411 {approx = true} : vector<16x1xf32> -> vector<16x1xf32>
    %413 = vector.broadcast %412 : vector<16x1xf32> to vector<16x16xf32>
    %414 = arith.mulf %409, %413 : vector<16x16xf32>
    %cst_164 = arith.constant dense<0.000000e+00> : vector<16x16xf32>
    %415 = tpu.matmul %414, %400, %cst_164 {dimension_numbers = #tpu.dot_dimension_numbers<[1], [0], [0], [1], [0, 0, 1, 1], [], []>} : vector<16x16xf32>, vector<16x16xf32>, vector<16x16xf32> -> vector<16x16xf32>
    %416 = vector.extract_strided_slice %358 {offsets = [0, 48], sizes = [16, 16], strides = [1, 1]} : vector<16x128xf32> to vector<16x16xf32>
    %417 = vector.extract_strided_slice %361 {offsets = [48, 0], sizes = [16, 16], strides = [1, 1]} : vector<128x16xf32> to vector<16x16xf32>
    %418 = vector.extract_strided_slice %360 {offsets = [0, 48], sizes = [16, 16], strides = [1, 1]} : vector<16x128xf32> to vector<16x16xf32>
    %cst_165 = arith.constant dense<0.000000e+00> : vector<16x16xf32>
    %419 = tpu.matmul %416, %417, %cst_165 {dimension_numbers = #tpu.dot_dimension_numbers<[1], [0], [0], [1], [0, 0, 1, 1], [], []>} : vector<16x16xf32>, vector<16x16xf32>, vector<16x16xf32> -> vector<16x16xf32>
    %cst_166 = arith.constant 2.500000e-01 : f32
    %420 = vector.broadcast %cst_166 : f32 to vector<16x16xf32>
    %421 = arith.mulf %419, %420 : vector<16x16xf32>
    %422 = arith.addf %421, %106 : vector<16x16xf32>
    %cst_167 = arith.constant dense<0xFF800000> : vector<16xf32>
    %423 = vector.multi_reduction <maximumf>, %422, %cst_167 [1] : vector<16x16xf32> to vector<16xf32>
    %424 = vector.shape_cast %423 : vector<16xf32> to vector<16x1xf32>
    %425 = vector.broadcast %424 : vector<16x1xf32> to vector<16x16xf32>
    %426 = arith.subf %422, %425 : vector<16x16xf32>
    %427 = math.exp %426 : vector<16x16xf32>
    %cst_168 = arith.constant dense<0.000000e+00> : vector<16xf32>
    %428 = vector.multi_reduction <add>, %427, %cst_168 [1] : vector<16x16xf32> to vector<16xf32>
    %429 = vector.shape_cast %428 : vector<16xf32> to vector<16x1xf32>
    %430 = tpu.reciprocal %429 {approx = true} : vector<16x1xf32> -> vector<16x1xf32>
    %431 = vector.broadcast %430 : vector<16x1xf32> to vector<16x16xf32>
    %432 = arith.mulf %427, %431 : vector<16x16xf32>
    %cst_169 = arith.constant dense<0.000000e+00> : vector<16x16xf32>
    %433 = tpu.matmul %432, %418, %cst_169 {dimension_numbers = #tpu.dot_dimension_numbers<[1], [0], [0], [1], [0, 0, 1, 1], [], []>} : vector<16x16xf32>, vector<16x16xf32>, vector<16x16xf32> -> vector<16x16xf32>
    %434 = vector.extract_strided_slice %358 {offsets = [0, 64], sizes = [16, 16], strides = [1, 1]} : vector<16x128xf32> to vector<16x16xf32>
    %435 = vector.extract_strided_slice %361 {offsets = [64, 0], sizes = [16, 16], strides = [1, 1]} : vector<128x16xf32> to vector<16x16xf32>
    %436 = vector.extract_strided_slice %360 {offsets = [0, 64], sizes = [16, 16], strides = [1, 1]} : vector<16x128xf32> to vector<16x16xf32>
    %cst_170 = arith.constant dense<0.000000e+00> : vector<16x16xf32>
    %437 = tpu.matmul %434, %435, %cst_170 {dimension_numbers = #tpu.dot_dimension_numbers<[1], [0], [0], [1], [0, 0, 1, 1], [], []>} : vector<16x16xf32>, vector<16x16xf32>, vector<16x16xf32> -> vector<16x16xf32>
    %cst_171 = arith.constant 2.500000e-01 : f32
    %438 = vector.broadcast %cst_171 : f32 to vector<16x16xf32>
    %439 = arith.mulf %437, %438 : vector<16x16xf32>
    %440 = arith.addf %439, %106 : vector<16x16xf32>
    %cst_172 = arith.constant dense<0xFF800000> : vector<16xf32>
    %441 = vector.multi_reduction <maximumf>, %440, %cst_172 [1] : vector<16x16xf32> to vector<16xf32>
    %442 = vector.shape_cast %441 : vector<16xf32> to vector<16x1xf32>
    %443 = vector.broadcast %442 : vector<16x1xf32> to vector<16x16xf32>
    %444 = arith.subf %440, %443 : vector<16x16xf32>
    %445 = math.exp %444 : vector<16x16xf32>
    %cst_173 = arith.constant dense<0.000000e+00> : vector<16xf32>
    %446 = vector.multi_reduction <add>, %445, %cst_173 [1] : vector<16x16xf32> to vector<16xf32>
    %447 = vector.shape_cast %446 : vector<16xf32> to vector<16x1xf32>
    %448 = tpu.reciprocal %447 {approx = true} : vector<16x1xf32> -> vector<16x1xf32>
    %449 = vector.broadcast %448 : vector<16x1xf32> to vector<16x16xf32>
    %450 = arith.mulf %445, %449 : vector<16x16xf32>
    %cst_174 = arith.constant dense<0.000000e+00> : vector<16x16xf32>
    %451 = tpu.matmul %450, %436, %cst_174 {dimension_numbers = #tpu.dot_dimension_numbers<[1], [0], [0], [1], [0, 0, 1, 1], [], []>} : vector<16x16xf32>, vector<16x16xf32>, vector<16x16xf32> -> vector<16x16xf32>
    %452 = vector.extract_strided_slice %358 {offsets = [0, 80], sizes = [16, 16], strides = [1, 1]} : vector<16x128xf32> to vector<16x16xf32>
    %453 = vector.extract_strided_slice %361 {offsets = [80, 0], sizes = [16, 16], strides = [1, 1]} : vector<128x16xf32> to vector<16x16xf32>
    %454 = vector.extract_strided_slice %360 {offsets = [0, 80], sizes = [16, 16], strides = [1, 1]} : vector<16x128xf32> to vector<16x16xf32>
    %cst_175 = arith.constant dense<0.000000e+00> : vector<16x16xf32>
    %455 = tpu.matmul %452, %453, %cst_175 {dimension_numbers = #tpu.dot_dimension_numbers<[1], [0], [0], [1], [0, 0, 1, 1], [], []>} : vector<16x16xf32>, vector<16x16xf32>, vector<16x16xf32> -> vector<16x16xf32>
    %cst_176 = arith.constant 2.500000e-01 : f32
    %456 = vector.broadcast %cst_176 : f32 to vector<16x16xf32>
    %457 = arith.mulf %455, %456 : vector<16x16xf32>
    %458 = arith.addf %457, %106 : vector<16x16xf32>
    %cst_177 = arith.constant dense<0xFF800000> : vector<16xf32>
    %459 = vector.multi_reduction <maximumf>, %458, %cst_177 [1] : vector<16x16xf32> to vector<16xf32>
    %460 = vector.shape_cast %459 : vector<16xf32> to vector<16x1xf32>
    %461 = vector.broadcast %460 : vector<16x1xf32> to vector<16x16xf32>
    %462 = arith.subf %458, %461 : vector<16x16xf32>
    %463 = math.exp %462 : vector<16x16xf32>
    %cst_178 = arith.constant dense<0.000000e+00> : vector<16xf32>
    %464 = vector.multi_reduction <add>, %463, %cst_178 [1] : vector<16x16xf32> to vector<16xf32>
    %465 = vector.shape_cast %464 : vector<16xf32> to vector<16x1xf32>
    %466 = tpu.reciprocal %465 {approx = true} : vector<16x1xf32> -> vector<16x1xf32>
    %467 = vector.broadcast %466 : vector<16x1xf32> to vector<16x16xf32>
    %468 = arith.mulf %463, %467 : vector<16x16xf32>
    %cst_179 = arith.constant dense<0.000000e+00> : vector<16x16xf32>
    %469 = tpu.matmul %468, %454, %cst_179 {dimension_numbers = #tpu.dot_dimension_numbers<[1], [0], [0], [1], [0, 0, 1, 1], [], []>} : vector<16x16xf32>, vector<16x16xf32>, vector<16x16xf32> -> vector<16x16xf32>
    %470 = vector.extract_strided_slice %358 {offsets = [0, 96], sizes = [16, 16], strides = [1, 1]} : vector<16x128xf32> to vector<16x16xf32>
    %471 = vector.extract_strided_slice %361 {offsets = [96, 0], sizes = [16, 16], strides = [1, 1]} : vector<128x16xf32> to vector<16x16xf32>
    %472 = vector.extract_strided_slice %360 {offsets = [0, 96], sizes = [16, 16], strides = [1, 1]} : vector<16x128xf32> to vector<16x16xf32>
    %cst_180 = arith.constant dense<0.000000e+00> : vector<16x16xf32>
    %473 = tpu.matmul %470, %471, %cst_180 {dimension_numbers = #tpu.dot_dimension_numbers<[1], [0], [0], [1], [0, 0, 1, 1], [], []>} : vector<16x16xf32>, vector<16x16xf32>, vector<16x16xf32> -> vector<16x16xf32>
    %cst_181 = arith.constant 2.500000e-01 : f32
    %474 = vector.broadcast %cst_181 : f32 to vector<16x16xf32>
    %475 = arith.mulf %473, %474 : vector<16x16xf32>
    %476 = arith.addf %475, %106 : vector<16x16xf32>
    %cst_182 = arith.constant dense<0xFF800000> : vector<16xf32>
    %477 = vector.multi_reduction <maximumf>, %476, %cst_182 [1] : vector<16x16xf32> to vector<16xf32>
    %478 = vector.shape_cast %477 : vector<16xf32> to vector<16x1xf32>
    %479 = vector.broadcast %478 : vector<16x1xf32> to vector<16x16xf32>
    %480 = arith.subf %476, %479 : vector<16x16xf32>
    %481 = math.exp %480 : vector<16x16xf32>
    %cst_183 = arith.constant dense<0.000000e+00> : vector<16xf32>
    %482 = vector.multi_reduction <add>, %481, %cst_183 [1] : vector<16x16xf32> to vector<16xf32>
    %483 = vector.shape_cast %482 : vector<16xf32> to vector<16x1xf32>
    %484 = tpu.reciprocal %483 {approx = true} : vector<16x1xf32> -> vector<16x1xf32>
    %485 = vector.broadcast %484 : vector<16x1xf32> to vector<16x16xf32>
    %486 = arith.mulf %481, %485 : vector<16x16xf32>
    %cst_184 = arith.constant dense<0.000000e+00> : vector<16x16xf32>
    %487 = tpu.matmul %486, %472, %cst_184 {dimension_numbers = #tpu.dot_dimension_numbers<[1], [0], [0], [1], [0, 0, 1, 1], [], []>} : vector<16x16xf32>, vector<16x16xf32>, vector<16x16xf32> -> vector<16x16xf32>
    %488 = vector.extract_strided_slice %358 {offsets = [0, 112], sizes = [16, 16], strides = [1, 1]} : vector<16x128xf32> to vector<16x16xf32>
    %489 = vector.extract_strided_slice %361 {offsets = [112, 0], sizes = [16, 16], strides = [1, 1]} : vector<128x16xf32> to vector<16x16xf32>
    %490 = vector.extract_strided_slice %360 {offsets = [0, 112], sizes = [16, 16], strides = [1, 1]} : vector<16x128xf32> to vector<16x16xf32>
    %cst_185 = arith.constant dense<0.000000e+00> : vector<16x16xf32>
    %491 = tpu.matmul %488, %489, %cst_185 {dimension_numbers = #tpu.dot_dimension_numbers<[1], [0], [0], [1], [0, 0, 1, 1], [], []>} : vector<16x16xf32>, vector<16x16xf32>, vector<16x16xf32> -> vector<16x16xf32>
    %cst_186 = arith.constant 2.500000e-01 : f32
    %492 = vector.broadcast %cst_186 : f32 to vector<16x16xf32>
    %493 = arith.mulf %491, %492 : vector<16x16xf32>
    %494 = arith.addf %493, %106 : vector<16x16xf32>
    %cst_187 = arith.constant dense<0xFF800000> : vector<16xf32>
    %495 = vector.multi_reduction <maximumf>, %494, %cst_187 [1] : vector<16x16xf32> to vector<16xf32>
    %496 = vector.shape_cast %495 : vector<16xf32> to vector<16x1xf32>
    %497 = vector.broadcast %496 : vector<16x1xf32> to vector<16x16xf32>
    %498 = arith.subf %494, %497 : vector<16x16xf32>
    %499 = math.exp %498 : vector<16x16xf32>
    %cst_188 = arith.constant dense<0.000000e+00> : vector<16xf32>
    %500 = vector.multi_reduction <add>, %499, %cst_188 [1] : vector<16x16xf32> to vector<16xf32>
    %501 = vector.shape_cast %500 : vector<16xf32> to vector<16x1xf32>
    %502 = tpu.reciprocal %501 {approx = true} : vector<16x1xf32> -> vector<16x1xf32>
    %503 = vector.broadcast %502 : vector<16x1xf32> to vector<16x16xf32>
    %504 = arith.mulf %499, %503 : vector<16x16xf32>
    %cst_189 = arith.constant dense<0.000000e+00> : vector<16x16xf32>
    %505 = tpu.matmul %504, %490, %cst_189 {dimension_numbers = #tpu.dot_dimension_numbers<[1], [0], [0], [1], [0, 0, 1, 1], [], []>} : vector<16x16xf32>, vector<16x16xf32>, vector<16x16xf32> -> vector<16x16xf32>
    %506 = tpu.concatenate %379, %397, %415, %433, %451, %469, %487, %505 in 1 : vector<16x16xf32>, vector<16x16xf32>, vector<16x16xf32>, vector<16x16xf32>, vector<16x16xf32>, vector<16x16xf32>, vector<16x16xf32>, vector<16x16xf32> -> vector<16x128xf32>
    %507 = arith.truncf %506 : vector<16x128xf32> to vector<16x128xbf16>
    %c1_190 = arith.constant 1 : index
    %c0_191 = arith.constant 0 : index
    %c0_192 = arith.constant 0 : index
    %508 = vector.load %arg13[%c1_190, %c0_191, %c0_192] : memref<2x128x128xbf16, #tpu.memory_space<vmem>>, vector<1x128x128xbf16>
    %509 = vector.shape_cast %508 : vector<1x128x128xbf16> to vector<128x128xbf16>
    %cst_193 = arith.constant dense<0.000000e+00> : vector<16x128xf32>
    %510 = tpu.matmul %507, %509, %cst_193 {dimension_numbers = #tpu.dot_dimension_numbers<[1], [0], [0], [1], [0, 0, 1, 1], [], []>} : vector<16x128xbf16>, vector<128x128xbf16>, vector<16x128xf32> -> vector<16x128xf32>
    %c1_194 = arith.constant 1 : index
    %c0_195 = arith.constant 0 : index
    %c0_196 = arith.constant 0 : index
    %511 = vector.load %arg14[%c1_194, %c0_195, %c0_196] : memref<2x1x128xf32, #tpu.memory_space<vmem>>, vector<1x1x128xf32>
    %512 = vector.shape_cast %511 : vector<1x1x128xf32> to vector<1x128xf32>
    %513 = vector.broadcast %512 : vector<1x128xf32> to vector<16x128xf32>
    %514 = arith.addf %510, %513 : vector<16x128xf32>
    %515 = arith.addf %349, %514 : vector<16x128xf32>
    %c1_197 = arith.constant 1 : index
    %c0_198 = arith.constant 0 : index
    %c0_199 = arith.constant 0 : index
    %516 = vector.load %arg15[%c1_197, %c0_198, %c0_199] : memref<2x1x128xf32, #tpu.memory_space<vmem>>, vector<1x1x128xf32>
    %517 = vector.shape_cast %516 : vector<1x1x128xf32> to vector<1x128xf32>
    %c1_200 = arith.constant 1 : index
    %c0_201 = arith.constant 0 : index
    %c0_202 = arith.constant 0 : index
    %518 = vector.load %arg16[%c1_200, %c0_201, %c0_202] : memref<2x1x128xf32, #tpu.memory_space<vmem>>, vector<1x1x128xf32>
    %519 = vector.shape_cast %518 : vector<1x1x128xf32> to vector<1x128xf32>
    %cst_203 = arith.constant dense<0.000000e+00> : vector<16xf32>
    %520 = vector.multi_reduction <add>, %515, %cst_203 [1] : vector<16x128xf32> to vector<16xf32>
    %521 = vector.shape_cast %520 : vector<16xf32> to vector<16x1xf32>
    %cst_204 = arith.constant 1.280000e+02 : f32
    %522 = vector.broadcast %cst_204 : f32 to vector<16x1xf32>
    %523 = arith.divf %521, %522 : vector<16x1xf32>
    %524 = vector.broadcast %523 : vector<16x1xf32> to vector<16x128xf32>
    %525 = arith.subf %515, %524 : vector<16x128xf32>
    %526 = arith.mulf %525, %525 : vector<16x128xf32>
    %cst_205 = arith.constant dense<0.000000e+00> : vector<16xf32>
    %527 = vector.multi_reduction <add>, %526, %cst_205 [1] : vector<16x128xf32> to vector<16xf32>
    %528 = vector.shape_cast %527 : vector<16xf32> to vector<16x1xf32>
    %cst_206 = arith.constant 1.280000e+02 : f32
    %529 = vector.broadcast %cst_206 : f32 to vector<16x1xf32>
    %530 = arith.divf %528, %529 : vector<16x1xf32>
    %531 = vector.broadcast %523 : vector<16x1xf32> to vector<16x128xf32>
    %532 = arith.subf %515, %531 : vector<16x128xf32>
    %cst_207 = arith.constant 9.99999974E-6 : f32
    %533 = vector.broadcast %cst_207 : f32 to vector<16x1xf32>
    %534 = arith.addf %530, %533 : vector<16x1xf32>
    %535 = math.rsqrt %534 : vector<16x1xf32>
    %536 = vector.broadcast %535 : vector<16x1xf32> to vector<16x128xf32>
    %537 = arith.mulf %532, %536 : vector<16x128xf32>
    %538 = vector.broadcast %517 : vector<1x128xf32> to vector<16x128xf32>
    %539 = arith.mulf %537, %538 : vector<16x128xf32>
    %540 = vector.broadcast %519 : vector<1x128xf32> to vector<16x128xf32>
    %541 = arith.addf %539, %540 : vector<16x128xf32>
    %542 = arith.truncf %541 : vector<16x128xf32> to vector<16x128xbf16>
    %c1_208 = arith.constant 1 : index
    %c0_209 = arith.constant 0 : index
    %c0_210 = arith.constant 0 : index
    %543 = vector.load %arg17[%c1_208, %c0_209, %c0_210] : memref<2x128x2048xbf16, #tpu.memory_space<vmem>>, vector<1x128x2048xbf16>
    %544 = vector.shape_cast %543 : vector<1x128x2048xbf16> to vector<128x2048xbf16>
    %cst_211 = arith.constant dense<0.000000e+00> : vector<16x2048xf32>
    %545 = tpu.matmul %542, %544, %cst_211 {dimension_numbers = #tpu.dot_dimension_numbers<[1], [0], [0], [1], [0, 0, 1, 1], [], []>} : vector<16x128xbf16>, vector<128x2048xbf16>, vector<16x2048xf32> -> vector<16x2048xf32>
    %c1_212 = arith.constant 1 : index
    %c0_213 = arith.constant 0 : index
    %c0_214 = arith.constant 0 : index
    %546 = vector.load %arg18[%c1_212, %c0_213, %c0_214] : memref<2x1x2048xf32, #tpu.memory_space<vmem>>, vector<1x1x2048xf32>
    %547 = vector.shape_cast %546 : vector<1x1x2048xf32> to vector<1x2048xf32>
    %548 = vector.broadcast %547 : vector<1x2048xf32> to vector<16x2048xf32>
    %549 = arith.addf %545, %548 : vector<16x2048xf32>
    %cst_215 = arith.constant 5.000000e-01 : f32
    %550 = vector.broadcast %cst_215 : f32 to vector<16x2048xf32>
    %551 = arith.mulf %550, %549 : vector<16x2048xf32>
    %cst_216 = arith.constant 0.707106769 : f32
    %552 = vector.broadcast %cst_216 : f32 to vector<16x2048xf32>
    %553 = arith.mulf %549, %552 : vector<16x2048xf32>
    %554 = math.erf %553 : vector<16x2048xf32>
    %cst_217 = arith.constant 1.000000e+00 : f32
    %555 = vector.broadcast %cst_217 : f32 to vector<16x2048xf32>
    %556 = arith.addf %555, %554 : vector<16x2048xf32>
    %557 = arith.mulf %551, %556 : vector<16x2048xf32>
    %558 = arith.truncf %557 : vector<16x2048xf32> to vector<16x2048xbf16>
    %c1_218 = arith.constant 1 : index
    %c0_219 = arith.constant 0 : index
    %c0_220 = arith.constant 0 : index
    %559 = vector.load %arg19[%c1_218, %c0_219, %c0_220] : memref<2x2048x128xbf16, #tpu.memory_space<vmem>>, vector<1x2048x128xbf16>
    %560 = vector.shape_cast %559 : vector<1x2048x128xbf16> to vector<2048x128xbf16>
    %cst_221 = arith.constant dense<0.000000e+00> : vector<16x128xf32>
    %561 = tpu.matmul %558, %560, %cst_221 {dimension_numbers = #tpu.dot_dimension_numbers<[1], [0], [0], [1], [0, 0, 1, 1], [], []>} : vector<16x2048xbf16>, vector<2048x128xbf16>, vector<16x128xf32> -> vector<16x128xf32>
    %c1_222 = arith.constant 1 : index
    %c0_223 = arith.constant 0 : index
    %c0_224 = arith.constant 0 : index
    %562 = vector.load %arg20[%c1_222, %c0_223, %c0_224] : memref<2x1x128xf32, #tpu.memory_space<vmem>>, vector<1x1x128xf32>
    %563 = vector.shape_cast %562 : vector<1x1x128xf32> to vector<1x128xf32>
    %564 = vector.broadcast %563 : vector<1x128xf32> to vector<16x128xf32>
    %565 = arith.addf %561, %564 : vector<16x128xf32>
    %566 = arith.addf %541, %565 : vector<16x128xf32>
    %c1_225 = arith.constant 1 : index
    %c0_226 = arith.constant 0 : index
    %c0_227 = arith.constant 0 : index
    %567 = vector.load %arg21[%c1_225, %c0_226, %c0_227] : memref<2x1x128xf32, #tpu.memory_space<vmem>>, vector<1x1x128xf32>
    %568 = vector.shape_cast %567 : vector<1x1x128xf32> to vector<1x128xf32>
    %c1_228 = arith.constant 1 : index
    %c0_229 = arith.constant 0 : index
    %c0_230 = arith.constant 0 : index
    %569 = vector.load %arg22[%c1_228, %c0_229, %c0_230] : memref<2x1x128xf32, #tpu.memory_space<vmem>>, vector<1x1x128xf32>
    %570 = vector.shape_cast %569 : vector<1x1x128xf32> to vector<1x128xf32>
    %cst_231 = arith.constant dense<0.000000e+00> : vector<16xf32>
    %571 = vector.multi_reduction <add>, %566, %cst_231 [1] : vector<16x128xf32> to vector<16xf32>
    %572 = vector.shape_cast %571 : vector<16xf32> to vector<16x1xf32>
    %cst_232 = arith.constant 1.280000e+02 : f32
    %573 = vector.broadcast %cst_232 : f32 to vector<16x1xf32>
    %574 = arith.divf %572, %573 : vector<16x1xf32>
    %575 = vector.broadcast %574 : vector<16x1xf32> to vector<16x128xf32>
    %576 = arith.subf %566, %575 : vector<16x128xf32>
    %577 = arith.mulf %576, %576 : vector<16x128xf32>
    %cst_233 = arith.constant dense<0.000000e+00> : vector<16xf32>
    %578 = vector.multi_reduction <add>, %577, %cst_233 [1] : vector<16x128xf32> to vector<16xf32>
    %579 = vector.shape_cast %578 : vector<16xf32> to vector<16x1xf32>
    %cst_234 = arith.constant 1.280000e+02 : f32
    %580 = vector.broadcast %cst_234 : f32 to vector<16x1xf32>
    %581 = arith.divf %579, %580 : vector<16x1xf32>
    %582 = vector.broadcast %574 : vector<16x1xf32> to vector<16x128xf32>
    %583 = arith.subf %566, %582 : vector<16x128xf32>
    %cst_235 = arith.constant 9.99999974E-6 : f32
    %584 = vector.broadcast %cst_235 : f32 to vector<16x1xf32>
    %585 = arith.addf %581, %584 : vector<16x1xf32>
    %586 = math.rsqrt %585 : vector<16x1xf32>
    %587 = vector.broadcast %586 : vector<16x1xf32> to vector<16x128xf32>
    %588 = arith.mulf %583, %587 : vector<16x128xf32>
    %589 = vector.broadcast %568 : vector<1x128xf32> to vector<16x128xf32>
    %590 = arith.mulf %588, %589 : vector<16x128xf32>
    %591 = vector.broadcast %570 : vector<1x128xf32> to vector<16x128xf32>
    %592 = arith.addf %590, %591 : vector<16x128xf32>
    %593 = vector.extract_strided_slice %592 {offsets = [0, 0], sizes = [2, 128], strides = [1, 1]} : vector<16x128xf32> to vector<2x128xf32>
    %c0_236 = arith.constant 0 : index
    %c0_237 = arith.constant 0 : index
    %594 = vector.load %arg23[%c0_236, %c0_237] : memref<128x64xf32, #tpu.memory_space<vmem>>, vector<128x64xf32>
    %cst_238 = arith.constant dense<0.000000e+00> : vector<2x64xf32>
    %595 = tpu.matmul %593, %594, %cst_238 {dimension_numbers = #tpu.dot_dimension_numbers<[1], [0], [0], [1], [0, 0, 1, 1], [], []>} : vector<2x128xf32>, vector<128x64xf32>, vector<2x64xf32> -> vector<2x64xf32>
    %c0_239 = arith.constant 0 : index
    %c0_240 = arith.constant 0 : index
    %596 = vector.load %arg24[%c0_239, %c0_240] : memref<1x64xf32, #tpu.memory_space<vmem>>, vector<1x64xf32>
    %597 = vector.broadcast %596 : vector<1x64xf32> to vector<2x64xf32>
    %598 = arith.addf %595, %597 : vector<2x64xf32>
    %cst_241 = arith.constant 0.000000e+00 : f32
    %599 = vector.broadcast %cst_241 : f32 to vector<2x64xf32>
    %600 = arith.maximumf %598, %599 : vector<2x64xf32>
    %c0_242 = arith.constant 0 : index
    %c0_243 = arith.constant 0 : index
    %601 = vector.load %arg25[%c0_242, %c0_243] : memref<64x1xf32, #tpu.memory_space<vmem>>, vector<64x1xf32>
    %cst_244 = arith.constant dense<0.000000e+00> : vector<2x1xf32>
    %602 = tpu.matmul %600, %601, %cst_244 {dimension_numbers = #tpu.dot_dimension_numbers<[1], [0], [0], [1], [0, 0, 1, 1], [], []>} : vector<2x64xf32>, vector<64x1xf32>, vector<2x1xf32> -> vector<2x1xf32>
    %c0_245 = arith.constant 0 : index
    %c0_246 = arith.constant 0 : index
    %603 = vector.load %arg26[%c0_245, %c0_246] : memref<1x1xf32, #tpu.memory_space<vmem>>, vector<1x1xf32>
    %604 = vector.broadcast %603 : vector<1x1xf32> to vector<2x1xf32>
    %605 = arith.addf %602, %604 : vector<2x1xf32>
    %c0_247 = arith.constant 0 : index
    %c0_248 = arith.constant 0 : index
    %606 = vector.load %arg27[%c0_247, %c0_248] : memref<2x1xf32, #tpu.memory_space<vmem>>, vector<2x1xf32>
    tpu.vector_store %arg27[%c0_247, %c0_248], %605 {strides = array<i32>} : memref<2x1xf32, #tpu.memory_space<vmem>>, vector<2x1xf32>,
    return
  }
}

</mosaic_0001>

<bundles_post_ra>
// kernel: tpu_custom_call.1
= control target key start
LH: loop header
LB: loop body
LE: loop exit
PB: predicated region body
PF: predicated region fallthrough
CT: control target
= control target key end

     0   :  { %s19298_s0 = inlined_call_operand.hbm [shape: f32[2,20], index: 0, kind: input, shape index: {}]   ;;  %s19299_s1 = inlined_call_operand.hbm [shape: f32[20,128], index: 1, kind: input, shape index: {}]   ;;  %s19300_s2 = inlined_call_operand.vmem [shape: f32[1,128], index: 2, kind: input, shape index: {}]   ;;  %s19301_s3 = inlined_call_operand.hbm [shape: f32[1,128], index: 3, kind: input, shape index: {}]   ;;  %s19302_s4 = inlined_call_operand.hbm [shape: f32[1,128], index: 4, kind: input, shape index: {}]   ;;  %s19303_s5 = inlined_call_operand.hbm [shape: f32[2,40], index: 5, kind: input, shape index: {}]   ;;  %s19304_s6 = inlined_call_operand.vmem [shape: f32[40,128], index: 6, kind: input, shape index: {}]   ;;  %s19305_s7 = inlined_call_operand.hbm [shape: f32[1,128], index: 7, kind: input, shape index: {}]   ;;  %s19306_s8 = inlined_call_operand.hbm [shape: f32[1,128], index: 8, kind: input, shape index: {}]   ;;  %s19307_s9 = inlined_call_operand.hbm [shape: f32[1,128], index: 9, kind: input, shape index: {}]   ;;  %s19308_s10 = inlined_call_operand.vmem [shape: f32[12,128], index: 10, kind: input, shape index: {}]   ;;  %s19309_s11 = inlined_call_operand.hbm [shape: bf16[2,128,384], index: 11, kind: input, shape index: {}]   ;;  %s19310_s12 = inlined_call_operand.hbm [shape: f32[2,1,384], index: 12, kind: input, shape index: {}]   ;;  %s19311_s13 = inlined_call_operand.vmem [shape: bf16[2,128,128], index: 13, kind: input, shape index: {}]   ;;  %s19312_s14 = inlined_call_operand.hbm [shape: f32[2,1,128], index: 14, kind: input, shape index: {}]   ;;  %s19313_s15 = inlined_call_operand.hbm [shape: f32[2,1,128], index: 15, kind: input, shape index: {}]   ;;  %s19314_s16 = inlined_call_operand.hbm [shape: f32[2,1,128], index: 16, kind: input, shape index: {}]   ;;  %s19315_s17 = inlined_call_operand.hbm [shape: bf16[2,128,2048], index: 17, kind: input, shape index: {}]   ;;  %s19316_s18 = inlined_call_operand.vmem [shape: f32[2,1,2048], index: 18, kind: input, shape index: {}]   ;;  %s19317_s19 = inlined_call_operand.hbm [shape: bf16[2,2048,128], index: 19, kind: input, shape index: {}]   ;;  %s19318_s20 = inlined_call_operand.hbm [shape: f32[2,1,128], index: 20, kind: input, shape index: {}]   ;;  %s19319_s21 = inlined_call_operand.hbm [shape: f32[2,1,128], index: 21, kind: input, shape index: {}]   ;;  %s19320_s22 = inlined_call_operand.hbm [shape: f32[2,1,128], index: 22, kind: input, shape index: {}]   ;;  %s19321_s23 = inlined_call_operand.vmem [shape: f32[128,64], index: 23, kind: input, shape index: {}]   ;;  %s19322_s24 = inlined_call_operand.hbm [shape: f32[1,64], index: 24, kind: input, shape index: {}]   ;;  %s19323_s25 = inlined_call_operand.vmem [shape: f32[64,1], index: 25, kind: input, shape index: {}]   ;;  %s19324_s26 = inlined_call_operand.<no memory space> [shape: f32[1,1], index: 26, kind: input, shape index: {}]   ;;  %s19325_s27 = inlined_call_operand.vmem [shape: f32[2,1], index: 27, kind: output, shape index: {}]  }
   0x1   :  { %19357 = sst [smem:[#allocation54_spill]] %s19298_s0  ;;  %v32_v0 = vstv %s19324_s26 }
   0x2   :  { %19358 = sst [smem:[#allocation55_spill]] %s19299_s1  ;;  %33 = vst [vmem:[#allocation3] sm:$0x1] %v32_v0 }
   0x3   :  { %19359 = sst [smem:[#allocation56_spill]] %s19300_s2 }
   0x4   :  { %19360 = sst [smem:[#allocation57_spill]] %s19301_s3 }
   0x5   :  { %19361 = sst [smem:[#allocation58_spill]] %s19302_s4 }
   0x6   :  { %19362 = sst [smem:[#allocation59_spill]] %s19303_s5 }
   0x7   :  { %19363 = sst [smem:[#allocation60_spill]] %s19304_s6 }
   0x8   :  { %19364 = sst [smem:[#allocation61_spill]] %s19305_s7 }
   0x9   :  { %19365 = sst [smem:[#allocation62_spill]] %s19306_s8 }
   0xa   :  { %19366 = sst [smem:[#allocation63_spill]] %s19307_s9 }
   0xb   :  { %19367 = sst [smem:[#allocation64_spill]] %s19308_s10 }
   0xc   :  { %19368 = sst [smem:[#allocation65_spill]] %s19309_s11 }
   0xd   :  { %19369 = sst [smem:[#allocation66_spill]] %s19321_s23 }
   0xe   :  { %19370 = sst [smem:[#allocation67_spill]] %s19323_s25 }
   0xf   :  { %19371 = sst [smem:[#allocation68_spill]] %s19325_s27 }
  0x10   :  { %34 = vsyncpa [#allocation5], 0 }
  0x11   :  { %35 = vsyncpa [#allocation7], 0 }
  0x12   :  { %36 = vsyncpa [#allocation10], 0 }
  0x13   :  { %37 = vsyncpa [#allocation13], 0 }
  0x14   :  { %38 = vsyncpa [#allocation16], 0 }
  0x15   :  { %39 = vsyncpa [#allocation19], 0 }
  0x16   :  { %40 = vsyncpa [#allocation22], 0 }
  0x17   :  { %41 = vsyncpa [#allocation25], 0 }
  0x18   :  { %42 = vsyncpa [#allocation28], 0  ;;  %s19372_s9 = sld [smem:[#allocation55_spill]] }
  0x1e   :  { %s59_s5 = sshll.u32 %s19372_s9, 4  ;;  %s60_s5 = int_to_ptr.hbm [resolvable:$true] %s59_s5 }
  0x1f   :  { %43 = vsyncpa [#allocation31], 0  ;;  %s14588_s28 = smov [#allocation6]   ;;  %s19373_s29 = sld [smem:[#allocation58_spill]] }
  0x20   :  { %s61_s0 = sshll.u32 %s14588_s28, 4  ;;  %s14589_s6 = smov 128   ;;  %s62_s0 = int_to_ptr.vmem [resolvable:$true] %s61_s0 }
  0x21   :  { %s14590_s11 = smov 8   ;;  %s14591_s2 = smov [#allocation9]  }
  0x22   :  { %67 = dma.hbm_to_vmem [thread:$0]  %s60_s5, 384, %s62_s0, [#allocation7], %s14589_s6, %s14589_s6, %s14590_s11  }
  0x23   :  { %s88_s3 = sshll.u32 %s14591_s2, 4  ;;  %s19374_s27 = sld [smem:[#allocation61_spill]]  ;;  %s89_s3 = int_to_ptr.vmem [resolvable:$true] %s88_s3 }
  0x24   :  { %s19375_s28 = sld [smem:[#allocation63_spill]]  ;;  %s14592_s23 = smov [#allocation12]  }
  0x25   :  { %s86_s1 = sshll.u32 %s19373_s29, 4  ;;  %s112_s26 = sshll.u32 %s14592_s23, 4  ;;  %s87_s1 = int_to_ptr.hbm [resolvable:$true] %s86_s1  ;;  %s113_s26 = int_to_ptr.vmem [resolvable:$true] %s112_s26 }
  0x26   :  { %91 = dma.hbm_to_vmem [thread:$0]  %s87_s1, 16, %s89_s3, [#allocation10]  }
  0x27   :  { %s14593_s5 = smov [#allocation15]   ;;  %s157_s6 = sshll.u32 %s19310_s12, 4  ;;  %s158_s6 = int_to_ptr.hbm [resolvable:$true] %s157_s6 }
  0x28   :  { %s134_s0 = sshll.u32 %s14593_s5, 4  ;;  %s14595_s11 = smov 48   ;;  %s135_s0 = int_to_ptr.vmem [resolvable:$true] %s134_s0 }
  0x29   :  { %s110_s8 = sshll.u32 %s19374_s27, 4  ;;  %s14594_s27 = smov [#allocation18]   ;;  %s111_s8 = int_to_ptr.hbm [resolvable:$true] %s110_s8 }
  0x2a   :  { %s132_s25 = sshll.u32 %s19375_s28, 4  ;;  %s159_s1 = sshll.u32 %s14594_s27, 4  ;;  %s133_s25 = int_to_ptr.hbm [resolvable:$true] %s132_s25  ;;  %s160_s1 = int_to_ptr.vmem [resolvable:$true] %s159_s1 }
  0x2b   :  { %115 = dma.hbm_to_vmem [thread:$0]  %s111_s8, 16, %s113_s26, [#allocation13]  }
  0x2c   :  { %137 = dma.hbm_to_vmem [thread:$0]  %s133_s25, 16, %s135_s0, [#allocation16]  }
  0x2d   :  { %s14596_s2 = smov 3   ;;  %s185_s7 = sshll.u32 %s19313_s15, 4  ;;  %s186_s7 = int_to_ptr.hbm [resolvable:$true] %s185_s7 }
  0x2e   :  { %165 = dma.hbm_to_vmem [thread:$0]  %s158_s6, 96, %s160_s1, [#allocation19], %s14595_s11, %s14595_s11, %s14596_s2  }
  0x2f   :  { %s14597_s4 = smov [#allocation21]   ;;  %s211_s9 = sshll.u32 %s19315_s17, 4  ;;  %s212_s9 = int_to_ptr.hbm [resolvable:$true] %s211_s9 }
  0x30   :  { %s187_s8 = sshll.u32 %s14597_s4, 4  ;;  %s14598_s25 = smov 16   ;;  %s188_s8 = int_to_ptr.vmem [resolvable:$true] %s187_s8 }
  0x31   :  { %s14599_s28 = smov 1   ;;  %s14600_s26 = smov [#allocation24]  }
  0x32   :  { %193 = dma.hbm_to_vmem [thread:$0]  %s186_s7, 32, %s188_s8, [#allocation22], %s14598_s25, %s14598_s25, %s14599_s28  }
  0x33   :  { %s213_s5 = sshll.u32 %s14600_s26, 4  ;;  %s239_s10 = sshll.u32 %s19318_s20, 4  ;;  %s214_s5 = int_to_ptr.vmem [resolvable:$true] %s213_s5  ;;  %s240_s10 = int_to_ptr.hbm [resolvable:$true] %s239_s10 }
  0x34   :  { %s14601_s29 = smov 1024   ;;  %s14602_s6 = smov 64  }
  0x35   :  { %219 = dma.hbm_to_vmem [thread:$0]  %s212_s9, 32768, %s214_s5, [#allocation25], %s14601_s29, %s14601_s29, %s14602_s6  }
  0x36   :  { %s14603_s17 = smov [#allocation27]   ;;  %s265_s23 = sshll.u32 %s19320_s22, 4  ;;  %s266_s23 = int_to_ptr.hbm [resolvable:$true] %s265_s23 }
  0x37   :  { %s241_s27 = sshll.u32 %s14603_s17, 4  ;;  %s19376_s20 = sld [smem:[#allocation54_spill]]  ;;  %s242_s27 = int_to_ptr.vmem [resolvable:$true] %s241_s27 }
  0x38   :  { %247 = dma.hbm_to_vmem [thread:$0]  %s240_s10, 32, %s242_s27, [#allocation28], %s14598_s25, %s14598_s25, %s14599_s28  }
  0x39   :  { %s14604_s8 = smov [#allocation30]   ;;  %s14605_s12 = smov [#allocation4]  }
  0x3a   :  { %s267_s30 = sshll.u32 %s14604_s8, 4  ;;  %s51_s22 = sshll.u32 %s14605_s12, 4  ;;  %s268_s30 = int_to_ptr.vmem [resolvable:$true] %s267_s30  ;;  %s52_s22 = int_to_ptr.vmem [resolvable:$true] %s51_s22 }
  0x3b   :  { %273 = dma.hbm_to_vmem [thread:$0]  %s266_s23, 32, %s268_s30, [#allocation31], %s14598_s25, %s14598_s25, %s14599_s28  }
  0x3c   :  { %s19377_s5 = sld [smem:[#allocation57_spill]]  ;;  %s14606_s27 = smov [#allocation8]  }
  0x3d   :  { %s49_s4 = sshll.u32 %s19376_s20, 4  ;;  %s19378_s29 = sld [smem:[#allocation59_spill]]  ;;  %s50_s4 = int_to_ptr.hbm [resolvable:$true] %s49_s4 }
  0x3e   :  { %54 = dma.hbm_to_vmem [thread:$0]  %s50_s4, 32, %s52_s22, [#allocation5]  }
  0x3f   :  { %s77_s1 = sshll.u32 %s14606_s27, 4  ;;  %s14607_s2 = smov [#allocation11]   ;;  %s78_s1 = int_to_ptr.vmem [resolvable:$true] %s77_s1 }
  0x40   :  { %s99_s23 = sshll.u32 %s14607_s2, 4  ;;  %s19379_s20 = sld [smem:[#allocation62_spill]]  ;;  %s100_s23 = int_to_ptr.vmem [resolvable:$true] %s99_s23 }
  0x41   :  { %s19380_s12 = sld [smem:[#allocation65_spill]]  ;;  %s14608_s9 = smov [#allocation14]  }
  0x42   :  { %s75_s0 = sshll.u32 %s19377_s5, 4  ;;  %s123_s26 = sshll.u32 %s14608_s9, 4  ;;  %s76_s0 = int_to_ptr.hbm [resolvable:$true] %s75_s0  ;;  %s124_s26 = int_to_ptr.vmem [resolvable:$true] %s123_s26 }
  0x43   :  { %s97_s17 = sshll.u32 %s19378_s29, 4  ;;  %s14609_s5 = smov [#allocation17]   ;;  %s98_s17 = int_to_ptr.hbm [resolvable:$true] %s97_s17 }
  0x44   :  { %80 = dma.hbm_to_vmem [thread:$0]  %s76_s0, 16, %s78_s1, [#allocation7]  }
  0x45   :  { %102 = dma.hbm_to_vmem [thread:$0]  %s98_s17, 32, %s100_s23, [#allocation10]  }
  0x46   :  { %s121_s8 = sshll.u32 %s19379_s20, 4  ;;  %s146_s0 = sshll.u32 %s14609_s5, 4  ;;  %s122_s8 = int_to_ptr.hbm [resolvable:$true] %s121_s8  ;;  %s147_s0 = int_to_ptr.vmem [resolvable:$true] %s146_s0 }
  0x47   :  { %s144_s22 = sshll.u32 %s19380_s12, 4  ;;  %s14610_s15 = smov 192   ;;  %s145_s22 = int_to_ptr.hbm [resolvable:$true] %s144_s22 }
  0x48   :  { %126 = dma.hbm_to_vmem [thread:$0]  %s122_s8, 16, %s124_s26, [#allocation13]  }
  0x49   :  { %s14611_s10 = smov 12   ;;  %s172_s1 = sshll.u32 %s19312_s14, 4  ;;  %s173_s1 = int_to_ptr.hbm [resolvable:$true] %s172_s1 }
  0x4a   :  { %152 = dma.hbm_to_vmem [thread:$0]  %s145_s22, 6144, %s147_s0, [#allocation16], %s14610_s15, %s14610_s15, %s14611_s10  }
  0x4b   :  { %s14612_s17 = smov [#allocation20]   ;;  %s198_s7 = sshll.u32 %s19314_s16, 4  ;;  %s199_s7 = int_to_ptr.hbm [resolvable:$true] %s198_s7 }
  0x4c   :  { %s174_s2 = sshll.u32 %s14612_s17, 4  ;;  %s14613_s20 = smov [#allocation23]   ;;  %s175_s2 = int_to_ptr.vmem [resolvable:$true] %s174_s2 }
  0x4d   :  { %180 = dma.hbm_to_vmem [thread:$0]  %s173_s1, 32, %s175_s2, [#allocation19], %s14598_s25, %s14598_s25, %s14599_s28  }
  0x4e   :  { %s200_s8 = sshll.u32 %s14613_s20, 4  ;;  %s226_s12 = sshll.u32 %s19317_s19, 4  ;;  %s201_s8 = int_to_ptr.vmem [resolvable:$true] %s200_s8  ;;  %s227_s12 = int_to_ptr.hbm [resolvable:$true] %s226_s12 }
  0x4f   :  { %206 = dma.hbm_to_vmem [thread:$0]  %s199_s7, 32, %s201_s8, [#allocation22], %s14598_s25, %s14598_s25, %s14599_s28  }
  0x50   :  { %s14614_s14 = smov [#allocation26]   ;;  %s252_s26 = sshll.u32 %s19319_s21, 4  ;;  %s253_s26 = int_to_ptr.hbm [resolvable:$true] %s252_s26 }
  0x51   :  { %s228_s22 = sshll.u32 %s14614_s14, 4  ;;  %s14615_s5 = smov 4   ;;  %s229_s22 = int_to_ptr.vmem [resolvable:$true] %s228_s22 }
  0x52   :  { %234 = dma.hbm_to_vmem [thread:$0]  %s227_s12, 32768, %s229_s22, [#allocation25], %s14602_s6, %s14602_s6, %s14615_s5  }
  0x53   :  { %s281_s15 = sshll.u32 %s19322_s24, 4  ;;  %s14616_s10 = smov [#allocation29]   ;;  %s282_s15 = int_to_ptr.hbm [resolvable:$true] %s281_s15 }
  0x54   :  { %s254_s29 = sshll.u32 %s14616_s10, 4  ;;  %s14617_s27 = smov [#allocation32]   ;;  %s255_s29 = int_to_ptr.vmem [resolvable:$true] %s254_s29 }
  0x55   :  { %260 = dma.hbm_to_vmem [thread:$0]  %s253_s26, 32, %s255_s29, [#allocation28], %s14598_s25, %s14598_s25, %s14599_s28  }
  0x56   :  { %s283_s21 = sshll.u32 %s14617_s27, 4  ;;  %s284_s21 = int_to_ptr.vmem [resolvable:$true] %s283_s21 }
  0x57   :  { %286 = dma.hbm_to_vmem [thread:$0]  %s282_s15, 16, %s284_s21, [#allocation31]  }
  0x58   :  { %14568 = dma.done.wait [#allocation5], 32  }
  0x59   :  { %14569 = vsyncadd [#allocation5], 4294967264 }
  0x5a   :  { %14570 = dma.done.wait [#allocation7], 400  }
  0x5b   :  { %14571 = vsyncadd [#allocation7], 4294966896 }
  0x5c   :  { %14572 = dma.done.wait [#allocation10], 48  }
  0x5d   :  { %14573 = vsyncadd [#allocation10], 4294967248 }
  0x5e   :  { %14574 = dma.done.wait [#allocation13], 32  }
  0x5f   :  { %14575 = vsyncadd [#allocation13], 4294967264 }
  0x60   :  { %14576 = dma.done.wait [#allocation16], 6160  }
  0x61   :  { %14577 = vsyncadd [#allocation16], 4294961136 }
  0x62   :  { %14578 = dma.done.wait [#allocation19], 128  }
  0x63   :  { %14579 = vsyncadd [#allocation19], 4294967168 }
  0x64   :  { %14580 = dma.done.wait [#allocation22], 64  }
  0x65   :  { %14581 = vsyncadd [#allocation22], 4294967232 }
  0x66   :  { %14582 = dma.done.wait [#allocation25], 65536  }
  0x67   :  { %14583 = vsyncadd [#allocation25], 4294901760 }
  0x68   :  { %14584 = dma.done.wait [#allocation28], 64  }
  0x69   :  { %14585 = vsyncadd [#allocation28], 4294967232 }
  0x6a   :  { %14586 = dma.done.wait [#allocation31], 48  }
  0x6b   :  { %14587 = vsyncadd [#allocation31], 4294967248  ;;  %vm379_vm0 = vcmask 1043456   ;;  %v370_v1 = vld [vmem:[#allocation6 + $0x10] sm:$0xf]  ;;  %s19381_s1 = sld [smem:[#allocation60_spill]] }
  0x6c   :  { %v369_v3 = vld [vmem:[#allocation6 + $0x8] sm:$0xff]  ;;  %10574 = vmatpush.msk.msra.mxu0 %vm379_vm0, %v370_v1  ;;  %v368_v5 = vld [vmem:[#allocation6] sm:$0xff]  ;;  %v367_v7 = vld [vmem:[#allocation4] sm:$0x3]  ;;  %vm375_vm1 = vcmask 162816   ;;  %vm454_vm2 = vcmask 326656  }
  0x6d   :  { %v444_v10 = vld [vmem:[#allocation11] sm:$0x3]  ;;  %s19382_s14 = sld [smem:[#allocation56_spill]]  ;;  %vm405_vm3 = vcmask 1041408   ;;  %v13813_v15 = vld [vmem:[#allocation12] ss:$0 sm:$0xff] }
  0x6e   :  { %397 = vmatpush.msra.mxu0 %v369_v3  ;;  %v14618_v19 = vmov 128.0   ;;  %v10663_v36 = vld [vmem:[#allocation17 + $0xa8] sm:$0xf]  ;;  %v13082_v37 = vld [vmem:[#allocation17 + $0xb0] sm:$0xf0]  ;;  %s19384_s9 = sld [smem:[#allocation64_spill]] }
  0x6f   :  { %13832 = vrcp.f32 %v14618_v19  ;;  %v13081_v38 = vld [vmem:[#allocation17 + $0xac] sm:$0xf]  ;;  %v10664_v39 = vor.u32 %v13082_v37, %v10663_v36  ;;  %v10665_v40 = vld [vmem:[#allocation17 + $0xb4] sm:$0xf0]  ;;  %v10671_v41 = vld [vmem:[#allocation17 + $0xb0] sm:$0xf] }
  0x70   :  { %398 = vmatpush.msra.mxu0 %v368_v5  ;;  %v13083_v42 = vld [vmem:[#allocation17 + $0xb8] sm:$0xf0]  ;;  %v10668_v43 = vor.u32 %v13081_v38, %v10665_v40  ;;  %v10651_v45 = vld [vmem:[#allocation17 + $0x90] sm:$0xf]  ;;  %v13078_v47 = vld [vmem:[#allocation17 + $0x94] sm:$0xf] }
  0x71   :  { %v449_v2 = vld [vmem:[%s19381_s1 + $0x20] sm:$0xff]  ;;  %v448_v4 = vld [vmem:[%s19381_s1 + $0x18] sm:$0xff]  ;;  %v447_v6 = vld [vmem:[%s19381_s1 + $0x10] sm:$0xff]  ;;  %10575 = vmatmul.msk.f32.vlgmr.msra.gmra.mxu0 %vm375_vm1, %v367_v7  ;;  %v10672_v44 = vor.u32 %v13083_v42, %v10671_v41  ;;  %733 = vmatpush.bf16.msra.mxu2 %v10664_v39  ;;  %s14619_s0 = smov 112   ;;  %vm775_vm11 = vcmask 130048   ;;  %s14620_s19 = smov 80  }
  0x72   :  { %469 = vmatpush.msra.mxu3 %v449_v2  ;;  %v446_v8 = vld [vmem:[%s19381_s1 + $0x8] sm:$0xff]  ;;  %v445_v9 = vld [vmem:[%s19381_s1] sm:$0xff]  ;;  %v13079_v46 = vld [vmem:[#allocation17 + $0x98] sm:$0xf0]  ;;  %s14621_s15 = smov 96   ;;  %s14623_s10 = smov 32  }
  0x73   :  { %v13812_v11 = vld [vmem:[%s19382_s14] ss:$0 sm:$0xff]  ;;  %761 = vmatpush.bf16.msrb.mxu0 %v10672_v44  ;;  %v10652_v48 = vor.u32 %v13079_v46, %v10651_v45  ;;  %v10653_v49 = vld [vmem:[#allocation17 + $0x9c] sm:$0xf0]  ;;  %v10659_v50 = vld [vmem:[#allocation17 + $0x98] sm:$0xf] }
  0x74   :  { %470 = vmatpush.msra.mxu3 %v448_v4  ;;  %v13080_v51 = vld [vmem:[#allocation17 + $0xa0] sm:$0xf0]  ;;  %v10656_v52 = vor.u32 %v13078_v47, %v10653_v49  ;;  %v10639_v54 = vld [vmem:[#allocation17 + $0x78] sm:$0xf]  ;;  %v13075_v56 = vld [vmem:[#allocation17 + $0x7c] sm:$0xf] }
  0x75   :  { %v13833_v20 = vpop.eup %13832  ;;  %v10660_v53 = vor.u32 %v13080_v51, %v10659_v50  ;;  %734 = vmatpush.bf16.msra.mxu2 %v10652_v48  ;;  %v13076_v55 = vld [vmem:[#allocation17 + $0x80] sm:$0xf0]  ;;  %v10641_v58 = vld [vmem:[#allocation17 + $0x84] sm:$0xf0]  ;;  %v10647_v59 = vld [vmem:[#allocation17 + $0x80] sm:$0xf] }
  0x76   :  { %471 = vmatpush.msra.mxu3 %v447_v6  ;;  %v410_v21 = vmul.f32 128.0, %v13833_v20  ;;  %vm414_vm4 = vweird.f32 %v13833_v20  ;;  %v10640_v57 = vor.u32 %v13076_v55, %v10639_v54  ;;  %v13077_v60 = vld [vmem:[#allocation17 + $0x88] sm:$0xf0]  ;;  %v10644_v61 = vor.u32 %v13075_v56, %v10641_v58  ;;  %v10627_v63 = vld [vmem:[#allocation17 + $0x60] sm:$0xf]  ;;  %s19610_s12 = sld [smem:[#allocation66_spill]] }
  0x77   :  { %762 = vmatpush.bf16.msrb.mxu0 %v10660_v53  ;;  %v10648_v62 = vor.u32 %v13077_v60, %v10647_v59  ;;  %v13073_v0 = vld [vmem:[#allocation17 + $0x68] sm:$0xf0]  ;;  %v13072_v1 = vld [vmem:[#allocation17 + $0x64] sm:$0xf]  ;;  %v10629_v3 = vld [vmem:[#allocation17 + $0x6c] sm:$0xf0] }
  0x78   :  { %472 = vmatpush.msra.mxu3 %v446_v8  ;;  %v411_v22 = vsub.f32 1.0, %v410_v21  ;;  %v10628_v2 = vor.u32 %v13073_v0, %v10627_v63  ;;  %v10635_v4 = vld [vmem:[#allocation17 + $0x68] sm:$0xf]  ;;  %v13074_v5 = vld [vmem:[#allocation17 + $0x70] sm:$0xf0]  ;;  %v10632_v6 = vor.u32 %v13072_v1, %v10629_v3  ;;  %vm1626_vm14 = vcmask 261120  }
  0x79   :  { %735 = vmatpush.bf16.msra.mxu2 %v10640_v57  ;;  %v10636_v7 = vor.u32 %v13074_v5, %v10635_v4  ;;  %v13067_v21 = vld [vmem:[#allocation17 + $0x38] sm:$0xf0]  ;;  %v514_v36 = vld [vmem:[%s19384_s9 + $0x8] sm:$0xf]  ;;  %v10593_v39 = vld [vmem:[#allocation17 + $0x24] sm:$0xf0] }
  0x7a   :  { %473 = vmatpush.msra.mxu3 %v445_v9  ;;  %v412_v23 = vmul.f32 %v13833_v20, %v411_v22  ;;  %v13066_v22 = vld [vmem:[#allocation17 + $0x34] sm:$0xf]  ;;  %v10599_v40 = vld [vmem:[#allocation17 + $0x20] sm:$0xf]  ;;  %v13065_v41 = vld [vmem:[#allocation17 + $0x28] sm:$0xf0] }
  0x7b   :  { %10576 = vmatmul.msk.f32.vlgmr.msra.gmra.mxu3 %vm454_vm2, %v444_v10  ;;  %763 = vmatpush.bf16.msrb.mxu0 %v10648_v62  ;;  %v10615_v10 = vld [vmem:[#allocation17 + $0x48] sm:$0xf]  ;;  %v10600_v45 = vor.u32 %v13065_v41, %v10599_v40  ;;  %v10579_v46 = vld [vmem:[#allocation17] sm:$0xf]  ;;  %v13061_v47 = vld [vmem:[#allocation17 + $0x8] sm:$0xf0] }
  0x7c   :  { %v413_v24 = vadd.f32 %v13833_v20, %v412_v23  ;;  %747 = vmatpush.bf16.msrb.mxu3 %v10668_v43  ;;  %v13060_v48 = vld [vmem:[#allocation17 + $0x4] sm:$0xf]  ;;  %v10580_v50 = vor.u32 %v13061_v47, %v10579_v46  ;;  %v10581_v51 = vld [vmem:[#allocation17 + $0xc] sm:$0xf0]  ;;  %v13062_v53 = vld [vmem:[#allocation17 + $0x10] sm:$0xf0] }
  0x7d   :  { %736 = vmatpush.bf16.msra.mxu2 %v10628_v2  ;;  %v10584_v55 = vor.u32 %v13060_v48, %v10581_v51  ;;  %516 = vst [vmem:[#allocation2 + $0xc] sm:$0xf] %v514_v36  ;;  %v13814_v62 = vld [vmem:[#allocation8] ss:$0 sm:$0xff]  ;;  %v13815_v1 = vld [vmem:[#allocation9] ss:$0 sm:$0xff] }
  0x7e   :  { %v14867_v25 = vsel %vm414_vm4, %v13833_v20, %v413_v24  ;;  %v10603_v20 = vld [vmem:[#allocation17 + $0x30] sm:$0xf]  ;;  %v10605_v24 = vld [vmem:[#allocation17 + $0x3c] sm:$0xf0]  ;;  %vm1629_vm15 = vcmask 392192   ;;  %vm1632_vm0 = vcmask 523264  }
  0x7f   :  { %19383 = vst [vmem:[#allocation43_spill] sm:$0xff] %v14867_v25  ;;  %764 = vmatpush.bf16.msrb.mxu0 %v10636_v7  ;;  %v10604_v23 = vor.u32 %v13067_v21, %v10603_v20  ;;  %v597_v20 = vld [vmem:[#allocation18] sm:$0x7]  ;;  %vm1635_vm1 = vcmask 654336   ;;  %vm1638_vm2 = vcmask 785408   ;;  %s19612_s16 = sld [smem:[#allocation67_spill]] }
  0x80   :  { %748 = vmatpush.bf16.msrb.mxu3 %v10656_v52  ;;  %v10587_v52 = vld [vmem:[#allocation17 + $0x8] sm:$0xf]  ;;  %v599_v21 = vperm.slane %v597_v20, 0  ;;  %s19613_s1 = sld [smem:[#allocation68_spill]] }
  0x81   :  { %v10588_v56 = vor.u32 %v13062_v53, %v10587_v52  ;;  %v14622_v53 = vmov -1e+30  }
  0x84   :  { %749 = vmatpush.bf16.msrb.mxu3 %v10644_v61 }
  0x88   :  { %750 = vmatpush.bf16.msrb.mxu3 %v10632_v6 }
  0xee   :  { %v400_v12 = vpop.f32.mrf.mxu0 }
  0xef   :  { %v401_v13 = vadd.f32 %v13812_v11, %v400_v12  ;;  %v13070_v11 = vld [vmem:[#allocation17 + $0x50] sm:$0xf0]  ;;  %v13069_v12 = vld [vmem:[#allocation17 + $0x4c] sm:$0xf] }
  0xf1   :  { %v406_v14 = vsel %vm405_vm3, %v401_v13, 0.0 }
  0xf2   :  { %407 = vadd.xlane.f32.xlu0 %v406_v14  ;;  %v10617_v14 = vld [vmem:[#allocation17 + $0x54] sm:$0xf0] }
  0xfe   :  { %v475_v16 = vpop.f32.mrf.mxu3 }
  0xff   :  { %v476_v17 = vadd.f32 %v13813_v15, %v475_v16  ;;  %v10623_v15 = vld [vmem:[#allocation17 + $0x50] sm:$0xf]  ;;  %v13071_v16 = vld [vmem:[#allocation17 + $0x58] sm:$0xf0] }
 0x100   :  { %v10624_v19 = vor.u32 %v13071_v16, %v10623_v15 }
 0x101   :  { %v480_v18 = vsel %vm405_vm3, %v476_v17, 0.0 }
 0x102   :  { %481 = vadd.xlane.f32.xlu0 %v480_v18  ;;  %v10620_v18 = vor.u32 %v13069_v12, %v10617_v14  ;;  %765 = vmatpush.bf16.msrb.mxu0 %v10624_v19  ;;  %v13817_v12 = vld [vmem:[#allocation15] ss:$0 sm:$0xff] }
 0x104   :  { %751 = vmatpush.bf16.msrb.mxu3 %v10620_v18 }
 0x165   :  { %v408_v26 = vpop.xlane.xlu0 %407 }
 0x166   :  { %v416_v27 = vmul.f32 %v14867_v25, %v408_v26  ;;  %v10611_v26 = vld [vmem:[#allocation17 + $0x38] sm:$0xf] }
 0x168   :  { %v14870_v28 = vsub.f32 %v401_v13, %v416_v27  ;;  %v10616_v13 = vor.u32 %v13070_v11, %v10615_v10  ;;  %v13068_v27 = vld [vmem:[#allocation17 + $0x40] sm:$0xf0]  ;;  %v13816_v10 = vld [vmem:[#allocation14] ss:$0 sm:$0xff] }
 0x16a   :  { %v418_v29 = vmul.f32 %v14870_v28, %v14870_v28  ;;  %737 = vmatpush.bf16.msra.mxu2 %v10616_v13 }
 0x16c   :  { %v419_v30 = vsel %vm405_vm3, %v418_v29, 0.0  ;;  %v10608_v29 = vor.u32 %v13066_v22, %v10605_v24  ;;  %v600_v22 = vperm.slane %v597_v20, 1 }
 0x16d   :  { %420 = vadd.xlane.f32.xlu1 %v419_v30  ;;  %v10612_v30 = vor.u32 %v13068_v27, %v10611_v26 }
 0x16e   :  { %738 = vmatpush.bf16.msra.mxu2 %v10604_v23  ;;  %752 = vmatpush.bf16.msrb.mxu3 %v10608_v29  ;;  %v601_v23 = vperm.slane %v597_v20, 2 }
 0x16f   :  { %766 = vmatpush.bf16.msrb.mxu0 %v10612_v30 }
 0x173   :  { %767 = vmatpush.bf16.msrb.mxu0 %v10600_v45 }
 0x175   :  { %v482_v31 = vpop.xlane.xlu0 %481 }
 0x176   :  { %v483_v32 = vmul.f32 %v482_v31, %v14867_v25  ;;  %v513_v31 = vld [vmem:[%s19384_s9] sm:$0xff] }
 0x177   :  { %515 = vst [vmem:[#allocation2 + $0x4] sm:$0xff] %v513_v31  ;;  %768 = vmatpush.bf16.msrb.mxu0 %v10588_v56 }
 0x178   :  { %v14876_v33 = vsub.f32 %v476_v17, %v483_v32  ;;  %v10591_v32 = vld [vmem:[#allocation17 + $0x18] sm:$0xf] }
 0x17a   :  { %v485_v34 = vmul.f32 %v14876_v33, %v14876_v33 }
 0x17c   :  { %v486_v35 = vsel %vm405_vm3, %v485_v34, 0.0  ;;  %v13064_v34 = vld [vmem:[#allocation17 + $0x20] sm:$0xf0]  ;;  %vm1641_vm3 = vcmask 916480  }
 0x17d   :  { %487 = vadd.xlane.f32.xlu1 %v486_v35  ;;  %v13063_v35 = vld [vmem:[#allocation17 + $0x1c] sm:$0xf]  ;;  %v10592_v38 = vor.u32 %v13064_v34, %v10591_v32 }
 0x17e   :  { %v10596_v44 = vor.u32 %v13063_v35, %v10593_v39 }
 0x17f   :  { %739 = vmatpush.bf16.msra.mxu2 %v10592_v38 }
 0x180   :  { %753 = vmatpush.bf16.msrb.mxu3 %v10596_v44  ;;  %v519_v44 = vlaneseq }
 0x182   :  { %v520_v46 = vshrl.u32 %v519_v44, 7  ;;  %v547_v47 = vand.u32 127, %v519_v44 }
 0x183   :  { %740 = vmatpush.bf16.msra.mxu2 %v10580_v50 }
 0x184   :  { %754 = vmatpush.bf16.msrb.mxu3 %v10584_v55  ;;  %v552_v50 = vand.u32 1, %v547_v47  ;;  %v521_v51 = vadd.s32 8, %v520_v46 }
 0x186   :  { %v533_v56 = vand.u32 1, %v521_v51 }
 0x188   :  { %vm561_vm13 = vcmp.eq.s32.totalorder %v533_v56, %v552_v50 }
 0x1e0   :  { %v421_v8 = vpop.xlane.xlu1 %420 }
 0x1e1   :  { %v422_v9 = vmul.f32 %v421_v8, %v14867_v25 }
 0x1e3   :  { %v423_v17 = vadd.f32 1e-05, %v422_v9 }
 0x1e5   :  { %13834 = vrsqrt.f32 %v423_v17  ;;  %vm430_vm6 = vweird.f32 %v423_v17 }
 0x1eb   :  { %v13835_v42 = vpop.eup %13834 }
 0x1ec   :  { %v425_v49 = vmul.f32 %v13835_v42, %v423_v17  ;;  %vm431_vm5 = vweird.f32 %v13835_v42 }
 0x1ed   :  { %vm432_vm7 = vmor %vm430_vm6, %vm431_vm5 }
 0x1ee   :  { %v426_v57 = vmul.f32 %v13835_v42, %v425_v49  ;;  %v526_v49 = vand.u32 1, %v520_v46 }
 0x1f0   :  { %v488_v37 = vpop.xlane.xlu1 %487  ;;  %v427_v58 = vmul.f32 0.5, %v426_v57  ;;  %vm560_vm12 = vcmp.eq.s32.totalorder %v526_v49, %v552_v50 }
 0x1f1   :  { %v489_v43 = vmul.f32 %v488_v37, %v14867_v25 }
 0x1f2   :  { %v428_v59 = vsub.f32 1.5, %v427_v58 }
 0x1f3   :  { %v490_v54 = vadd.f32 1e-05, %v489_v43 }
 0x1f4   :  { %v429_v60 = vmul.f32 %v13835_v42, %v428_v59 }
 0x1f5   :  { %13836 = vrsqrt.f32 %v490_v54  ;;  %vm497_vm9 = vweird.f32 %v490_v54 }
 0x1f6   :  { %v433_v63 = vsel %vm432_vm7, %v13835_v42, %v429_v60  ;;  %v14947_v60 = vsel %vm561_vm13, 0.0, %v14622_v53 }
 0x1f7   :  { %v434_v2 = vmul.f32 %v433_v63, %v14870_v28  ;;  %v518_v28 = vld [vmem:[#allocation2 + $0x8] sm:$0xff]  ;;  %19386 = vst [vmem:[#allocation45_spill] sm:$0xff] %v14947_v60 }
 0x1f9   :  { %v438_v4 = vmul.f32 %v13814_v62, %v434_v2 }
 0x1fb   :  { %v13837_v61 = vpop.eup %13836  ;;  %v442_v6 = vadd.f32 %v13815_v1, %v438_v4 }
 0x1fc   :  { %v492_v0 = vmul.f32 %v13837_v61, %v490_v54  ;;  %vm498_vm8 = vweird.f32 %v13837_v61  ;;  %v14942_v54 = vsel %vm560_vm12, 0.0, %v14622_v53 }
 0x1fd   :  { %v443_v8 = vmax.f32 %v442_v6, 0.0  ;;  %vm499_vm10 = vmor %vm497_vm9, %vm498_vm8  ;;  %19385 = vst [vmem:[#allocation44_spill] sm:$0xff] %v14942_v54 }
 0x1fe   :  { %v493_v3 = vmul.f32 %v13837_v61, %v492_v0 }
 0x1ff   :  { %511 = vst [vmem:[#allocation2] sm:$0x3] %v443_v8 }
 0x200   :  { %v494_v5 = vmul.f32 0.5, %v493_v3 }
 0x202   :  { %v495_v7 = vsub.f32 1.5, %v494_v5 }
 0x204   :  { %v496_v9 = vmul.f32 %v13837_v61, %v495_v7 }
 0x206   :  { %v500_v11 = vsel %vm499_vm10, %v13837_v61, %v496_v9 }
 0x207   :  { %v501_v13 = vmul.f32 %v500_v11, %v14876_v33 }
 0x209   :  { %v505_v14 = vmul.f32 %v13816_v10, %v501_v13 }
 0x20b   :  { %v509_v15 = vadd.f32 %v13817_v12, %v505_v14 }
 0x20d   :  { %v510_v16 = vmax.f32 %v509_v15, 0.0 }
 0x20f   :  { %512 = vst [vmem:[#allocation2 + $0x2] sm:$0x3] %v510_v16 }
 0x216   :  { %v517_v17 = vld [vmem:[#allocation2] sm:$0xff] }
 0x217   :  { %v564_v18 = vpack.c.bf16 %v518_v28, %v517_v17 }
 0x219   :  { %741 = vmatmul.bf16.vlgmr.msra.gmra.mxu2 %v564_v18  ;;  %755 = vmatmul.bf16.vlgmr.msrb.gmra.mxu3 %v564_v18 }
 0x21a   :  { %769 = vmatmul.bf16.vlgmr.msrb.gmra.mxu0 %v564_v18 }
 0x297   :  { %v770_v19 = vpop.f32.mrf.mxu0 }
 0x298   :  { %v771_v30 = vadd.f32 %v770_v19, %v601_v23 }
 0x29c   :  { %v742_v24 = vpop.f32.mrf.mxu2  ;;  %v756_v26 = vpop.f32.mrf.mxu3 }
 0x29d   :  { %v14891_v27 = vadd.f32 %v742_v24, %v599_v21  ;;  %v14893_v33 = vadd.f32 %v756_v26, %v600_v22 }
 0x29f   :  { %v772_v29 = vpop.f32.mrf.mxu0  ;;  %870 = vrot.lane.b32.xlu1 %v14893_v33, %s14619_s0  ;;  %866 = vrot.lane.b32.xlu2 %v14891_v27, %s14619_s0 }
 0x2a0   :  { %v773_v31 = vadd.f32 %v772_v29, %v601_v23 }
 0x2a2   :  { %v14899_v32 = vpack.i.bf16 %v771_v30, %v773_v31 }
 0x2a4   :  { %v758_v34 = vpop.f32.mrf.mxu3  ;;  %v744_v36 = vpop.f32.mrf.mxu2 }
 0x2a5   :  { %v14901_v35 = vadd.f32 %v758_v34, %v600_v22  ;;  %v14921_v37 = vadd.f32 %v744_v36, %v599_v21 }
 0x2a7   :  { %872 = vrot.lane.b32.xlu0 %v14901_v35, %s14619_s0  ;;  %10673 = vmatpush.xpose.msk.msra.mxu1 %vm775_vm11, %v14901_v35 }
 0x2a8   :  { %1274 = vrot.lane.b32.xlu1 %v14901_v35, %s14595_s11  ;;  %1072 = vrot.lane.b32.xlu2 %v14893_v33, %s14620_s19 }
 0x2ab   :  { %10674 = vmatpush.xpose.msk.msra.mxu1 %vm775_vm11, %v14893_v33 }
 0x2ae   :  { %10675 = vmatmul.msk.f32.vlgmr.msra.gmra.mxu1 %vm775_vm11, %v14891_v27 }
 0x2af   :  { %857 = vmatpush.msrb.mxu1 %v773_v31  ;;  %972 = vrot.lane.b32.xlu0 %v14893_v33, %s14621_s15 }
 0x2b0   :  { %1172 = vrot.lane.b32.xlu1 %v14893_v33, %s14602_s6  ;;  %1068 = vrot.lane.b32.xlu2 %v14891_v27, %s14620_s19 }
 0x2b1   :  { %858 = vmatpush.msrb.mxu1 %v771_v30 }
 0x2b6   :  { %10676 = vmatmul.msk.f32.gmra.mxu1 %vm775_vm11, %v14921_v37 }
 0x2b7   :  { %1268 = vrot.lane.b32.xlu0 %v14891_v27, %s14595_s11 }
 0x2b8   :  { %1168 = vrot.lane.b32.xlu1 %v14891_v27, %s14602_s6  ;;  %868 = vrot.lane.b32.xlu2 %v14921_v37, %s14619_s0 }
 0x2bf   :  { %1174 = vrot.lane.b32.xlu0 %v14901_v35, %s14602_s6 }
 0x2c0   :  { %1074 = vrot.lane.b32.xlu2 %v14901_v35, %s14620_s19 }
 0x2f9   :  { %v867_v38 = vpop.permute.xlu2 %866 }
 0x302   :  { %v1073_v39 = vpop.permute.xlu2 %1072 }
 0x30a   :  { %v1069_v40 = vpop.permute.xlu2 %1068 }
 0x311   :  { %v871_v42 = vpop.permute.xlu1 %870 }
 0x312   :  { %v869_v41 = vpop.permute.xlu2 %868 }
 0x319   :  { %v873_v43 = vpop.permute.xlu0 %872 }
 0x31a   :  { %10679 = vmatpush.xpose.msk.msrb.mxu2 %vm775_vm11, %v873_v43  ;;  %v1075_v45 = vpop.permute.xlu2 %1074  ;;  %v1275_v48 = vpop.permute.xlu1 %1274 }
 0x31e   :  { %10680 = vmatpush.xpose.msk.msrb.mxu2 %vm775_vm11, %v871_v42 }
 0x321   :  { %10681 = vmatmul.msk.f32.vlgmr.msrb.gmra.mxu2 %vm775_vm11, %v867_v38  ;;  %v973_v14 = vpop.permute.xlu0 %972 }
 0x322   :  { %10691 = vmatpush.xpose.msk.msra.mxu2 %vm775_vm11, %v1075_v45  ;;  %v1173_v31 = vpop.permute.xlu1 %1172 }
 0x326   :  { %10692 = vmatpush.xpose.msk.msra.mxu2 %vm775_vm11, %v1073_v39 }
 0x329   :  { %10682 = vmatmul.msk.f32.gmra.mxu2 %vm775_vm11, %v869_v41  ;;  %v1269_v19 = vpop.permute.xlu0 %1268 }
 0x32a   :  { %10703 = vmatpush.xpose.msk.msrb.mxu2 %vm775_vm11, %v1275_v48  ;;  %v1169_v36 = vpop.permute.xlu1 %1168 }
 0x32b   :  { %v805_v52 = vpop.f32.mrf.mxu1 }
 0x32c   :  { %v811_v55 = vmul.f32 0.25, %v805_v52 }
 0x32e   :  { %v813_v57 = vadd.f32 %v811_v55, %v14942_v54 }
 0x330   :  { %v815_v58 = vsel %vm775_vm11, %v813_v57, -inf }
 0x331   :  { %10693 = vmatmul.msk.f32.vlgmr.msra.gmra.mxu2 %vm775_vm11, %v1069_v40  ;;  %816 = vmax.xlane.f32.xlu2 %v815_v58 }
 0x333   :  { %v808_v59 = vpop.f32.mrf.mxu1 }
 0x334   :  { %v812_v61 = vmul.f32 0.25, %v808_v59 }
 0x336   :  { %v814_v62 = vadd.f32 %v812_v61, %v14947_v60 }
 0x338   :  { %v818_v63 = vsel %vm775_vm11, %v814_v62, -inf }
 0x339   :  { %819 = vmax.xlane.f32.xlu2 %v818_v63 }
 0x351   :  { %974 = vrot.lane.b32.xlu2 %v14901_v35, %s14621_s15 }
 0x359   :  { %1070 = vrot.lane.b32.xlu2 %v14921_v37, %s14620_s19 }
 0x361   :  { %968 = vrot.lane.b32.xlu2 %v14891_v27, %s14621_s15 }
 0x369   :  { %1272 = vrot.lane.b32.xlu2 %v14893_v33, %s14595_s11 }
 0x371   :  { %970 = vrot.lane.b32.xlu2 %v14921_v37, %s14621_s15 }
 0x379   :  { %1270 = vrot.lane.b32.xlu2 %v14921_v37, %s14595_s11 }
 0x381   :  { %1472 = vrot.lane.b32.xlu2 %v14893_v33, %s14598_s25 }
 0x389   :  { %1374 = vrot.lane.b32.xlu2 %v14901_v35, %s14623_s10 }
 0x391   :  { %1368 = vrot.lane.b32.xlu2 %v14891_v27, %s14623_s10 }
 0x3a4   :  { %v899_v0 = vpop.f32.mrf.mxu2  ;;  %v817_v1 = vpop.xlane.xlu2 %816 }
 0x3a5   :  { %v821_v2 = vsub.f32 %v813_v57, %v817_v1  ;;  %v905_v22 = vmul.f32 0.25, %v899_v0 }
 0x3a7   :  { %v823_v3 = vmul.f32 1.442695, %v821_v2  ;;  %v14999_v23 = vadd.f32 %v905_v22, %v14942_v54 }
 0x3a9   :  { %13838 = vpow2.f32 %v823_v3  ;;  %v909_v26 = vsel %vm775_vm11, %v14999_v23, -inf }
 0x3ac   :  { %v820_v4 = vpop.xlane.xlu2 %819  ;;  %v902_v6 = vpop.f32.mrf.mxu2 }
 0x3ad   :  { %v822_v5 = vsub.f32 %v814_v62, %v820_v4  ;;  %v906_v10 = vmul.f32 0.25, %v902_v6 }
 0x3af   :  { %v13839_v7 = vpop.eup %13838  ;;  %v825_v8 = vmul.f32 1.442695, %v822_v5  ;;  %v14972_v12 = vadd.f32 %v906_v10, %v14947_v60 }
 0x3b0   :  { %v827_v9 = vsel %vm775_vm11, %v13839_v7, 0.0 }
 0x3b1   :  { %13840 = vpow2.f32 %v825_v8  ;;  %828 = vadd.xlane.f32.xlu0 %v827_v9  ;;  %v912_v16 = vsel %vm775_vm11, %v14972_v12, -inf }
 0x3b4   :  { %v975_v11 = vpop.permute.xlu2 %974  ;;  %v1101_v24 = vpop.f32.mrf.mxu2 }
 0x3b5   :  { %10685 = vmatpush.xpose.msk.msra.mxu1 %vm775_vm11, %v975_v11 }
 0x3b7   :  { %v13841_v13 = vpop.eup %13840 }
 0x3b8   :  { %v830_v15 = vsel %vm775_vm11, %v13841_v13, 0.0 }
 0x3b9   :  { %831 = vadd.xlane.f32.xlu1 %v830_v15  ;;  %10686 = vmatpush.xpose.msk.msra.mxu1 %vm775_vm11, %v973_v14 }
 0x3ba   :  { %913 = vmax.xlane.f32.xlu2 %v912_v16 }
 0x3bc   :  { %v1071_v28 = vpop.permute.xlu2 %1070 }
 0x3bd   :  { %10694 = vmatmul.msk.f32.gmra.mxu2 %vm775_vm11, %v1071_v28 }
 0x3c4   :  { %v969_v17 = vpop.permute.xlu2 %968 }
 0x3c5   :  { %1474 = vrot.lane.b32.xlu0 %v14901_v35, %s14598_s25  ;;  %v1175_v35 = vpop.permute.xlu0 %1174 }
 0x3cc   :  { %v1273_v18 = vpop.permute.xlu2 %1272 }
 0x3cd   :  { %1468 = vrot.lane.b32.xlu0 %v14891_v27, %s14598_s25  ;;  %10704 = vmatpush.xpose.msk.msrb.mxu2 %vm775_vm11, %v1273_v18  ;;  %v1107_v27 = vmul.f32 0.25, %v1101_v24 }
 0x3d0   :  { %10705 = vmatmul.msk.f32.vlgmr.msrb.gmra.mxu2 %vm775_vm11, %v1269_v19 }
 0x3d2   :  { %13683 = vrot.lane.b32.xlu2 %v14899_v32, %s14621_s15  ;;  %1170 = vrot.lane.b32.xlu1 %v14921_v37, %s14602_s6 }
 0x3d4   :  { %v971_v20 = vpop.permute.xlu2 %970 }
 0x3d5   :  { %1372 = vrot.lane.b32.xlu0 %v14893_v33, %s14623_s10  ;;  %v15004_v33 = vadd.f32 %v1107_v27, %v14942_v54 }
 0x3d7   :  { %v1111_v29 = vsel %vm775_vm11, %v15004_v33, -inf }
 0x3da   :  { %1470 = vrot.lane.b32.xlu1 %v14921_v37, %s14598_s25 }
 0x3dc   :  { %v1271_v21 = vpop.permute.xlu2 %1270 }
 0x3dd   :  { %1370 = vrot.lane.b32.xlu0 %v14921_v37, %s14623_s10  ;;  %10706 = vmatmul.msk.f32.gmra.mxu2 %vm775_vm11, %v1271_v21 }
 0x3e4   :  { %v1473_v30 = vpop.permute.xlu2 %1472 }
 0x3e5   :  { %13673 = vrot.lane.b32.xlu0 %v14899_v32, %s14619_s0 }
 0x3ec   :  { %v1375_v34 = vpop.permute.xlu2 %1374 }
 0x3f4   :  { %v1369_v38 = vpop.permute.xlu2 %1368 }
 0x404   :  { %910 = vmax.xlane.f32.xlu1 %v909_v26 }
 0x40f   :  { %1112 = vmax.xlane.f32.xlu0 %v1111_v29 }
 0x41d   :  { %13678 = vrot.lane.b32.xlu1 %v14899_v32, %s14620_s19 }
 0x424   :  { %v829_v37 = vpop.xlane.xlu0 %828 }
 0x425   :  { %13842 = vrcp.f32 %v829_v37 }
 0x42b   :  { %v13843_v39 = vpop.eup %13842 }
 0x42c   :  { %v832_v40 = vpop.xlane.xlu1 %831  ;;  %v835_v41 = vmul.f32 %v13843_v39, %v13839_v7 }
 0x42d   :  { %13844 = vrcp.f32 %v832_v40  ;;  %v914_v42 = vpop.xlane.xlu2 %913 }
 0x42e   :  { %10677 = vmatmul.msk.f32.vlgmr.msrb.gmra.mxu1 %vm775_vm11, %v835_v41  ;;  %v916_v58 = vsub.f32 %v14972_v12, %v914_v42 }
 0x42f   :  { %10697 = vmatpush.xpose.msk.msrb.mxu1 %vm775_vm11, %v1175_v35 }
 0x430   :  { %v919_v61 = vmul.f32 1.442695, %v916_v58 }
 0x432   :  { %13846 = vpow2.f32 %v919_v61 }
 0x433   :  { %v13845_v43 = vpop.eup %13844  ;;  %10698 = vmatpush.xpose.msk.msrb.mxu1 %vm775_vm11, %v1173_v31 }
 0x434   :  { %v836_v44 = vmul.f32 %v13845_v43, %v13841_v13 }
 0x435   :  { %v13684_v45 = vpop.permute.xlu2 %13683 }
 0x436   :  { %v13685_v46 = vunpack.i.l.bf16 %v13684_v45  ;;  %10678 = vmatmul.msk.f32.gmra.mxu1 %vm775_vm11, %v836_v44  ;;  %v13686_v48 = vunpack.i.h.bf16 %v13684_v45 }
 0x437   :  { %v1475_v47 = vpop.permute.xlu0 %1474 }
 0x438   :  { %1059 = vmatpush.msra.mxu0 %v13685_v46  ;;  %10715 = vmatpush.xpose.msk.msra.mxu2 %vm775_vm11, %v1475_v47  ;;  %v15032_v5 = vpop.eup %13846 }
 0x439   :  { %v924_v7 = vsel %vm775_vm11, %v15032_v5, 0.0 }
 0x43a   :  { %1060 = vmatpush.msra.mxu0 %v13686_v48 }
 0x43c   :  { %10716 = vmatpush.xpose.msk.msra.mxu2 %vm775_vm11, %v1473_v30 }
 0x43e   :  { %10687 = vmatmul.msk.f32.vlgmr.msra.gmra.mxu1 %vm775_vm11, %v969_v17 }
 0x43f   :  { %10709 = vmatpush.xpose.msk.msra.mxu1 %vm775_vm11, %v1375_v34  ;;  %v1469_v49 = vpop.permute.xlu0 %1468 }
 0x440   :  { %v1104_v50 = vpop.f32.mrf.mxu2  ;;  %10717 = vmatmul.msk.f32.vlgmr.msra.gmra.mxu2 %vm775_vm11, %v1469_v49 }
 0x441   :  { %v1108_v51 = vmul.f32 0.25, %v1104_v50 }
 0x443   :  { %v1110_v52 = vadd.f32 %v1108_v51, %v14947_v60 }
 0x444   :  { %v1171_v53 = vpop.permute.xlu1 %1170 }
 0x445   :  { %v1114_v55 = vsel %vm775_vm11, %v1110_v52, -inf }
 0x446   :  { %1115 = vmax.xlane.f32.xlu2 %v1114_v55  ;;  %10688 = vmatmul.msk.f32.gmra.mxu1 %vm775_vm11, %v971_v20 }
 0x447   :  { %v1373_v56 = vpop.permute.xlu0 %1372 }
 0x448   :  { %10710 = vmatpush.xpose.msk.msra.mxu1 %vm775_vm11, %v1373_v56 }
 0x44c   :  { %v1471_v57 = vpop.permute.xlu1 %1470 }
 0x44d   :  { %10718 = vmatmul.msk.f32.gmra.mxu2 %vm775_vm11, %v1471_v57 }
 0x44e   :  { %10699 = vmatmul.msk.f32.vlgmr.msrb.gmra.mxu1 %vm775_vm11, %v1169_v36 }
 0x44f   :  { %v1371_v59 = vpop.permute.xlu0 %1370 }
 0x453   :  { %v1301_v62 = vpop.f32.mrf.mxu2 }
 0x454   :  { %v1307_v63 = vmul.f32 0.25, %v1301_v62 }
 0x456   :  { %10700 = vmatmul.msk.f32.gmra.mxu1 %vm775_vm11, %v1171_v53  ;;  %v15028_v0 = vadd.f32 %v1307_v63, %v14942_v54 }
 0x457   :  { %v13674_v1 = vpop.permute.xlu0 %13673 }
 0x458   :  { %v13675_v2 = vunpack.i.l.bf16 %v13674_v1  ;;  %v1311_v3 = vsel %vm775_vm11, %v15028_v0, -inf  ;;  %v13676_v4 = vunpack.i.h.bf16 %v13674_v1 }
 0x459   :  { %1312 = vmax.xlane.f32.xlu1 %v1311_v3 }
 0x45a   :  { %959 = vmatpush.msra.mxu3 %v13675_v2 }
 0x45c   :  { %960 = vmatpush.msra.mxu3 %v13676_v4 }
 0x45e   :  { %10711 = vmatmul.msk.f32.vlgmr.msra.gmra.mxu1 %vm775_vm11, %v1369_v38 }
 0x460   :  { %v1304_v6 = vpop.f32.mrf.mxu2 }
 0x461   :  { %v1308_v8 = vmul.f32 0.25, %v1304_v6  ;;  %925 = vadd.xlane.f32.xlu1 %v924_v7 }
 0x463   :  { %v1310_v9 = vadd.f32 %v1308_v8, %v14947_v60 }
 0x465   :  { %v1314_v10 = vsel %vm775_vm11, %v1310_v9, -inf }
 0x466   :  { %1315 = vmax.xlane.f32.xlu0 %v1314_v10  ;;  %10712 = vmatmul.msk.f32.gmra.mxu1 %vm775_vm11, %v1371_v59 }
 0x477   :  { %v911_v11 = vpop.xlane.xlu1 %910 }
 0x478   :  { %v915_v12 = vsub.f32 %v14999_v23, %v911_v11 }
 0x47a   :  { %v917_v13 = vmul.f32 1.442695, %v915_v12 }
 0x47c   :  { %13848 = vpow2.f32 %v917_v13 }
 0x482   :  { %v15041_v14 = vpop.eup %13848  ;;  %v1113_v15 = vpop.xlane.xlu0 %1112 }
 0x483   :  { %v1117_v16 = vsub.f32 %v15004_v33, %v1113_v15  ;;  %v921_v28 = vsel %vm775_vm11, %v15041_v14, 0.0 }
 0x484   :  { %922 = vadd.xlane.f32.xlu0 %v921_v28 }
 0x485   :  { %v1119_v17 = vmul.f32 1.442695, %v1117_v16 }
 0x487   :  { %13850 = vpow2.f32 %v1119_v17 }
 0x48d   :  { %v15046_v18 = vpop.eup %13850 }
 0x48e   :  { %v1123_v19 = vsel %vm775_vm11, %v15046_v18, 0.0 }
 0x48f   :  { %v13679_v20 = vpop.permute.xlu1 %13678  ;;  %1124 = vadd.xlane.f32.xlu1 %v1123_v19 }
 0x490   :  { %v13680_v21 = vunpack.i.l.bf16 %v13679_v20  ;;  %v13681_v22 = vunpack.i.h.bf16 %v13679_v20 }
 0x492   :  { %1159 = vmatpush.msrb.mxu3 %v13680_v21 }
 0x494   :  { %1160 = vmatpush.msrb.mxu3 %v13681_v22 }
 0x4ab   :  { %v15050_v23 = vpop.f32.mrf.mxu1 }
 0x4b3   :  { %v15052_v24 = vpop.f32.mrf.mxu1 }
 0x4b9   :  { %v1116_v26 = vpop.xlane.xlu2 %1115 }
 0x4ba   :  { %v1118_v27 = vsub.f32 %v1110_v52, %v1116_v26 }
 0x4bb   :  { %v1001_v33 = vpop.f32.mrf.mxu1 }
 0x4bc   :  { %v1121_v29 = vmul.f32 1.442695, %v1118_v27  ;;  %v1007_v30 = vmul.f32 0.25, %v1001_v33 }
 0x4be   :  { %13852 = vpow2.f32 %v1121_v29  ;;  %v15055_v31 = vadd.f32 %v1007_v30, %v14942_v54 }
 0x4c0   :  { %v1011_v34 = vsel %vm775_vm11, %v15055_v31, -inf }
 0x4c1   :  { %1012 = vmax.xlane.f32.xlu1 %v1011_v34 }
 0x4c3   :  { %v1004_v35 = vpop.f32.mrf.mxu1  ;;  %v1501_v36 = vpop.f32.mrf.mxu2 }
 0x4c4   :  { %v15059_v37 = vpop.eup %13852  ;;  %v1507_v38 = vmul.f32 0.25, %v1501_v36  ;;  %v1008_v39 = vmul.f32 0.25, %v1004_v35 }
 0x4c5   :  { %v1126_v40 = vsel %vm775_vm11, %v15059_v37, 0.0 }
 0x4c6   :  { %1127 = vadd.xlane.f32.xlu0 %v1126_v40  ;;  %v15064_v41 = vadd.f32 %v1507_v38, %v14942_v54  ;;  %v15069_v43 = vadd.f32 %v1008_v39, %v14947_v60 }
 0x4c8   :  { %v1511_v42 = vsel %vm775_vm11, %v15064_v41, -inf  ;;  %v1014_v47 = vsel %vm775_vm11, %v15069_v43, -inf }
 0x4c9   :  { %1512 = vmax.xlane.f32.xlu2 %v1511_v42 }
 0x4cb   :  { %v1201_v44 = vpop.f32.mrf.mxu1 }
 0x4cc   :  { %v1313_v45 = vpop.xlane.xlu1 %1312  ;;  %v1207_v61 = vmul.f32 0.25, %v1201_v44 }
 0x4cd   :  { %v1317_v46 = vsub.f32 %v15028_v0, %v1313_v45 }
 0x4ce   :  { %1015 = vmax.xlane.f32.xlu0 %v1014_v47  ;;  %v15084_v63 = vadd.f32 %v1207_v61, %v14942_v54 }
 0x4cf   :  { %v1319_v48 = vmul.f32 1.442695, %v1317_v46 }
 0x4d0   :  { %v1504_v49 = vpop.f32.mrf.mxu2  ;;  %v1211_v4 = vsel %vm775_vm11, %v15084_v63, -inf }
 0x4d1   :  { %v1508_v50 = vmul.f32 0.25, %v1504_v49  ;;  %13854 = vpow2.f32 %v1319_v48 }
 0x4d3   :  { %v1204_v51 = vpop.f32.mrf.mxu1  ;;  %v15075_v52 = vadd.f32 %v1508_v50, %v14947_v60 }
 0x4d4   :  { %v1208_v2 = vmul.f32 0.25, %v1204_v51  ;;  %v926_v16 = vpop.xlane.xlu1 %925 }
 0x4d5   :  { %v1514_v53 = vsel %vm775_vm11, %v15075_v52, -inf }
 0x4d6   :  { %1515 = vmax.xlane.f32.xlu2 %v1514_v53  ;;  %v15098_v8 = vadd.f32 %v1208_v2, %v14947_v60 }
 0x4d7   :  { %v15079_v56 = vpop.eup %13854 }
 0x4d8   :  { %v1323_v62 = vsel %vm775_vm11, %v15079_v56, 0.0  ;;  %v1214_v11 = vsel %vm775_vm11, %v15098_v8, -inf }
 0x4d9   :  { %v1316_v55 = vpop.xlane.xlu0 %1315 }
 0x4da   :  { %v1318_v57 = vsub.f32 %v1310_v9, %v1316_v55 }
 0x4db   :  { %v1401_v58 = vpop.f32.mrf.mxu1 }
 0x4dc   :  { %v1321_v59 = vmul.f32 1.442695, %v1318_v57  ;;  %v1407_v9 = vmul.f32 0.25, %v1401_v58 }
 0x4de   :  { %13856 = vpow2.f32 %v1321_v59  ;;  %1324 = vadd.xlane.f32.xlu2 %v1323_v62  ;;  %v15105_v12 = vadd.f32 %v1407_v9, %v14942_v54 }
 0x4e0   :  { %v1411_v13 = vsel %vm775_vm11, %v15105_v12, -inf }
 0x4e2   :  { %13688 = vrot.lane.b32.xlu0 %v14899_v32, %s14595_s11 }
 0x4e3   :  { %v1404_v0 = vpop.f32.mrf.mxu1 }
 0x4e4   :  { %v15088_v1 = vpop.eup %13856  ;;  %v1408_v3 = vmul.f32 0.25, %v1404_v0 }
 0x4e5   :  { %v1326_v6 = vsel %vm775_vm11, %v15088_v1, 0.0 }
 0x4e6   :  { %1212 = vmax.xlane.f32.xlu2 %v1211_v4  ;;  %1327 = vadd.xlane.f32.xlu1 %v1326_v6  ;;  %v15095_v7 = vadd.f32 %v1408_v3, %v14947_v60 }
 0x4e8   :  { %v1414_v10 = vsel %vm775_vm11, %v15095_v7, -inf }
 0x4ee   :  { %1415 = vmax.xlane.f32.xlu2 %v1414_v10  ;;  %1215 = vmax.xlane.f32.xlu1 %v1214_v11 }
 0x4f6   :  { %1412 = vmax.xlane.f32.xlu1 %v1411_v13 }
 0x4f7   :  { %v923_v15 = vpop.xlane.xlu0 %922 }
 0x4f8   :  { %13858 = vrcp.f32 %v923_v15 }
 0x4f9   :  { %13860 = vrcp.f32 %v926_v16 }
 0x4fe   :  { %v13859_v28 = vpop.eup %13858 }
 0x4ff   :  { %v929_v17 = vmul.f32 %v13859_v28, %v15041_v14  ;;  %v13861_v20 = vpop.eup %13860 }
 0x500   :  { %v930_v21 = vmul.f32 %v13861_v20, %v15032_v5 }
 0x501   :  { %10683 = vmatmul.msk.f32.vlgmr.msra.gmra.mxu3 %vm775_vm11, %v929_v17 }
 0x502   :  { %v1125_v19 = vpop.xlane.xlu1 %1124 }
 0x503   :  { %13862 = vrcp.f32 %v1125_v19 }
 0x509   :  { %10684 = vmatmul.msk.f32.gmra.mxu3 %vm775_vm11, %v930_v21  ;;  %v13863_v22 = vpop.eup %13862 }
 0x50a   :  { %v1131_v26 = vmul.f32 %v13863_v22, %v15046_v18 }
 0x511   :  { %10695 = vmatmul.msk.f32.vlgmr.msrb.gmra.mxu3 %vm775_vm11, %v1131_v26 }
 0x534   :  { %v1013_v27 = vpop.xlane.xlu1 %1012 }
 0x535   :  { %v1017_v33 = vsub.f32 %v15055_v31, %v1013_v27 }
 0x537   :  { %v1019_v29 = vmul.f32 1.442695, %v1017_v33 }
 0x539   :  { %13864 = vpow2.f32 %v1019_v29  ;;  %v1128_v14 = vpop.xlane.xlu0 %1127 }
 0x53a   :  { %13866 = vrcp.f32 %v1128_v14 }
 0x53c   :  { %v1513_v30 = vpop.xlane.xlu2 %1512 }
 0x53d   :  { %v1517_v34 = vsub.f32 %v15064_v41, %v1513_v30 }
 0x53f   :  { %v15117_v35 = vpop.eup %13864  ;;  %v1519_v5 = vmul.f32 1.442695, %v1517_v34 }
 0x540   :  { %v13867_v36 = vpop.eup %13866  ;;  %v1023_v38 = vsel %vm775_vm11, %v15117_v35, 0.0 }
 0x541   :  { %13868 = vpow2.f32 %v1519_v5  ;;  %1024 = vadd.xlane.f32.xlu2 %v1023_v38  ;;  %v1016_v18 = vpop.xlane.xlu0 %1015  ;;  %v1132_v39 = vmul.f32 %v13867_v36, %v15059_v37 }
 0x542   :  { %v1018_v31 = vsub.f32 %v15069_v43, %v1016_v18 }
 0x543   :  { %10696 = vmatmul.msk.f32.gmra.mxu3 %vm775_vm11, %v1132_v39 }
 0x544   :  { %v1021_v40 = vmul.f32 1.442695, %v1018_v31 }
 0x546   :  { %13870 = vpow2.f32 %v1021_v40 }
 0x547   :  { %v15124_v42 = vpop.eup %13868 }
 0x548   :  { %v1523_v41 = vsel %vm775_vm11, %v15124_v42, 0.0 }
 0x549   :  { %1524 = vadd.xlane.f32.xlu1 %v1523_v41  ;;  %v1516_v44 = vpop.xlane.xlu2 %1515 }
 0x54a   :  { %v1518_v3 = vsub.f32 %v15075_v52, %v1516_v44 }
 0x54c   :  { %v15128_v45 = vpop.eup %13870  ;;  %v1521_v4 = vmul.f32 1.442695, %v1518_v3 }
 0x54d   :  { %v1026_v46 = vsel %vm775_vm11, %v15128_v45, 0.0 }
 0x551   :  { %1027 = vadd.xlane.f32.xlu1 %v1026_v46  ;;  %v1325_v37 = vpop.xlane.xlu2 %1324 }
 0x552   :  { %13872 = vrcp.f32 %v1325_v37 }
 0x554   :  { %v13689_v43 = vpop.permute.xlu0 %13688 }
 0x555   :  { %v13690_v47 = vunpack.i.l.bf16 %v13689_v43  ;;  %v13691_v48 = vunpack.i.h.bf16 %v13689_v43 }
 0x557   :  { %1359 = vmatpush.msra.mxu3 %v13690_v47 }
 0x558   :  { %v13873_v49 = vpop.eup %13872 }
 0x559   :  { %v1331_v50 = vmul.f32 %v13873_v49, %v15079_v56  ;;  %13693 = vrot.lane.b32.xlu2 %v14899_v32, %s14602_s6  ;;  %v1328_v51 = vpop.xlane.xlu1 %1327  ;;  %1360 = vmatpush.msra.mxu3 %v13691_v48  ;;  %v1213_v53 = vpop.xlane.xlu2 %1212 }
 0x55a   :  { %13874 = vrcp.f32 %v1328_v51  ;;  %v1217_v55 = vsub.f32 %v15084_v63, %v1213_v53 }
 0x55b   :  { %10707 = vmatmul.msk.f32.vlgmr.msra.gmra.mxu3 %vm775_vm11, %v1331_v50 }
 0x55c   :  { %v1219_v57 = vmul.f32 1.442695, %v1217_v55 }
 0x55e   :  { %13876 = vpow2.f32 %v1219_v57 }
 0x560   :  { %v13875_v58 = vpop.eup %13874 }
 0x561   :  { %v1216_v59 = vpop.xlane.xlu1 %1215  ;;  %v1332_v61 = vmul.f32 %v13875_v58, %v15088_v1  ;;  %v1416_v13 = vpop.xlane.xlu2 %1415 }
 0x562   :  { %v1218_v62 = vsub.f32 %v15098_v8, %v1216_v59  ;;  %v1418_v15 = vsub.f32 %v15095_v7, %v1416_v13 }
 0x563   :  { %10708 = vmatmul.msk.f32.gmra.mxu3 %vm775_vm11, %v1332_v61 }
 0x564   :  { %v15140_v56 = vpop.eup %13876  ;;  %v1221_v0 = vmul.f32 1.442695, %v1218_v62  ;;  %v1421_v16 = vmul.f32 1.442695, %v1418_v15 }
 0x565   :  { %v1223_v2 = vsel %vm775_vm11, %v15140_v56, 0.0 }
 0x566   :  { %13878 = vpow2.f32 %v1221_v0  ;;  %1224 = vadd.xlane.f32.xlu0 %v1223_v2 }
 0x567   :  { %13880 = vpow2.f32 %v1521_v4 }
 0x569   :  { %v1413_v8 = vpop.xlane.xlu1 %1412 }
 0x56a   :  { %13698 = vrot.lane.b32.xlu1 %v14899_v32, %s14598_s25  ;;  %v1417_v10 = vsub.f32 %v15105_v12, %v1413_v8 }
 0x56c   :  { %v15146_v63 = vpop.eup %13878  ;;  %v1419_v11 = vmul.f32 1.442695, %v1417_v10 }
 0x56d   :  { %v1226_v1 = vsel %vm775_vm11, %v15146_v63, 0.0  ;;  %v15151_v6 = vpop.eup %13880 }
 0x56e   :  { %1227 = vadd.xlane.f32.xlu0 %v1226_v1  ;;  %v1526_v9 = vsel %vm775_vm11, %v15151_v6, 0.0  ;;  %13882 = vpow2.f32 %v1419_v11 }
 0x56f   :  { %13884 = vpow2.f32 %v1421_v16  ;;  %v13090_v16 = vld [vmem:[%s19311_s13 + $0x30] sm:$0xff] }
 0x574   :  { %v15159_v28 = vpop.eup %13882 }
 0x575   :  { %v1423_v17 = vsel %vm775_vm11, %v15159_v28, 0.0  ;;  %v15163_v12 = vpop.eup %13884 }
 0x582   :  { %1527 = vadd.xlane.f32.xlu2 %v1526_v9  ;;  %13703 = vrot.lane.b32.xlu0 %v14899_v32, %s14623_s10  ;;  %v1426_v32 = vsel %vm775_vm11, %v15163_v12, 0.0 }
 0x584   :  { %v962_v52 = vpop.f32.mrf.mxu3 }
 0x58c   :  { %v965_v19 = vpop.f32.mrf.mxu3 }
 0x58d   :  { %v13707_v20 = vpack.i.bf16 %v965_v19, %v962_v52  ;;  %v13091_v52 = vld [vmem:[%s19311_s13 + $0x38] sm:$0xff] }
 0x58e   :  { %1713 = vmatpush.bf16.msrb.mxu1 %v13091_v52  ;;  %v13087_v19 = vld [vmem:[%s19311_s13 + $0x18] sm:$0xff] }
 0x592   :  { %1714 = vmatpush.bf16.msrb.mxu1 %v13090_v16  ;;  %v13205_v16 = vld [vmem:[#allocation24 + $0x38c] sm:$0xf] }
 0x594   :  { %1424 = vadd.xlane.f32.xlu1 %v1423_v17  ;;  %v1162_v29 = vpop.f32.mrf.mxu3  ;;  %v13088_v17 = vld [vmem:[%s19311_s13 + $0x20] sm:$0xff] }
 0x59a   :  { %13708 = vrot.lane.b32.xlu2 %v13707_v20, %s14598_s25  ;;  %v13085_v20 = vld [vmem:[%s19311_s13 + $0x8] sm:$0xff] }
 0x59c   :  { %1427 = vadd.xlane.f32.xlu1 %v1426_v32  ;;  %v13084_v32 = vld [vmem:[%s19311_s13] sm:$0xff] }
 0x5b4   :  { %v1025_v7 = vpop.xlane.xlu2 %1024 }
 0x5b5   :  { %13886 = vrcp.f32 %v1025_v7 }
 0x5bb   :  { %v13887_v21 = vpop.eup %13886 }
 0x5bc   :  { %v1031_v22 = vmul.f32 %v13887_v21, %v15117_v35  ;;  %v1525_v26 = vpop.xlane.xlu1 %1524  ;;  %v13694_v27 = vpop.permute.xlu2 %13693 }
 0x5bd   :  { %v13695_v33 = vunpack.i.l.bf16 %v13694_v27  ;;  %v13696_v14 = vunpack.i.h.bf16 %v13694_v27 }
 0x5be   :  { %10689 = vmatmul.msk.f32.vlgmr.msra.gmra.mxu0 %vm775_vm11, %v1031_v22 }
 0x5bf   :  { %1259 = vmatpush.msrb.mxu0 %v13695_v33 }
 0x5c1   :  { %1260 = vmatpush.msrb.mxu0 %v13696_v14 }
 0x5c4   :  { %v1028_v30 = vpop.xlane.xlu1 %1027 }
 0x5c5   :  { %13888 = vrcp.f32 %v1028_v30 }
 0x5c6   :  { %v1165_v34 = vpop.f32.mrf.mxu3  ;;  %13890 = vrcp.f32 %v1525_v26 }
 0x5c7   :  { %v13712_v5 = vpack.i.bf16 %v1165_v34, %v1162_v29 }
 0x5c9   :  { %13713 = vrot.lane.b32.xlu0 %v13712_v5, %s14595_s11 }
 0x5cb   :  { %v13889_v36 = vpop.eup %13888 }
 0x5cc   :  { %v1032_v38 = vmul.f32 %v13889_v36, %v15128_v45  ;;  %v13891_v39 = vpop.eup %13890 }
 0x5cd   :  { %v1531_v46 = vmul.f32 %v13891_v39, %v15124_v42 }
 0x5ce   :  { %10690 = vmatmul.msk.f32.gmra.mxu0 %vm775_vm11, %v1032_v38 }
 0x5d9   :  { %v1225_v35 = vpop.xlane.xlu0 %1224 }
 0x5da   :  { %13892 = vrcp.f32 %v1225_v35 }
 0x5dc   :  { %v13699_v18 = vpop.permute.xlu1 %13698 }
 0x5dd   :  { %v13700_v31 = vunpack.i.l.bf16 %v13699_v18  ;;  %v13701_v41 = vunpack.i.h.bf16 %v13699_v18 }
 0x5de   :  { %v1362_v40 = vpop.f32.mrf.mxu3 }
 0x5df   :  { %1559 = vmatpush.msrb.mxu3 %v13700_v31 }
 0x5e0   :  { %v13893_v44 = vpop.eup %13892 }
 0x5e1   :  { %v1231_v37 = vmul.f32 %v13893_v44, %v15140_v56  ;;  %1560 = vmatpush.msrb.mxu3 %v13701_v41  ;;  %v1228_v43 = vpop.xlane.xlu0 %1227 }
 0x5e2   :  { %13894 = vrcp.f32 %v1228_v43  ;;  %10719 = vmatmul.msk.f32.vlgmr.msrb.gmra.mxu3 %vm775_vm11, %v1531_v46 }
 0x5e3   :  { %10701 = vmatmul.msk.f32.vlgmr.msrb.gmra.mxu0 %vm775_vm11, %v1231_v37 }
 0x5e6   :  { %v1365_v45 = vpop.f32.mrf.mxu3 }
 0x5e7   :  { %v13717_v47 = vpack.i.bf16 %v1365_v45, %v1362_v40 }
 0x5e8   :  { %v13895_v48 = vpop.eup %13894 }
 0x5e9   :  { %13718 = vrot.lane.b32.xlu2 %v13717_v47, %s14620_s19  ;;  %v1232_v49 = vmul.f32 %v13895_v48, %v15146_v63 }
 0x5eb   :  { %10702 = vmatmul.msk.f32.gmra.mxu0 %vm775_vm11, %v1232_v49 }
 0x5f4   :  { %v13704_v50 = vpop.permute.xlu0 %13703 }
 0x5f5   :  { %v13705_v42 = vunpack.i.l.bf16 %v13704_v50  ;;  %v1528_v51 = vpop.xlane.xlu2 %1527  ;;  %v13706_v53 = vunpack.i.h.bf16 %v13704_v50 }
 0x5f6   :  { %13896 = vrcp.f32 %v1528_v51 }
 0x5f7   :  { %1459 = vmatpush.msra.mxu0 %v13705_v42 }
 0x5f9   :  { %1460 = vmatpush.msra.mxu0 %v13706_v53 }
 0x5fc   :  { %v13897_v55 = vpop.eup %13896 }
 0x5fd   :  { %v1532_v57 = vmul.f32 %v13897_v55, %v15151_v6  ;;  %v13709_v22 = vpop.permute.xlu2 %13708 }
 0x5fe   :  { %v13711_v26 = vunpack.i.h.bf16 %v13709_v22  ;;  %v13710_v27 = vunpack.i.l.bf16 %v13709_v22  ;;  %v11147_v22 = vld [vmem:[#allocation24 + $0x308] sm:$0xf] }
 0x5ff   :  { %10720 = vmatmul.msk.f32.gmra.mxu3 %vm775_vm11, %v1532_v57 }
 0x600   :  { %v1625_v30 = vsel %vm775_vm11, %v15052_v24, %v13711_v26  ;;  %v1624_v34 = vsel %vm775_vm11, %v15050_v23, %v13710_v27  ;;  %v13197_v26 = vld [vmem:[#allocation24 + $0x344] sm:$0xf0]  ;;  %v13189_v27 = vld [vmem:[#allocation24 + $0x30c] sm:$0xf] }
 0x607   :  { %v1425_v58 = vpop.xlane.xlu1 %1424 }
 0x608   :  { %13898 = vrcp.f32 %v1425_v58 }
 0x60e   :  { %v13899_v59 = vpop.eup %13898 }
 0x60f   :  { %v1431_v61 = vmul.f32 %v13899_v59, %v15159_v28  ;;  %v1428_v62 = vpop.xlane.xlu1 %1427  ;;  %v13089_v28 = vld [vmem:[%s19311_s13 + $0x28] sm:$0xff]  ;;  %v13818_v59 = vld [vmem:[#allocation20] ss:$0 sm:$0xff] }
 0x610   :  { %13900 = vrcp.f32 %v1428_v62  ;;  %1715 = vmatpush.bf16.msrb.mxu1 %v13089_v28  ;;  %v11213_v28 = vld [vmem:[#allocation24 + $0x3c8] sm:$0xf0] }
 0x611   :  { %10713 = vmatmul.msk.f32.vlgmr.msra.gmra.mxu0 %vm775_vm11, %v1431_v61 }
 0x614   :  { %1716 = vmatpush.bf16.msrb.mxu1 %v13088_v17  ;;  %v11139_v17 = vld [vmem:[#allocation24 + $0x300] sm:$0xf] }
 0x616   :  { %v13901_v56 = vpop.eup %13900 }
 0x617   :  { %v1432_v0 = vmul.f32 %v13901_v56, %v15163_v12  ;;  %v13086_v12 = vld [vmem:[%s19311_s13 + $0x10] sm:$0xff]  ;;  %v14108_v56 = vld [vmem:[#allocation2] sm:$0xff] }
 0x618   :  { %1717 = vmatpush.bf16.msrb.mxu1 %v13087_v19  ;;  %v11216_v19 = vor.u32 %v13205_v16, %v11213_v28  ;;  %v10883_v16 = vld [vmem:[#allocation24 + $0x100] sm:$0xf]  ;;  %v13124_v28 = vld [vmem:[#allocation24 + $0x104] sm:$0xf] }
 0x619   :  { %10714 = vmatmul.msk.f32.gmra.mxu0 %vm775_vm11, %v1432_v0 }
 0x61c   :  { %1718 = vmatpush.bf16.msrb.mxu1 %v13086_v12  ;;  %v13196_v12 = vld [vmem:[#allocation24 + $0x33c] sm:$0xf0] }
 0x620   :  { %1719 = vmatpush.bf16.msrb.mxu1 %v13085_v20  ;;  %v13188_v20 = vld [vmem:[#allocation24 + $0x304] sm:$0xf] }
 0x624   :  { %1720 = vmatpush.bf16.msrb.mxu1 %v13084_v32  ;;  %v11141_v32 = vld [vmem:[#allocation24 + $0x340] sm:$0xf0] }
 0x628   :  { %2628 = vmatpush.bf16.msra.mxu1 %v11216_v19  ;;  %v10885_v19 = vld [vmem:[#allocation24 + $0x140] sm:$0xf0] }
 0x63b   :  { %v1062_v2 = vpop.f32.mrf.mxu0  ;;  %v13714_v7 = vpop.permute.xlu0 %13713 }
 0x63c   :  { %v13716_v18 = vunpack.i.h.bf16 %v13714_v7  ;;  %v13715_v39 = vunpack.i.l.bf16 %v13714_v7  ;;  %v11140_v7 = vor.u32 %v13196_v12, %v11139_v17  ;;  %v10891_v12 = vld [vmem:[#allocation24 + $0x108] sm:$0xf] }
 0x643   :  { %v13719_v31 = vpop.permute.xlu2 %13718 }
 0x644   :  { %v13721_v46 = vunpack.i.h.bf16 %v13719_v31  ;;  %v13720_v37 = vunpack.i.l.bf16 %v13719_v31  ;;  %v11085_v31 = vld [vmem:[#allocation24 + $0x2c8] sm:$0xf0] }
 0x64b   :  { %v1065_v63 = vpop.f32.mrf.mxu0 }
 0x64c   :  { %v13722_v1 = vpack.i.bf16 %v1065_v63, %v1062_v2 }
 0x64e   :  { %13723 = vrot.lane.b32.xlu0 %v13722_v1, %s14623_s10  ;;  %v14109_v1 = vld [vmem:[#allocation2 + $0x8] sm:$0xff] }
 0x660   :  { %v1262_v3 = vpop.f32.mrf.mxu0 }
 0x665   :  { %v1562_v8 = vpop.f32.mrf.mxu3 }
 0x668   :  { %v1265_v4 = vpop.f32.mrf.mxu0 }
 0x669   :  { %v13727_v6 = vpack.i.bf16 %v1265_v4, %v1262_v3  ;;  %v11203_v4 = vld [vmem:[#allocation24 + $0x380] sm:$0xf] }
 0x66b   :  { %13728 = vrot.lane.b32.xlu0 %v13727_v6, %s14602_s6  ;;  %v13212_v6 = vld [vmem:[#allocation24 + $0x3bc] sm:$0xf0] }
 0x682   :  { %v1565_v9 = vpop.f32.mrf.mxu3 }
 0x683   :  { %v13737_v10 = vpack.i.bf16 %v1565_v9, %v1562_v8  ;;  %v13204_v8 = vld [vmem:[#allocation24 + $0x384] sm:$0xf]  ;;  %v11204_v9 = vor.u32 %v13212_v6, %v11203_v4 }
 0x685   :  { %13738 = vrot.lane.b32.xlu1 %v13737_v10, %s14619_s0  ;;  %v11205_v10 = vld [vmem:[#allocation24 + $0x3c0] sm:$0xf0]  ;;  %2586 = vmatpush.bf16.msrb.mxu0 %v11204_v9 }
 0x689   :  { %2587 = vmatpush.bf16.msrb.mxu0 %v11140_v7 }
 0x68e   :  { %v1462_v11 = vpop.f32.mrf.mxu0 }
 0x696   :  { %v1465_v13 = vpop.f32.mrf.mxu0 }
 0x697   :  { %v13732_v15 = vpack.i.bf16 %v1465_v13, %v1462_v11  ;;  %v11211_v11 = vld [vmem:[#allocation24 + $0x388] sm:$0xf] }
 0x698   :  { %v13213_v13 = vld [vmem:[#allocation24 + $0x3c4] sm:$0xf0] }
 0x699   :  { %13733 = vrot.lane.b32.xlu0 %v13732_v15, %s14621_s15  ;;  %v11208_v15 = vor.u32 %v13204_v8, %v11205_v10  ;;  %v11212_v52 = vor.u32 %v13213_v13, %v11211_v11 }
 0x69b   :  { %2600 = vmatpush.bf16.msrb.mxu2 %v11208_v15  ;;  %2614 = vmatpush.bf16.msra.mxu3 %v11212_v52 }
 0x6c0   :  { %v13724_v21 = vpop.permute.xlu0 %13723 }
 0x6c1   :  { %v13726_v33 = vunpack.i.h.bf16 %v13724_v21  ;;  %v13725_v29 = vunpack.i.l.bf16 %v13724_v21  ;;  %v11144_v21 = vor.u32 %v13188_v20, %v11141_v32  ;;  %v13133_v20 = vld [vmem:[#allocation24 + $0x144] sm:$0xf0]  ;;  %v10888_v32 = vor.u32 %v13124_v28, %v10885_v19  ;;  %v13182_v28 = vld [vmem:[#allocation24 + $0x2cc] sm:$0xf0] }
 0x6c2   :  { %v10892_v7 = vor.u32 %v13133_v20, %v10891_v12  ;;  %v11093_v12 = vld [vmem:[#allocation24 + $0x2d0] sm:$0xf0]  ;;  %v11099_v20 = vld [vmem:[#allocation24 + $0x298] sm:$0xf] }
 0x6c3   :  { %v1628_v5 = vsel %vm1626_vm14, %v1625_v30, %v13726_v33  ;;  %v1627_v36 = vsel %vm1626_vm14, %v1624_v34, %v13725_v29  ;;  %v11148_v33 = vor.u32 %v13197_v26, %v11147_v22  ;;  %v11149_v29 = vld [vmem:[#allocation24 + $0x348] sm:$0xf0]  ;;  %v13180_v30 = vld [vmem:[#allocation24 + $0x2bc] sm:$0xf0]  ;;  %2601 = vmatpush.bf16.msrb.mxu2 %v11144_v21 }
 0x6c4   :  { %v1630_v40 = vsel %vm1629_vm15, %v1627_v36, %v13715_v39  ;;  %v1631_v41 = vsel %vm1629_vm15, %v1628_v5, %v13716_v18  ;;  %v11152_v34 = vor.u32 %v13189_v27, %v11149_v29  ;;  %v13172_v5 = vld [vmem:[#allocation24 + $0x284] sm:$0xf]  ;;  %v13181_v18 = vld [vmem:[#allocation24 + $0x2c4] sm:$0xf0]  ;;  %v13173_v39 = vld [vmem:[#allocation24 + $0x28c] sm:$0xf] }
 0x6c5   :  { %v11077_v36 = vld [vmem:[#allocation24 + $0x2c0] sm:$0xf0]  ;;  %2615 = vmatpush.bf16.msra.mxu3 %v11148_v33  ;;  %v13125_v21 = vld [vmem:[#allocation24 + $0x10c] sm:$0xf]  ;;  %v13116_v27 = vld [vmem:[#allocation24 + $0xbc] sm:$0xf0] }
 0x6c6   :  { %2629 = vmatpush.bf16.msra.mxu1 %v11152_v34  ;;  %v10893_v22 = vld [vmem:[#allocation24 + $0x148] sm:$0xf0]  ;;  %v13108_v33 = vld [vmem:[#allocation24 + $0x84] sm:$0xf]  ;;  %v13117_v34 = vld [vmem:[#allocation24 + $0xc4] sm:$0xf0] }
 0x6c7   :  { %v10896_v26 = vor.u32 %v13125_v21, %v10893_v22  ;;  %v13175_v22 = vld [vmem:[#allocation24 + $0x29c] sm:$0xf] }
 0x6dd   :  { %v13729_v14 = vpop.permute.xlu0 %13728 }
 0x6de   :  { %v13731_v38 = vunpack.i.h.bf16 %v13729_v14  ;;  %v13730_v35 = vunpack.i.l.bf16 %v13729_v14  ;;  %v11075_v14 = vld [vmem:[#allocation24 + $0x280] sm:$0xf] }
 0x6e0   :  { %v1634_v24 = vsel %vm1632_vm0, %v1631_v41, %v13731_v38  ;;  %v1633_v44 = vsel %vm1632_vm0, %v1630_v40, %v13730_v35  ;;  %v11083_v38 = vld [vmem:[#allocation24 + $0x288] sm:$0xf]  ;;  %v11076_v35 = vor.u32 %v13180_v30, %v11075_v14  ;;  %v11080_v40 = vor.u32 %v13172_v5, %v11077_v36  ;;  %v10821_v14 = vld [vmem:[#allocation24 + $0xc0] sm:$0xf0] }
 0x6e1   :  { %v1636_v50 = vsel %vm1635_vm1, %v1633_v44, %v13720_v37  ;;  %v1637_v42 = vsel %vm1635_vm1, %v1634_v24, %v13721_v46  ;;  %v11084_v41 = vor.u32 %v13181_v18, %v11083_v38  ;;  %v11011_v24 = vld [vmem:[#allocation24 + $0x200] sm:$0xf]  ;;  %v11088_v46 = vor.u32 %v13173_v39, %v11085_v31  ;;  %v11013_v37 = vld [vmem:[#allocation24 + $0x240] sm:$0xf0]  ;;  %v10827_v30 = vld [vmem:[#allocation24 + $0x88] sm:$0xf] }
 0x6e2   :  { %v13164_v44 = vld [vmem:[#allocation24 + $0x23c] sm:$0xf0]  ;;  %2588 = vmatpush.bf16.msrb.mxu0 %v11076_v35  ;;  %2602 = vmatpush.bf16.msrb.mxu2 %v11080_v40  ;;  %v10824_v5 = vor.u32 %v13108_v33, %v10821_v14  ;;  %v10828_v36 = vor.u32 %v13117_v34, %v10827_v30  ;;  %v13109_v38 = vld [vmem:[#allocation24 + $0x8c] sm:$0xf]  ;;  %v13092_v40 = vld [vmem:[#allocation24 + $0x4] sm:$0xf] }
 0x6e3   :  { %2616 = vmatpush.bf16.msra.mxu3 %v11084_v41  ;;  %2630 = vmatpush.bf16.msra.mxu1 %v11088_v46  ;;  %v10829_v35 = vld [vmem:[#allocation24 + $0xc8] sm:$0xf0]  ;;  %v10755_v39 = vld [vmem:[#allocation24] sm:$0xf]  ;;  %v13166_v33 = vld [vmem:[#allocation24 + $0x24c] sm:$0xf0] }
 0x6e4   :  { %v10832_v18 = vor.u32 %v13109_v38, %v10829_v35  ;;  %v13100_v31 = vld [vmem:[#allocation24 + $0x3c] sm:$0xf0]  ;;  %v11029_v30 = vld [vmem:[#allocation24 + $0x250] sm:$0xf0]  ;;  %v11035_v34 = vld [vmem:[#allocation24 + $0x218] sm:$0xf] }
 0x6e5   :  { %v10756_v41 = vor.u32 %v13100_v31, %v10755_v39  ;;  %v13159_v35 = vld [vmem:[#allocation24 + $0x21c] sm:$0xf]  ;;  %v10963_v31 = vld [vmem:[#allocation24 + $0x190] sm:$0xf] }
 0x6f7   :  { %v13739_v23 = vpop.permute.xlu1 %13738 }
 0x6f8   :  { %v13741_v48 = vunpack.i.h.bf16 %v13739_v23  ;;  %v13740_v49 = vunpack.i.l.bf16 %v13739_v23  ;;  %v13156_v23 = vld [vmem:[#allocation24 + $0x204] sm:$0xf] }
 0x70b   :  { %v13734_v43 = vpop.permute.xlu0 %13733 }
 0x70c   :  { %v13736_v45 = vunpack.i.h.bf16 %v13734_v43  ;;  %v13735_v47 = vunpack.i.l.bf16 %v13734_v43  ;;  %v11019_v43 = vld [vmem:[#allocation24 + $0x208] sm:$0xf] }
 0x70e   :  { %v1640_v51 = vsel %vm1638_vm2, %v1637_v42, %v13736_v45  ;;  %v1639_v53 = vsel %vm1638_vm2, %v1636_v50, %v13735_v47  ;;  %v13165_v45 = vld [vmem:[#allocation24 + $0x244] sm:$0xf0]  ;;  %v13157_v47 = vld [vmem:[#allocation24 + $0x20c] sm:$0xf]  ;;  %v11016_v50 = vor.u32 %v13156_v23, %v11013_v37 }
 0x70f   :  { %v1642_v55 = vsel %vm1641_vm3, %v1639_v53, %v13740_v49  ;;  %v1643_v57 = vsel %vm1641_vm3, %v1640_v51, %v13741_v48  ;;  %v11021_v48 = vld [vmem:[#allocation24 + $0x248] sm:$0xf0]  ;;  %v11012_v49 = vor.u32 %v13164_v44, %v11011_v24  ;;  %v11020_v42 = vor.u32 %v13165_v45, %v11019_v43  ;;  %v10947_v51 = vld [vmem:[#allocation24 + $0x180] sm:$0xf]  ;;  %v10757_v24 = vld [vmem:[#allocation24 + $0x40] sm:$0xf0] }
 0x710   :  { %v1644_v58 = vpack.c.bf16 %v1643_v57, %v1642_v55  ;;  %v13148_v53 = vld [vmem:[#allocation24 + $0x1bc] sm:$0xf0]  ;;  %v13140_v55 = vld [vmem:[#allocation24 + $0x184] sm:$0xf]  ;;  %v11024_v57 = vor.u32 %v13157_v47, %v11021_v48  ;;  %2603 = vmatpush.bf16.msrb.mxu2 %v11016_v50  ;;  %v10763_v44 = vld [vmem:[#allocation24 + $0x8] sm:$0xf]  ;;  %v10760_v46 = vor.u32 %v13092_v40, %v10757_v24 }
 0x711   :  { %2589 = vmatpush.bf16.msrb.mxu0 %v11012_v49  ;;  %2617 = vmatpush.bf16.msra.mxu3 %v11020_v42  ;;  %v13101_v23 = vld [vmem:[#allocation24 + $0x44] sm:$0xf0]  ;;  %v13093_v43 = vld [vmem:[#allocation24 + $0xc] sm:$0xf]  ;;  %v11219_v47 = vld [vmem:[#allocation24 + $0x390] sm:$0xf] }
 0x712   :  { %1721 = vmatmul.bf16.vlgmr.msrb.gmra.mxu1 %v1644_v58  ;;  %v10949_v58 = vld [vmem:[#allocation24 + $0x1c0] sm:$0xf0]  ;;  %v10764_v37 = vor.u32 %v13101_v23, %v10763_v44  ;;  %v10765_v45 = vld [vmem:[#allocation24 + $0x48] sm:$0xf0]  ;;  %v13214_v49 = vld [vmem:[#allocation24 + $0x3cc] sm:$0xf0] }
 0x713   :  { %2631 = vmatpush.bf16.msra.mxu1 %v11024_v57  ;;  %v10768_v48 = vor.u32 %v13093_v43, %v10765_v45  ;;  %v13206_v50 = vld [vmem:[#allocation24 + $0x394] sm:$0xf]  ;;  %v13215_v57 = vld [vmem:[#allocation24 + $0x3d4] sm:$0xf0]  ;;  %v13150_v40 = vld [vmem:[#allocation24 + $0x1cc] sm:$0xf0] }
 0x714   :  { %v11221_v42 = vld [vmem:[#allocation24 + $0x3d0] sm:$0xf0]  ;;  %v10964_v24 = vor.u32 %v13150_v40, %v10963_v31  ;;  %v10971_v23 = vld [vmem:[#allocation24 + $0x198] sm:$0xf]  ;;  %v13143_v45 = vld [vmem:[#allocation24 + $0x19c] sm:$0xf] }
 0x715   :  { %v10965_v44 = vld [vmem:[#allocation24 + $0x1d0] sm:$0xf0] }
 0x78f   :  { %v1722_v61 = vpop.f32.mrf.mxu1 }
 0x790   :  { %v1723_v62 = vadd.f32 %v13818_v59, %v1722_v61  ;;  %v13149_v61 = vld [vmem:[#allocation24 + $0x1c4] sm:$0xf0] }
 0x792   :  { %v15230_v0 = vadd.f32 %v14108_v56, %v1723_v62  ;;  %v13141_v62 = vld [vmem:[#allocation24 + $0x18c] sm:$0xf] }
 0x793   :  { %v10957_v56 = vld [vmem:[#allocation24 + $0x1c8] sm:$0xf0] }
 0x794   :  { %1731 = vadd.xlane.f32.xlu2 %v15230_v0  ;;  %v10960_v6 = vor.u32 %v13141_v62, %v10957_v56  ;;  %v11155_v62 = vld [vmem:[#allocation24 + $0x310] sm:$0xf] }
 0x795   :  { %v13198_v56 = vld [vmem:[#allocation24 + $0x34c] sm:$0xf0] }
 0x796   :  { %2632 = vmatpush.bf16.msra.mxu1 %v10960_v6  ;;  %v11163_v6 = vld [vmem:[#allocation24 + $0x318] sm:$0xf] }
 0x797   :  { %v1724_v2 = vpop.f32.mrf.mxu1 }
 0x798   :  { %v1725_v63 = vadd.f32 %v13818_v59, %v1724_v2  ;;  %v10955_v59 = vld [vmem:[#allocation24 + $0x188] sm:$0xf]  ;;  %v10948_v2 = vor.u32 %v13148_v53, %v10947_v51  ;;  %v11220_v51 = vor.u32 %v13214_v49, %v11219_v47  ;;  %v11224_v53 = vor.u32 %v13206_v50, %v11221_v42  ;;  %v10973_v47 = vld [vmem:[#allocation24 + $0x1d8] sm:$0xf0]  ;;  %v10899_v49 = vld [vmem:[#allocation24 + $0x110] sm:$0xf] }
 0x799   :  { %v13134_v50 = vld [vmem:[#allocation24 + $0x14c] sm:$0xf0]  ;;  %v13126_v42 = vld [vmem:[#allocation24 + $0x114] sm:$0xf] }
 0x79a   :  { %v15233_v3 = vadd.f32 %v14109_v1, %v1725_v63  ;;  %v10952_v63 = vor.u32 %v13140_v55, %v10949_v58  ;;  %v10956_v1 = vor.u32 %v13149_v61, %v10955_v59  ;;  %2590 = vmatpush.bf16.msrb.mxu0 %v10948_v2  ;;  %2633 = vmatpush.bf16.msra.mxu1 %v10896_v26  ;;  %v11227_v55 = vld [vmem:[#allocation24 + $0x398] sm:$0xf]  ;;  %v13207_v58 = vld [vmem:[#allocation24 + $0x39c] sm:$0xf] }
 0x79b   :  { %v11228_v59 = vor.u32 %v13215_v57, %v11227_v55  ;;  %v11229_v61 = vld [vmem:[#allocation24 + $0x3d8] sm:$0xf0]  ;;  %v10907_v55 = vld [vmem:[#allocation24 + $0x118] sm:$0xf] }
 0x79c   :  { %1733 = vadd.xlane.f32.xlu0 %v15233_v3  ;;  %2604 = vmatpush.bf16.msrb.mxu2 %v10952_v63  ;;  %v11232_v2 = vor.u32 %v13207_v58, %v11229_v61  ;;  %v11156_v63 = vor.u32 %v13198_v56, %v11155_v62  ;;  %v11101_v26 = vld [vmem:[#allocation24 + $0x2d8] sm:$0xf0]  ;;  %v13135_v57 = vld [vmem:[#allocation24 + $0x154] sm:$0xf0] }
 0x79d   :  { %2618 = vmatpush.bf16.msra.mxu3 %v10956_v1  ;;  %v13190_v1 = vld [vmem:[#allocation24 + $0x314] sm:$0xf]  ;;  %v13127_v61 = vld [vmem:[#allocation24 + $0x11c] sm:$0xf] }
 0x79e   :  { %2634 = vmatpush.bf16.msra.mxu1 %v10832_v18  ;;  %v11037_v18 = vld [vmem:[#allocation24 + $0x258] sm:$0xf0] }
 0x79f   :  { %v11040_v39 = vor.u32 %v13159_v35, %v11037_v18  ;;  %v10909_v62 = vld [vmem:[#allocation24 + $0x158] sm:$0xf0] }
 0x7a0   :  { %2605 = vmatpush.bf16.msrb.mxu2 %v10888_v32  ;;  %v13183_v32 = vld [vmem:[#allocation24 + $0x2d4] sm:$0xf0] }
 0x7a1   :  { %2619 = vmatpush.bf16.msra.mxu3 %v10892_v7  ;;  %v11100_v21 = vor.u32 %v13183_v32, %v11099_v20  ;;  %v13102_v20 = vld [vmem:[#allocation24 + $0x4c] sm:$0xf0]  ;;  %v13094_v32 = vld [vmem:[#allocation24 + $0x14] sm:$0xf] }
 0x7a2   :  { %2635 = vmatpush.bf16.msra.mxu1 %v10768_v48  ;;  %v10976_v48 = vor.u32 %v13143_v45, %v10973_v47 }
 0x7a4   :  { %2606 = vmatpush.bf16.msrb.mxu2 %v10824_v5  ;;  %v13167_v5 = vld [vmem:[#allocation24 + $0x254] sm:$0xf0] }
 0x7a5   :  { %2620 = vmatpush.bf16.msra.mxu3 %v10828_v36  ;;  %v11036_v38 = vor.u32 %v13167_v5, %v11035_v34 }
 0x7a6   :  { %2684 = vmatpush.bf16.msrb.mxu1 %v11232_v2  ;;  %v10912_v2 = vor.u32 %v13127_v61, %v10909_v62  ;;  %v13217_v62 = vld [vmem:[#allocation24 + $0x3e4] sm:$0xf0] }
 0x7a8   :  { %2607 = vmatpush.bf16.msrb.mxu2 %v10760_v46  ;;  %v13151_v46 = vld [vmem:[#allocation24 + $0x1d4] sm:$0xf0] }
 0x7a9   :  { %2621 = vmatpush.bf16.msra.mxu3 %v10764_v37  ;;  %v10972_v43 = vor.u32 %v13151_v46, %v10971_v23 }
 0x7ac   :  { %2656 = vmatpush.bf16.msra.mxu2 %v11224_v53  ;;  %v10901_v53 = vld [vmem:[#allocation24 + $0x150] sm:$0xf0] }
 0x7ad   :  { %2670 = vmatpush.bf16.msrb.mxu3 %v11228_v59  ;;  %v10904_v58 = vor.u32 %v13126_v42, %v10901_v53  ;;  %v10908_v59 = vor.u32 %v13135_v57, %v10907_v55  ;;  %v13216_v53 = vld [vmem:[#allocation24 + $0x3dc] sm:$0xf0]  ;;  %v13208_v55 = vld [vmem:[#allocation24 + $0x3a4] sm:$0xf] }
 0x7ae   :  { %v11237_v57 = vld [vmem:[#allocation24 + $0x3e0] sm:$0xf0] }
 0x807   :  { %v1732_v4 = vpop.xlane.xlu2 %1731 }
 0x808   :  { %v1735_v8 = vmul.f32 %v1732_v4, %v14867_v25  ;;  %v11157_v4 = vld [vmem:[#allocation24 + $0x350] sm:$0xf0] }
 0x80a   :  { %v15238_v9 = vsub.f32 %v15230_v0, %v1735_v8  ;;  %v13132_v0 = vld [vmem:[#allocation24 + $0x13c] sm:$0xf0]  ;;  %v11160_v8 = vor.u32 %v13190_v1, %v11157_v4  ;;  %v10835_v1 = vld [vmem:[#allocation24 + $0x90] sm:$0xf] }
 0x80b   :  { %v10884_v17 = vor.u32 %v13132_v0, %v10883_v16  ;;  %v11091_v0 = vld [vmem:[#allocation24 + $0x290] sm:$0xf] }
 0x80c   :  { %v1739_v10 = vmul.f32 %v15238_v9, %v15238_v9  ;;  %2657 = vmatpush.bf16.msra.mxu2 %v11160_v8  ;;  %v11092_v19 = vor.u32 %v13182_v28, %v11091_v0  ;;  %v13118_v4 = vld [vmem:[#allocation24 + $0xcc] sm:$0xf0]  ;;  %v13111_v28 = vld [vmem:[#allocation24 + $0x9c] sm:$0xf] }
 0x80d   :  { %2591 = vmatpush.bf16.msrb.mxu0 %v10884_v17  ;;  %v13174_v17 = vld [vmem:[#allocation24 + $0x294] sm:$0xf]  ;;  %v10836_v8 = vor.u32 %v13118_v4, %v10835_v1  ;;  %v11240_v1 = vor.u32 %v13208_v55, %v11237_v57  ;;  %v13200_v4 = vld [vmem:[#allocation24 + $0x35c] sm:$0xf0] }
 0x80e   :  { %1741 = vadd.xlane.f32.xlu1 %v1739_v10  ;;  %v13199_v10 = vld [vmem:[#allocation24 + $0x354] sm:$0xf0]  ;;  %v11096_v7 = vor.u32 %v13174_v17, %v11093_v12  ;;  %v10845_v17 = vld [vmem:[#allocation24 + $0xd8] sm:$0xf0]  ;;  %v10771_v12 = vld [vmem:[#allocation24 + $0x10] sm:$0xf] }
 0x80f   :  { %v1734_v11 = vpop.xlane.xlu0 %1733 }
 0x810   :  { %v1736_v13 = vmul.f32 %v1734_v11, %v14867_v25  ;;  %v13191_v11 = vld [vmem:[#allocation24 + $0x31c] sm:$0xf]  ;;  %2658 = vmatpush.bf16.msra.mxu2 %v11096_v7  ;;  %v10772_v7 = vor.u32 %v13102_v20, %v10771_v12  ;;  %v13184_v12 = vld [vmem:[#allocation24 + $0x2dc] sm:$0xf0] }
 0x812   :  { %v15244_v15 = vsub.f32 %v15233_v3, %v1736_v13  ;;  %v10819_v3 = vld [vmem:[#allocation24 + $0x80] sm:$0xf]  ;;  %v11165_v13 = vld [vmem:[#allocation24 + $0x358] sm:$0xf0] }
 0x813   :  { %v10820_v29 = vor.u32 %v13116_v27, %v10819_v3  ;;  %v11168_v16 = vor.u32 %v13191_v11, %v11165_v13  ;;  %v11104_v3 = vor.u32 %v13175_v22, %v11101_v26  ;;  %v11027_v27 = vld [vmem:[#allocation24 + $0x210] sm:$0xf]  ;;  %v10843_v11 = vld [vmem:[#allocation24 + $0x98] sm:$0xf] }
 0x814   :  { %v1740_v52 = vmul.f32 %v15244_v15, %v15244_v15  ;;  %v11028_v14 = vor.u32 %v13166_v33, %v11027_v27  ;;  %v13119_v13 = vld [vmem:[#allocation24 + $0xd4] sm:$0xf0]  ;;  %v13095_v33 = vld [vmem:[#allocation24 + $0x1c] sm:$0xf] }
 0x815   :  { %2592 = vmatpush.bf16.msrb.mxu0 %v10820_v29  ;;  %2685 = vmatpush.bf16.msrb.mxu1 %v11168_v16  ;;  %v13158_v29 = vld [vmem:[#allocation24 + $0x214] sm:$0xf]  ;;  %v10844_v0 = vor.u32 %v13119_v13, %v10843_v11  ;;  %v10779_v22 = vld [vmem:[#allocation24 + $0x18] sm:$0xf]  ;;  %v11173_v11 = vld [vmem:[#allocation24 + $0x360] sm:$0xf0] }
 0x816   :  { %1743 = vadd.xlane.f32.xlu2 %v1740_v52  ;;  %v11164_v52 = vor.u32 %v13199_v10, %v11163_v6  ;;  %v11032_v36 = vor.u32 %v13158_v29, %v11029_v30  ;;  %v13110_v6 = vld [vmem:[#allocation24 + $0x94] sm:$0xf]  ;;  %v13103_v26 = vld [vmem:[#allocation24 + $0x54] sm:$0xf0]  ;;  %v10781_v29 = vld [vmem:[#allocation24 + $0x58] sm:$0xf0] }
 0x817   :  { %v10837_v10 = vld [vmem:[#allocation24 + $0xd0] sm:$0xf0]  ;;  %v10780_v27 = vor.u32 %v13103_v26, %v10779_v22  ;;  %v10784_v30 = vor.u32 %v13095_v33, %v10781_v29  ;;  %v11179_v13 = vld [vmem:[#allocation24 + $0x328] sm:$0xf] }
 0x818   :  { %2671 = vmatpush.bf16.msrb.mxu3 %v11164_v52  ;;  %2659 = vmatpush.bf16.msra.mxu2 %v11032_v36  ;;  %v10840_v16 = vor.u32 %v13110_v6, %v10837_v10  ;;  %v13192_v10 = vld [vmem:[#allocation24 + $0x324] sm:$0xf]  ;;  %v11115_v22 = vld [vmem:[#allocation24 + $0x2a8] sm:$0xf] }
 0x819   :  { %2593 = vmatpush.bf16.msrb.mxu0 %v10756_v41  ;;  %2686 = vmatpush.bf16.msrb.mxu1 %v11104_v3  ;;  %v13142_v41 = vld [vmem:[#allocation24 + $0x194] sm:$0xf]  ;;  %v13185_v26 = vld [vmem:[#allocation24 + $0x2e4] sm:$0xf0] }
 0x81a   :  { %v10968_v37 = vor.u32 %v13142_v41, %v10965_v44 }
 0x81c   :  { %2672 = vmatpush.bf16.msrb.mxu3 %v11100_v21  ;;  %2660 = vmatpush.bf16.msra.mxu2 %v10968_v37  ;;  %v10773_v21 = vld [vmem:[#allocation24 + $0x50] sm:$0xf0]  ;;  %v13819_v37 = vld [vmem:[#allocation21] ss:$0 sm:$0xff] }
 0x81d   :  { %2642 = vmatpush.bf16.msra.mxu0 %v11220_v51  ;;  %2687 = vmatpush.bf16.msrb.mxu1 %v11040_v39  ;;  %v10900_v51 = vor.u32 %v13134_v50, %v10899_v49  ;;  %v10776_v3 = vor.u32 %v13094_v32, %v10773_v21  ;;  %v11109_v21 = vld [vmem:[#allocation24 + $0x2e0] sm:$0xf0] }
 0x820   :  { %2673 = vmatpush.bf16.msrb.mxu3 %v11036_v38  ;;  %2661 = vmatpush.bf16.msra.mxu2 %v10904_v58  ;;  %v11243_v58 = vld [vmem:[#allocation24 + $0x3a8] sm:$0xf] }
 0x821   :  { %2643 = vmatpush.bf16.msra.mxu0 %v11156_v63  ;;  %2688 = vmatpush.bf16.msrb.mxu1 %v10976_v48  ;;  %v13820_v48 = vld [vmem:[#allocation23] ss:$0 sm:$0xff]  ;;  %v11244_v6 = vor.u32 %v13217_v62, %v11243_v58  ;;  %v13128_v58 = vld [vmem:[#allocation24 + $0x124] sm:$0xf] }
 0x822   :  { %v10917_v62 = vld [vmem:[#allocation24 + $0x160] sm:$0xf0] }
 0x824   :  { %2674 = vmatpush.bf16.msrb.mxu3 %v10972_v43  ;;  %2662 = vmatpush.bf16.msra.mxu2 %v10840_v16  ;;  %v13193_v16 = vld [vmem:[#allocation24 + $0x32c] sm:$0xf] }
 0x825   :  { %2644 = vmatpush.bf16.msra.mxu0 %v11092_v19  ;;  %2689 = vmatpush.bf16.msrb.mxu1 %v10912_v2  ;;  %v10848_v19 = vor.u32 %v13111_v28, %v10845_v17  ;;  %v11176_v17 = vor.u32 %v13192_v10, %v11173_v11 }
 0x828   :  { %2675 = vmatpush.bf16.msrb.mxu3 %v10908_v59  ;;  %2663 = vmatpush.bf16.msra.mxu2 %v10776_v3  ;;  %v13177_v3 = vld [vmem:[#allocation24 + $0x2ac] sm:$0xf] }
 0x829   :  { %2645 = vmatpush.bf16.msra.mxu0 %v11028_v14  ;;  %2690 = vmatpush.bf16.msrb.mxu1 %v10848_v19  ;;  %v11107_v19 = vld [vmem:[#allocation24 + $0x2a0] sm:$0xf] }
 0x82a   :  { %v11108_v33 = vor.u32 %v13184_v12, %v11107_v19  ;;  %v10787_v19 = vld [vmem:[#allocation24 + $0x20] sm:$0xf] }
 0x82c   :  { %2676 = vmatpush.bf16.msrb.mxu3 %v10844_v0  ;;  %v11181_v0 = vld [vmem:[#allocation24 + $0x368] sm:$0xf0] }
 0x82d   :  { %2646 = vmatpush.bf16.msra.mxu0 %v10964_v24  ;;  %2691 = vmatpush.bf16.msrb.mxu1 %v10784_v30  ;;  %v11184_v32 = vor.u32 %v13193_v16, %v11181_v0  ;;  %v13168_v30 = vld [vmem:[#allocation24 + $0x25c] sm:$0xf0]  ;;  %v10859_v16 = vld [vmem:[#allocation24 + $0xa8] sm:$0xf] }
 0x82e   :  { %v13121_v0 = vld [vmem:[#allocation24 + $0xe4] sm:$0xf0] }
 0x830   :  { %2677 = vmatpush.bf16.msrb.mxu3 %v10780_v27  ;;  %v11117_v27 = vld [vmem:[#allocation24 + $0x2e8] sm:$0xf0] }
 0x831   :  { %2647 = vmatpush.bf16.msra.mxu0 %v10900_v51  ;;  %v11235_v51 = vld [vmem:[#allocation24 + $0x3a0] sm:$0xf] }
 0x835   :  { %2648 = vmatpush.bf16.msra.mxu0 %v10836_v8 }
 0x839   :  { %2649 = vmatpush.bf16.msra.mxu0 %v10772_v7  ;;  %v13176_v7 = vld [vmem:[#allocation24 + $0x2a4] sm:$0xf] }
 0x83a   :  { %v11112_v29 = vor.u32 %v13176_v7, %v11109_v21  ;;  %v13096_v7 = vld [vmem:[#allocation24 + $0x24] sm:$0xf] }
 0x83b   :  { %v10789_v21 = vld [vmem:[#allocation24 + $0x60] sm:$0xf0] }
 0x881   :  { %v1742_v56 = vpop.xlane.xlu1 %1741 }
 0x882   :  { %v1745_v63 = vmul.f32 %v1742_v56, %v14867_v25  ;;  %v11245_v56 = vld [vmem:[#allocation24 + $0x3e8] sm:$0xf0] }
 0x884   :  { %v1747_v52 = vadd.f32 1e-05, %v1745_v63  ;;  %v11236_v63 = vor.u32 %v13216_v53, %v11235_v51  ;;  %v10915_v51 = vld [vmem:[#allocation24 + $0x120] sm:$0xf] }
 0x885   :  { %v13136_v53 = vld [vmem:[#allocation24 + $0x15c] sm:$0xf0] }
 0x886   :  { %13902 = vrsqrt.f32 %v1747_v52  ;;  %vm1755_vm5 = vweird.f32 %v1747_v52 }
 0x889   :  { %v1744_v14 = vpop.xlane.xlu2 %1743 }
 0x88a   :  { %v1746_v34 = vmul.f32 %v1744_v14, %v14867_v25  ;;  %v11043_v14 = vld [vmem:[#allocation24 + $0x220] sm:$0xf] }
 0x88c   :  { %v13903_v5 = vpop.eup %13902  ;;  %v1748_v36 = vadd.f32 1e-05, %v1746_v34  ;;  %v11116_v34 = vor.u32 %v13185_v26, %v11115_v22  ;;  %v10860_v22 = vor.u32 %v13121_v0, %v10859_v16  ;;  %v13162_v16 = vld [vmem:[#allocation24 + $0x234] sm:$0xf] }
 0x88d   :  { %v1750_v38 = vmul.f32 %v13903_v5, %v1747_v52  ;;  %vm1756_vm4 = vweird.f32 %v13903_v5  ;;  %v13201_v52 = vld [vmem:[#allocation24 + $0x364] sm:$0xf0]  ;;  %v11061_v0 = vld [vmem:[#allocation24 + $0x270] sm:$0xf0] }
 0x88e   :  { %13904 = vrsqrt.f32 %v1748_v36  ;;  %vm1757_vm6 = vmor %vm1755_vm5, %vm1756_vm4  ;;  %vm1765_vm8 = vweird.f32 %v1748_v36  ;;  %v11180_v20 = vor.u32 %v13201_v52, %v11179_v13  ;;  %v13112_v13 = vld [vmem:[#allocation24 + $0xa4] sm:$0xf] }
 0x88f   :  { %v1751_v35 = vmul.f32 %v13903_v5, %v1750_v38  ;;  %v11045_v38 = vld [vmem:[#allocation24 + $0x260] sm:$0xf0] }
 0x890   :  { %v10853_v52 = vld [vmem:[#allocation24 + $0xe0] sm:$0xf0] }
 0x891   :  { %v1752_v18 = vmul.f32 0.5, %v1751_v35  ;;  %v11051_v35 = vld [vmem:[#allocation24 + $0x228] sm:$0xf] }
 0x893   :  { %v1753_v39 = vsub.f32 1.5, %v1752_v18  ;;  %v13169_v18 = vld [vmem:[#allocation24 + $0x264] sm:$0xf0] }
 0x894   :  { %v13905_v31 = vpop.eup %13904 }
 0x895   :  { %v1754_v40 = vmul.f32 %v13903_v5, %v1753_v39  ;;  %v1760_v41 = vmul.f32 %v13905_v31, %v1748_v36  ;;  %vm1766_vm7 = vweird.f32 %v13905_v31  ;;  %v13160_v36 = vld [vmem:[#allocation24 + $0x224] sm:$0xf]  ;;  %v13161_v39 = vld [vmem:[#allocation24 + $0x22c] sm:$0xf] }
 0x896   :  { %vm1767_vm9 = vmor %vm1765_vm8, %vm1766_vm7 }
 0x897   :  { %v1761_v24 = vmul.f32 %v13905_v31, %v1760_v41  ;;  %v1758_v44 = vsel %vm1757_vm6, %v13903_v5, %v1754_v40  ;;  %v11120_v5 = vor.u32 %v13177_v3, %v11117_v27  ;;  %v11044_v40 = vor.u32 %v13168_v30, %v11043_v14  ;;  %v10795_v3 = vld [vmem:[#allocation24 + $0x28] sm:$0xf]  ;;  %v11251_v14 = vld [vmem:[#allocation24 + $0x3b0] sm:$0xf] }
 0x898   :  { %v1769_v43 = vmul.f32 %v1758_v44, %v15238_v9  ;;  %v13209_v9 = vld [vmem:[#allocation24 + $0x3ac] sm:$0xf]  ;;  %v11048_v41 = vor.u32 %v13160_v36, %v11045_v38  ;;  %v13152_v44 = vld [vmem:[#allocation24 + $0x1dc] sm:$0xf0]  ;;  %v13105_v27 = vld [vmem:[#allocation24 + $0x64] sm:$0xf0] }
 0x899   :  { %v1762_v23 = vmul.f32 0.5, %v1761_v24  ;;  %v11248_v8 = vor.u32 %v13209_v9, %v11245_v56  ;;  %v10979_v24 = vld [vmem:[#allocation24 + $0x1a0] sm:$0xf]  ;;  %v10923_v9 = vld [vmem:[#allocation24 + $0x128] sm:$0xf] }
 0x89a   :  { %v1774_v49 = vmul.f32 %v13819_v37, %v1769_v43  ;;  %v10981_v43 = vld [vmem:[#allocation24 + $0x1e0] sm:$0xf0]  ;;  %v13137_v56 = vld [vmem:[#allocation24 + $0x164] sm:$0xf0]  ;;  %v13218_v30 = vld [vmem:[#allocation24 + $0x3ec] sm:$0xf0] }
 0x89b   :  { %v1763_v46 = vsub.f32 1.5, %v1762_v23  ;;  %v11052_v23 = vor.u32 %v13169_v18, %v11051_v35  ;;  %v10924_v10 = vor.u32 %v13137_v56, %v10923_v9  ;;  %v11259_v36 = vld [vmem:[#allocation24 + $0x3b8] sm:$0xf]  ;;  %v10792_v35 = vor.u32 %v13096_v7, %v10789_v21  ;;  %v13178_v9 = vld [vmem:[#allocation24 + $0x2b4] sm:$0xf] }
 0x89c   :  { %v15252_v59 = vadd.f32 %v13820_v48, %v1774_v49  ;;  %v10989_v49 = vld [vmem:[#allocation24 + $0x1e8] sm:$0xf0]  ;;  %v13219_v18 = vld [vmem:[#allocation24 + $0x3f4] sm:$0xf0]  ;;  %v11125_v56 = vld [vmem:[#allocation24 + $0x2f0] sm:$0xf0] }
 0x89d   :  { %v1764_v45 = vmul.f32 %v13905_v31, %v1763_v46  ;;  %v10995_v7 = vld [vmem:[#allocation24 + $0x1b0] sm:$0xf] }
 0x89e   :  { %19387 = vst [vmem:[#allocation46_spill] sm:$0xff] %v15252_v59  ;;  %v13154_v21 = vld [vmem:[#allocation24 + $0x1ec] sm:$0xf0] }
 0x89f   :  { %v1768_v47 = vsel %vm1767_vm9, %v13905_v31, %v1764_v45  ;;  %v11053_v31 = vld [vmem:[#allocation24 + $0x268] sm:$0xf0]  ;;  %v10987_v45 = vld [vmem:[#allocation24 + $0x1a8] sm:$0xf] }
 0x8a0   :  { %v1770_v50 = vmul.f32 %v1768_v47, %v15244_v15  ;;  %v11171_v15 = vld [vmem:[#allocation24 + $0x320] sm:$0xf]  ;;  %v11056_v46 = vor.u32 %v13161_v39, %v11053_v31  ;;  %v13153_v47 = vld [vmem:[#allocation24 + $0x1e4] sm:$0xf0]  ;;  %v13211_v39 = vld [vmem:[#allocation24 + $0x3bc] sm:$0xf] }
 0x8a1   :  { %v11172_v28 = vor.u32 %v13200_v4, %v11171_v15  ;;  %v10988_v55 = vor.u32 %v13153_v47, %v10987_v45  ;;  %v10916_v15 = vor.u32 %v13136_v53, %v10915_v51  ;;  %v10920_v4 = vor.u32 %v13128_v58, %v10917_v62  ;;  %v11261_v31 = vld [vmem:[#allocation24 + $0x3f8] sm:$0xf0]  ;;  %v13194_v45 = vld [vmem:[#allocation24 + $0x334] sm:$0xf] }
 0x8a2   :  { %v1775_v42 = vmul.f32 %v13819_v37, %v1770_v50  ;;  %v13144_v37 = vld [vmem:[#allocation24 + $0x1a4] sm:$0xf]  ;;  %v10980_v50 = vor.u32 %v13152_v44, %v10979_v24  ;;  %v11252_v24 = vor.u32 %v13218_v30, %v11251_v14  ;;  %v11189_v47 = vld [vmem:[#allocation24 + $0x370] sm:$0xf0]  ;;  %v13147_v14 = vld [vmem:[#allocation24 + $0x1bc] sm:$0xf] }
 0x8a3   :  { %v11192_v53 = vor.u32 %v13194_v45, %v11189_v47  ;;  %v11005_v30 = vld [vmem:[#allocation24 + $0x1f8] sm:$0xf0] }
 0x8a4   :  { %v15254_v61 = vadd.f32 %v13820_v48, %v1775_v42  ;;  %v13145_v48 = vld [vmem:[#allocation24 + $0x1ac] sm:$0xf]  ;;  %v10984_v42 = vor.u32 %v13144_v37, %v10981_v43  ;;  %v11260_v37 = vor.u32 %v13219_v18, %v11259_v36  ;;  %v11264_v43 = vor.u32 %v13211_v39, %v11261_v31  ;;  %v10931_v36 = vld [vmem:[#allocation24 + $0x130] sm:$0xf]  ;;  %v13130_v39 = vld [vmem:[#allocation24 + $0x134] sm:$0xf] }
 0x8a5   :  { %v10992_v57 = vor.u32 %v13145_v48, %v10989_v49  ;;  %v11195_v48 = vld [vmem:[#allocation24 + $0x338] sm:$0xf]  ;;  %v11008_v18 = vor.u32 %v13147_v14, %v11005_v30  ;;  %v10933_v31 = vld [vmem:[#allocation24 + $0x170] sm:$0xf0] }
 0x8a6   :  { %19388 = vst [vmem:[#allocation47_spill] sm:$0xff] %v15254_v61  ;;  %v15258_v2 = vpack.c.bf16 %v15254_v61, %v15252_v59  ;;  %v13203_v49 = vld [vmem:[#allocation24 + $0x374] sm:$0xf0] }
 0x8a7   :  { %v11196_v58 = vor.u32 %v13203_v49, %v11195_v48  ;;  %v13114_v48 = vld [vmem:[#allocation24 + $0xb4] sm:$0xf]  ;;  %v13275_v61 = vld [vmem:[#allocation26 + $0x1b8] sm:$0xff] }
 0x8a8   :  { %2594 = vmatmul.bf16.vlgmr.msrb.gmra.mxu0 %v15258_v2  ;;  %2608 = vmatmul.bf16.vlgmr.msrb.gmra.mxu2 %v15258_v2  ;;  %v10869_v49 = vld [vmem:[#allocation24 + $0xf0] sm:$0xf0] }
 0x8a9   :  { %2622 = vmatmul.bf16.vlgmr.msra.gmra.mxu3 %v15258_v2  ;;  %2636 = vmatmul.bf16.vlgmr.msra.gmra.mxu1 %v15258_v2 }
 0x8aa   :  { %2698 = vmatpush.bf16.msrb.mxu0 %v11236_v63  ;;  %2712 = vmatpush.bf16.msrb.mxu2 %v11240_v1  ;;  %v13129_v63 = vld [vmem:[#allocation24 + $0x12c] sm:$0xf] }
 0x8ab   :  { %2726 = vmatpush.bf16.msra.mxu3 %v11244_v6  ;;  %2740 = vmatpush.bf16.msra.mxu1 %v11248_v8  ;;  %v10925_v1 = vld [vmem:[#allocation24 + $0x168] sm:$0xf0]  ;;  %v10851_v6 = vld [vmem:[#allocation24 + $0xa0] sm:$0xf] }
 0x8ac   :  { %v13120_v8 = vld [vmem:[#allocation24 + $0xdc] sm:$0xf0]  ;;  %v10928_v11 = vor.u32 %v13129_v63, %v10925_v1  ;;  %v11131_v63 = vld [vmem:[#allocation24 + $0x2b8] sm:$0xf] }
 0x8ad   :  { %v10852_v12 = vor.u32 %v13120_v8, %v10851_v6  ;;  %v13187_v1 = vld [vmem:[#allocation24 + $0x2f4] sm:$0xf0]  ;;  %v11128_v8 = vor.u32 %v13178_v9, %v11125_v56 }
 0x8ae   :  { %2699 = vmatpush.bf16.msrb.mxu0 %v11172_v28  ;;  %2713 = vmatpush.bf16.msrb.mxu2 %v11176_v17  ;;  %v13113_v28 = vld [vmem:[#allocation24 + $0xac] sm:$0xf] }
 0x8af   :  { %2727 = vmatpush.bf16.msra.mxu3 %v11180_v20  ;;  %2741 = vmatpush.bf16.msra.mxu1 %v11184_v32  ;;  %v10861_v17 = vld [vmem:[#allocation24 + $0xe8] sm:$0xf0]  ;;  %v10856_v20 = vor.u32 %v13112_v13, %v10853_v52  ;;  %v13104_v32 = vld [vmem:[#allocation24 + $0x5c] sm:$0xf0]  ;;  %v11132_v13 = vor.u32 %v13187_v1, %v11131_v63  ;;  %v13098_v63 = vld [vmem:[#allocation24 + $0x34] sm:$0xf] }
 0x8b0   :  { %v10864_v26 = vor.u32 %v13113_v28, %v10861_v17  ;;  %v10788_v38 = vor.u32 %v13104_v32, %v10787_v19  ;;  %v11067_v28 = vld [vmem:[#allocation24 + $0x238] sm:$0xf]  ;;  %v13163_v19 = vld [vmem:[#allocation24 + $0x23c] sm:$0xf]  ;;  %v11064_v32 = vor.u32 %v13162_v16, %v11061_v0  ;;  %v10805_v1 = vld [vmem:[#allocation24 + $0x70] sm:$0xf0] }
 0x8b1   :  { %v13171_v17 = vld [vmem:[#allocation24 + $0x274] sm:$0xf0] }
 0x8b2   :  { %2700 = vmatpush.bf16.msrb.mxu0 %v11108_v33  ;;  %2714 = vmatpush.bf16.msrb.mxu2 %v11112_v29  ;;  %v13097_v33 = vld [vmem:[#allocation24 + $0x2c] sm:$0xf]  ;;  %v13227_v16 = vld [vmem:[#allocation26 + $0x38] sm:$0xff] }
 0x8b3   :  { %2728 = vmatpush.bf16.msra.mxu3 %v11116_v34  ;;  %2742 = vmatpush.bf16.msra.mxu1 %v11120_v5  ;;  %v10797_v29 = vld [vmem:[#allocation24 + $0x68] sm:$0xf0]  ;;  %v13210_v34 = vld [vmem:[#allocation24 + $0x3b4] sm:$0xf]  ;;  %v13251_v0 = vld [vmem:[#allocation26 + $0xf8] sm:$0xff] }
 0x8b4   :  { %v11253_v5 = vld [vmem:[#allocation24 + $0x3f0] sm:$0xf0] }
 0x8b5   :  { %v11256_v44 = vor.u32 %v13210_v34, %v11253_v5  ;;  %v10996_v34 = vor.u32 %v13154_v21, %v10995_v7 }
 0x8b6   :  { %2701 = vmatpush.bf16.msrb.mxu0 %v11044_v40  ;;  %2715 = vmatpush.bf16.msrb.mxu2 %v11048_v41  ;;  %v10796_v40 = vor.u32 %v13105_v27, %v10795_v3  ;;  %v10800_v41 = vor.u32 %v13097_v33, %v10797_v29  ;;  %v13146_v3 = vld [vmem:[#allocation24 + $0x1b4] sm:$0xf]  ;;  %v11003_v33 = vld [vmem:[#allocation24 + $0x1b8] sm:$0xf] }
 0x8b7   :  { %2729 = vmatpush.bf16.msra.mxu3 %v11052_v23  ;;  %2743 = vmatpush.bf16.msra.mxu1 %v11056_v46  ;;  %v11187_v23 = vld [vmem:[#allocation24 + $0x330] sm:$0xf]  ;;  %v10997_v27 = vld [vmem:[#allocation24 + $0x1f0] sm:$0xf0]  ;;  %v13155_v29 = vld [vmem:[#allocation24 + $0x1f4] sm:$0xf0] }
 0x8b8   :  { %2650 = vmatmul.bf16.vlgmr.msra.gmra.mxu0 %v15258_v2  ;;  %2664 = vmatmul.bf16.vlgmr.msra.gmra.mxu2 %v15258_v2  ;;  %v13202_v46 = vld [vmem:[#allocation24 + $0x36c] sm:$0xf0]  ;;  %v11000_v5 = vor.u32 %v13146_v3, %v10997_v27 }
 0x8b9   :  { %2678 = vmatmul.bf16.vlgmr.msrb.gmra.mxu3 %v15258_v2  ;;  %2692 = vmatmul.bf16.vlgmr.msrb.gmra.mxu1 %v15258_v2  ;;  %v11188_v51 = vor.u32 %v13202_v46, %v11187_v23  ;;  %v10936_v46 = vor.u32 %v13130_v39, %v10933_v31 }
 0x8ba   :  { %2702 = vmatpush.bf16.msrb.mxu0 %v10980_v50  ;;  %2716 = vmatpush.bf16.msrb.mxu2 %v10984_v42  ;;  %v13195_v50 = vld [vmem:[#allocation24 + $0x33c] sm:$0xf] }
 0x8bb   :  { %2730 = vmatpush.bf16.msra.mxu3 %v10988_v55  ;;  %2744 = vmatpush.bf16.msra.mxu1 %v10992_v57  ;;  %v11197_v42 = vld [vmem:[#allocation24 + $0x378] sm:$0xf0]  ;;  %v11123_v55 = vld [vmem:[#allocation24 + $0x2b0] sm:$0xf] }
 0x8bc   :  { %v13186_v57 = vld [vmem:[#allocation24 + $0x2ec] sm:$0xf0]  ;;  %v11200_v62 = vor.u32 %v13195_v50, %v11197_v42  ;;  %v10875_v50 = vld [vmem:[#allocation24 + $0xb8] sm:$0xf] }
 0x8bd   :  { %v11124_v6 = vor.u32 %v13186_v57, %v11123_v55  ;;  %v13123_v42 = vld [vmem:[#allocation24 + $0xf4] sm:$0xf0]  ;;  %v10872_v57 = vor.u32 %v13114_v48, %v10869_v49 }
 0x8be   :  { %2703 = vmatpush.bf16.msrb.mxu0 %v10916_v15  ;;  %2717 = vmatpush.bf16.msrb.mxu2 %v10920_v4  ;;  %v13179_v15 = vld [vmem:[#allocation24 + $0x2bc] sm:$0xf]  ;;  %v10876_v9 = vor.u32 %v13123_v42, %v10875_v50 }
 0x8bf   :  { %2731 = vmatpush.bf16.msra.mxu3 %v10924_v10  ;;  %2745 = vmatpush.bf16.msra.mxu1 %v10928_v11  ;;  %v11133_v4 = vld [vmem:[#allocation24 + $0x2f8] sm:$0xf0]  ;;  %v11059_v10 = vld [vmem:[#allocation24 + $0x230] sm:$0xf] }
 0x8c0   :  { %v13170_v11 = vld [vmem:[#allocation24 + $0x26c] sm:$0xf0]  ;;  %v11136_v52 = vor.u32 %v13179_v15, %v11133_v4  ;;  %v10811_v15 = vld [vmem:[#allocation24 + $0x38] sm:$0xf] }
 0x8c1   :  { %v13107_v4 = vld [vmem:[#allocation24 + $0x74] sm:$0xf0] }
 0x8c2   :  { %2704 = vmatpush.bf16.msrb.mxu0 %v10852_v12  ;;  %2718 = vmatpush.bf16.msrb.mxu2 %v10856_v20  ;;  %v11069_v12 = vld [vmem:[#allocation24 + $0x278] sm:$0xf0]  ;;  %v11060_v20 = vor.u32 %v13170_v11, %v11059_v10  ;;  %v10808_v11 = vor.u32 %v13098_v63, %v10805_v1 }
 0x8c3   :  { %2732 = vmatpush.bf16.msra.mxu3 %v10860_v22  ;;  %2746 = vmatpush.bf16.msra.mxu1 %v10864_v26  ;;  %v11068_v22 = vor.u32 %v13171_v17, %v11067_v28  ;;  %v11072_v26 = vor.u32 %v13163_v19, %v11069_v12  ;;  %v15279_v28 = vld [vmem:[%s19316_s18] sm:$0xff] }
 0x8c4   :  { %v1914_v17 = vperm.slane %v15279_v28, 0  ;;  %v1917_v19 = vperm.slane %v15279_v28, 3  ;;  %v1915_v21 = vperm.slane %v15279_v28, 1  ;;  %v13243_v48 = vld [vmem:[#allocation26 + $0xb8] sm:$0xff] }
 0x8c6   :  { %2705 = vmatpush.bf16.msrb.mxu0 %v10788_v38  ;;  %2719 = vmatpush.bf16.msrb.mxu2 %v10792_v35  ;;  %v13138_v38 = vld [vmem:[#allocation24 + $0x16c] sm:$0xf0]  ;;  %v11004_v35 = vor.u32 %v13155_v29, %v11003_v33 }
 0x8c7   :  { %2733 = vmatpush.bf16.msra.mxu3 %v10796_v40  ;;  %2747 = vmatpush.bf16.msra.mxu1 %v10800_v41  ;;  %v10939_v40 = vld [vmem:[#allocation24 + $0x138] sm:$0xf]  ;;  %v10932_v23 = vor.u32 %v13138_v38, %v10931_v36 }
 0x8c8   :  { %v13139_v41 = vld [vmem:[#allocation24 + $0x174] sm:$0xf0] }
 0x8c9   :  { %2706 = vmatmul.bf16.vlgmr.msrb.gmra.mxu0 %v15258_v2  ;;  %2720 = vmatmul.bf16.vlgmr.msrb.gmra.mxu2 %v15258_v2  ;;  %v10940_v45 = vor.u32 %v13139_v41, %v10939_v40 }
 0x8ca   :  { %2754 = vmatpush.bf16.msra.mxu0 %v11252_v24  ;;  %2768 = vmatpush.bf16.msra.mxu2 %v11256_v44  ;;  %v13131_v24 = vld [vmem:[#allocation24 + $0x13c] sm:$0xf] }
 0x8cb   :  { %2782 = vmatpush.bf16.msrb.mxu3 %v11260_v37  ;;  %2796 = vmatpush.bf16.msrb.mxu1 %v11264_v43  ;;  %v10941_v44 = vld [vmem:[#allocation24 + $0x178] sm:$0xf0]  ;;  %v10867_v37 = vld [vmem:[#allocation24 + $0xb0] sm:$0xf] }
 0x8cc   :  { %2734 = vmatmul.bf16.vlgmr.msra.gmra.mxu3 %v15258_v2  ;;  %2748 = vmatmul.bf16.vlgmr.msra.gmra.mxu1 %v15258_v2  ;;  %v13122_v43 = vld [vmem:[#allocation24 + $0xec] sm:$0xf0]  ;;  %v10944_v47 = vor.u32 %v13131_v24, %v10941_v44 }
 0x8cd   :  { %v10868_v55 = vor.u32 %v13122_v43, %v10867_v37  ;;  %v13226_v44 = vld [vmem:[#allocation26 + $0x30] sm:$0xff] }
 0x8ce   :  { %2755 = vmatpush.bf16.msra.mxu0 %v11188_v51  ;;  %2769 = vmatpush.bf16.msra.mxu2 %v11192_v53  ;;  %v13115_v51 = vld [vmem:[#allocation24 + $0xbc] sm:$0xf] }
 0x8cf   :  { %2783 = vmatpush.bf16.msrb.mxu3 %v11196_v58  ;;  %2797 = vmatpush.bf16.msrb.mxu1 %v11200_v62  ;;  %v10877_v53 = vld [vmem:[#allocation24 + $0xf8] sm:$0xf0]  ;;  %v10803_v58 = vld [vmem:[#allocation24 + $0x30] sm:$0xf] }
 0x8d0   :  { %v13106_v62 = vld [vmem:[#allocation24 + $0x6c] sm:$0xf0]  ;;  %v10880_v56 = vor.u32 %v13115_v51, %v10877_v53 }
 0x8d1   :  { %v10804_v10 = vor.u32 %v13106_v62, %v10803_v58 }
 0x8d2   :  { %2756 = vmatpush.bf16.msra.mxu0 %v11124_v6  ;;  %2770 = vmatpush.bf16.msra.mxu2 %v11128_v8  ;;  %v13099_v6 = vld [vmem:[#allocation24 + $0x3c] sm:$0xf] }
 0x8d3   :  { %2784 = vmatpush.bf16.msrb.mxu3 %v11132_v13  ;;  %2798 = vmatpush.bf16.msrb.mxu1 %v11136_v52  ;;  %v10813_v8 = vld [vmem:[#allocation24 + $0x78] sm:$0xf0]  ;;  %v10812_v13 = vor.u32 %v13107_v4, %v10811_v15 }
 0x8d4   :  { %v10816_v52 = vor.u32 %v13099_v6, %v10813_v8 }
 0x8d6   :  { %2757 = vmatpush.bf16.msra.mxu0 %v11060_v20  ;;  %2771 = vmatpush.bf16.msra.mxu2 %v11064_v32 }
 0x8d7   :  { %2785 = vmatpush.bf16.msrb.mxu3 %v11068_v22  ;;  %2799 = vmatpush.bf16.msrb.mxu1 %v11072_v26  ;;  %v1916_v26 = vperm.slane %v15279_v28, 2 }
 0x8da   :  { %2758 = vmatpush.bf16.msra.mxu0 %v10996_v34  ;;  %2772 = vmatpush.bf16.msra.mxu2 %v11000_v5 }
 0x8db   :  { %2786 = vmatpush.bf16.msrb.mxu3 %v11004_v35  ;;  %2800 = vmatpush.bf16.msrb.mxu1 %v11008_v18 }
 0x8de   :  { %2759 = vmatpush.bf16.msra.mxu0 %v10932_v23  ;;  %2773 = vmatpush.bf16.msra.mxu2 %v10936_v46  ;;  %v13250_v23 = vld [vmem:[#allocation26 + $0xf0] sm:$0xff]  ;;  %v13235_v46 = vld [vmem:[#allocation26 + $0x78] sm:$0xff] }
 0x8df   :  { %2787 = vmatpush.bf16.msrb.mxu3 %v10940_v45  ;;  %2801 = vmatpush.bf16.msrb.mxu1 %v10944_v47 }
 0x8e2   :  { %2760 = vmatpush.bf16.msra.mxu0 %v10868_v55  ;;  %2774 = vmatpush.bf16.msra.mxu2 %v10872_v57 }
 0x8e3   :  { %2788 = vmatpush.bf16.msrb.mxu3 %v10876_v9  ;;  %2802 = vmatpush.bf16.msrb.mxu1 %v10880_v56 }
 0x8e6   :  { %2761 = vmatpush.bf16.msra.mxu0 %v10804_v10  ;;  %2775 = vmatpush.bf16.msra.mxu2 %v10808_v11 }
 0x8e7   :  { %2789 = vmatpush.bf16.msrb.mxu3 %v10812_v13  ;;  %2803 = vmatpush.bf16.msrb.mxu1 %v10816_v52 }
 0x8e9   :  { %2762 = vmatmul.bf16.vlgmr.msra.gmra.mxu0 %v15258_v2  ;;  %2776 = vmatmul.bf16.vlgmr.msra.gmra.mxu2 %v15258_v2 }
 0x8ea   :  { %2790 = vmatmul.bf16.vlgmr.msrb.gmra.mxu3 %v15258_v2  ;;  %2804 = vmatmul.bf16.vlgmr.msrb.gmra.mxu1 %v15258_v2 }
 0x8eb   :  { %5262 = vmatpush.bf16.msrb.mxu0 %v13227_v16  ;;  %5304 = vmatpush.bf16.msra.mxu1 %v13251_v0 }
 0x8ec   :  { %5276 = vmatpush.bf16.msrb.mxu2 %v13235_v46  ;;  %5290 = vmatpush.bf16.msra.mxu3 %v13243_v48 }
 0x8ef   :  { %5263 = vmatpush.bf16.msrb.mxu0 %v13226_v44  ;;  %5305 = vmatpush.bf16.msra.mxu1 %v13250_v23 }
 0x925   :  { %v2595_v12 = vpop.f32.mrf.mxu0 }
 0x926   :  { %v15283_v20 = vadd.f32 %v2595_v12, %v1914_v17  ;;  %v2637_v32 = vpop.f32.mrf.mxu1 }
 0x927   :  { %v15287_v2 = vadd.f32 %v2637_v32, %v1917_v19 }
 0x928   :  { %v15290_v7 = vmul.f32 0.70710677, %v15283_v20 }
 0x929   :  { %v15294_v22 = vmul.f32 0.70710677, %v15287_v2 }
 0x92a   :  { %v2874_v3 = vmul.f32 %v15290_v7, %v15290_v7 }
 0x92b   :  { %v2994_v27 = vmul.f32 %v15294_v22, %v15294_v22  ;;  %v2609_v33 = vpop.f32.mrf.mxu2 }
 0x92c   :  { %v15301_v29 = vmin.f32 %v2874_v3, 16.0  ;;  %v15305_v14 = vadd.f32 %v2609_v33, %v1915_v21  ;;  %v2623_v30 = vpop.f32.mrf.mxu3 }
 0x92d   :  { %v15307_v34 = vmin.f32 %v2994_v27, 16.0  ;;  %v15311_v5 = vadd.f32 %v2623_v30, %v1916_v26  ;;  %v2597_v51 = vpop.f32.mrf.mxu0 }
 0x92e   :  { %v2887_v36 = vmul.f32 3.8918573e-05, %v15301_v29  ;;  %v15316_v35 = vmul.f32 0.70710677, %v15305_v14  ;;  %v2876_v39 = vmul.f32 2.1237322e-06, %v15301_v29  ;;  %v15336_v63 = vadd.f32 %v2597_v51, %v1914_v17 }
 0x92f   :  { %v3007_v38 = vmul.f32 3.8918573e-05, %v15307_v34  ;;  %v15322_v41 = vmul.f32 0.70710677, %v15311_v5  ;;  %v2996_v37 = vmul.f32 2.1237322e-06, %v15307_v34 }
 0x930   :  { %v2888_v18 = vadd.f32 0.001143296, %v2887_v36  ;;  %v2914_v40 = vmul.f32 %v15316_v35, %v15316_v35  ;;  %v2877_v50 = vadd.f32 0.00028619796, %v2876_v39  ;;  %v15344_v13 = vmul.f32 0.70710677, %v15336_v63  ;;  %v2639_v39 = vpop.f32.mrf.mxu1 }
 0x931   :  { %v3008_v31 = vadd.f32 0.001143296, %v3007_v38  ;;  %v2954_v47 = vmul.f32 %v15322_v41, %v15322_v41  ;;  %v2997_v58 = vadd.f32 0.00028619796, %v2996_v37 }
 0x932   :  { %v2889_v24 = vmul.f32 %v2888_v18, %v15301_v29  ;;  %v15327_v45 = vmin.f32 %v2914_v40, 16.0  ;;  %v2878_v1 = vmul.f32 %v2877_v50, %v15301_v29  ;;  %v3514_v27 = vmul.f32 %v15344_v13, %v15344_v13  ;;  %v13249_v50 = vld [vmem:[#allocation26 + $0xe8] sm:$0xff] }
 0x933   :  { %v3009_v43 = vmul.f32 %v3008_v31, %v15307_v34  ;;  %v15333_v57 = vmin.f32 %v2954_v47, 16.0  ;;  %v2998_v10 = vmul.f32 %v2997_v58, %v15307_v34  ;;  %v13225_v47 = vld [vmem:[#allocation26 + $0x28] sm:$0xff]  ;;  %5306 = vmatpush.bf16.msra.mxu1 %v13249_v50 }
 0x934   :  { %v2890_v49 = vadd.f32 0.014752088, %v2889_v24  ;;  %v2927_v55 = vmul.f32 3.8918573e-05, %v15327_v45  ;;  %v2879_v52 = vadd.f32 0.0036580483, %v2878_v1  ;;  %5264 = vmatpush.bf16.msrb.mxu0 %v13225_v47 }
 0x935   :  { %v3010_v42 = vadd.f32 0.014752088, %v3009_v43  ;;  %v2967_v6 = vmul.f32 3.8918573e-05, %v15333_v57  ;;  %v2916_v16 = vmul.f32 2.1237322e-06, %v15327_v45  ;;  %v2640_v43 = vadd.f32 %v2639_v39, %v1917_v19  ;;  %v2611_v39 = vpop.f32.mrf.mxu2 }
 0x936   :  { %v2891_v53 = vmul.f32 %v2890_v49, %v15301_v29  ;;  %v2928_v56 = vadd.f32 0.001143296, %v2927_v55  ;;  %v2999_v3 = vadd.f32 0.0036580483, %v2998_v10  ;;  %v2880_v33 = vmul.f32 %v2879_v52, %v15301_v29 }
 0x937   :  { %v3011_v62 = vmul.f32 %v3010_v42, %v15307_v34  ;;  %v2968_v12 = vadd.f32 0.001143296, %v2967_v6  ;;  %v2917_v30 = vadd.f32 0.00028619796, %v2916_v16  ;;  %v2956_v24 = vmul.f32 2.1237322e-06, %v15333_v57 }
 0x938   :  { %v2892_v9 = vadd.f32 0.112945676, %v2891_v53  ;;  %v2929_v4 = vmul.f32 %v2928_v56, %v15327_v45  ;;  %v3000_v40 = vmul.f32 %v2999_v3, %v15307_v34  ;;  %v15356_v44 = vmin.f32 %v3514_v27, 16.0 }
 0x939   :  { %v3012_v15 = vadd.f32 0.112945676, %v3011_v62  ;;  %v2969_v36 = vmul.f32 %v2968_v12, %v15333_v57  ;;  %v2881_v23 = vadd.f32 0.05243302, %v2880_v33  ;;  %v2918_v46 = vmul.f32 %v2917_v30, %v15327_v45 }
 0x93a   :  { %v2893_v8 = vmul.f32 %v2892_v9, %v15301_v29  ;;  %v2930_v11 = vadd.f32 0.014752088, %v2929_v4  ;;  %v3001_v51 = vadd.f32 0.05243302, %v3000_v40  ;;  %v2957_v55 = vadd.f32 0.00028619796, %v2956_v24 }
 0x93b   :  { %v3013_v0 = vmul.f32 %v3012_v15, %v15307_v34  ;;  %v2970_v37 = vadd.f32 0.014752088, %v2969_v36  ;;  %v3527_v58 = vmul.f32 3.8918573e-05, %v15356_v44  ;;  %v2882_v62 = vmul.f32 %v2881_v23, %v15301_v29 }
 0x93c   :  { %v2931_v17 = vmul.f32 %v2930_v11, %v15327_v45  ;;  %v2894_v32 = vadd.f32 0.4994258, %v2893_v8  ;;  %v2919_v9 = vadd.f32 0.0036580483, %v2918_v46  ;;  %v15368_v19 = vmul.f32 0.70710677, %v2640_v43 }
 0x93d   :  { %v3014_v38 = vadd.f32 0.4994258, %v3013_v0  ;;  %v2971_v53 = vmul.f32 %v2970_v37, %v15333_v57  ;;  %v3002_v4 = vmul.f32 %v3001_v51, %v15307_v34  ;;  %v2958_v6 = vmul.f32 %v2957_v55, %v15333_v57 }
 0x93e   :  { %v2932_v18 = vadd.f32 0.112945676, %v2931_v17  ;;  %v2895_v31 = vmul.f32 %v2894_v32, %v15301_v29  ;;  %v3528_v8 = vadd.f32 0.001143296, %v3527_v58  ;;  %v2883_v10 = vadd.f32 0.18741608, %v2882_v62 }
 0x93f   :  { %v3015_v48 = vmul.f32 %v3014_v38, %v15307_v34  ;;  %v2972_v15 = vadd.f32 0.112945676, %v2971_v53  ;;  %v3634_v11 = vmul.f32 %v15368_v19, %v15368_v19  ;;  %v2920_v52 = vmul.f32 %v2919_v9, %v15327_v45 }
 0x940   :  { %v2933_v49 = vmul.f32 %v2932_v18, %v15327_v45  ;;  %v15363_v42 = vadd.f32 1.0, %v2895_v31  ;;  %v3003_v17 = vadd.f32 0.18741608, %v3002_v4  ;;  %v3529_v12 = vmul.f32 %v3528_v8, %v15356_v44 }
 0x941   :  { %v15370_v56 = vadd.f32 1.0, %v3015_v48  ;;  %v2973_v0 = vmul.f32 %v2972_v15, %v15333_v57  ;;  %v2959_v32 = vadd.f32 0.0036580483, %v2958_v6  ;;  %v2884_v27 = vmul.f32 %v2883_v10, %v15301_v29 }
 0x942   :  { %v2934_v1 = vadd.f32 0.4994258, %v2933_v49  ;;  %13906 = vrcp.f32 %v15363_v42  ;;  %v3530_v33 = vadd.f32 0.014752088, %v3529_v12  ;;  %v15385_v30 = vmin.f32 %v3634_v11, 16.0  ;;  %v13234_v11 = vld [vmem:[#allocation26 + $0x70] sm:$0xff] }
 0x943   :  { %13908 = vrcp.f32 %v15370_v56  ;;  %v2921_v36 = vadd.f32 0.05243302, %v2920_v52  ;;  %v2974_v18 = vadd.f32 0.4994258, %v2973_v0  ;;  %v15390_v31 = vmul.f32 0.5, %v15283_v20  ;;  %v13242_v52 = vld [vmem:[#allocation26 + $0xb0] sm:$0xff]  ;;  %5277 = vmatpush.bf16.msrb.mxu2 %v13234_v11 }
 0x944   :  { %v2935_v16 = vmul.f32 %v2934_v1, %v15327_v45  ;;  %v15393_v40 = vmul.f32 0.5, %v15287_v2  ;;  %v3004_v24 = vmul.f32 %v3003_v17, %v15307_v34  ;;  %v3531_v23 = vmul.f32 %v3530_v33, %v15356_v44  ;;  %5291 = vmatpush.bf16.msra.mxu3 %v13242_v52 }
 0x945   :  { %v15402_v37 = vmul.f32 0.5, %v15305_v14  ;;  %v15405_v47 = vmul.f32 0.5, %v15311_v5  ;;  %v2960_v20 = vmul.f32 %v2959_v32, %v15333_v57  ;;  %v2885_v48 = vadd.f32 1.1283791, %v2884_v27 }
 0x946   :  { %v15387_v38 = vadd.f32 1.0, %v2935_v16  ;;  %v3516_v2 = vmul.f32 2.1237322e-06, %v15356_v44  ;;  %v3647_v34 = vmul.f32 3.8918573e-05, %v15385_v30  ;;  %v15412_v49 = vadd.f32 %v2611_v39, %v1915_v21 }
 0x947   :  { %v2922_v50 = vmul.f32 %v2921_v36, %v15327_v45  ;;  %v2975_v14 = vmul.f32 %v2974_v18, %v15333_v57  ;;  %v3532_v51 = vadd.f32 0.112945676, %v3531_v23  ;;  %v3005_v5 = vadd.f32 1.1283791, %v3004_v24  ;;  %v13224_v18 = vld [vmem:[#allocation26 + $0x20] sm:$0xff] }
 0x948   :  { %v15382_v3 = vpop.eup %13906  ;;  %13910 = vrcp.f32 %v15387_v38  ;;  %v15420_v55 = vmul.f32 0.5, %v15336_v63  ;;  %v15422_v58 = vmul.f32 0.5, %v2640_v43  ;;  %v2906_v21 = vand.u32 2147483647, %v15363_v42  ;;  %5265 = vmatpush.bf16.msrb.mxu0 %v13224_v18 }
 0x949   :  { %v15397_v46 = vpop.eup %13908  ;;  %v2898_v29 = vmul.f32 %v15382_v3, %v15363_v42  ;;  %v2961_v9 = vadd.f32 0.05243302, %v2960_v20  ;;  %v3533_v1 = vmul.f32 %v3532_v51, %v15356_v44  ;;  %v15427_v15 = vmul.f32 %v2885_v48, %v15290_v7 }
 0x94a   :  { %v3018_v53 = vmul.f32 %v15397_v46, %v15370_v56  ;;  %v3517_v4 = vadd.f32 0.00028619796, %v3516_v2  ;;  %v3648_v6 = vadd.f32 0.001143296, %v3647_v34  ;;  %v15430_v8 = vmul.f32 0.70710677, %v15412_v49 }
 0x94b   :  { %v2899_v62 = vsub.f32 1.0, %v2898_v29  ;;  %vm2902_vm10 = vweird.f32 %v15363_v42  ;;  %v2908_v63 = vand.u32 2147483648, %v15363_v42  ;;  %v2923_v43 = vadd.f32 0.18741608, %v2922_v50  ;;  %v13233_v50 = vld [vmem:[#allocation26 + $0x68] sm:$0xff] }
 0x94c   :  { %v15434_v10 = vadd.f32 1.0, %v2975_v14  ;;  %v15437_v16 = vmul.f32 %v3005_v5, %v15294_v22  ;;  %v3019_v0 = vsub.f32 1.0, %v3018_v53  ;;  %v3028_v7 = vand.u32 2147483648, %v15370_v56  ;;  %v13248_v22 = vld [vmem:[#allocation26 + $0xe0] sm:$0xff]  ;;  %v13241_v14 = vld [vmem:[#allocation26 + $0xa8] sm:$0xff]  ;;  %5278 = vmatpush.bf16.msrb.mxu2 %v13233_v50 }
 0x94d   :  { %v3649_v17 = vmul.f32 %v3648_v6, %v15385_v30  ;;  %v2900_v32 = vmul.f32 %v15382_v3, %v2899_v62  ;;  %v2962_v27 = vmul.f32 %v2961_v9, %v15333_v57  ;;  %v3534_v33 = vadd.f32 0.4994258, %v3533_v1  ;;  %5307 = vmatpush.bf16.msra.mxu1 %v13248_v22  ;;  %5292 = vmatpush.bf16.msra.mxu3 %v13241_v14  ;;  %v2651_v14 = vpop.f32.mrf.mxu0 }
 0x94e   :  { %v15441_v12 = vpop.eup %13910  ;;  %v3554_v36 = vmul.f32 %v15430_v8, %v15430_v8  ;;  %v3026_v39 = vand.u32 2147483647, %v15370_v56  ;;  %v3518_v24 = vmul.f32 %v3517_v4, %v15356_v44  ;;  %v3636_v23 = vmul.f32 2.1237322e-06, %v15385_v30 }
 0x94f   :  { %v3650_v29 = vadd.f32 0.014752088, %v3649_v17  ;;  %vm15450_vm12 = vcmp.eq.f32.partialorder %v2906_v21, 8.507059e+37  ;;  %v2909_v48 = vor.u32 1.1754944e-38, %v2908_v63  ;;  %v2924_v2 = vmul.f32 %v2923_v43, %v15327_v45  ;;  %v2625_v21 = vpop.f32.mrf.mxu3 }
 0x950   :  { %13912 = vrcp.f32 %v15434_v10  ;;  %v15456_v34 = vmin.f32 %v3554_v36, 16.0  ;;  %v3020_v51 = vmul.f32 %v15397_v46, %v3019_v0  ;;  %v3029_v5 = vor.u32 1.1754944e-38, %v3028_v7 }
 0x951   :  { %v2938_v53 = vmul.f32 %v15441_v12, %v15387_v38  ;;  %v3651_v62 = vmul.f32 %v3650_v29, %v15385_v30  ;;  %v2901_v9 = vadd.f32 %v15382_v3, %v2900_v32  ;;  %vm2903_vm13 = vweird.f32 %v15382_v3 }
 0x952   :  { %v2963_v45 = vadd.f32 0.18741608, %v2962_v27  ;;  %v3535_v1 = vmul.f32 %v3534_v33, %v15356_v44  ;;  %vm3022_vm4 = vweird.f32 %v15370_v56  ;;  %vm15466_vm5 = vcmp.eq.f32.partialorder %v3026_v39, 8.507059e+37  ;;  %vm15480_vm6 = vmor %vm2902_vm10, %vm2903_vm13 }
 0x953   :  { %v3519_v6 = vadd.f32 0.0036580483, %v3518_v24  ;;  %v3637_v63 = vadd.f32 0.00028619796, %v3636_v23  ;;  %v3652_v43 = vadd.f32 0.112945676, %v3651_v62  ;;  %v15476_v7 = vadd.f32 %v2625_v21, %v1916_v26 }
 0x954   :  { %v2925_v11 = vadd.f32 1.1283791, %v2924_v2  ;;  %v15471_v52 = vmul.f32 0.5, %v15412_v49  ;;  %v3567_v0 = vmul.f32 3.8918573e-05, %v15456_v34  ;;  %v3021_v32 = vadd.f32 %v15397_v46, %v3020_v51 }
 0x955   :  { %vm3023_vm7 = vweird.f32 %v15397_v46  ;;  %v2939_v27 = vsub.f32 1.0, %v2938_v53  ;;  %v3653_v49 = vmul.f32 %v3652_v43, %v15385_v30  ;;  %v2905_v26 = vsel %vm15480_vm6, %v15382_v3, %v2901_v9 }
 0x956   :  { %v15487_v33 = vpop.eup %13912  ;;  %v2964_v36 = vmul.f32 %v2963_v45, %v15333_v57  ;;  %v15493_v42 = vadd.f32 1.0, %v3535_v1  ;;  %v3568_v18 = vadd.f32 0.001143296, %v3567_v0  ;;  %v2946_v22 = vand.u32 2147483647, %v15387_v38  ;;  %vm15500_vm8 = vmor %vm3022_vm4, %vm3023_vm7 }
 0x957   :  { %v3520_v39 = vmul.f32 %v3519_v6, %v15356_v44  ;;  %v3638_v24 = vmul.f32 %v3637_v63, %v15385_v30  ;;  %v3654_v23 = vadd.f32 0.4994258, %v3653_v49  ;;  %v2948_v3 = vand.u32 2147483648, %v15387_v38 }
 0x958   :  { %v3569_v57 = vmul.f32 %v3568_v18, %v15456_v34  ;;  %v15507_v2 = vmul.f32 0.70710677, %v15476_v7  ;;  %v1918_v50 = vperm.slane %v15279_v28, 4  ;;  %v2910_v51 = vsel %vm15450_vm12, %v2909_v48, %v2905_v26 }
 0x959   :  { %v3025_v56 = vsel %vm15500_vm8, %v15397_v46, %v3021_v32  ;;  %v2940_v53 = vmul.f32 %v15441_v12, %v2939_v27  ;;  %v2978_v62 = vmul.f32 %v15487_v33, %v15434_v10  ;;  %13914 = vrcp.f32 %v15493_v42 }
 0x95a   :  { %v3655_v21 = vmul.f32 %v3654_v23, %v15385_v30  ;;  %v3570_v9 = vadd.f32 0.014752088, %v3569_v57  ;;  %v3594_v45 = vmul.f32 %v15507_v2, %v15507_v2  ;;  %v2965_v1 = vadd.f32 1.1283791, %v2964_v36 }
 0x95b   :  { %v3521_v20 = vadd.f32 0.05243302, %v3520_v39  ;;  %v3639_v48 = vadd.f32 0.0036580483, %v3638_v24  ;;  %v15524_v6 = vadd.f32 %v2651_v14, %v1918_v50  ;;  %v2911_v46 = vmul.f32 %v2910_v51, %v15427_v15 }
 0x95c   :  { %v3030_v63 = vsel %vm15466_vm5, %v3029_v5, %v3025_v56  ;;  %v2926_v43 = vmul.f32 %v2925_v11, %v15316_v35  ;;  %v15530_v0 = vmin.f32 %v3594_v45, 16.0  ;;  %v2941_v17 = vadd.f32 %v15441_v12, %v2940_v53 }
 0x95d   :  { %vm2943_vm9 = vweird.f32 %v15441_v12  ;;  %v2979_v32 = vsub.f32 1.0, %v2978_v62  ;;  %v15535_v27 = vmul.f32 0.70710677, %v15524_v6  ;;  %vm2942_vm10 = vweird.f32 %v15387_v38 }
 0x95e   :  { %vm15538_vm12 = vcmp.eq.f32.partialorder %v2946_v22, 8.507059e+37  ;;  %v15542_v15 = vadd.f32 1.0, %v3655_v21  ;;  %v3571_v35 = vmul.f32 %v3570_v9, %v15456_v34  ;;  %v2949_v5 = vor.u32 1.1754944e-38, %v2948_v3  ;;  %vm15553_vm13 = vmor %vm2942_vm10, %vm2943_vm9  ;;  %v13247_v3 = vld [vmem:[#allocation26 + $0xd8] sm:$0xff] }
 0x95f   :  { %v15546_v4 = vmul.f32 %v2965_v1, %v15322_v41  ;;  %v3522_v11 = vmul.f32 %v3521_v20, %v15356_v44  ;;  %v3640_v26 = vmul.f32 %v3639_v48, %v15385_v30  ;;  %v15550_v36 = vpop.eup %13914  ;;  %v11265_v18 = vclamps-f32 %v2911_v46, 1.0  ;;  %5308 = vmatpush.bf16.msra.mxu1 %v13247_v3 }
 0x960   :  { %v3031_v38 = vmul.f32 %v3030_v63, %v15437_v16  ;;  %v3607_v39 = vmul.f32 3.8918573e-05, %v15530_v0  ;;  %v3034_v24 = vmul.f32 %v15535_v27, %v15535_v27  ;;  %v2945_v41 = vsel %vm15553_vm13, %v15441_v12, %v2941_v17  ;;  %v13223_v16 = vld [vmem:[#allocation26 + $0x18] sm:$0xff]  ;;  %v2693_v63 = vpop.f32.mrf.mxu1 }
 0x961   :  { %v2980_v23 = vmul.f32 %v15487_v33, %v2979_v32  ;;  %vm2982_vm4 = vweird.f32 %v15434_v10  ;;  %v3556_v29 = vmul.f32 2.1237322e-06, %v15456_v34  ;;  %13916 = vrcp.f32 %v15542_v15  ;;  %5266 = vmatpush.bf16.msrb.mxu0 %v13223_v16 }
 0x962   :  { %v3572_v57 = vadd.f32 0.112945676, %v3571_v35  ;;  %v3608_v14 = vadd.f32 0.001143296, %v3607_v39  ;;  %v15567_v51 = vmin.f32 %v3034_v24, 16.0  ;;  %v3538_v12 = vmul.f32 %v15550_v36, %v15493_v42 }
 0x963   :  { %v2986_v56 = vand.u32 2147483647, %v15434_v10  ;;  %v3523_v53 = vadd.f32 0.18741608, %v3522_v11  ;;  %v3641_v62 = vadd.f32 0.05243302, %v3640_v26  ;;  %v2950_v48 = vsel %vm15538_vm12, %v2949_v5, %v2945_v41 }
 0x964   :  { %v2988_v21 = vand.u32 2147483648, %v15434_v10  ;;  %v3609_v9 = vmul.f32 %v3608_v14, %v15530_v0  ;;  %v3047_v45 = vmul.f32 3.8918573e-05, %v15567_v51  ;;  %v1921_v1 = vperm.slane %v15279_v28, 7 }
 0x965   :  { %v11268_v20 = vclamps-f32 %v3031_v38, 1.0  ;;  %vm2983_vm5 = vweird.f32 %v15487_v33  ;;  %v3557_v46 = vadd.f32 0.00028619796, %v3556_v29  ;;  %v2981_v17 = vadd.f32 %v15487_v33, %v2980_v23 }
 0x966   :  { %v3573_v32 = vmul.f32 %v3572_v57, %v15456_v34  ;;  %v3596_v35 = vmul.f32 2.1237322e-06, %v15530_v0  ;;  %v3610_v11 = vadd.f32 0.014752088, %v3609_v9  ;;  %v3524_v26 = vmul.f32 %v3523_v53, %v15356_v44  ;;  %vm15599_vm7 = vmor %vm2982_vm4, %vm2983_vm5 }
 0x967   :  { %v3539_v22 = vsub.f32 1.0, %v3538_v12  ;;  %v3642_v39 = vmul.f32 %v3641_v62, %v15385_v30  ;;  %v3048_v38 = vadd.f32 0.001143296, %v3047_v45  ;;  %v15584_v24 = vpop.eup %13916  ;;  %v4154_v49 = vadd.f32 1.0, %v11265_v18 }
 0x968   :  { %vm15586_vm6 = vcmp.eq.f32.partialorder %v2986_v56, 8.507059e+37  ;;  %v3611_v41 = vmul.f32 %v3610_v11, %v15530_v0  ;;  %v15593_v23 = vadd.f32 %v2693_v63, %v1921_v1  ;;  %v2951_v29 = vmul.f32 %v2950_v48, %v2926_v43 }
 0x969   :  { %v2989_v18 = vor.u32 1.1754944e-38, %v2988_v21  ;;  %v3558_v16 = vmul.f32 %v3557_v46, %v15456_v34  ;;  %v3049_v3 = vmul.f32 %v3048_v38, %v15567_v51  ;;  %v15605_v57 = vadd.f32 1.0, %v11268_v20 }
 0x96a   :  { %v2985_v14 = vsel %vm15599_vm7, %v15487_v33, %v2981_v17  ;;  %v3574_v43 = vadd.f32 0.4994258, %v3573_v32  ;;  %v3597_v56 = vadd.f32 0.00028619796, %v3596_v35  ;;  %v3525_v53 = vadd.f32 1.1283791, %v3524_v26 }
 0x96b   :  { %v3540_v10 = vmul.f32 %v15550_v36, %v3539_v22  ;;  %v3643_v12 = vadd.f32 0.18741608, %v3642_v39  ;;  %v3658_v62 = vmul.f32 %v15584_v24, %v15542_v15  ;;  %v15614_v21 = vmul.f32 %v4154_v49, %v15390_v31 }
 0x96c   :  { %v3612_v9 = vadd.f32 0.112945676, %v3611_v41  ;;  %v3050_v45 = vadd.f32 0.014752088, %v3049_v3  ;;  %v15617_v20 = vmul.f32 0.70710677, %v15593_v23  ;;  %v2990_v33 = vsel %vm15586_vm6, %v2989_v18, %v2985_v14  ;;  %v2665_v18 = vpop.f32.mrf.mxu2  ;;  %v2679_v3 = vpop.f32.mrf.mxu3 }
 0x96d   :  { %v11266_v48 = vclamps-f32 %v2951_v29, 1.0  ;;  %v3548_v46 = vand.u32 2147483648, %v15493_v42  ;;  %v3559_v63 = vadd.f32 0.0036580483, %v3558_v16  ;;  %v3575_v17 = vmul.f32 %v3574_v43, %v15456_v34 }
 0x96e   :  { %v3598_v32 = vmul.f32 %v3597_v56, %v15530_v0  ;;  %v3051_v35 = vmul.f32 %v3050_v45, %v15567_v51  ;;  %v3154_v31 = vmul.f32 %v15617_v20, %v15617_v20  ;;  %v3541_v11 = vadd.f32 %v15550_v36, %v3540_v10 }
 0x96f   :  { %vm3543_vm8 = vweird.f32 %v15550_v36  ;;  %v3659_v26 = vsub.f32 1.0, %v3658_v62  ;;  %v3036_v22 = vmul.f32 2.1237322e-06, %v15567_v51  ;;  %v3644_v39 = vmul.f32 %v3643_v12, %v15385_v30 }
 0x970   :  { %v3613_v38 = vmul.f32 %v3612_v9, %v15530_v0  ;;  %v15632_v49 = vmin.f32 %v3154_v31, 16.0  ;;  %v1919_v5 = vperm.slane %v15279_v28, 5  ;;  %v2991_v41 = vmul.f32 %v2990_v33, %v15546_v4 }
 0x971   :  { %vm3542_vm9 = vweird.f32 %v15493_v42  ;;  %v3546_v29 = vand.u32 2147483647, %v15493_v42  ;;  %v3560_v44 = vmul.f32 %v3559_v63, %v15456_v34  ;;  %v15639_v16 = vadd.f32 1.0, %v11266_v48 }
 0x972   :  { %vm15641_vm10 = vmor %vm3542_vm9, %vm3543_vm8  ;;  %v15645_v30 = vadd.f32 1.0, %v3575_v17  ;;  %v3599_v14 = vadd.f32 0.0036580483, %v3598_v32  ;;  %v3052_v43 = vadd.f32 0.112945676, %v3051_v35  ;;  %v3549_v56 = vor.u32 1.1754944e-38, %v3548_v46 }
 0x973   :  { %v3545_v4 = vsel %vm15641_vm10, %v15550_v36, %v3541_v11  ;;  %v3660_v42 = vmul.f32 %v15584_v24, %v3659_v26  ;;  %v3037_v10 = vadd.f32 0.00028619796, %v3036_v22  ;;  %v3645_v12 = vadd.f32 1.1283791, %v3644_v39  ;;  %v13232_v17 = vld [vmem:[#allocation26 + $0x60] sm:$0xff] }
 0x974   :  { %v3614_v62 = vadd.f32 0.4994258, %v3613_v38  ;;  %v3167_v9 = vmul.f32 3.8918573e-05, %v15632_v49  ;;  %v15654_v45 = vadd.f32 %v2665_v18, %v1919_v5  ;;  %v11267_v48 = vclamps-f32 %v2991_v41, 1.0  ;;  %v13240_v32 = vld [vmem:[#allocation26 + $0xa0] sm:$0xff]  ;;  %5279 = vmatpush.bf16.msrb.mxu2 %v13232_v17 }
 0x975   :  { %v3526_v33 = vmul.f32 %v3525_v53, %v15344_v13  ;;  %vm3547_vm12 = vcmp.eq.f32.partialorder %v3546_v29, 8.507059e+37  ;;  %v3561_v63 = vadd.f32 0.05243302, %v3560_v44  ;;  %13918 = vrcp.f32 %v15645_v30  ;;  %v13222_v13 = vld [vmem:[#allocation26 + $0x10] sm:$0xff]  ;;  %5293 = vmatpush.bf16.msra.mxu3 %v13240_v32 }
 0x976   :  { %v3550_v36 = vsel %vm3547_vm12, %v3549_v56, %v3545_v4  ;;  %v3600_v46 = vmul.f32 %v3599_v14, %v15530_v0  ;;  %v3053_v35 = vmul.f32 %v3052_v43, %v15567_v51  ;;  %v3661_v31 = vadd.f32 %v15584_v24, %v3660_v42  ;;  %v13246_v53 = vld [vmem:[#allocation26 + $0xd0] sm:$0xff]  ;;  %5267 = vmatpush.bf16.msrb.mxu0 %v13222_v13  ;;  %v13231_v14 = vld [vmem:[#allocation26 + $0x58] sm:$0xff] }
 0x977   :  { %vm3662_vm13 = vweird.f32 %v15542_v15  ;;  %vm3663_vm4 = vweird.f32 %v15584_v24  ;;  %v3038_v11 = vmul.f32 %v3037_v10, %v15567_v51  ;;  %v3615_v26 = vmul.f32 %v3614_v62, %v15530_v0  ;;  %5309 = vmatpush.bf16.msra.mxu1 %v13246_v53  ;;  %v13239_v62 = vld [vmem:[#allocation26 + $0x98] sm:$0xff] }
 0x978   :  { %v3168_v22 = vadd.f32 0.001143296, %v3167_v9  ;;  %v15666_v39 = vmul.f32 0.70710677, %v15654_v45  ;;  %v19330_v38 = vperm.slane %v15279_v28, 6  ;;  %v3551_v41 = vmul.f32 %v3550_v36, %v3526_v33  ;;  %vm15676_vm5 = vmor %vm3662_vm13, %vm3663_vm4  ;;  %5280 = vmatpush.bf16.msrb.mxu2 %v13231_v14 }
 0x979   :  { %v3666_v29 = vand.u32 2147483647, %v15542_v15  ;;  %v3668_v44 = vand.u32 2147483648, %v15542_v15  ;;  %v3562_v18 = vmul.f32 %v3561_v63, %v15456_v34  ;;  %v3601_v4 = vadd.f32 0.05243302, %v3600_v46  ;;  %5294 = vmatpush.bf16.msra.mxu3 %v13239_v62 }
 0x97a   :  { %v3054_v56 = vadd.f32 0.4994258, %v3053_v35  ;;  %v3169_v42 = vmul.f32 %v3168_v22, %v15632_v49  ;;  %v3074_v10 = vmul.f32 %v15666_v39, %v15666_v39  ;;  %v4156_v9 = vadd.f32 1.0, %v11267_v48 }
 0x97b   :  { %v3646_v33 = vmul.f32 %v3645_v12, %v15368_v19  ;;  %v3665_v63 = vsel %vm15676_vm5, %v15584_v24, %v3661_v31  ;;  %v3039_v15 = vadd.f32 0.0036580483, %v3038_v11  ;;  %v15687_v17 = vpop.eup %13918  ;;  %v15689_v32 = vadd.f32 1.0, %v3615_v26 }
 0x97c   :  { %v3156_v36 = vmul.f32 2.1237322e-06, %v15632_v49  ;;  %v3170_v46 = vadd.f32 0.014752088, %v3169_v42  ;;  %v15694_v35 = vadd.f32 %v2679_v3, %v19330_v38  ;;  %vm3667_vm6 = vcmp.eq.f32.partialorder %v3666_v29, 8.507059e+37 }
 0x97d   :  { %v3669_v19 = vor.u32 1.1754944e-38, %v3668_v44  ;;  %v3563_v12 = vadd.f32 0.18741608, %v3562_v18  ;;  %v15696_v48 = vmin.f32 %v3074_v10, 16.0  ;;  %v11281_v24 = vclamps-f32 %v3551_v41, 1.0 }
 0x97e   :  { %v3602_v31 = vmul.f32 %v3601_v4, %v15530_v0  ;;  %v3055_v11 = vmul.f32 %v3054_v56, %v15567_v51  ;;  %v3171_v13 = vmul.f32 %v3170_v46, %v15632_v49  ;;  %v3578_v26 = vmul.f32 %v15687_v17, %v15645_v30 }
 0x97f   :  { %v3670_v53 = vsel %vm3667_vm6, %v3669_v19, %v3665_v63  ;;  %v3040_v22 = vmul.f32 %v3039_v15, %v15567_v51  ;;  %v3087_v3 = vmul.f32 3.8918573e-05, %v15696_v48  ;;  %13920 = vrcp.f32 %v15689_v32 }
 0x980   :  { %v3157_v29 = vadd.f32 0.00028619796, %v3156_v36  ;;  %v3172_v44 = vadd.f32 0.112945676, %v3171_v13  ;;  %v15707_v41 = vmul.f32 0.70710677, %v15694_v35  ;;  %v15711_v18 = vmul.f32 %v15605_v57, %v15393_v40  ;;  %v2653_v13 = vpop.f32.mrf.mxu0 }
 0x981   :  { %v15715_v14 = vmul.f32 %v15639_v16, %v15402_v37  ;;  %v15718_v43 = vmul.f32 0.5, %v15476_v7  ;;  %v3088_v4 = vadd.f32 0.001143296, %v3087_v3  ;;  %v15721_v56 = vmul.f32 %v4156_v9, %v15405_v47 }
 0x982   :  { %v3671_v42 = vmul.f32 %v3670_v53, %v3646_v33  ;;  %v3564_v10 = vmul.f32 %v3563_v12, %v15456_v34  ;;  %v15724_v62 = vadd.f32 1.0, %v3055_v11  ;;  %v3603_v63 = vadd.f32 0.18741608, %v3602_v31 }
 0x983   :  { %v3041_v15 = vadd.f32 0.05243302, %v3040_v22  ;;  %v3089_v40 = vmul.f32 %v3088_v4, %v15696_v48  ;;  %v3114_v37 = vmul.f32 %v15707_v41, %v15707_v41  ;;  %v4170_v57 = vadd.f32 1.0, %v11281_v24 }
 0x984   :  { %v3579_v16 = vsub.f32 1.0, %v3578_v26  ;;  %v3158_v7 = vmul.f32 %v3157_v29, %v15632_v49  ;;  %v3173_v36 = vmul.f32 %v3172_v44, %v15632_v49  ;;  %v15732_v47 = vmul.f32 0.5, %v15524_v6 }
 0x985   :  { %v15735_v34 = vmul.f32 0.5, %v15593_v23  ;;  %v3090_v9 = vadd.f32 0.014752088, %v3089_v40  ;;  %v15737_v33 = vmin.f32 %v3114_v37, 16.0  ;;  %v15739_v46 = vpop.eup %13920  ;;  %v11284_v19 = vclamps-f32 %v3671_v42, 1.0 }
 0x986   :  { %v3565_v12 = vadd.f32 1.1283791, %v3564_v10  ;;  %v3586_v24 = vand.u32 2147483647, %v15645_v30  ;;  %13922 = vrcp.f32 %v15724_v62  ;;  %v3588_v31 = vand.u32 2147483648, %v15645_v30 }
 0x987   :  { %v3604_v11 = vmul.f32 %v3603_v63, %v15530_v0  ;;  %v3042_v6 = vmul.f32 %v3041_v15, %v15567_v51  ;;  %v3091_v23 = vmul.f32 %v3090_v9, %v15696_v48  ;;  %v15748_v53 = vmul.f32 %v4170_v57, %v15420_v55 }
 0x988   :  { %v3580_v26 = vmul.f32 %v15687_v17, %v3579_v16  ;;  %v3159_v22 = vadd.f32 0.0036580483, %v3158_v7  ;;  %v3174_v3 = vadd.f32 0.4994258, %v3173_v36  ;;  %v3618_v29 = vmul.f32 %v15739_v46, %v15689_v32 }
 0x989   :  { %v3076_v44 = vmul.f32 2.1237322e-06, %v15696_v48  ;;  %v3092_v4 = vadd.f32 0.112945676, %v3091_v23  ;;  %v3127_v0 = vmul.f32 3.8918573e-05, %v15737_v33  ;;  %v3566_v10 = vmul.f32 %v3565_v12, %v15430_v8 }
 0x98a   :  { %v4173_v42 = vadd.f32 1.0, %v11284_v19  ;;  %vm15756_vm7 = vcmp.eq.f32.partialorder %v3586_v24, 8.507059e+37  ;;  %v15762_v55 = vadd.f32 %v2653_v13, %v1918_v50  ;;  %vm3583_vm8 = vweird.f32 %v15687_v17  ;;  %v13221_v12 = vld [vmem:[#allocation26 + $0x8] sm:$0xff] }
 0x98b   :  { %v3589_v15 = vor.u32 1.1754944e-38, %v3588_v31  ;;  %v3605_v40 = vadd.f32 1.1283791, %v3604_v11  ;;  %v3043_v37 = vadd.f32 0.18741608, %v3042_v6  ;;  %v3581_v16 = vadd.f32 %v15687_v17, %v3580_v26  ;;  %v13245_v23 = vld [vmem:[#allocation26 + $0xc8] sm:$0xff]  ;;  %5268 = vmatpush.bf16.msrb.mxu0 %v13221_v12 }
 0x98c   :  { %v15765_v57 = vpop.eup %13922  ;;  %v3160_v7 = vmul.f32 %v3159_v22, %v15632_v49  ;;  %v3175_v8 = vmul.f32 %v3174_v3, %v15632_v49  ;;  %v3093_v36 = vmul.f32 %v3092_v4, %v15696_v48  ;;  %vm3582_vm9 = vweird.f32 %v15645_v30  ;;  %5310 = vmatpush.bf16.msra.mxu1 %v13245_v23 }
 0x98d   :  { %v3619_v9 = vsub.f32 1.0, %v3618_v29  ;;  %v3077_v50 = vadd.f32 0.00028619796, %v3076_v44  ;;  %v3128_v19 = vadd.f32 0.001143296, %v3127_v0  ;;  %v15773_v24 = vmul.f32 %v4173_v42, %v15422_v58  ;;  %vm15784_vm10 = vmor %vm3582_vm9, %vm3583_vm8 }
 0x98e   :  { %v3626_v31 = vand.u32 2147483647, %v15689_v32  ;;  %v15777_v11 = vmul.f32 0.5, %v15654_v45  ;;  %v15780_v6 = vmul.f32 0.70710677, %v15762_v55  ;;  %v3628_v13 = vand.u32 2147483648, %v15689_v32  ;;  %v2695_v45 = vpop.f32.mrf.mxu1 }
 0x98f   :  { %v3058_v58 = vmul.f32 %v15765_v57, %v15724_v62  ;;  %v3094_v26 = vadd.f32 0.4994258, %v3093_v36  ;;  %v3129_v22 = vmul.f32 %v3128_v19, %v15737_v33  ;;  %v3585_v3 = vsel %vm15784_vm10, %v15687_v17, %v3581_v16 }
 0x990   :  { %v3161_v29 = vadd.f32 0.05243302, %v3160_v7  ;;  %v15795_v44 = vadd.f32 1.0, %v3175_v8  ;;  %v3674_v4 = vmul.f32 %v15780_v6, %v15780_v6  ;;  %v15800_v0 = vmul.f32 %v3605_v40, %v15507_v2 }
 0x991   :  { %v3620_v42 = vmul.f32 %v15739_v46, %v3619_v9  ;;  %v3078_v36 = vmul.f32 %v3077_v50, %v15696_v48  ;;  %v3130_v19 = vadd.f32 0.014752088, %v3129_v22  ;;  %vm3622_vm12 = vweird.f32 %v15689_v32 }
 0x992   :  { %v3044_v12 = vmul.f32 %v3043_v37, %v15567_v51  ;;  %v15806_v17 = vmin.f32 %v3674_v4, 16.0  ;;  %v15810_v16 = vadd.f32 %v2695_v45, %v1921_v1  ;;  %v3590_v7 = vsel %vm15756_vm7, %v3589_v15, %v3585_v3  ;;  %v2667_v1 = vpop.f32.mrf.mxu2 }
 0x993   :  { %vm15814_vm13 = vcmp.eq.f32.partialorder %v3626_v31, 8.507059e+37  ;;  %v3059_v40 = vsub.f32 1.0, %v3058_v58  ;;  %v3095_v8 = vmul.f32 %v3094_v26, %v15696_v48  ;;  %v3131_v9 = vmul.f32 %v3130_v19, %v15737_v33 }
 0x994   :  { %vm3623_vm4 = vweird.f32 %v15739_v46  ;;  %v3629_v51 = vor.u32 1.1754944e-38, %v3628_v13  ;;  %v3162_v37 = vmul.f32 %v3161_v29, %v15632_v49  ;;  %13924 = vrcp.f32 %v15795_v44 }
 0x995   :  { %v3621_v63 = vadd.f32 %v15739_v46, %v3620_v42  ;;  %v3079_v15 = vadd.f32 0.0036580483, %v3078_v36  ;;  %v3116_v50 = vmul.f32 2.1237322e-06, %v15737_v33  ;;  %v3132_v31 = vadd.f32 0.112945676, %v3131_v9  ;;  %vm15841_vm5 = vmor %vm3622_vm12, %vm3623_vm4 }
 0x996   :  { %v3591_v23 = vmul.f32 %v3590_v7, %v3566_v10  ;;  %v3045_v30 = vadd.f32 1.1283791, %v3044_v12  ;;  %v3687_v58 = vmul.f32 3.8918573e-05, %v15806_v17  ;;  %v15827_v26 = vmul.f32 0.70710677, %v15810_v16 }
 0x997   :  { %v3060_v13 = vmul.f32 %v15765_v57, %v3059_v40  ;;  %v15830_v22 = vadd.f32 1.0, %v3095_v8  ;;  %v3133_v45 = vmul.f32 %v3132_v31, %v15737_v33  ;;  %v15835_v3 = vadd.f32 %v2667_v1, %v1919_v5 }
 0x998   :  { %vm3062_vm6 = vweird.f32 %v15724_v62  ;;  %v3163_v29 = vadd.f32 0.18741608, %v3162_v37  ;;  %v3688_v4 = vadd.f32 0.001143296, %v3687_v58  ;;  %v3794_v42 = vmul.f32 %v15827_v26, %v15827_v26 }
 0x999   :  { %v3625_v5 = vsel %vm15841_vm5, %v15739_v46, %v3621_v63  ;;  %v3066_v36 = vand.u32 2147483647, %v15724_v62  ;;  %v3080_v19 = vmul.f32 %v3079_v15, %v15696_v48  ;;  %v3117_v32 = vadd.f32 0.00028619796, %v3116_v50 }
 0x99a   :  { %v15853_v12 = vpop.eup %13924  ;;  %v11282_v7 = vclamps-f32 %v3591_v23, 1.0  ;;  %vm3063_vm7 = vweird.f32 %v15765_v57  ;;  %v3689_v40 = vmul.f32 %v3688_v4, %v15806_v17  ;;  %v15857_v8 = vmin.f32 %v3794_v42, 16.0 }
 0x99b   :  { %v3061_v9 = vadd.f32 %v15765_v57, %v3060_v13  ;;  %13926 = vrcp.f32 %v15830_v22  ;;  %v3134_v37 = vadd.f32 0.4994258, %v3133_v45  ;;  %v15862_v46 = vmul.f32 0.70710677, %v15835_v3  ;;  %vm15877_vm8 = vmor %vm3062_vm6, %vm3063_vm7 }
 0x99c   :  { %v3630_v1 = vsel %vm15814_vm13, %v3629_v51, %v3625_v5  ;;  %v3068_v63 = vand.u32 2147483648, %v15724_v62  ;;  %v3164_v15 = vmul.f32 %v3163_v29, %v15632_v49  ;;  %v3690_v50 = vadd.f32 0.014752088, %v3689_v40  ;;  %v13238_v62 = vld [vmem:[#allocation26 + $0x90] sm:$0xff] }
 0x99d   :  { %v3178_v31 = vmul.f32 %v15853_v12, %v15795_v44  ;;  %v3081_v23 = vadd.f32 0.05243302, %v3080_v19  ;;  %v3118_v58 = vmul.f32 %v3117_v32, %v15737_v33  ;;  %v3807_v13 = vmul.f32 3.8918573e-05, %v15857_v8  ;;  %5295 = vmatpush.bf16.msra.mxu3 %v13238_v62 }
 0x99e   :  { %v4171_v45 = vadd.f32 1.0, %v11282_v7  ;;  %v3046_v10 = vmul.f32 %v3045_v30, %v15535_v27  ;;  %v3676_v49 = vmul.f32 2.1237322e-06, %v15806_v17  ;;  %v3691_v51 = vmul.f32 %v3690_v50, %v15806_v17  ;;  %v13230_v30 = vld [vmem:[#allocation26 + $0x50] sm:$0xff] }
 0x99f   :  { %v3065_v29 = vsel %vm15877_vm8, %v15765_v57, %v3061_v9  ;;  %v3135_v4 = vmul.f32 %v3134_v37, %v15737_v33  ;;  %v3808_v42 = vadd.f32 0.001143296, %v3807_v13  ;;  %v3714_v27 = vmul.f32 %v15862_v46, %v15862_v46  ;;  %5281 = vmatpush.bf16.msrb.mxu2 %v13230_v30  ;;  %v13220_v37 = vld [vmem:[#allocation26] sm:$0xff] }
 0x9a0   :  { %v3631_v5 = vmul.f32 %v3630_v1, %v15800_v0  ;;  %vm3067_vm9 = vcmp.eq.f32.partialorder %v3066_v36, 8.507059e+37  ;;  %v3069_v19 = vor.u32 1.1754944e-38, %v3068_v63  ;;  %v3165_v32 = vadd.f32 1.1283791, %v3164_v15  ;;  %v13244_v13 = vld [vmem:[#allocation26 + $0xc0] sm:$0xff]  ;;  %v13259_v36 = vld [vmem:[#allocation26 + $0x138] sm:$0xff]  ;;  %5269 = vmatpush.bf16.msrb.mxu0 %v13220_v37 }
 0x9a1   :  { %v15890_v7 = vpop.eup %13926  ;;  %v3179_v40 = vsub.f32 1.0, %v3178_v31  ;;  %v3082_v50 = vmul.f32 %v3081_v23, %v15696_v48  ;;  %v15894_v57 = vmul.f32 0.5, %v15694_v35  ;;  %v3119_v9 = vadd.f32 0.0036580483, %v3118_v58  ;;  %v13283_v1 = vld [vmem:[#allocation26 + $0x1f8] sm:$0xff]  ;;  %5311 = vmatpush.bf16.msra.mxu1 %v13244_v13  ;;  %v13229_v23 = vld [vmem:[#allocation26 + $0x48] sm:$0xff] }
 0x9a2   :  { %v3070_v2 = vsel %vm3067_vm9, %v3069_v19, %v3065_v29  ;;  %v3677_v38 = vadd.f32 0.00028619796, %v3676_v49  ;;  %v3692_v60 = vadd.f32 0.112945676, %v3691_v51  ;;  %v3809_v0 = vmul.f32 %v3808_v42, %v15857_v8  ;;  %v13237_v58 = vld [vmem:[#allocation26 + $0x88] sm:$0xff] }
 0x9a3   :  { %v15898_v63 = vmul.f32 %v4171_v45, %v15471_v52  ;;  %v15900_v15 = vadd.f32 1.0, %v3135_v4  ;;  %v3796_v35 = vmul.f32 2.1237322e-06, %v15857_v8  ;;  %v15903_v31 = vmin.f32 %v3714_v27, 16.0  ;;  %5282 = vmatpush.bf16.msrb.mxu2 %v13229_v23  ;;  %5296 = vmatpush.bf16.msra.mxu3 %v13237_v58 }
 0x9a4   :  { %v11283_v29 = vclamps-f32 %v3631_v5, 1.0  ;;  %v15906_v49 = vmul.f32 %v3165_v32, %v15617_v20  ;;  %v3098_v51 = vmul.f32 %v15890_v7, %v15830_v22  ;;  %v3810_v42 = vadd.f32 0.014752088, %v3809_v0  ;;  %5318 = vmatpush.bf16.msra.mxu0 %v13259_v36  ;;  %v2681_v32 = vpop.f32.mrf.mxu3 }
 0x9a5   :  { %5360 = vmatpush.bf16.msrb.mxu1 %v13283_v1  ;;  %v3071_v52 = vmul.f32 %v3070_v2, %v3046_v10  ;;  %vm3182_vm10 = vweird.f32 %v15795_v44  ;;  %v3083_v45 = vadd.f32 0.18741608, %v3082_v50  ;;  %v15912_v4 = vmul.f32 0.5, %v15762_v55 }
 0x9a6   :  { %v3120_v27 = vmul.f32 %v3119_v9, %v15737_v33  ;;  %v3693_v20 = vmul.f32 %v3692_v60, %v15806_v17  ;;  %v3811_v30 = vmul.f32 %v3810_v42, %v15857_v8  ;;  %v3727_v62 = vmul.f32 3.8918573e-05, %v15903_v31 }
 0x9a7   :  { %v3180_v5 = vmul.f32 %v15853_v12, %v3179_v40  ;;  %13928 = vrcp.f32 %v15900_v15  ;;  %v3678_v10 = vmul.f32 %v3677_v38, %v15806_v17  ;;  %v3797_v19 = vadd.f32 0.00028619796, %v3796_v35 }
 0x9a8   :  { %v4172_v55 = vadd.f32 1.0, %v11283_v29  ;;  %v3186_v50 = vand.u32 2147483647, %v15795_v44  ;;  %v3188_v37 = vand.u32 2147483648, %v15795_v44  ;;  %v3099_v9 = vsub.f32 1.0, %v3098_v51 }
 0x9a9   :  { %v11269_v13 = vclamps-f32 %v3071_v52, 1.0  ;;  %v3084_v60 = vmul.f32 %v3083_v45, %v15696_v48  ;;  %v3812_v2 = vadd.f32 0.112945676, %v3811_v30  ;;  %v3728_v0 = vadd.f32 0.001143296, %v3727_v62 }
 0x9aa   :  { %vm3183_vm12 = vweird.f32 %v15853_v12  ;;  %v3121_v40 = vadd.f32 0.05243302, %v3120_v27  ;;  %v3694_v36 = vadd.f32 0.4994258, %v3693_v20  ;;  %v19419_v1 = vperm.slane %v15279_v28, 6 }
 0x9ab   :  { %v3181_v35 = vadd.f32 %v15853_v12, %v3180_v5  ;;  %v3679_v23 = vadd.f32 0.0036580483, %v3678_v10  ;;  %v3798_v58 = vmul.f32 %v3797_v19, %v15857_v8  ;;  %v3729_v29 = vmul.f32 %v3728_v0, %v15903_v31  ;;  %vm15948_vm4 = vmor %vm3182_vm10, %vm3183_vm12 }
 0x9ac   :  { %v15927_v38 = vadd.f32 %v2681_v32, %v19419_v1  ;;  %v15933_v51 = vmul.f32 %v4172_v55, %v15718_v43  ;;  %vm15935_vm13 = vcmp.eq.f32.partialorder %v3186_v50, 8.507059e+37  ;;  %v3189_v42 = vor.u32 1.1754944e-38, %v3188_v37  ;;  %v15960_v32 = vld [vmem:[%s19316_s18 + $0x8] sm:$0xff] }
 0x9ad   :  { %v3100_v52 = vmul.f32 %v15890_v7, %v3099_v9  ;;  %v15940_v28 = vpop.eup %13928  ;;  %v4158_v45 = vadd.f32 1.0, %v11269_v13  ;;  %v3085_v27 = vadd.f32 1.1283791, %v3084_v60  ;;  %v3106_v20 = vand.u32 2147483647, %v15830_v22 }
 0x9ae   :  { %v3813_v30 = vmul.f32 %v3812_v2, %v15857_v8  ;;  %v3122_v62 = vmul.f32 %v3121_v40, %v15737_v33  ;;  %v3695_v5 = vmul.f32 %v3694_v36, %v15806_v17  ;;  %v3730_v10 = vadd.f32 0.014752088, %v3729_v29 }
 0x9af   :  { %v15955_v19 = vmul.f32 0.70710677, %v15927_v38  ;;  %v3185_v44 = vsel %vm15948_vm4, %v15853_v12, %v3181_v35  ;;  %vm3103_vm5 = vweird.f32 %v15890_v7  ;;  %v3680_v55 = vmul.f32 %v3679_v23, %v15806_v17  ;;  %v2707_v23 = vpop.f32.mrf.mxu0 }
 0x9b0   :  { %v3799_v50 = vadd.f32 0.0036580483, %v3798_v58  ;;  %v3101_v37 = vadd.f32 %v15890_v7, %v3100_v52  ;;  %v3138_v9 = vmul.f32 %v15940_v28, %v15900_v15  ;;  %v3731_v13 = vmul.f32 %v3730_v10, %v15903_v31 }
 0x9b1   :  { %v3754_v60 = vmul.f32 %v15955_v19, %v15955_v19  ;;  %v3086_v2 = vmul.f32 %v3085_v27, %v15666_v39  ;;  %v3108_v0 = vand.u32 2147483648, %v15830_v22  ;;  %v3814_v12 = vadd.f32 0.4994258, %v3813_v30  ;;  %v13282_v39 = vld [vmem:[#allocation26 + $0x1f0] sm:$0xff] }
 0x9b2   :  { %v19334_v40 = vperm.slane %v15960_v32, 0  ;;  %vm3102_vm6 = vweird.f32 %v15830_v22  ;;  %v15977_v36 = vadd.f32 1.0, %v3695_v5  ;;  %v3732_v1 = vadd.f32 0.112945676, %v3731_v13  ;;  %5361 = vmatpush.bf16.msrb.mxu1 %v13282_v39 }
 0x9b3   :  { %v15979_v35 = vmin.f32 %v3754_v60, 16.0  ;;  %v3190_v58 = vsel %vm15935_vm13, %v3189_v42, %v3185_v44  ;;  %vm15985_vm7 = vmor %vm3102_vm6, %vm3103_vm5  ;;  %v3123_v29 = vadd.f32 0.18741608, %v3122_v62  ;;  %v3681_v52 = vadd.f32 0.05243302, %v3680_v55  ;;  %v2749_v62 = vpop.f32.mrf.mxu1 }
 0x9b4   :  { %v3800_v27 = vmul.f32 %v3799_v50, %v15857_v8  ;;  %v3105_v22 = vsel %vm15985_vm7, %v15890_v7, %v3101_v37  ;;  %vm3107_vm8 = vcmp.eq.f32.partialorder %v3106_v20, 8.507059e+37  ;;  %v3139_v30 = vsub.f32 1.0, %v3138_v9 }
 0x9b5   :  { %v19333_v43 = vperm.slane %v15960_v32, 3  ;;  %v3109_v48 = vor.u32 1.1754944e-38, %v3108_v0  ;;  %v3815_v42 = vmul.f32 %v3814_v12, %v15857_v8  ;;  %v3733_v5 = vmul.f32 %v3732_v1, %v15903_v31  ;;  %v13258_v12 = vld [vmem:[#allocation26 + $0x130] sm:$0xff] }
 0x9b6   :  { %v15998_v10 = vadd.f32 %v2707_v23, %v19334_v40  ;;  %v3191_v44 = vmul.f32 %v3190_v58, %v15906_v49  ;;  %13930 = vrcp.f32 %v15977_v36  ;;  %v3716_v7 = vmul.f32 2.1237322e-06, %v15903_v31  ;;  %5319 = vmatpush.bf16.msra.mxu0 %v13258_v12  ;;  %v13228_v40 = vld [vmem:[#allocation26 + $0x40] sm:$0xff] }
 0x9b7   :  { %v3767_v20 = vmul.f32 3.8918573e-05, %v15979_v35  ;;  %v3110_v55 = vsel %vm3107_vm8, %v3109_v48, %v3105_v22  ;;  %v3124_v50 = vmul.f32 %v3123_v29, %v15737_v33  ;;  %v3682_v37 = vmul.f32 %v3681_v52, %v15806_v17  ;;  %5283 = vmatpush.bf16.msrb.mxu2 %v13228_v40  ;;  %v13257_v40 = vld [vmem:[#allocation26 + $0x128] sm:$0xff] }
 0x9b8   :  { %v3801_v9 = vadd.f32 0.05243302, %v3800_v27  ;;  %v3140_v13 = vmul.f32 %v15940_v28, %v3139_v30  ;;  %v16008_v60 = vmul.f32 0.5, %v15810_v16  ;;  %v16012_v49 = vadd.f32 %v2749_v62, %v19333_v43 }
 0x9b9   :  { %v3768_v0 = vadd.f32 0.001143296, %v3767_v20  ;;  %v16015_v1 = vmul.f32 %v4158_v45, %v15732_v47  ;;  %v16017_v23 = vadd.f32 1.0, %v3815_v42  ;;  %v3734_v33 = vadd.f32 0.4994258, %v3733_v5 }
 0x9ba   :  { %v16020_v58 = vmul.f32 0.70710677, %v15998_v10  ;;  %v3111_v29 = vmul.f32 %v3110_v55, %v3086_v2  ;;  %v16023_v16 = vmul.f32 0.5, %v15835_v3  ;;  %v3717_v52 = vadd.f32 0.00028619796, %v3716_v7  ;;  %5320 = vmatpush.bf16.msra.mxu0 %v13257_v40 }
 0x9bb   :  { %v3769_v27 = vmul.f32 %v3768_v0, %v15979_v35  ;;  %v11272_v22 = vclamps-f32 %v3191_v44, 1.0  ;;  %v3125_v30 = vadd.f32 1.1283791, %v3124_v50  ;;  %v3683_v48 = vadd.f32 0.18741608, %v3682_v37 }
 0x9bc   :  { %v3802_v47 = vmul.f32 %v3801_v9, %v15857_v8  ;;  %v16027_v45 = vpop.eup %13930  ;;  %v3141_v42 = vadd.f32 %v15940_v28, %v3140_v13  ;;  %vm3143_vm9 = vweird.f32 %v15940_v28  ;;  %v16032_v3 = vmul.f32 0.70710677, %v16012_v49 }
 0x9bd   :  { %v3770_v2 = vadd.f32 0.014752088, %v3769_v27  ;;  %v3148_v5 = vand.u32 2147483648, %v15900_v15  ;;  %13932 = vrcp.f32 %v16017_v23  ;;  %v3735_v62 = vmul.f32 %v3734_v33, %v15903_v31 }
 0x9be   :  { %v3194_v44 = vmul.f32 %v16020_v58, %v16020_v58  ;;  %v11270_v7 = vclamps-f32 %v3111_v29, 1.0  ;;  %vm3142_vm10 = vweird.f32 %v15900_v15  ;;  %v3146_v20 = vand.u32 2147483647, %v15900_v15 }
 0x9bf   :  { %v3718_v55 = vmul.f32 %v3717_v52, %v15903_v31  ;;  %v4161_v50 = vadd.f32 1.0, %v11272_v22  ;;  %vm16042_vm12 = vmor %vm3142_vm10, %vm3143_vm9  ;;  %v3684_v9 = vmul.f32 %v3683_v48, %v15806_v17  ;;  %v3698_v13 = vmul.f32 %v16027_v45, %v15977_v36 }
 0x9c0   :  { %v3803_v0 = vadd.f32 0.18741608, %v3802_v47  ;;  %v3145_v12 = vsel %vm16042_vm12, %v15940_v28, %v3141_v42  ;;  %v3771_v33 = vmul.f32 %v3770_v2, %v15979_v35  ;;  %v16053_v15 = vmin.f32 %v3194_v44, 16.0 }
 0x9c1   :  { %v3314_v39 = vmul.f32 %v16032_v3, %v16032_v3  ;;  %v3126_v29 = vmul.f32 %v3125_v30, %v15707_v41  ;;  %v3149_v52 = vor.u32 1.1754944e-38, %v3148_v5  ;;  %v16058_v27 = vadd.f32 1.0, %v3735_v62 }
 0x9c2   :  { %v3756_v17 = vmul.f32 2.1237322e-06, %v15979_v35  ;;  %v4159_v22 = vadd.f32 1.0, %v11270_v7  ;;  %vm3147_vm13 = vcmp.eq.f32.partialorder %v3146_v20, 8.507059e+37  ;;  %v3719_v48 = vadd.f32 0.0036580483, %v3718_v55 }
 0x9c3   :  { %v3207_v47 = vmul.f32 3.8918573e-05, %v16053_v15  ;;  %v16062_v28 = vpop.eup %13932  ;;  %v3150_v42 = vsel %vm3147_vm13, %v3149_v52, %v3145_v12  ;;  %v3685_v2 = vadd.f32 1.1283791, %v3684_v9  ;;  %v3699_v44 = vsub.f32 1.0, %v3698_v13 }
 0x9c4   :  { %v16064_v37 = vmin.f32 %v3314_v39, 16.0  ;;  %v16067_v43 = vmul.f32 %v4161_v50, %v15735_v34  ;;  %v3804_v41 = vmul.f32 %v3803_v0, %v15857_v8  ;;  %v3772_v30 = vadd.f32 0.112945676, %v3771_v33 }
 0x9c5   :  { %v3208_v5 = vadd.f32 0.001143296, %v3207_v47  ;;  %v3708_v62 = vand.u32 2147483648, %v15977_v36  ;;  %13934 = vrcp.f32 %v16058_v27  ;;  %v16073_v7 = vmul.f32 0.5, %v15927_v38 }
 0x9c6   :  { %v3757_v20 = vadd.f32 0.00028619796, %v3756_v17  ;;  %v3151_v55 = vmul.f32 %v3150_v42, %v3126_v29  ;;  %v3818_v9 = vmul.f32 %v16062_v28, %v16017_v23  ;;  %v3720_v13 = vmul.f32 %v3719_v48, %v15903_v31 }
 0x9c7   :  { %v3209_v34 = vmul.f32 %v3208_v5, %v16053_v15  ;;  %v16080_v8 = vmul.f32 %v4159_v22, %v15777_v11  ;;  %v16083_v50 = vmul.f32 %v3685_v2, %v15780_v6  ;;  %v3700_v0 = vmul.f32 %v16027_v45, %v3699_v44 }
 0x9c8   :  { %v3327_v38 = vmul.f32 3.8918573e-05, %v16064_v37  ;;  %v3706_v12 = vand.u32 2147483647, %v15977_v36  ;;  %v3805_v33 = vadd.f32 1.1283791, %v3804_v41  ;;  %v3773_v39 = vmul.f32 %v3772_v30, %v15979_v35 }
 0x9c9   :  { %19428 = vst [vmem:[#allocation48_spill] sm:$0xff] %v16080_v8  ;;  %v3210_v29 = vadd.f32 0.014752088, %v3209_v34  ;;  %vm3702_vm4 = vweird.f32 %v15977_v36  ;;  %v3709_v52 = vor.u32 1.1754944e-38, %v3708_v62  ;;  %v3758_v17 = vmul.f32 %v3757_v20, %v15979_v35  ;;  %v13281_v30 = vld [vmem:[#allocation26 + $0x1e8] sm:$0xff] }
 0x9ca   :  { %v3328_v11 = vadd.f32 0.001143296, %v3327_v38  ;;  %v11271_v22 = vclamps-f32 %v3151_v55, 1.0  ;;  %v3819_v48 = vsub.f32 1.0, %v3818_v9  ;;  %v3721_v6 = vadd.f32 0.05243302, %v3720_v13  ;;  %5362 = vmatpush.bf16.msrb.mxu1 %v13281_v30 }
 0x9cb   :  { %v3211_v47 = vmul.f32 %v3210_v29, %v16053_v15  ;;  %v16092_v42 = vpop.eup %13934  ;;  %v3701_v2 = vadd.f32 %v16027_v45, %v3700_v0  ;;  %vm3703_vm5 = vweird.f32 %v16027_v45  ;;  %v3196_v44 = vmul.f32 2.1237322e-06, %v16053_v15  ;;  %v2721_v0 = vpop.f32.mrf.mxu2 }
 0x9cc   :  { %v3329_v41 = vmul.f32 %v3328_v11, %v16064_v37  ;;  %vm16098_vm6 = vcmp.eq.f32.partialorder %v3706_v12, 8.507059e+37  ;;  %v16103_v5 = vmul.f32 %v3805_v33, %v15827_v26  ;;  %v3826_v62 = vand.u32 2147483647, %v16017_v23  ;;  %vm16111_vm8 = vmor %vm3702_vm4, %vm3703_vm5 }
 0x9cd   :  { %v3774_v20 = vadd.f32 0.4994258, %v3773_v39  ;;  %v19335_v55 = vperm.slane %v15960_v32, 1  ;;  %vm3822_vm7 = vweird.f32 %v16017_v23  ;;  %v3828_v9 = vand.u32 2147483648, %v16017_v23 }
 0x9ce   :  { %v3759_v13 = vadd.f32 0.0036580483, %v3758_v17  ;;  %v3212_v34 = vadd.f32 0.112945676, %v3211_v47  ;;  %v4160_v38 = vadd.f32 1.0, %v11271_v22  ;;  %v3820_v26 = vmul.f32 %v16062_v28, %v3819_v48 }
 0x9cf   :  { %v3738_v33 = vmul.f32 %v16092_v42, %v16058_v27  ;;  %v3330_v39 = vadd.f32 0.014752088, %v3329_v41  ;;  %v3705_v29 = vsel %vm16111_vm8, %v16027_v45, %v3701_v2  ;;  %v3722_v17 = vmul.f32 %v3721_v6, %v15903_v31  ;;  %v2735_v45 = vpop.f32.mrf.mxu3 }
 0x9d0   :  { %v3197_v11 = vadd.f32 0.00028619796, %v3196_v44  ;;  %v3213_v22 = vmul.f32 %v3212_v34, %v16053_v15  ;;  %vm16123_vm9 = vcmp.eq.f32.partialorder %v3826_v62, 8.507059e+37  ;;  %v3775_v47 = vmul.f32 %v3774_v20, %v15979_v35 }
 0x9d1   :  { %v3331_v48 = vmul.f32 %v3330_v39, %v16064_v37  ;;  %v16131_v41 = vadd.f32 %v2721_v0, %v19335_v55  ;;  %vm3823_vm10 = vweird.f32 %v16062_v28  ;;  %v3760_v6 = vmul.f32 %v3759_v13, %v15979_v35  ;;  %v13236_v13 = vld [vmem:[#allocation26 + $0x80] sm:$0xff] }
 0x9d2   :  { %v3214_v2 = vadd.f32 0.4994258, %v3213_v22  ;;  %v3316_v44 = vmul.f32 2.1237322e-06, %v16064_v37  ;;  %v3821_v62 = vadd.f32 %v16062_v28, %v3820_v26  ;;  %v3739_v34 = vsub.f32 1.0, %v3738_v33  ;;  %v13267_v22 = vld [vmem:[#allocation26 + $0x178] sm:$0xff]  ;;  %vm16160_vm12 = vmor %vm3822_vm7, %vm3823_vm10  ;;  %5297 = vmatpush.bf16.msra.mxu3 %v13236_v13 }
 0x9d3   :  { %v3332_v20 = vadd.f32 0.112945676, %v3331_v48  ;;  %v16139_v39 = vmul.f32 0.70710677, %v16131_v41  ;;  %v3829_v0 = vor.u32 1.1754944e-38, %v3828_v9  ;;  %v3198_v12 = vmul.f32 %v3197_v11, %v16053_v15  ;;  %v2709_v48 = vpop.f32.mrf.mxu0  ;;  %5332 = vmatpush.bf16.msra.mxu2 %v13267_v22  ;;  %v13266_v13 = vld [vmem:[#allocation26 + $0x170] sm:$0xff] }
 0x9d4   :  { %v3723_v55 = vadd.f32 0.18741608, %v3722_v17  ;;  %v19435_v54 = vperm.slane %v15960_v32, 2  ;;  %v16146_v59 = vadd.f32 1.0, %v3775_v47  ;;  %v16149_v26 = vmul.f32 0.5, %v15998_v10  ;;  %v13274_v22 = vld [vmem:[#allocation26 + $0x1b0] sm:$0xff] }
 0x9d5   :  { %v3333_v33 = vmul.f32 %v3332_v20, %v16064_v37  ;;  %v3234_v9 = vmul.f32 %v16139_v39, %v16139_v39  ;;  %v3710_v17 = vsel %vm16098_vm6, %v3709_v52, %v3705_v29  ;;  %v3761_v11 = vadd.f32 0.05243302, %v3760_v6 }
 0x9d6   :  { %v16144_v25 = vadd.f32 %v2735_v45, %v19435_v54  ;;  %v3215_v10 = vmul.f32 %v3214_v2, %v16053_v15  ;;  %v16166_v47 = vmul.f32 0.5, %v16012_v49  ;;  %v3825_v52 = vsel %vm16160_vm12, %v16062_v28, %v3821_v62  ;;  %5346 = vmatpush.bf16.msrb.mxu3 %v13275_v61 }
 0x9d7   :  { %v3740_v23 = vmul.f32 %v16092_v42, %v3739_v34  ;;  %v3317_v29 = vadd.f32 0.00028619796, %v3316_v44  ;;  %v16172_v45 = vmin.f32 %v3234_v9, 16.0  ;;  %v16175_v6 = vmul.f32 %v4160_v38, %v15894_v57  ;;  %5333 = vmatpush.bf16.msra.mxu2 %v13266_v13 }
 0x9d8   :  { %v3724_v49 = vmul.f32 %v3723_v55, %v15903_v31  ;;  %v3199_v2 = vadd.f32 0.0036580483, %v3198_v12  ;;  %v16179_v20 = vmul.f32 0.70710677, %v16144_v25  ;;  %v3711_v28 = vmul.f32 %v3710_v17, %v16083_v50 }
 0x9d9   :  { %19438 = vst [vmem:[#allocation49_spill] sm:$0xff] %v16175_v6  ;;  %13936 = vrcp.f32 %v16146_v59  ;;  %v3334_v44 = vadd.f32 0.4994258, %v3333_v33  ;;  %v19439_v61 = vperm.slane %v15960_v32, 0  ;;  %v3830_v57 = vsel %vm16123_vm9, %v3829_v0, %v3825_v52 }
 0x9da   :  { %vm3742_vm13 = vweird.f32 %v16058_v27  ;;  %vm3743_vm4 = vweird.f32 %v16092_v42  ;;  %v16191_v31 = vadd.f32 1.0, %v3215_v10  ;;  %v3741_v55 = vadd.f32 %v16092_v42, %v3740_v23  ;;  %5347 = vmatpush.bf16.msrb.mxu3 %v13274_v22 }
 0x9db   :  { %v16185_v62 = vadd.f32 %v2709_v48, %v19439_v61  ;;  %v3318_v50 = vmul.f32 %v3317_v29, %v16064_v37  ;;  %v3247_v38 = vmul.f32 3.8918573e-05, %v16172_v45  ;;  %v3274_v12 = vmul.f32 %v16179_v20, %v16179_v20  ;;  %vm16211_vm5 = vmor %vm3742_vm13, %vm3743_vm4 }
 0x9dc   :  { %v3746_v36 = vand.u32 2147483647, %v16058_v27  ;;  %v3748_v34 = vand.u32 2147483648, %v16058_v27  ;;  %v3762_v0 = vmul.f32 %v3761_v11, %v15979_v35  ;;  %v3200_v33 = vmul.f32 %v3199_v2, %v16053_v15 }
 0x9dd   :  { %v3831_v9 = vmul.f32 %v3830_v57, %v16103_v5  ;;  %v3335_v17 = vmul.f32 %v3334_v44, %v16064_v37  ;;  %v3248_v54 = vadd.f32 0.001143296, %v3247_v38  ;;  %v16205_v10 = vmul.f32 0.70710677, %v16185_v62 }
 0x9de   :  { %v3725_v48 = vadd.f32 1.1283791, %v3724_v49  ;;  %13938 = vrcp.f32 %v16191_v31  ;;  %v3236_v11 = vmul.f32 2.1237322e-06, %v16172_v45  ;;  %v16217_v5 = vmin.f32 %v3274_v12, 16.0 }
 0x9df   :  { %v16219_v30 = vpop.eup %13936  ;;  %v11285_v52 = vclamps-f32 %v3711_v28, 1.0  ;;  %v3745_v23 = vsel %vm16211_vm5, %v16092_v42, %v3741_v55  ;;  %v3319_v29 = vadd.f32 0.0036580483, %v3318_v50  ;;  %v3249_v27 = vmul.f32 %v3248_v54, %v16172_v45 }
 0x9e0   :  { %vm3747_vm6 = vcmp.eq.f32.partialorder %v3746_v36, 8.507059e+37  ;;  %v3749_v49 = vor.u32 1.1754944e-38, %v3748_v34  ;;  %v3763_v2 = vadd.f32 0.18741608, %v3762_v0  ;;  %v3201_v13 = vadd.f32 0.05243302, %v3200_v33 }
 0x9e1   :  { %v11288_v22 = vclamps-f32 %v3831_v9, 1.0  ;;  %v16225_v44 = vadd.f32 1.0, %v3335_v17  ;;  %v3250_v61 = vadd.f32 0.014752088, %v3249_v27  ;;  %v3834_v57 = vmul.f32 %v16205_v10, %v16205_v10  ;;  %v13256_v0 = vld [vmem:[#allocation26 + $0x120] sm:$0xff]  ;;  %v13273_v27 = vld [vmem:[#allocation26 + $0x1a8] sm:$0xff] }
 0x9e2   :  { %v3750_v38 = vsel %vm3747_vm6, %v3749_v49, %v3745_v23  ;;  %v3778_v28 = vmul.f32 %v16219_v30, %v16146_v59  ;;  %v3237_v12 = vadd.f32 0.00028619796, %v3236_v11  ;;  %v3287_v42 = vmul.f32 3.8918573e-05, %v16217_v5  ;;  %v13280_v33 = vld [vmem:[#allocation26 + $0x1e0] sm:$0xff]  ;;  %v13265_v23 = vld [vmem:[#allocation26 + $0x168] sm:$0xff]  ;;  %5321 = vmatpush.bf16.msra.mxu0 %v13256_v0  ;;  %5348 = vmatpush.bf16.msrb.mxu3 %v13273_v27 }
 0x9e3   :  { %v3726_v55 = vmul.f32 %v3725_v48, %v15862_v46  ;;  %v3320_v50 = vmul.f32 %v3319_v29, %v16064_v37  ;;  %v3251_v36 = vmul.f32 %v3250_v61, %v16172_v45  ;;  %v16235_v34 = vmin.f32 %v3834_v57, 16.0  ;;  %5363 = vmatpush.bf16.msrb.mxu1 %v13280_v33  ;;  %5334 = vmatpush.bf16.msra.mxu2 %v13265_v23  ;;  %v13264_v0 = vld [vmem:[#allocation26 + $0x160] sm:$0xff] }
 0x9e4   :  { %v16237_v9 = vpop.eup %13938  ;;  %v4174_v17 = vadd.f32 1.0, %v11285_v52  ;;  %v3764_v54 = vmul.f32 %v3763_v2, %v15979_v35  ;;  %v3202_v40 = vmul.f32 %v3201_v13, %v16053_v15  ;;  %v3288_v11 = vadd.f32 0.001143296, %v3287_v42  ;;  %v13255_v35 = vld [vmem:[#allocation26 + $0x118] sm:$0xff]  ;;  %v13272_v33 = vld [vmem:[#allocation26 + $0x1a0] sm:$0xff] }
 0x9e5   :  { %v4177_v49 = vadd.f32 1.0, %v11288_v22  ;;  %v3751_v46 = vmul.f32 %v3750_v38, %v3726_v55  ;;  %13940 = vrcp.f32 %v16225_v44  ;;  %v3252_v48 = vadd.f32 0.112945676, %v3251_v36  ;;  %v13279_v2 = vld [vmem:[#allocation26 + $0x1d8] sm:$0xff] }
 0x9e6   :  { %v3779_v29 = vsub.f32 1.0, %v3778_v28  ;;  %v3786_v61 = vand.u32 2147483647, %v16146_v59  ;;  %v3238_v57 = vmul.f32 %v3237_v12, %v16172_v45  ;;  %v3289_v52 = vmul.f32 %v3288_v11, %v16217_v5  ;;  %5322 = vmatpush.bf16.msra.mxu0 %v13255_v35  ;;  %5349 = vmatpush.bf16.msrb.mxu3 %v13272_v33 }
 0x9e7   :  { %v3218_v13 = vmul.f32 %v16237_v9, %v16191_v31  ;;  %v3321_v22 = vadd.f32 0.05243302, %v3320_v50  ;;  %v3276_v38 = vmul.f32 2.1237322e-06, %v16217_v5  ;;  %v3847_v42 = vmul.f32 3.8918573e-05, %v16235_v34  ;;  %5364 = vmatpush.bf16.msrb.mxu1 %v13279_v2  ;;  %5335 = vmatpush.bf16.msra.mxu2 %v13264_v0 }
 0x9e8   :  { %v16250_v28 = vmul.f32 %v4174_v17, %v15912_v4  ;;  %v3203_v55 = vadd.f32 0.18741608, %v3202_v40  ;;  %v3253_v12 = vmul.f32 %v3252_v48, %v16172_v45  ;;  %v3290_v36 = vadd.f32 0.014752088, %v3289_v52  ;;  %v13254_v40 = vld [vmem:[#allocation26 + $0x110] sm:$0xff] }
 0x9e9   :  { %v16254_v11 = vmul.f32 %v4177_v49, %v16008_v60  ;;  %v11286_v23 = vclamps-f32 %v3751_v46, 1.0  ;;  %v3765_v27 = vadd.f32 1.1283791, %v3764_v54  ;;  %v3788_v50 = vand.u32 2147483648, %v16146_v59  ;;  %v13278_v48 = vld [vmem:[#allocation26 + $0x1d0] sm:$0xff] }
 0x9ea   :  { %v3780_v6 = vmul.f32 %v16219_v30, %v3779_v29  ;;  %vm3782_vm7 = vweird.f32 %v16146_v59  ;;  %v3239_v4 = vadd.f32 0.0036580483, %v3238_v57  ;;  %v3291_v17 = vmul.f32 %v3290_v36, %v16217_v5  ;;  %v13263_v36 = vld [vmem:[#allocation26 + $0x158] sm:$0xff]  ;;  %5323 = vmatpush.bf16.msra.mxu0 %v13254_v40  ;;  %v2723_v59 = vpop.f32.mrf.mxu2 }
 0x9eb   :  { %v16260_v52 = vpop.eup %13940  ;;  %v3219_v60 = vsub.f32 1.0, %v3218_v13  ;;  %v3322_v54 = vmul.f32 %v3321_v22, %v16064_v37  ;;  %v3277_v49 = vadd.f32 0.00028619796, %v3276_v38  ;;  %v3848_v46 = vadd.f32 0.001143296, %v3847_v42  ;;  %v2751_v22 = vpop.f32.mrf.mxu1  ;;  %5365 = vmatpush.bf16.msrb.mxu1 %v13278_v48  ;;  %5336 = vmatpush.bf16.msra.mxu2 %v13263_v36 }
 0x9ec   :  { %vm16263_vm8 = vcmp.eq.f32.partialorder %v3786_v61, 8.507059e+37  ;;  %v3204_v29 = vmul.f32 %v3203_v55, %v16053_v15  ;;  %v3254_v57 = vadd.f32 0.4994258, %v3253_v12  ;;  %v3292_v2 = vadd.f32 0.112945676, %v3291_v17  ;;  %v13271_v61 = vld [vmem:[#allocation26 + $0x198] sm:$0xff] }
 0x9ed   :  { %v16268_v0 = vadd.f32 1.0, %v11286_v23  ;;  %v3789_v33 = vor.u32 1.1754944e-38, %v3788_v50  ;;  %v16271_v8 = vmul.f32 0.5, %v16131_v41  ;;  %v3849_v13 = vmul.f32 %v3848_v46, %v16235_v34  ;;  %v13253_v55 = vld [vmem:[#allocation26 + $0x108] sm:$0xff]  ;;  %5350 = vmatpush.bf16.msrb.mxu3 %v13271_v61 }
 0x9ee   :  { %v3781_v38 = vadd.f32 %v16219_v30, %v3780_v6  ;;  %vm3783_vm9 = vweird.f32 %v16219_v30  ;;  %v3338_v15 = vmul.f32 %v16260_v52, %v16225_v44  ;;  %v3293_v42 = vmul.f32 %v3292_v2, %v16217_v5  ;;  %v13277_v12 = vld [vmem:[#allocation26 + $0x1c8] sm:$0xff]  ;;  %5324 = vmatpush.bf16.msra.mxu0 %v13253_v55 }
 0x9ef   :  { %v3220_v41 = vmul.f32 %v16237_v9, %v3219_v60  ;;  %v3323_v23 = vadd.f32 0.18741608, %v3322_v54  ;;  %v3240_v50 = vmul.f32 %v3239_v4, %v16172_v45  ;;  %v3278_v17 = vmul.f32 %v3277_v49, %v16217_v5  ;;  %vm16295_vm10 = vmor %vm3782_vm7, %vm3783_vm9  ;;  %5366 = vmatpush.bf16.msrb.mxu1 %v13277_v12 }
 0x9f0   :  { %v3205_v40 = vadd.f32 1.1283791, %v3204_v29  ;;  %v3255_v6 = vmul.f32 %v3254_v57, %v16172_v45  ;;  %v16284_v48 = vmul.f32 0.5, %v16144_v25  ;;  %v19444_v46 = vperm.slane %v15960_v32, 3 }
 0x9f1   :  { %v3766_v36 = vmul.f32 %v3765_v27, %v15955_v19  ;;  %v3226_v60 = vand.u32 2147483647, %v16191_v31  ;;  %v3294_v54 = vadd.f32 0.4994258, %v3293_v42  ;;  %v3850_v49 = vadd.f32 0.014752088, %v3849_v13 }
 0x9f2   :  { %v16288_v2 = vadd.f32 %v2751_v22, %v19444_v46  ;;  %v3785_v25 = vsel %vm16295_vm10, %v16219_v30, %v3781_v38  ;;  %vm3223_vm12 = vweird.f32 %v16237_v9  ;;  %v3228_v19 = vand.u32 2147483648, %v16191_v31 }
 0x9f3   :  { %v3339_v27 = vsub.f32 1.0, %v3338_v15  ;;  %v3221_v29 = vadd.f32 %v16237_v9, %v3220_v41  ;;  %v3241_v57 = vadd.f32 0.05243302, %v3240_v50  ;;  %v3279_v22 = vadd.f32 0.0036580483, %v3278_v17 }
 0x9f4   :  { %v3851_v61 = vmul.f32 %v3850_v49, %v16235_v34  ;;  %v3206_v13 = vmul.f32 %v3205_v40, %v16020_v58  ;;  %v3324_v42 = vmul.f32 %v3323_v23, %v16064_v37  ;;  %v16309_v55 = vadd.f32 1.0, %v3255_v6  ;;  %v2737_v6 = vpop.f32.mrf.mxu3 }
 0x9f5   :  { %v16312_v30 = vmul.f32 0.70710677, %v16288_v2  ;;  %v3790_v38 = vsel %vm16263_vm8, %v3789_v33, %v3785_v25  ;;  %vm3222_vm13 = vweird.f32 %v16191_v31  ;;  %v3295_v15 = vmul.f32 %v3294_v54, %v16217_v5 }
 0x9f6   :  { %v19447_v12 = vperm.slane %v15960_v32, 1  ;;  %vm16324_vm4 = vmor %vm3222_vm13, %vm3223_vm12  ;;  %vm16328_vm5 = vcmp.eq.f32.partialorder %v3226_v60, 8.507059e+37  ;;  %v3340_v35 = vmul.f32 %v16260_v52, %v3339_v27  ;;  %v3852_v33 = vadd.f32 0.112945676, %v3851_v61 }
 0x9f7   :  { %v3954_v31 = vmul.f32 %v16312_v30, %v16312_v30  ;;  %v3225_v23 = vsel %vm16324_vm4, %v16237_v9, %v3221_v29  ;;  %v3229_v50 = vor.u32 1.1754944e-38, %v3228_v19  ;;  %v3242_v17 = vmul.f32 %v3241_v57, %v16172_v45 }
 0x9f8   :  { %v16320_v41 = vadd.f32 %v2723_v59, %v19447_v12  ;;  %v3280_v40 = vmul.f32 %v3279_v22, %v16217_v5  ;;  %v3791_v46 = vmul.f32 %v3790_v38, %v3766_v36  ;;  %13942 = vrcp.f32 %v16309_v55 }
 0x9f9   :  { %v3836_v4 = vmul.f32 2.1237322e-06, %v16235_v34  ;;  %v16342_v60 = vmin.f32 %v3954_v31, 16.0  ;;  %vm3343_vm6 = vweird.f32 %v16260_v52  ;;  %v3348_v54 = vand.u32 2147483648, %v16225_v44  ;;  %v13262_v31 = vld [vmem:[#allocation26 + $0x150] sm:$0xff] }
 0x9fa   :  { %v16346_v49 = vadd.f32 1.0, %v3295_v15  ;;  %v16349_v9 = vmul.f32 0.70710677, %v16320_v41  ;;  %v3230_v25 = vsel %vm16328_vm5, %v3229_v50, %v3225_v23  ;;  %v3341_v36 = vadd.f32 %v16260_v52, %v3340_v35  ;;  %v13270_v23 = vld [vmem:[#allocation26 + $0x190] sm:$0xff]  ;;  %5337 = vmatpush.bf16.msra.mxu2 %v13262_v31 }
 0x9fb   :  { %v3853_v19 = vmul.f32 %v3852_v33, %v16235_v34  ;;  %v19452_v27 = vperm.slane %v15960_v32, 2  ;;  %v3243_v29 = vadd.f32 0.18741608, %v3242_v17  ;;  %v3281_v57 = vadd.f32 0.05243302, %v3280_v40  ;;  %5351 = vmatpush.bf16.msrb.mxu3 %v13270_v23 }
 0x9fc   :  { %v3967_v22 = vmul.f32 3.8918573e-05, %v16342_v60  ;;  %v3874_v61 = vmul.f32 %v16349_v9, %v16349_v9  ;;  %v11287_v38 = vclamps-f32 %v3791_v46, 1.0  ;;  %vm3342_vm7 = vweird.f32 %v16225_v44 }
 0x9fd   :  { %v16357_v59 = vadd.f32 %v2737_v6, %v19452_v27  ;;  %v3346_v15 = vand.u32 2147483647, %v16225_v44  ;;  %v3837_v12 = vadd.f32 0.00028619796, %v3836_v4  ;;  %v3231_v58 = vmul.f32 %v3230_v25, %v3206_v13  ;;  %vm16366_vm8 = vmor %vm3342_vm7, %vm3343_vm6  ;;  %v13252_v27 = vld [vmem:[#allocation26 + $0x100] sm:$0xff] }
 0x9fe   :  { %13944 = vrcp.f32 %v16346_v49  ;;  %v3968_v35 = vadd.f32 0.001143296, %v3967_v22  ;;  %v16371_v33 = vmin.f32 %v3874_v61, 16.0  ;;  %v16373_v50 = vpop.eup %13942  ;;  %v3325_v17 = vadd.f32 1.1283791, %v3324_v42  ;;  %v13276_v22 = vld [vmem:[#allocation26 + $0x1c0] sm:$0xff]  ;;  %5325 = vmatpush.bf16.msra.mxu0 %v13252_v27 }
 0x9ff   :  { %v3345_v44 = vsel %vm16366_vm8, %v16260_v52, %v3341_v36  ;;  %v3854_v13 = vadd.f32 0.4994258, %v3853_v19  ;;  %v16379_v40 = vmul.f32 0.70710677, %v16357_v59  ;;  %v3349_v6 = vor.u32 1.1754944e-38, %v3348_v54  ;;  %5367 = vmatpush.bf16.msrb.mxu1 %v13276_v22 }
 0xa00   :  { %v3244_v46 = vmul.f32 %v3243_v29, %v16172_v45  ;;  %v3282_v4 = vmul.f32 %v3281_v57, %v16217_v5  ;;  %v3969_v25 = vmul.f32 %v3968_v35, %v16342_v60  ;;  %v4176_v42 = vadd.f32 1.0, %v11287_v38  ;;  %v13261_v29 = vld [vmem:[#allocation26 + $0x148] sm:$0xff] }
 0xa01   :  { %vm3347_vm9 = vcmp.eq.f32.partialorder %v3346_v15, 8.507059e+37  ;;  %v3838_v61 = vmul.f32 %v3837_v12, %v16235_v34  ;;  %v3887_v52 = vmul.f32 3.8918573e-05, %v16371_v33  ;;  %v11273_v36 = vclamps-f32 %v3231_v58, 1.0  ;;  %v13269_v57 = vld [vmem:[#allocation26 + $0x188] sm:$0xff]  ;;  %5338 = vmatpush.bf16.msra.mxu2 %v13261_v29 }
 0xa02   :  { %v3350_v19 = vsel %vm3347_vm9, %v3349_v6, %v3345_v44  ;;  %v3258_v54 = vmul.f32 %v16373_v50, %v16309_v55  ;;  %v16389_v45 = vmul.f32 0.5, %v16185_v62  ;;  %v3326_v37 = vmul.f32 %v3325_v17, %v16032_v3  ;;  %5352 = vmatpush.bf16.msrb.mxu3 %v13269_v57 }
 0xa03   :  { %v3855_v38 = vmul.f32 %v3854_v13, %v16235_v34  ;;  %v3970_v15 = vadd.f32 0.014752088, %v3969_v25  ;;  %v3914_v12 = vmul.f32 %v16379_v40, %v16379_v40  ;;  %v16399_v35 = vmul.f32 %v16268_v0, %v16023_v16 }
 0xa04   :  { %v16395_v58 = vpop.eup %13944  ;;  %v3245_v62 = vadd.f32 1.1283791, %v3244_v46  ;;  %v3283_v31 = vadd.f32 0.18741608, %v3282_v4  ;;  %v3888_v23 = vadd.f32 0.001143296, %v3887_v52  ;;  %v16402_v44 = vmul.f32 %v4176_v42, %v16073_v7 }
 0xa05   :  { %v3351_v3 = vmul.f32 %v3350_v19, %v3326_v37  ;;  %v3839_v17 = vadd.f32 0.0036580483, %v3838_v61  ;;  %v3971_v13 = vmul.f32 %v3970_v15, %v16342_v60  ;;  %v4162_v6 = vadd.f32 1.0, %v11273_v36 }
 0xa06   :  { %v3259_v25 = vsub.f32 1.0, %v3258_v54  ;;  %v3956_v27 = vmul.f32 2.1237322e-06, %v16342_v60  ;;  %v3889_v22 = vmul.f32 %v3888_v23, %v16371_v33  ;;  %v3298_v16 = vmul.f32 %v16395_v58, %v16346_v49 }
 0xa07   :  { %v16409_v0 = vadd.f32 1.0, %v3855_v38  ;;  %v3972_v46 = vadd.f32 0.112945676, %v3971_v13  ;;  %v16411_v4 = vmin.f32 %v3914_v12, 16.0  ;;  %v16414_v7 = vmul.f32 %v3245_v62, %v16139_v39  ;;  %v2763_v38 = vpop.f32.mrf.mxu0 }
 0xa08   :  { %vm3262_vm10 = vweird.f32 %v16309_v55  ;;  %v3284_v42 = vmul.f32 %v3283_v31, %v16217_v5  ;;  %v3890_v61 = vadd.f32 0.014752088, %v3889_v22  ;;  %v11276_v52 = vclamps-f32 %v3351_v3, 1.0 }
 0xa09   :  { %v3266_v36 = vand.u32 2147483647, %v16309_v55  ;;  %v3840_v19 = vmul.f32 %v3839_v17, %v16235_v34  ;;  %v19342_v54 = vperm.slane %v15960_v32, 4  ;;  %v3260_v29 = vmul.f32 %v16373_v50, %v3259_v25 }
 0xa0a   :  { %v3957_v57 = vadd.f32 0.00028619796, %v3956_v27  ;;  %v3973_v37 = vmul.f32 %v3972_v46, %v16342_v60  ;;  %v3891_v39 = vmul.f32 %v3890_v61, %v16371_v33  ;;  %v3299_v15 = vsub.f32 1.0, %v3298_v16 }
 0xa0b   :  { %13946 = vrcp.f32 %v16409_v0  ;;  %v3876_v5 = vmul.f32 2.1237322e-06, %v16371_v33  ;;  %v3927_v12 = vmul.f32 3.8918573e-05, %v16411_v4  ;;  %v16428_v62 = vmul.f32 %v4162_v6, %v16149_v26 }
 0xa0c   :  { %v3268_v31 = vand.u32 2147483648, %v16309_v55  ;;  %v3285_v23 = vadd.f32 1.1283791, %v3284_v42  ;;  %v3974_v3 = vadd.f32 0.4994258, %v3973_v37  ;;  %v4165_v17 = vadd.f32 1.0, %v11276_v52 }
 0xa0d   :  { %v3841_v13 = vadd.f32 0.05243302, %v3840_v19  ;;  %v3928_v25 = vadd.f32 0.001143296, %v3927_v12  ;;  %v16433_v27 = vadd.f32 %v2763_v38, %v19342_v54  ;;  %v3261_v22 = vadd.f32 %v16373_v50, %v3260_v29 }
 0xa0e   :  { %vm3263_vm12 = vweird.f32 %v16373_v50  ;;  %v3958_v16 = vmul.f32 %v3957_v57, %v16342_v60  ;;  %v3892_v46 = vadd.f32 0.112945676, %v3891_v39  ;;  %vm16438_vm13 = vcmp.eq.f32.partialorder %v3266_v36, 8.507059e+37 }
 0xa0f   :  { %v3300_v6 = vmul.f32 %v16395_v58, %v3299_v15  ;;  %v3877_v42 = vadd.f32 0.00028619796, %v3876_v5  ;;  %v3929_v61 = vmul.f32 %v3928_v25, %v16411_v4  ;;  %v3269_v52 = vor.u32 1.1754944e-38, %v3268_v31  ;;  %vm16453_vm4 = vmor %vm3262_vm10, %vm3263_vm12 }
 0xa10   :  { %v3286_v19 = vmul.f32 %v3285_v23, %v16179_v20  ;;  %v16446_v37 = vmul.f32 0.5, %v16288_v2  ;;  %v3975_v29 = vmul.f32 %v3974_v3, %v16342_v60  ;;  %v3308_v57 = vand.u32 2147483648, %v16346_v49 }
 0xa11   :  { %v16449_v38 = vpop.eup %13946  ;;  %v3842_v39 = vmul.f32 %v3841_v13, %v16235_v34  ;;  %v3930_v15 = vadd.f32 0.014752088, %v3929_v61  ;;  %v16460_v20 = vmul.f32 0.70710677, %v16433_v27  ;;  %v16463_v2 = vmul.f32 %v4165_v17, %v16166_v47 }
 0xa12   :  { %v3265_v5 = vsel %vm16453_vm4, %v16373_v50, %v3261_v22  ;;  %v3959_v55 = vadd.f32 0.0036580483, %v3958_v16  ;;  %v3893_v12 = vmul.f32 %v3892_v46, %v16371_v33  ;;  %v3301_v31 = vadd.f32 %v16395_v58, %v3300_v6 }
 0xa13   :  { %vm3303_vm5 = vweird.f32 %v16395_v58  ;;  %v3878_v23 = vmul.f32 %v3877_v42, %v16371_v33  ;;  %v3916_v3 = vmul.f32 2.1237322e-06, %v16411_v4  ;;  %v3858_v13 = vmul.f32 %v16449_v38, %v16409_v0 }
 0xa14   :  { %v16475_v47 = vadd.f32 1.0, %v3975_v29  ;;  %v3931_v17 = vmul.f32 %v3930_v15, %v16411_v4  ;;  %v3354_v50 = vmul.f32 %v16460_v20, %v16460_v20  ;;  %vm3302_vm6 = vweird.f32 %v16346_v49 }
 0xa15   :  { %v3306_v25 = vand.u32 2147483647, %v16346_v49  ;;  %v3309_v22 = vor.u32 1.1754944e-38, %v3308_v57  ;;  %v3843_v16 = vadd.f32 0.18741608, %v3842_v39  ;;  %v3270_v46 = vsel %vm16438_vm13, %v3269_v52, %v3265_v5  ;;  %vm16484_vm7 = vmor %vm3302_vm6, %vm3303_vm5  ;;  %v2805_v39 = vpop.f32.mrf.mxu1 }
 0xa16   :  { %v3960_v42 = vmul.f32 %v3959_v55, %v16342_v60  ;;  %v3894_v61 = vadd.f32 0.4994258, %v3893_v12  ;;  %v3932_v29 = vadd.f32 0.112945676, %v3931_v17  ;;  %v3305_v36 = vsel %vm16484_vm7, %v16395_v58, %v3301_v31 }
 0xa17   :  { %v3879_v15 = vadd.f32 0.0036580483, %v3878_v23  ;;  %v16492_v54 = vmin.f32 %v3354_v50, 16.0  ;;  %v19344_v49 = vperm.slane %v15960_v32, 7  ;;  %v3859_v57 = vsub.f32 1.0, %v3858_v13 }
 0xa18   :  { %13948 = vrcp.f32 %v16475_v47  ;;  %v3917_v26 = vadd.f32 0.00028619796, %v3916_v3  ;;  %v3933_v52 = vmul.f32 %v3932_v29, %v16411_v4  ;;  %vm3307_vm8 = vcmp.eq.f32.partialorder %v3306_v25, 8.507059e+37  ;;  %v13315_v25 = vld [vmem:[#allocation26 + $0x2f8] sm:$0xff] }
 0xa19   :  { %v3844_v5 = vmul.f32 %v3843_v16, %v16235_v34  ;;  %v16499_v55 = vmul.f32 0.5, %v16320_v41  ;;  %v16502_v58 = vmul.f32 0.5, %v16357_v59  ;;  %v3271_v12 = vmul.f32 %v3270_v46, %v16414_v7  ;;  %v13291_v41 = vld [vmem:[#allocation26 + $0x238] sm:$0xff] }
 0xa1a   :  { %v3310_v31 = vsel %vm3307_vm8, %v3309_v22, %v3305_v36  ;;  %v3895_v23 = vmul.f32 %v3894_v61, %v16371_v33  ;;  %v3934_v13 = vadd.f32 0.4994258, %v3933_v52  ;;  %v3961_v17 = vadd.f32 0.05243302, %v3960_v42 }
 0xa1b   :  { %v3880_v3 = vmul.f32 %v3879_v15, %v16371_v33  ;;  %v3367_v50 = vmul.f32 3.8918573e-05, %v16492_v54  ;;  %v16510_v34 = vadd.f32 %v2805_v39, %v19344_v49  ;;  %v3860_v59 = vmul.f32 %v16449_v38, %v3859_v57 }
 0xa1c   :  { %v3918_v16 = vmul.f32 %v3917_v26, %v16411_v4  ;;  %v4218_v7 = vpack.c.bf16 %v15748_v53, %v15614_v21  ;;  %v4221_v22 = vpack.c.bf16 %v15773_v24, %v15711_v18  ;;  %v3311_v46 = vmul.f32 %v3310_v31, %v3286_v19 }
 0xa1d   :  { %v3845_v6 = vadd.f32 1.1283791, %v3844_v5  ;;  %vm3862_vm9 = vweird.f32 %v16409_v0  ;;  %v3368_v42 = vadd.f32 0.001143296, %v3367_v50  ;;  %v11274_v29 = vclamps-f32 %v3271_v12, 1.0 }
 0xa1e   :  { %v16519_v61 = vpop.eup %13948  ;;  %v3868_v36 = vand.u32 2147483648, %v16409_v0  ;;  %v16522_v15 = vadd.f32 1.0, %v3895_v23  ;;  %v3935_v57 = vmul.f32 %v3934_v13, %v16411_v4  ;;  %5270 = vmatmul.bf16.vlgmr.msrb.gmra.mxu0 %v4218_v7  ;;  %5312 = vmatmul.bf16.vlgmr.msra.gmra.mxu1 %v4221_v22  ;;  %v3962_v21 = vmul.f32 %v3961_v17, %v16342_v60 }
 0xa1f   :  { %v3881_v53 = vadd.f32 0.05243302, %v3880_v3  ;;  %v3369_v18 = vmul.f32 %v3368_v42, %v16492_v54  ;;  %v16528_v24 = vmul.f32 0.70710677, %v16510_v34  ;;  %5374 = vmatpush.bf16.msrb.mxu0 %v13291_v41  ;;  %5416 = vmatpush.bf16.msra.mxu1 %v13315_v25  ;;  %v3861_v19 = vadd.f32 %v16449_v38, %v3860_v59  ;;  %v2777_v42 = vpop.f32.mrf.mxu2 }
 0xa20   :  { %vm3863_vm10 = vweird.f32 %v16449_v38  ;;  %v3866_v26 = vand.u32 2147483647, %v16409_v0  ;;  %v3919_v52 = vadd.f32 0.0036580483, %v3918_v16  ;;  %v11275_v39 = vclamps-f32 %v3311_v46, 1.0  ;;  %v16558_v0 = vld [vmem:[%s19316_s18 + $0x8] sm:$0xff] }
 0xa21   :  { %v3978_v5 = vmul.f32 %v16519_v61, %v16475_v47  ;;  %v3356_v12 = vmul.f32 2.1237322e-06, %v16492_v54  ;;  %v3370_v31 = vadd.f32 0.014752088, %v3369_v18  ;;  %v3869_v23 = vor.u32 1.1754944e-38, %v3868_v36  ;;  %vm16543_vm12 = vmor %vm3862_vm9, %vm3863_vm10 }
 0xa22   :  { %13950 = vrcp.f32 %v16522_v15  ;;  %v16537_v13 = vadd.f32 1.0, %v3935_v57  ;;  %v3474_v17 = vmul.f32 %v16528_v24, %v16528_v24  ;;  %v4163_v3 = vadd.f32 1.0, %v11274_v29 }
 0xa23   :  { %v3963_v41 = vadd.f32 0.18741608, %v3962_v21  ;;  %v3882_v25 = vmul.f32 %v3881_v53, %v16371_v33  ;;  %v3371_v59 = vmul.f32 %v3370_v31, %v16492_v54  ;;  %v3865_v16 = vsel %vm16543_vm12, %v16449_v38, %v3861_v19 }
 0xa24   :  { %v3920_v7 = vmul.f32 %v3919_v52, %v16411_v4  ;;  %v16553_v22 = vmin.f32 %v3474_v17, 16.0  ;;  %v19343_v46 = vperm.slane %v16558_v0, 5  ;;  %v4164_v29 = vadd.f32 1.0, %v11275_v39 }
 0xa25   :  { %v3979_v36 = vsub.f32 1.0, %v3978_v5  ;;  %v3357_v57 = vadd.f32 0.00028619796, %v3356_v12  ;;  %v3372_v21 = vadd.f32 0.112945676, %v3371_v59  ;;  %v3846_v53 = vmul.f32 %v3845_v6, %v16205_v10  ;;  %v13290_v12 = vld [vmem:[#allocation26 + $0x230] sm:$0xff] }
 0xa26   :  { %vm3867_vm13 = vcmp.eq.f32.partialorder %v3866_v26, 8.507059e+37  ;;  %13952 = vrcp.f32 %v16537_v13  ;;  %v3487_v38 = vmul.f32 3.8918573e-05, %v16553_v22  ;;  %v3883_v19 = vadd.f32 0.18741608, %v3882_v25  ;;  %v13260_v59 = vld [vmem:[#allocation26 + $0x140] sm:$0xff]  ;;  %5375 = vmatpush.bf16.msrb.mxu0 %v13290_v12 }
 0xa27   :  { %v3870_v18 = vsel %vm3867_vm13, %v3869_v23, %v3865_v16  ;;  %v16565_v52 = vmul.f32 0.5, %v16433_v27  ;;  %v16569_v31 = vadd.f32 %v2777_v42, %v19343_v46  ;;  %v16574_v5 = vmul.f32 %v4163_v3, %v16271_v8  ;;  %v13314_v23 = vld [vmem:[#allocation26 + $0x2f0] sm:$0xff]  ;;  %v13268_v16 = vld [vmem:[#allocation26 + $0x180] sm:$0xff]  ;;  %5339 = vmatpush.bf16.msra.mxu2 %v13260_v59 }
 0xa28   :  { %v16571_v39 = vpop.eup %13950  ;;  %v3964_v10 = vmul.f32 %v3963_v41, %v16342_v60  ;;  %v3921_v6 = vadd.f32 0.05243302, %v3920_v7  ;;  %v3373_v26 = vmul.f32 %v3372_v21, %v16492_v54  ;;  %v16579_v17 = vmul.f32 %v4164_v29, %v16284_v48  ;;  %5417 = vmatpush.bf16.msra.mxu1 %v13314_v23  ;;  %5353 = vmatpush.bf16.msrb.mxu3 %v13268_v16  ;;  %v2765_v16 = vpop.f32.mrf.mxu0 }
 0xa29   :  { %19463 = vst [vmem:[#allocation50_spill] sm:$0xff] %v16569_v31  ;;  %v3980_v27 = vmul.f32 %v16519_v61, %v3979_v36  ;;  %v3358_v50 = vmul.f32 %v3357_v57, %v16492_v54  ;;  %v3488_v25 = vadd.f32 0.001143296, %v3487_v38  ;;  %v16583_v42 = vmul.f32 %v3870_v18, %v3846_v53 }
 0xa2a   :  { %v3986_v8 = vand.u32 2147483647, %v16475_v47  ;;  %v3988_v60 = vand.u32 2147483648, %v16475_v47  ;;  %v3374_v3 = vadd.f32 0.4994258, %v3373_v26  ;;  %v3884_v41 = vmul.f32 %v3883_v19, %v16371_v33  ;;  %v2791_v26 = vpop.f32.mrf.mxu3 }
 0xa2b   :  { %v3898_v48 = vmul.f32 %v16571_v39, %v16522_v15  ;;  %v3489_v7 = vmul.f32 %v3488_v25, %v16553_v22  ;;  %v16592_v29 = vmul.f32 0.70710677, %v16569_v31  ;;  %vm3983_vm4 = vweird.f32 %v16519_v61 }
 0xa2c   :  { %v16594_v36 = vpop.eup %13952  ;;  %v3922_v57 = vmul.f32 %v3921_v6, %v16411_v4  ;;  %v3375_v21 = vmul.f32 %v3374_v3, %v16492_v54  ;;  %v19347_v33 = vperm.slane %v16558_v0, 6  ;;  %v3981_v53 = vadd.f32 %v16519_v61, %v3980_v27  ;;  %v13289_v3 = vld [vmem:[#allocation26 + $0x228] sm:$0xff] }
 0xa2d   :  { %19464 = vst [vmem:[#allocation51_spill] sm:$0xff] %v16592_v29  ;;  %v3359_v38 = vadd.f32 0.0036580483, %v3358_v50  ;;  %v3490_v18 = vadd.f32 0.014752088, %v3489_v7  ;;  %v3394_v19 = vmul.f32 %v16592_v29, %v16592_v29  ;;  %vm3982_vm5 = vweird.f32 %v16475_v47  ;;  %v13313_v7 = vld [vmem:[#allocation26 + $0x2e8] sm:$0xff]  ;;  %5376 = vmatpush.bf16.msrb.mxu0 %v13289_v3 }
 0xa2e   :  { %v3965_v12 = vadd.f32 1.1283791, %v3964_v10  ;;  %v16604_v23 = vadd.f32 1.0, %v3375_v21  ;;  %v3476_v25 = vmul.f32 2.1237322e-06, %v16553_v22  ;;  %vm16607_vm6 = vcmp.eq.f32.partialorder %v3986_v8, 8.507059e+37  ;;  %vm16618_vm7 = vmor %vm3982_vm5, %vm3983_vm4  ;;  %5418 = vmatpush.bf16.msra.mxu1 %v13313_v7 }
 0xa2f   :  { %v3899_v59 = vsub.f32 1.0, %v3898_v48  ;;  %v3938_v27 = vmul.f32 %v16594_v36, %v16537_v13  ;;  %v16613_v50 = vmin.f32 %v3394_v19, 16.0  ;;  %v11289_v10 = vclamps-f32 %v16583_v42, 1.0 }
 0xa30   :  { %v3989_v8 = vor.u32 1.1754944e-38, %v3988_v60  ;;  %v3491_v21 = vmul.f32 %v3490_v18, %v16553_v22  ;;  %v16625_v48 = vadd.f32 %v2791_v26, %v19347_v33  ;;  %v3985_v19 = vsel %vm16618_vm7, %v16519_v61, %v3981_v53 }
 0xa31   :  { %v3885_v46 = vadd.f32 1.1283791, %v3884_v41  ;;  %v3923_v49 = vadd.f32 0.18741608, %v3922_v57  ;;  %v3360_v42 = vmul.f32 %v3359_v38, %v16492_v54  ;;  %13954 = vrcp.f32 %v16604_v23  ;;  %v13299_v57 = vld [vmem:[#allocation26 + $0x278] sm:$0xff] }
 0xa32   :  { %19469 = vst [vmem:[#allocation52_spill] sm:$0xff] %v16625_v48  ;;  %v3477_v31 = vadd.f32 0.00028619796, %v3476_v25  ;;  %v3407_v60 = vmul.f32 3.8918573e-05, %v16613_v50  ;;  %v19470_v18 = vperm.slane %v15960_v32, 4  ;;  %v3900_v26 = vmul.f32 %v16571_v39, %v3899_v59 }
 0xa33   :  { %v3906_v47 = vand.u32 2147483647, %v16522_v15  ;;  %v3908_v61 = vand.u32 2147483648, %v16522_v15  ;;  %v3939_v41 = vsub.f32 1.0, %v3938_v27  ;;  %v3966_v53 = vmul.f32 %v3965_v12, %v16312_v30 }
 0xa34   :  { %v16635_v29 = vadd.f32 %v2765_v16, %v19470_v18  ;;  %v3492_v38 = vadd.f32 0.112945676, %v3491_v21  ;;  %v3408_v3 = vadd.f32 0.001143296, %v3407_v60  ;;  %v16642_v25 = vmul.f32 0.70710677, %v16625_v48 }
 0xa35   :  { %v3990_v7 = vsel %vm16607_vm6, %v3989_v8, %v3985_v19  ;;  %v3924_v16 = vmul.f32 %v3923_v49, %v16411_v4  ;;  %v3361_v18 = vadd.f32 0.05243302, %v3360_v42  ;;  %v4219_v59 = vpack.c.bf16 %v15898_v63, %v15715_v14  ;;  %v13288_v60 = vld [vmem:[#allocation26 + $0x220] sm:$0xff] }
 0xa36   :  { %19471 = vst [vmem:[#allocation53_spill] sm:$0xff] %v16642_v25  ;;  %v3478_v33 = vmul.f32 %v3477_v31, %v16553_v22  ;;  %v3409_v27 = vmul.f32 %v3408_v3, %v16613_v50  ;;  %v3434_v30 = vmul.f32 %v16642_v25, %v16642_v25  ;;  %v16654_v12 = vmul.f32 0.70710677, %v16635_v29  ;;  %5377 = vmatpush.bf16.msrb.mxu0 %v13288_v60 }
 0xa37   :  { %v4178_v21 = vadd.f32 1.0, %v11289_v10  ;;  %v3901_v6 = vadd.f32 %v16571_v39, %v3900_v26  ;;  %vm3903_vm8 = vweird.f32 %v16571_v39  ;;  %v3396_v4 = vmul.f32 2.1237322e-06, %v16613_v50  ;;  %5284 = vmatmul.bf16.vlgmr.msrb.gmra.mxu2 %v4219_v59  ;;  %v16659_v49 = vpop.eup %13954 }
 0xa38   :  { %vm3902_vm9 = vweird.f32 %v16522_v15  ;;  %v3940_v14 = vmul.f32 %v16594_v36, %v3939_v41  ;;  %v3493_v63 = vmul.f32 %v3492_v38, %v16553_v22  ;;  %v16664_v31 = vmin.f32 %v3434_v30, 16.0  ;;  %5388 = vmatpush.bf16.msrb.mxu2 %v13299_v57 }
 0xa39   :  { %v3991_v8 = vmul.f32 %v3990_v7, %v3966_v53  ;;  %vm16666_vm10 = vcmp.eq.f32.partialorder %v3906_v47, 8.507059e+37  ;;  %v3410_v19 = vadd.f32 0.014752088, %v3409_v27  ;;  %v3994_v42 = vmul.f32 %v16654_v12, %v16654_v12  ;;  %vm16672_vm12 = vmor %vm3902_vm9, %vm3903_vm8 }
 0xa3a   :  { %v3909_v15 = vor.u32 1.1754944e-38, %v3908_v61  ;;  %v3925_v26 = vadd.f32 1.1283791, %v3924_v16  ;;  %v3362_v41 = vmul.f32 %v3361_v18, %v16492_v54  ;;  %v3479_v38 = vadd.f32 0.0036580483, %v3478_v33 }
 0xa3b   :  { %v3905_v47 = vsel %vm16672_vm12, %v16571_v39, %v3901_v6  ;;  %v3378_v57 = vmul.f32 %v16659_v49, %v16604_v23  ;;  %v3397_v53 = vadd.f32 0.00028619796, %v3396_v4  ;;  %v16682_v3 = vmin.f32 %v3994_v42, 16.0 }
 0xa3c   :  { %v3941_v7 = vadd.f32 %v16594_v36, %v3940_v14  ;;  %vm3943_vm13 = vweird.f32 %v16594_v36  ;;  %v3494_v59 = vadd.f32 0.4994258, %v3493_v63  ;;  %v3447_v61 = vmul.f32 3.8918573e-05, %v16664_v31 }
 0xa3d   :  { %v11292_v16 = vclamps-f32 %v3991_v8, 1.0  ;;  %vm3942_vm4 = vweird.f32 %v16537_v13  ;;  %v3948_v33 = vand.u32 2147483648, %v16537_v13  ;;  %v3411_v39 = vmul.f32 %v3410_v19, %v16613_v50  ;;  %v13298_v19 = vld [vmem:[#allocation26 + $0x270] sm:$0xff] }
 0xa3e   :  { %v3910_v18 = vsel %vm16666_vm10, %v3909_v15, %v3905_v47  ;;  %v3946_v27 = vand.u32 2147483647, %v16537_v13  ;;  %v3363_v30 = vadd.f32 0.18741608, %v3362_v41  ;;  %v3480_v6 = vmul.f32 %v3479_v38, %v16553_v22  ;;  %vm16695_vm5 = vmor %vm3942_vm4, %vm3943_vm13  ;;  %5389 = vmatpush.bf16.msrb.mxu2 %v13298_v19 }
 0xa3f   :  { %v3886_v4 = vmul.f32 %v3885_v46, %v16349_v9  ;;  %v3379_v63 = vsub.f32 1.0, %v3378_v57  ;;  %v3398_v8 = vmul.f32 %v3397_v53, %v16613_v50  ;;  %v3996_v42 = vmul.f32 2.1237322e-06, %v16682_v3  ;;  %v13312_v46 = vld [vmem:[#allocation26 + $0x2e0] sm:$0xff] }
 0xa40   :  { %v3945_v13 = vsel %vm16695_vm5, %v16594_v36, %v3941_v7  ;;  %v3495_v10 = vmul.f32 %v3494_v59, %v16553_v22  ;;  %v3448_v15 = vadd.f32 0.001143296, %v3447_v61  ;;  %v4007_v9 = vmul.f32 3.8918573e-05, %v16682_v3  ;;  %5419 = vmatpush.bf16.msra.mxu1 %v13312_v46  ;;  %v13297_v36 = vld [vmem:[#allocation26 + $0x268] sm:$0xff] }
 0xa41   :  { %v4181_v41 = vadd.f32 1.0, %v11292_v16  ;;  %v16706_v38 = vmul.f32 %v3910_v18, %v3886_v4  ;;  %v3949_v47 = vor.u32 1.1754944e-38, %v3948_v33  ;;  %v3412_v57 = vadd.f32 0.112945676, %v3411_v39  ;;  %v2807_v16 = vpop.f32.mrf.mxu1  ;;  %v13287_v18 = vld [vmem:[#allocation26 + $0x218] sm:$0xff] }
 0xa42   :  { %v16709_v53 = vmul.f32 %v4178_v21, %v16389_v45  ;;  %vm3947_vm6 = vcmp.eq.f32.partialorder %v3946_v27, 8.507059e+37  ;;  %v3481_v48 = vadd.f32 0.05243302, %v3480_v6  ;;  %v4008_v14 = vadd.f32 0.001143296, %v4007_v9  ;;  %v13311_v4 = vld [vmem:[#allocation26 + $0x2d8] sm:$0xff]  ;;  %5390 = vmatpush.bf16.msrb.mxu2 %v13297_v36  ;;  %5378 = vmatpush.bf16.msrb.mxu0 %v13287_v18 }
 0xa43   :  { %v3950_v7 = vsel %vm3947_vm6, %v3949_v47, %v3945_v13  ;;  %v3380_v59 = vmul.f32 %v16659_v49, %v3379_v63  ;;  %v3399_v61 = vadd.f32 0.0036580483, %v3398_v8  ;;  %v3997_v25 = vadd.f32 0.00028619796, %v3996_v42  ;;  %v13296_v8 = vld [vmem:[#allocation26 + $0x260] sm:$0xff]  ;;  %v13295_v47 = vld [vmem:[#allocation26 + $0x258] sm:$0xff] }
 0xa44   :  { %v3926_v33 = vmul.f32 %v3925_v26, %v16379_v40  ;;  %v3364_v39 = vmul.f32 %v3363_v30, %v16492_v54  ;;  %v16714_v19 = vadd.f32 1.0, %v3495_v10  ;;  %v3449_v45 = vmul.f32 %v3448_v15, %v16664_v31  ;;  %5420 = vmatpush.bf16.msra.mxu1 %v13311_v4  ;;  %v13286_v10 = vld [vmem:[#allocation26 + $0x210] sm:$0xff]  ;;  %v13285_v4 = vld [vmem:[#allocation26 + $0x208] sm:$0xff] }
 0xa45   :  { %v16718_v21 = vmul.f32 %v4181_v41, %v16446_v37  ;;  %v11290_v27 = vclamps-f32 %v16706_v38, 1.0  ;;  %v3413_v6 = vmul.f32 %v3412_v57, %v16613_v50  ;;  %v4009_v63 = vmul.f32 %v4008_v14, %v16682_v3  ;;  %v13310_v15 = vld [vmem:[#allocation26 + $0x2d0] sm:$0xff] }
 0xa46   :  { %v3951_v42 = vmul.f32 %v3950_v7, %v3926_v33  ;;  %vm3383_vm7 = vweird.f32 %v16659_v49  ;;  %v3482_v40 = vmul.f32 %v3481_v48, %v16553_v22  ;;  %v19478_v54 = vperm.slane %v15960_v32, 7  ;;  %5391 = vmatpush.bf16.msrb.mxu2 %v13296_v8  ;;  %5379 = vmatpush.bf16.msrb.mxu0 %v13286_v10  ;;  %v13309_v33 = vld [vmem:[#allocation26 + $0x2c8] sm:$0xff] }
 0xa47   :  { %v3381_v37 = vadd.f32 %v16659_v49, %v3380_v59  ;;  %v3400_v30 = vmul.f32 %v3399_v61, %v16613_v50  ;;  %v3998_v60 = vmul.f32 %v3997_v25, %v16682_v3  ;;  %v4010_v13 = vadd.f32 0.014752088, %v4009_v63 }
 0xa48   :  { %v16727_v26 = vadd.f32 %v2807_v16, %v19478_v54  ;;  %v3365_v9 = vadd.f32 1.1283791, %v3364_v39  ;;  %v3386_v46 = vand.u32 2147483647, %v16604_v23  ;;  %13956 = vrcp.f32 %v16714_v19  ;;  %5421 = vmatpush.bf16.msra.mxu1 %v13310_v15  ;;  %v2779_v15 = vpop.f32.mrf.mxu2 }
 0xa49   :  { %v3450_v48 = vadd.f32 0.014752088, %v3449_v45  ;;  %vm3382_vm8 = vweird.f32 %v16604_v23  ;;  %v3388_v32 = vand.u32 2147483648, %v16604_v23  ;;  %v3414_v41 = vadd.f32 0.4994258, %v3413_v6  ;;  %v13307_v23 = vld [vmem:[#allocation26 + $0x2b8] sm:$0xff] }
 0xa4a   :  { %v3436_v38 = vmul.f32 2.1237322e-06, %v16664_v31  ;;  %v11291_v25 = vclamps-f32 %v3951_v42, 1.0  ;;  %vm16739_vm9 = vmor %vm3382_vm8, %vm3383_vm7  ;;  %v3483_v14 = vadd.f32 0.18741608, %v3482_v40  ;;  %v4011_v36 = vmul.f32 %v4010_v13, %v16682_v3  ;;  %5392 = vmatpush.bf16.msrb.mxu2 %v13295_v47  ;;  %5380 = vmatpush.bf16.msrb.mxu0 %v13285_v4 }
 0xa4b   :  { %v16745_v7 = vmul.f32 0.70710677, %v16727_v26  ;;  %v4229_v59 = vpack.c.bf16 %v16718_v21, %v16463_v2  ;;  %v3385_v61 = vsel %vm16739_vm9, %v16659_v49, %v3381_v37  ;;  %v3401_v16 = vadd.f32 0.05243302, %v3400_v30  ;;  %v13294_v49 = vld [vmem:[#allocation26 + $0x250] sm:$0xff]  ;;  %v13327_v21 = vld [vmem:[#allocation26 + $0x358] sm:$0xff] }
 0xa4c   :  { %v3999_v18 = vadd.f32 0.0036580483, %v3998_v60  ;;  %v3451_v39 = vmul.f32 %v3450_v48, %v16664_v31  ;;  %v4012_v45 = vadd.f32 0.112945676, %v4011_v36  ;;  %v4220_v63 = vpack.c.bf16 %v15933_v51, %v15721_v56  ;;  %5422 = vmatpush.bf16.msra.mxu1 %v13309_v33  ;;  %v13306_v48 = vld [vmem:[#allocation26 + $0x2b0] sm:$0xff] }
 0xa4d   :  { %v4114_v6 = vmul.f32 %v16745_v7, %v16745_v7  ;;  %v4179_v8 = vadd.f32 1.0, %v11290_v27  ;;  %v3389_v42 = vor.u32 1.1754944e-38, %v3388_v32  ;;  %v3415_v40 = vmul.f32 %v3414_v41, %v16613_v50  ;;  %v13284_v32 = vld [vmem:[#allocation26 + $0x200] sm:$0xff]  ;;  %v13342_v2 = vld [vmem:[#allocation26 + $0x3d0] sm:$0xff] }
 0xa4e   :  { %v3437_v54 = vadd.f32 0.00028619796, %v3436_v38  ;;  %v16758_v37 = vpop.eup %13956  ;;  %v3366_v30 = vmul.f32 %v3365_v9, %v16460_v20  ;;  %vm3387_vm10 = vcmp.eq.f32.partialorder %v3386_v46, 8.507059e+37  ;;  %v4013_v60 = vmul.f32 %v4012_v45, %v16682_v3  ;;  %5298 = vmatmul.bf16.vlgmr.msra.gmra.mxu3 %v4220_v63  ;;  %v13308_v41 = vld [vmem:[#allocation26 + $0x2c0] sm:$0xff]  ;;  %5393 = vmatpush.bf16.msrb.mxu2 %v13294_v49 }
 0xa4f   :  { %v16762_v13 = vmin.f32 %v4114_v6, 16.0  ;;  %v4180_v56 = vadd.f32 1.0, %v11291_v25  ;;  %v3390_v51 = vsel %vm3387_vm10, %v3389_v42, %v3385_v61  ;;  %v3484_v27 = vmul.f32 %v3483_v14, %v16553_v22  ;;  %5402 = vmatpush.bf16.msra.mxu3 %v13307_v23  ;;  %5381 = vmatpush.bf16.msrb.mxu0 %v13284_v32  ;;  %v13293_v14 = vld [vmem:[#allocation26 + $0x248] sm:$0xff]  ;;  %v2793_v42 = vpop.f32.mrf.mxu3  ;;  %v13304_v32 = vld [vmem:[#allocation26 + $0x2a0] sm:$0xff] }
 0xa50   :  { %v4000_v10 = vmul.f32 %v3999_v18, %v16682_v3  ;;  %v3402_v20 = vmul.f32 %v3401_v16, %v16613_v50  ;;  %v3452_v9 = vadd.f32 0.112945676, %v3451_v39  ;;  %v4014_v46 = vadd.f32 0.4994258, %v4013_v60  ;;  %5423 = vmatpush.bf16.msra.mxu1 %v13308_v41  ;;  %v13305_v6 = vld [vmem:[#allocation26 + $0x2a8] sm:$0xff] }
 0xa51   :  { %v4116_v38 = vmul.f32 2.1237322e-06, %v16762_v13  ;;  %v3498_v47 = vmul.f32 %v16758_v37, %v16714_v19  ;;  %v16770_v25 = vadd.f32 1.0, %v3415_v40  ;;  %v3438_v22 = vmul.f32 %v3437_v54, %v16664_v31 }
 0xa52   :  { %v4127_v57 = vmul.f32 3.8918573e-05, %v16762_v13  ;;  %v16775_v36 = vmul.f32 %v4179_v8, %v16499_v55  ;;  %v3391_v23 = vmul.f32 %v3390_v51, %v3366_v30  ;;  %v16778_v61 = vmul.f32 0.5, %v16635_v29  ;;  %5394 = vmatpush.bf16.msrb.mxu2 %v13293_v14 }
 0xa53   :  { %v19481_v16 = vperm.slane %v16558_v0, 5  ;;  %v16785_v4 = vmul.f32 %v4180_v56, %v16502_v58  ;;  %v3485_v33 = vadd.f32 1.1283791, %v3484_v27  ;;  %v4001_v39 = vadd.f32 0.05243302, %v4000_v10  ;;  %5403 = vmatpush.bf16.msra.mxu3 %v13306_v48  ;;  %v13292_v58 = vld [vmem:[#allocation26 + $0x240] sm:$0xff] }
 0xa54   :  { %v4015_v45 = vmul.f32 %v4014_v46, %v16682_v3  ;;  %v3403_v55 = vadd.f32 0.18741608, %v3402_v20  ;;  %v3453_v63 = vmul.f32 %v3452_v9, %v16664_v31  ;;  %v4117_v8 = vadd.f32 0.00028619796, %v4116_v38 }
 0xa55   :  { %v16782_v18 = vadd.f32 %v2779_v15, %v19481_v16  ;;  %v4128_v29 = vadd.f32 0.001143296, %v4127_v57  ;;  %v3499_v40 = vsub.f32 1.0, %v3498_v47  ;;  %13958 = vrcp.f32 %v16770_v25  ;;  %v13323_v16 = vld [vmem:[#allocation26 + $0x338] sm:$0xff] }
 0xa56   :  { %v3439_v54 = vadd.f32 0.0036580483, %v3438_v22  ;;  %v16790_v49 = vadd.f32 1.0, %v4015_v45  ;;  %v11277_v30 = vclamps-f32 %v3391_v23, 1.0  ;;  %v4118_v60 = vmul.f32 %v4117_v8, %v16762_v13  ;;  %5395 = vmatpush.bf16.msrb.mxu2 %v13292_v58 }
 0xa57   :  { %v4129_v56 = vmul.f32 %v4128_v29, %v16762_v13  ;;  %v16795_v51 = vmul.f32 0.70710677, %v16782_v18  ;;  %v4228_v27 = vpack.c.bf16 %v16785_v4, %v16579_v17  ;;  %v4002_v10 = vmul.f32 %v4001_v39, %v16682_v3  ;;  %5404 = vmatpush.bf16.msra.mxu3 %v13305_v6 }
 0xa58   :  { %13960 = vrcp.f32 %v16790_v49  ;;  %v19482_v15 = vperm.slane %v16558_v0, 6  ;;  %v16806_v41 = vmul.f32 %v3485_v33, %v16528_v24  ;;  %v3454_v20 = vadd.f32 0.4994258, %v3453_v63 }
 0xa59   :  { %v4119_v9 = vadd.f32 0.0036580483, %v4118_v60  ;;  %v4130_v46 = vadd.f32 0.014752088, %v4129_v56  ;;  %v3500_v38 = vmul.f32 %v16758_v37, %v3499_v40  ;;  %v3506_v47 = vand.u32 2147483647, %v16714_v19 }
 0xa5a   :  { %v16803_v48 = vadd.f32 %v2793_v42, %v19482_v15  ;;  %v3508_v22 = vand.u32 2147483648, %v16714_v19  ;;  %v3404_v57 = vmul.f32 %v3403_v55, %v16613_v50  ;;  %v16812_v0 = vadd.f32 1.0, %v11277_v30  ;;  %v13303_v55 = vld [vmem:[#allocation26 + $0x298] sm:$0xff]  ;;  %v19483_v60 = vld [vmem:[#allocation48_spill] sm:$0xff] }
 0xa5b   :  { %v3440_v14 = vmul.f32 %v3439_v54, %v16664_v31  ;;  %v4131_v23 = vmul.f32 %v4130_v46, %v16762_v13  ;;  %v4034_v24 = vmul.f32 %v16795_v51, %v16795_v51  ;;  %v16818_v33 = vpop.eup %13958  ;;  %vm3503_vm12 = vweird.f32 %v16758_v37  ;;  %5405 = vmatpush.bf16.msra.mxu3 %v13304_v32  ;;  %v13347_v40 = vld [vmem:[#allocation26 + $0x3f8] sm:$0xff]  ;;  %v13302_v32 = vld [vmem:[#allocation26 + $0x290] sm:$0xff] }
 0xa5c   :  { %v4003_v39 = vadd.f32 0.18741608, %v4002_v10  ;;  %v4120_v45 = vmul.f32 %v4119_v9, %v16762_v13  ;;  %v16823_v50 = vmul.f32 0.70710677, %v16803_v48  ;;  %v4222_v6 = vpack.c.bf16 %v16250_v28, %v16015_v1  ;;  %v13331_v54 = vld [vmem:[#allocation26 + $0x378] sm:$0xff] }
 0xa5d   :  { %v3455_v63 = vmul.f32 %v3454_v20, %v16664_v31  ;;  %v4132_v8 = vadd.f32 0.112945676, %v4131_v23  ;;  %v16828_v29 = vmin.f32 %v4034_v24, 16.0  ;;  %v4225_v42 = vpack.c.bf16 %v16254_v11, %v16067_v43  ;;  %v13322_v20 = vld [vmem:[#allocation26 + $0x330] sm:$0xff] }
 0xa5e   :  { %v16832_v58 = vpop.eup %13960  ;;  %v16835_v30 = vadd.f32 %v16758_v37, %v3500_v38  ;;  %vm3502_vm13 = vweird.f32 %v16714_v19  ;;  %v16838_v1 = vadd.f32 1.1283791, %v3404_v57  ;;  %v4074_v28 = vmul.f32 %v16823_v50, %v16823_v50  ;;  %5326 = vmatmul.bf16.vlgmr.msra.gmra.mxu0 %v4222_v6  ;;  %v13346_v6 = vld [vmem:[#allocation26 + $0x3f0] sm:$0xff]  ;;  %v13339_v19 = vld [vmem:[#allocation26 + $0x3b8] sm:$0xff] }
 0xa5f   :  { %v4223_v56 = vpack.c.bf16 %v16399_v35, %v19483_v60  ;;  %v16846_v43 = vmul.f32 %v16818_v33, %v16770_v25  ;;  %v16848_v11 = vadd.f32 0.05243302, %v3440_v14  ;;  %v4018_v10 = vmul.f32 %v16832_v58, %v16790_v49  ;;  %5368 = vmatmul.bf16.vlgmr.msrb.gmra.mxu1 %v4225_v42  ;;  %5430 = vmatpush.bf16.msra.mxu0 %v13323_v16  ;;  %vm16891_vm8 = vmor %vm3502_vm13, %vm3503_vm12 }
 0xa60   :  { %v4133_v15 = vmul.f32 %v4132_v8, %v16762_v13  ;;  %v4004_v9 = vmul.f32 %v4003_v39, %v16682_v3  ;;  %v4121_v46 = vadd.f32 0.05243302, %v4120_v45  ;;  %v4036_v35 = vmul.f32 2.1237322e-06, %v16828_v29  ;;  %5406 = vmatpush.bf16.msra.mxu3 %v13303_v55  ;;  %5472 = vmatpush.bf16.msrb.mxu1 %v13347_v40  ;;  %v19486_v8 = vld [vmem:[#allocation49_spill] sm:$0xff] }
 0xa61   :  { %v4047_v38 = vmul.f32 3.8918573e-05, %v16828_v29  ;;  %5340 = vmatmul.bf16.vlgmr.msra.gmra.mxu2 %v4223_v56  ;;  %v16856_v57 = vadd.f32 1.0, %v3455_v63  ;;  %v4019_v14 = vsub.f32 1.0, %v4018_v10  ;;  %v16858_v24 = vmin.f32 %v4074_v28, 16.0  ;;  %v13330_v63 = vld [vmem:[#allocation26 + $0x370] sm:$0xff] }
 0xa62   :  { %v4134_v23 = vadd.f32 0.4994258, %v4133_v15  ;;  %5444 = vmatpush.bf16.msra.mxu2 %v13331_v54  ;;  %vm16860_vm4 = vcmp.eq.f32.partialorder %v3506_v47, 8.507059e+37  ;;  %v4028_v3 = vand.u32 2147483648, %v16790_v49  ;;  %v4037_v39 = vadd.f32 0.00028619796, %v4036_v35 }
 0xa63   :  { %v4048_v45 = vadd.f32 0.001143296, %v4047_v38  ;;  %v4224_v55 = vpack.c.bf16 %v16402_v44, %v19486_v8  ;;  %v4020_v42 = vmul.f32 %v16832_v58, %v4019_v14  ;;  %vm4023_vm5 = vweird.f32 %v16832_v58  ;;  %5431 = vmatpush.bf16.msra.mxu0 %v13322_v20  ;;  %v13321_v47 = vld [vmem:[#allocation26 + $0x328] sm:$0xff] }
 0xa64   :  { %v4026_v40 = vand.u32 2147483647, %v16790_v49  ;;  %v4135_v54 = vmul.f32 %v4134_v23, %v16762_v13  ;;  %v4005_v28 = vadd.f32 1.1283791, %v4004_v9  ;;  %v4122_v60 = vmul.f32 %v4121_v46, %v16762_v13  ;;  %5407 = vmatpush.bf16.msra.mxu3 %v13302_v32  ;;  %v13301_v38 = vld [vmem:[#allocation26 + $0x288] sm:$0xff]  ;;  %5473 = vmatpush.bf16.msrb.mxu1 %v13346_v6  ;;  %v13338_v32 = vld [vmem:[#allocation26 + $0x3b0] sm:$0xff] }
 0xa65   :  { %v4038_v56 = vmul.f32 %v4037_v39, %v16828_v29  ;;  %v4049_v10 = vmul.f32 %v4048_v45, %v16828_v29  ;;  %5354 = vmatmul.bf16.vlgmr.msrb.gmra.mxu3 %v4224_v55  ;;  %v4021_v44 = vadd.f32 %v16832_v58, %v4020_v42  ;;  %vm4022_vm6 = vweird.f32 %v16790_v49  ;;  %v13345_v20 = vld [vmem:[#allocation26 + $0x3e8] sm:$0xff]  ;;  %v13320_v39 = vld [vmem:[#allocation26 + $0x320] sm:$0xff] }
 0xa66   :  { %v16876_v15 = vadd.f32 1.0, %v4135_v54  ;;  %v4076_v35 = vmul.f32 2.1237322e-06, %v16858_v24  ;;  %13962 = vrcp.f32 %v16856_v57  ;;  %vm16882_vm7 = vmor %vm4022_vm6, %vm4023_vm5  ;;  %v4029_v46 = vor.u32 1.1754944e-38, %v4028_v3  ;;  %5445 = vmatpush.bf16.msra.mxu2 %v13330_v63  ;;  %v13329_v23 = vld [vmem:[#allocation26 + $0x368] sm:$0xff] }
 0xa67   :  { %v4050_v14 = vadd.f32 0.014752088, %v4049_v10  ;;  %v4087_v49 = vmul.f32 3.8918573e-05, %v16858_v24  ;;  %v4025_v6 = vsel %vm16882_vm7, %v16832_v58, %v4021_v44  ;;  %vm4027_vm9 = vcmp.eq.f32.partialorder %v4026_v40, 8.507059e+37  ;;  %5432 = vmatpush.bf16.msra.mxu0 %v13321_v47  ;;  %v13300_v47 = vld [vmem:[#allocation26 + $0x280] sm:$0xff] }
 0xa68   :  { %13964 = vrcp.f32 %v16876_v15  ;;  %v4039_v3 = vadd.f32 0.0036580483, %v4038_v56  ;;  %v3505_v45 = vsel %vm16891_vm8, %v16758_v37, %v16835_v30  ;;  %v4006_v8 = vmul.f32 %v4005_v28, %v16654_v12  ;;  %5408 = vmatpush.bf16.msra.mxu3 %v13301_v38  ;;  %5474 = vmatpush.bf16.msrb.mxu1 %v13345_v20  ;;  %v13344_v56 = vld [vmem:[#allocation26 + $0x3e0] sm:$0xff] }
 0xa69   :  { %v4030_v55 = vsel %vm4027_vm9, %v4029_v46, %v4025_v6  ;;  %v4123_v63 = vadd.f32 0.18741608, %v4122_v60  ;;  %v3509_v42 = vor.u32 1.1754944e-38, %v3508_v22  ;;  %v3419_v58 = vsub.f32 1.0, %v16846_v43  ;;  %v13318_v6 = vld [vmem:[#allocation26 + $0x310] sm:$0xff] }
 0xa6a   :  { %v4051_v40 = vmul.f32 %v4050_v14, %v16828_v29  ;;  %v4077_v54 = vadd.f32 0.00028619796, %v4076_v35  ;;  %v16910_v10 = vmul.f32 %v16812_v0, %v16565_v52  ;;  %v4031_v37 = vmul.f32 %v4030_v55, %v4006_v8  ;;  %5446 = vmatpush.bf16.msra.mxu2 %v13329_v23  ;;  %v13319_v52 = vld [vmem:[#allocation26 + $0x318] sm:$0xff]  ;;  %v13328_v14 = vld [vmem:[#allocation26 + $0x360] sm:$0xff] }
 0xa6b   :  { %v4088_v12 = vadd.f32 0.001143296, %v4087_v49  ;;  %v4226_v30 = vpack.c.bf16 %v16709_v53, %v16428_v62  ;;  %v3510_v22 = vsel %vm16860_vm4, %v3509_v42, %v3505_v45  ;;  %vm3422_vm10 = vweird.f32 %v16770_v25  ;;  %5433 = vmatpush.bf16.msra.mxu0 %v13320_v39 }
 0xa6c   :  { %v4040_v43 = vmul.f32 %v4039_v3, %v16828_v29  ;;  %v4052_v28 = vadd.f32 0.112945676, %v4051_v40  ;;  %v4078_v60 = vmul.f32 %v4077_v54, %v16858_v24  ;;  %v16919_v0 = vpop.eup %13962  ;;  %v3426_v44 = vand.u32 2147483647, %v16770_v25  ;;  %5409 = vmatpush.bf16.msra.mxu3 %v13300_v47  ;;  %5475 = vmatpush.bf16.msrb.mxu1 %v13344_v56  ;;  %v13337_v56 = vld [vmem:[#allocation26 + $0x3a8] sm:$0xff] }
 0xa6d   :  { %v4124_v62 = vmul.f32 %v4123_v63, %v16762_v13  ;;  %v4089_v53 = vmul.f32 %v4088_v12, %v16858_v24  ;;  %v4227_v16 = vpack.c.bf16 %v16775_v36, %v16574_v5  ;;  %v3420_v38 = vmul.f32 %v16818_v33, %v3419_v58  ;;  %v13343_v13 = vld [vmem:[#allocation26 + $0x3d8] sm:$0xff] }
 0xa6e   :  { %v16926_v35 = vpop.eup %13964  ;;  %v3428_v20 = vand.u32 2147483648, %v16770_v25  ;;  %v16932_v9 = vmul.f32 %v16848_v11, %v16664_v31  ;;  %v4053_v46 = vmul.f32 %v4052_v28, %v16828_v29  ;;  %v16936_v49 = vmul.f32 %v3510_v22, %v16806_v41  ;;  %5382 = vmatmul.bf16.vlgmr.msrb.gmra.mxu0 %v4226_v30  ;;  %5447 = vmatpush.bf16.msra.mxu2 %v13328_v14  ;;  %v13317_v22 = vld [vmem:[#allocation26 + $0x308] sm:$0xff] }
 0xa6f   :  { %v11293_v5 = vclamps-f32 %v4031_v37, 1.0  ;;  %v4138_v36 = vmul.f32 %v16926_v35, %v16876_v15  ;;  %v4090_v23 = vadd.f32 0.014752088, %v4089_v53  ;;  %v3458_v11 = vmul.f32 %v16919_v0, %v16856_v57  ;;  %5424 = vmatmul.bf16.vlgmr.msra.gmra.mxu1 %v4229_v59  ;;  %5434 = vmatpush.bf16.msra.mxu0 %v13319_v52 }
 0xa70   :  { %5458 = vmatpush.bf16.msrb.mxu3 %v13339_v19  ;;  %v4041_v3 = vadd.f32 0.05243302, %v4040_v43  ;;  %v4054_v39 = vadd.f32 0.4994258, %v4053_v46  ;;  %v4079_v45 = vadd.f32 0.0036580483, %v4078_v60  ;;  %vm3423_vm12 = vweird.f32 %v16818_v33  ;;  %5476 = vmatpush.bf16.msrb.mxu1 %v13343_v13 }
 0xa71   :  { %v4125_v41 = vadd.f32 1.1283791, %v4124_v62  ;;  %v4139_v8 = vsub.f32 1.0, %v4138_v36  ;;  %v4091_v55 = vmul.f32 %v4090_v23, %v16858_v24  ;;  %5396 = vmatmul.bf16.vlgmr.msrb.gmra.mxu2 %v4227_v16  ;;  %v3421_v63 = vadd.f32 %v16818_v33, %v3420_v38  ;;  %vm16962_vm4 = vmor %vm3422_vm10, %vm3423_vm12  ;;  %v13326_v38 = vld [vmem:[#allocation26 + $0x350] sm:$0xff] }
 0xa72   :  { %v4146_v42 = vand.u32 2147483647, %v16876_v15  ;;  %v4148_v58 = vand.u32 2147483648, %v16876_v15  ;;  %v4055_v40 = vmul.f32 %v4054_v39, %v16828_v29  ;;  %v4182_v59 = vadd.f32 1.0, %v11293_v5  ;;  %5448 = vmatpush.bf16.msra.mxu2 %v13327_v21 }
 0xa73   :  { %v4140_v54 = vmul.f32 %v16926_v35, %v4139_v8  ;;  %vm4143_vm13 = vweird.f32 %v16926_v35  ;;  %v4092_v47 = vadd.f32 0.112945676, %v4091_v55  ;;  %v3459_v37 = vsub.f32 1.0, %v3458_v11  ;;  %5435 = vmatpush.bf16.msra.mxu0 %v13318_v6  ;;  %v13340_v11 = vld [vmem:[#allocation26 + $0x3c0] sm:$0xff] }
 0xa74   :  { %5459 = vmatpush.bf16.msrb.mxu3 %v13338_v32  ;;  %v4042_v12 = vmul.f32 %v4041_v3, %v16828_v29  ;;  %v16954_v30 = vadd.f32 1.0, %v4055_v40  ;;  %v4080_v19 = vmul.f32 %v4079_v45, %v16858_v24  ;;  %v11280_v43 = vclamps-f32 %v16936_v49, 1.0  ;;  %5477 = vmatpush.bf16.msrb.mxu1 %v13342_v2  ;;  %v13316_v49 = vld [vmem:[#allocation26 + $0x300] sm:$0xff]  ;;  %v13325_v3 = vld [vmem:[#allocation26 + $0x348] sm:$0xff] }
 0xa75   :  { %v4141_v60 = vadd.f32 %v16926_v35, %v4140_v54  ;;  %vm4142_vm5 = vweird.f32 %v16876_v15  ;;  %v4093_v52 = vmul.f32 %v4092_v47, %v16858_v24  ;;  %5410 = vmatmul.bf16.vlgmr.msra.gmra.mxu3 %v4228_v27  ;;  %v3425_v62 = vsel %vm16962_vm4, %v16818_v33, %v3421_v63  ;;  %v13341_v15 = vld [vmem:[#allocation26 + $0x3c8] sm:$0xff]  ;;  %v13336_v27 = vld [vmem:[#allocation26 + $0x3a0] sm:$0xff]  ;;  %v13334_v54 = vld [vmem:[#allocation26 + $0x390] sm:$0xff] }
 0xa76   :  { %v4126_v53 = vmul.f32 %v4125_v41, %v16745_v7  ;;  %vm4144_vm6 = vmor %vm4142_vm5, %vm4143_vm13  ;;  %v4149_v16 = vor.u32 1.1754944e-38, %v4148_v58  ;;  %13966 = vrcp.f32 %v16954_v30  ;;  %v4214_v46 = vmul.f32 %v4182_v59, %v16778_v61  ;;  %5449 = vmatpush.bf16.msra.mxu2 %v13326_v38  ;;  %v13335_v41 = vld [vmem:[#allocation26 + $0x398] sm:$0xff] }
 0xa77   :  { %v4145_v17 = vsel %vm4144_vm6, %v16926_v35, %v4141_v60  ;;  %vm4147_vm7 = vcmp.eq.f32.partialorder %v4146_v42, 8.507059e+37  ;;  %v4094_v4 = vadd.f32 0.4994258, %v4093_v52  ;;  %v3460_v7 = vmul.f32 %v16919_v0, %v3459_v37  ;;  %5436 = vmatpush.bf16.msra.mxu0 %v13317_v22  ;;  %v13333_v52 = vld [vmem:[#allocation26 + $0x388] sm:$0xff] }
 0xa78   :  { %5460 = vmatpush.bf16.msrb.mxu3 %v13337_v56  ;;  %v4150_v33 = vsel %vm4147_vm7, %v4149_v16, %v4145_v17  ;;  %v4043_v13 = vadd.f32 0.18741608, %v4042_v12  ;;  %v4081_v14 = vadd.f32 0.05243302, %v4080_v19  ;;  %v3429_v5 = vor.u32 1.1754944e-38, %v3428_v20  ;;  %5478 = vmatpush.bf16.msrb.mxu1 %v13341_v15 }
 0xa79   :  { %v3443_v36 = vadd.f32 0.18741608, %v16932_v9  ;;  %v4151_v23 = vmul.f32 %v4150_v33, %v4126_v53  ;;  %v4095_v61 = vmul.f32 %v4094_v4, %v16858_v24  ;;  %v2825_v35 = vmul.f32 0.5, %v16510_v34  ;;  %v19496_v4 = vld [vmem:[#allocation53_spill] sm:$0xff] }
 0xa7a   :  { %v4169_v32 = vadd.f32 1.0, %v11280_v43  ;;  %vm3427_vm8 = vcmp.eq.f32.partialorder %v3426_v44, 8.507059e+37  ;;  %v2841_v6 = vmul.f32 0.5, %v16727_v26  ;;  %v4230_v20 = vpack.c.bf16 %v4214_v46, %v16910_v10  ;;  %v19493_v44 = vld [vmem:[#allocation51_spill] sm:$0xff]  ;;  %5450 = vmatpush.bf16.msra.mxu2 %v13325_v3 }
 0xa7b   :  { %v3430_v39 = vsel %vm3427_vm8, %v3429_v5, %v3425_v62  ;;  %v11296_v45 = vclamps-f32 %v4151_v23, 1.0  ;;  %v16991_v9 = vadd.f32 1.0, %v4095_v61  ;;  %v3461_v34 = vadd.f32 %v16919_v0, %v3460_v7  ;;  %5437 = vmatpush.bf16.msra.mxu0 %v13316_v49  ;;  %v19497_v61 = vld [vmem:[#allocation50_spill] sm:$0xff] }
 0xa7c   :  { %5461 = vmatpush.bf16.msrb.mxu3 %v13336_v27  ;;  %v13967_v8 = vpop.eup %13966  ;;  %vm3463_vm9 = vweird.f32 %v16919_v0  ;;  %v4044_v25 = vmul.f32 %v4043_v13, %v16828_v29  ;;  %v4082_v26 = vmul.f32 %v4081_v14, %v16858_v24  ;;  %v3406_v55 = vmul.f32 %v16838_v1, %v19493_v44  ;;  %5479 = vmatpush.bf16.msrb.mxu1 %v13340_v11  ;;  %v13324_v29 = vld [vmem:[#allocation26 + $0x340] sm:$0xff] }
 0xa7d   :  { %v3444_v10 = vmul.f32 %v3443_v36, %v16664_v31  ;;  %v4185_v63 = vadd.f32 1.0, %v11296_v45  ;;  %v4058_v42 = vmul.f32 %v13967_v8, %v16954_v30  ;;  %vm3462_vm10 = vweird.f32 %v16856_v57  ;;  %v13332_v13 = vld [vmem:[#allocation26 + $0x380] sm:$0xff] }
 0xa7e   :  { %v3466_v58 = vand.u32 2147483647, %v16856_v57  ;;  %v3468_v40 = vand.u32 2147483648, %v16856_v57  ;;  %13968 = vrcp.f32 %v16991_v9  ;;  %v4201_v2 = vmul.f32 %v4169_v32, %v2825_v35  ;;  %vm17007_vm12 = vmor %vm3462_vm10, %vm3463_vm9  ;;  %5438 = vmatmul.bf16.vlgmr.msra.gmra.mxu0 %v4230_v20  ;;  %5451 = vmatpush.bf16.msra.mxu2 %v13324_v29 }
 0xa7f   :  { %v3431_v21 = vmul.f32 %v3430_v39, %v3406_v55  ;;  %v4217_v1 = vmul.f32 %v4185_v63, %v2841_v6  ;;  %v4059_v59 = vsub.f32 1.0, %v4058_v42  ;;  %v3465_v57 = vsel %vm17007_vm12, %v16919_v0, %v3461_v34 }
 0xa80   :  { %5462 = vmatpush.bf16.msrb.mxu3 %v13335_v41  ;;  %v4045_v47 = vadd.f32 1.1283791, %v4044_v25  ;;  %v4068_v56 = vand.u32 2147483648, %v16954_v30  ;;  %v4083_v37 = vadd.f32 0.18741608, %v4082_v26  ;;  %vm4063_vm13 = vweird.f32 %v13967_v8 }
 0xa81   :  { %v4233_v12 = vpack.c.bf16 %v4217_v1, %v4201_v2  ;;  %v4060_v19 = vmul.f32 %v13967_v8, %v4059_v59  ;;  %v4066_v22 = vand.u32 2147483647, %v16954_v30  ;;  %v3445_v43 = vadd.f32 1.1283791, %v3444_v10  ;;  %v13821_v59 = vld [vmem:[#allocation27] ss:$0 sm:$0xff] }
 0xa82   :  { %v3469_v28 = vor.u32 1.1754944e-38, %v3468_v40  ;;  %vm3467_vm4 = vcmp.eq.f32.partialorder %v3466_v58, 8.507059e+37  ;;  %vm4062_vm5 = vweird.f32 %v16954_v30  ;;  %v11278_v62 = vclamps-f32 %v3431_v21, 1.0 }
 0xa83   :  { %v4061_v60 = vadd.f32 %v13967_v8, %v4060_v19  ;;  %5480 = vmatmul.bf16.vlgmr.msrb.gmra.mxu1 %v4233_v12  ;;  %vm4064_vm6 = vmor %vm4062_vm5, %vm4063_vm13  ;;  %v4069_v16 = vor.u32 1.1754944e-38, %v4068_v56  ;;  %v4084_v15 = vmul.f32 %v4083_v37, %v16858_v24  ;;  %v4046_v38 = vmul.f32 %v4045_v47, %v16795_v51 }
 0xa84   :  { %5463 = vmatpush.bf16.msrb.mxu3 %v13334_v54  ;;  %v13969_v0 = vpop.eup %13968  ;;  %v3470_v53 = vsel %vm3467_vm4, %v3469_v28, %v3465_v57  ;;  %vm4067_vm7 = vcmp.eq.f32.partialorder %v4066_v22, 8.507059e+37  ;;  %v3446_v27 = vmul.f32 %v3445_v43, %v19496_v4  ;;  %v4167_v14 = vadd.f32 1.0, %v11278_v62 }
 0xa85   :  { %v4065_v46 = vsel %vm4064_vm6, %v13967_v8, %v4061_v60  ;;  %v4098_v17 = vmul.f32 %v13969_v0, %v16991_v9  ;;  %v4085_v5 = vadd.f32 1.1283791, %v4084_v15  ;;  %v4108_v36 = vand.u32 2147483648, %v16991_v9 }
 0xa86   :  { %v4070_v7 = vsel %vm4067_vm7, %v4069_v16, %v4065_v46  ;;  %v3471_v49 = vmul.f32 %v3470_v53, %v3446_v27  ;;  %vm4103_vm8 = vweird.f32 %v13969_v0  ;;  %v4106_v51 = vand.u32 2147483647, %v16991_v9 }
 0xa87   :  { %v4071_v30 = vmul.f32 %v4070_v7, %v4046_v38  ;;  %v4099_v33 = vsub.f32 1.0, %v4098_v17  ;;  %v2823_v35 = vmul.f32 0.5, %v19497_v61  ;;  %v2839_v32 = vmul.f32 0.5, %v16782_v18  ;;  %v19498_v18 = vld [vmem:[#allocation52_spill] sm:$0xff] }
 0xa88   :  { %5464 = vmatpush.bf16.msrb.mxu3 %v13333_v52  ;;  %vm4102_vm9 = vweird.f32 %v16991_v9  ;;  %v11279_v39 = vclamps-f32 %v3471_v49, 1.0  ;;  %v4109_v20 = vor.u32 1.1754944e-38, %v4108_v36  ;;  %v4086_v41 = vmul.f32 %v4085_v5, %v16823_v50 }
 0xa89   :  { %v11294_v23 = vclamps-f32 %v4071_v30, 1.0  ;;  %v4100_v24 = vmul.f32 %v13969_v0, %v4099_v33  ;;  %v4199_v3 = vmul.f32 %v4167_v14, %v2823_v35  ;;  %vm4104_vm10 = vmor %vm4102_vm9, %vm4103_vm8  ;;  %vm4107_vm12 = vcmp.eq.f32.partialorder %v4106_v51, 8.507059e+37 }
 0xa8a   :  { %v4168_v44 = vadd.f32 1.0, %v11279_v39  ;;  %v2824_v10 = vmul.f32 0.5, %v19498_v18  ;;  %v2840_v9 = vmul.f32 0.5, %v16803_v48 }
 0xa8b   :  { %v4183_v6 = vadd.f32 1.0, %v11294_v23  ;;  %v4101_v11 = vadd.f32 %v13969_v0, %v4100_v24 }
 0xa8c   :  { %5465 = vmatpush.bf16.msrb.mxu3 %v13332_v13  ;;  %v4200_v42 = vmul.f32 %v4168_v44, %v2824_v10 }
 0xa8d   :  { %v4215_v45 = vmul.f32 %v4183_v6, %v2839_v32  ;;  %v4105_v8 = vsel %vm4104_vm10, %v13969_v0, %v4101_v11 }
 0xa8e   :  { %v4110_v34 = vsel %vm4107_vm12, %v4109_v20, %v4105_v8 }
 0xa8f   :  { %v4231_v25 = vpack.c.bf16 %v4215_v45, %v4199_v3  ;;  %v4111_v26 = vmul.f32 %v4110_v34, %v4086_v41 }
 0xa91   :  { %v11295_v55 = vclamps-f32 %v4111_v26, 1.0  ;;  %5452 = vmatmul.bf16.vlgmr.msra.gmra.mxu2 %v4231_v25 }
 0xa93   :  { %v4184_v63 = vadd.f32 1.0, %v11295_v55 }
 0xa95   :  { %v4216_v58 = vmul.f32 %v4184_v63, %v2840_v9 }
 0xa97   :  { %v4232_v40 = vpack.c.bf16 %v4216_v58, %v4200_v42  ;;  %v19499_v42 = vld [vmem:[#allocation46_spill] sm:$0xff] }
 0xa99   :  { %5466 = vmatmul.bf16.vlgmr.msrb.gmra.mxu3 %v4232_v40 }
 0xa9b   :  { %v5271_v29 = vpop.f32.mrf.mxu0  ;;  %v5313_v50 = vpop.f32.mrf.mxu1 }
 0xa9c   :  { %v5272_v37 = vadd.f32 %v13821_v59, %v5271_v29 }
 0xaa3   :  { %v5273_v21 = vpop.f32.mrf.mxu0  ;;  %v5315_v54 = vpop.f32.mrf.mxu1 }
 0xaa4   :  { %v5274_v28 = vadd.f32 %v13821_v59, %v5273_v21  ;;  %v19500_v21 = vld [vmem:[#allocation47_spill] sm:$0xff] }
 0xaa5   :  { %v19501_v59 = vld [vmem:[#allocation43_spill] sm:$0xff] }
 0xaba   :  { %v5285_v2 = vpop.f32.mrf.mxu2 }
 0xabb   :  { %v5286_v12 = vadd.f32 %v5285_v2, %v5272_v37 }
 0xac2   :  { %v5287_v1 = vpop.f32.mrf.mxu2 }
 0xac3   :  { %v5288_v0 = vadd.f32 %v5287_v1, %v5274_v28 }
 0xad1   :  { %v5299_v31 = vpop.f32.mrf.mxu3 }
 0xad2   :  { %v5300_v19 = vadd.f32 %v5299_v31, %v5286_v12 }
 0xad4   :  { %v5314_v52 = vadd.f32 %v5313_v50, %v5300_v19 }
 0xad9   :  { %v5301_v47 = vpop.f32.mrf.mxu3 }
 0xada   :  { %v5302_v53 = vadd.f32 %v5301_v47, %v5288_v0  ;;  %v13371_v0 = vld [vmem:[#allocation17 + $0x178] sm:$0xf0] }
 0xadb   :  { %v5327_v57 = vpop.f32.mrf.mxu0 }
 0xadc   :  { %v5369_v48 = vpop.f32.mrf.mxu1  ;;  %v5328_v62 = vadd.f32 %v5327_v57, %v5314_v52  ;;  %v5316_v17 = vadd.f32 %v5315_v54, %v5302_v53  ;;  %v11903_v52 = vld [vmem:[#allocation17 + $0x170] sm:$0xf] }
 0xadd   :  { %v11904_v53 = vor.u32 %v13371_v0, %v11903_v52  ;;  %v11811_v52 = vld [vmem:[#allocation17 + $0xc0] sm:$0xf]  ;;  %v13349_v0 = vld [vmem:[#allocation17 + $0xc8] sm:$0xf0] }
 0xadf   :  { %5739 = vmatpush.bf16.msra.mxu3 %v11904_v53  ;;  %v13348_v53 = vld [vmem:[#allocation17 + $0xc4] sm:$0xf] }
 0xae3   :  { %v5329_v22 = vpop.f32.mrf.mxu0 }
 0xae4   :  { %v5341_v56 = vpop.f32.mrf.mxu2  ;;  %v5371_v16 = vpop.f32.mrf.mxu1  ;;  %v5330_v7 = vadd.f32 %v5329_v22, %v5316_v17  ;;  %v13370_v22 = vld [vmem:[#allocation17 + $0x170] sm:$0xf0]  ;;  %v11885_v17 = vld [vmem:[#allocation17 + $0x15c] sm:$0xf0] }
 0xae5   :  { %v5342_v15 = vadd.f32 %v5341_v56, %v5328_v62 }
 0xae8   :  { %v5355_v43 = vpop.f32.mrf.mxu3 }
 0xae9   :  { %v5356_v27 = vadd.f32 %v5355_v43, %v5342_v15  ;;  %v13369_v43 = vld [vmem:[#allocation17 + $0x16c] sm:$0xf]  ;;  %v13367_v15 = vld [vmem:[#allocation17 + $0x158] sm:$0xf0] }
 0xaeb   :  { %v5383_v38 = vpop.f32.mrf.mxu0  ;;  %v5370_v30 = vadd.f32 %v5369_v48, %v5356_v27  ;;  %v11895_v48 = vld [vmem:[#allocation17 + $0x168] sm:$0xf]  ;;  %v13368_v27 = vld [vmem:[#allocation17 + $0x160] sm:$0xf0] }
 0xaec   :  { %v5343_v60 = vpop.f32.mrf.mxu2  ;;  %v5425_v13 = vpop.f32.mrf.mxu1  ;;  %v11896_v28 = vor.u32 %v13370_v22, %v11895_v48  ;;  %v13353_v48 = vld [vmem:[#allocation17 + $0xe8] sm:$0xf0] }
 0xaed   :  { %v5344_v33 = vadd.f32 %v5343_v60, %v5330_v7  ;;  %v5384_v5 = vadd.f32 %v5383_v38, %v5370_v30  ;;  %v11897_v60 = vld [vmem:[#allocation17 + $0x174] sm:$0xf0]  ;;  %v13366_v38 = vld [vmem:[#allocation17 + $0x154] sm:$0xf] }
 0xaee   :  { %v11900_v62 = vor.u32 %v13369_v43, %v11897_v60  ;;  %5711 = vmatpush.bf16.msrb.mxu0 %v11896_v28  ;;  %v11888_v7 = vor.u32 %v13366_v38, %v11885_v17 }
 0xaf0   :  { %v5357_v46 = vpop.f32.mrf.mxu3  ;;  %5725 = vmatpush.bf16.msrb.mxu2 %v11900_v62  ;;  %v11812_v62 = vor.u32 %v13349_v0, %v11811_v52 }
 0xaf1   :  { %v5358_v36 = vadd.f32 %v5357_v46, %v5344_v33  ;;  %v11871_v33 = vld [vmem:[#allocation17 + $0x138] sm:$0xf] }
 0xaf3   :  { %v5385_v14 = vpop.f32.mrf.mxu0  ;;  %v5372_v51 = vadd.f32 %v5371_v16, %v5358_v36  ;;  %v11883_v16 = vld [vmem:[#allocation17 + $0x150] sm:$0xf]  ;;  %v11879_v36 = vld [vmem:[#allocation17 + $0x140] sm:$0xf] }
 0xaf4   :  { %v5397_v4 = vpop.f32.mrf.mxu2  ;;  %v5427_v6 = vpop.f32.mrf.mxu1  ;;  %v11884_v46 = vor.u32 %v13367_v15, %v11883_v16  ;;  %5726 = vmatpush.bf16.msrb.mxu2 %v11888_v7  ;;  %v11813_v16 = vld [vmem:[#allocation17 + $0xcc] sm:$0xf0]  ;;  %v11819_v15 = vld [vmem:[#allocation17 + $0xc8] sm:$0xf] }
 0xaf5   :  { %v5398_v24 = vadd.f32 %v5397_v4, %v5384_v5  ;;  %v5386_v32 = vadd.f32 %v5385_v14, %v5372_v51  ;;  %v11891_v4 = vld [vmem:[#allocation17 + $0x158] sm:$0xf]  ;;  %v13363_v14 = vld [vmem:[#allocation17 + $0x13c] sm:$0xf]  ;;  %v11873_v5 = vld [vmem:[#allocation17 + $0x144] sm:$0xf0]  ;;  %v11816_v38 = vor.u32 %v13348_v53, %v11813_v16 }
 0xaf6   :  { %v11892_v30 = vor.u32 %v13368_v27, %v11891_v4  ;;  %5712 = vmatpush.bf16.msrb.mxu0 %v11884_v46  ;;  %v13350_v46 = vld [vmem:[#allocation17 + $0xd0] sm:$0xf0] }
 0xaf7   :  { %v11820_v17 = vor.u32 %v13350_v46, %v11819_v15 }
 0xaf8   :  { %v5411_v49 = vpop.f32.mrf.mxu3  ;;  %5740 = vmatpush.bf16.msra.mxu3 %v11892_v30 }
 0xaf9   :  { %v5412_v61 = vadd.f32 %v5411_v49, %v5398_v24  ;;  %v11876_v24 = vor.u32 %v13363_v14, %v11873_v5 }
 0xafb   :  { %v5439_v35 = vpop.f32.mrf.mxu0  ;;  %v5426_v20 = vadd.f32 %v5425_v13, %v5412_v61  ;;  %v13364_v13 = vld [vmem:[#allocation17 + $0x140] sm:$0xf0]  ;;  %5727 = vmatpush.bf16.msrb.mxu2 %v11876_v24  ;;  %v11859_v61 = vld [vmem:[#allocation17 + $0x120] sm:$0xf] }
 0xafc   :  { %v5399_v23 = vpop.f32.mrf.mxu2  ;;  %v11872_v49 = vor.u32 %v13364_v13, %v11871_v33 }
 0xafd   :  { %v5400_v39 = vadd.f32 %v5399_v23, %v5386_v32  ;;  %v5440_v45 = vadd.f32 %v5439_v35, %v5426_v20  ;;  %v13365_v23 = vld [vmem:[#allocation17 + $0x148] sm:$0xf0]  ;;  %v13360_v32 = vld [vmem:[#allocation17 + $0x124] sm:$0xf] }
 0xafe   :  { %v11880_v51 = vor.u32 %v13365_v23, %v11879_v36  ;;  %5713 = vmatpush.bf16.msrb.mxu0 %v11872_v49  ;;  %v13361_v35 = vld [vmem:[#allocation17 + $0x128] sm:$0xf0] }
 0xb00   :  { %v5413_v11 = vpop.f32.mrf.mxu3  ;;  %v5481_v34 = vpop.f32.mrf.mxu1  ;;  %5741 = vmatpush.bf16.msra.mxu3 %v11880_v51 }
 0xb01   :  { %v5414_v41 = vadd.f32 %v5413_v11, %v5400_v39  ;;  %v11861_v11 = vld [vmem:[#allocation17 + $0x12c] sm:$0xf0]  ;;  %v13362_v39 = vld [vmem:[#allocation17 + $0x130] sm:$0xf0] }
 0xb02   :  { %v11864_v20 = vor.u32 %v13360_v32, %v11861_v11  ;;  %v13822_v32 = vld [vmem:[#allocation29] ss:$0 sm:$0xff] }
 0xb03   :  { %v5441_v25 = vpop.f32.mrf.mxu0  ;;  %v5428_v44 = vadd.f32 %v5427_v6, %v5414_v41  ;;  %v11860_v6 = vor.u32 %v13361_v35, %v11859_v61  ;;  %v11847_v41 = vld [vmem:[#allocation17 + $0x108] sm:$0xf] }
 0xb04   :  { %5728 = vmatpush.bf16.msrb.mxu2 %v11864_v20 }
 0xb05   :  { %v5442_v10 = vadd.f32 %v5441_v25, %v5428_v44  ;;  %5714 = vmatpush.bf16.msrb.mxu0 %v11860_v6  ;;  %v11855_v44 = vld [vmem:[#allocation17 + $0x110] sm:$0xf] }
 0xb08   :  { %v5483_v2 = vpop.f32.mrf.mxu1 }
 0xb14   :  { %v5453_v3 = vpop.f32.mrf.mxu2 }
 0xb15   :  { %v5454_v8 = vadd.f32 %v5453_v3, %v5440_v45  ;;  %v11867_v3 = vld [vmem:[#allocation17 + $0x128] sm:$0xf] }
 0xb16   :  { %v11868_v45 = vor.u32 %v13362_v39, %v11867_v3  ;;  %v13823_v39 = vld [vmem:[#allocation30] ss:$0 sm:$0xff] }
 0xb18   :  { %5742 = vmatpush.bf16.msra.mxu3 %v11868_v45 }
 0xb1c   :  { %v5467_v26 = vpop.f32.mrf.mxu3  ;;  %v5455_v18 = vpop.f32.mrf.mxu2 }
 0xb1d   :  { %v5468_v55 = vadd.f32 %v5467_v26, %v5454_v8  ;;  %v5456_v63 = vadd.f32 %v5455_v18, %v5442_v10  ;;  %v13358_v8 = vld [vmem:[#allocation17 + $0x110] sm:$0xf0]  ;;  %v11849_v26 = vld [vmem:[#allocation17 + $0x114] sm:$0xf0] }
 0xb1e   :  { %v11848_v25 = vor.u32 %v13358_v8, %v11847_v41 }
 0xb1f   :  { %v5482_v9 = vadd.f32 %v5481_v34, %v5468_v55  ;;  %v13357_v34 = vld [vmem:[#allocation17 + $0x10c] sm:$0xf]  ;;  %v13359_v55 = vld [vmem:[#allocation17 + $0x118] sm:$0xf0] }
 0xb20   :  { %v11852_v18 = vor.u32 %v13357_v34, %v11849_v26  ;;  %v11856_v10 = vor.u32 %v13359_v55, %v11855_v44  ;;  %5715 = vmatpush.bf16.msrb.mxu0 %v11848_v25 }
 0xb21   :  { %v5486_v58 = vadd.f32 %v5482_v9, %v19499_v42  ;;  %v11835_v9 = vld [vmem:[#allocation17 + $0xf0] sm:$0xf]  ;;  %v13354_v42 = vld [vmem:[#allocation17 + $0xf4] sm:$0xf] }
 0xb22   :  { %5729 = vmatpush.bf16.msrb.mxu2 %v11852_v18  ;;  %5743 = vmatpush.bf16.msra.mxu3 %v11856_v10 }
 0xb23   :  { %5490 = vadd.xlane.f32.xlu0 %v5486_v58 }
 0xb24   :  { %v5469_v40 = vpop.f32.mrf.mxu3 }
 0xb25   :  { %v5470_v29 = vadd.f32 %v5469_v40, %v5456_v63  ;;  %v13355_v63 = vld [vmem:[#allocation17 + $0xf8] sm:$0xf0]  ;;  %v11837_v40 = vld [vmem:[#allocation17 + $0xfc] sm:$0xf0] }
 0xb27   :  { %v5484_v50 = vadd.f32 %v5483_v2, %v5470_v29  ;;  %v11843_v29 = vld [vmem:[#allocation17 + $0xf8] sm:$0xf]  ;;  %v13356_v2 = vld [vmem:[#allocation17 + $0x100] sm:$0xf0] }
 0xb29   :  { %v5487_v31 = vadd.f32 %v5484_v50, %v19500_v21  ;;  %v11840_v50 = vor.u32 %v13354_v42, %v11837_v40  ;;  %v11844_v21 = vor.u32 %v13356_v2, %v11843_v29 }
 0xb2b   :  { %5492 = vadd.xlane.f32.xlu2 %v5487_v31  ;;  %5730 = vmatpush.bf16.msrb.mxu2 %v11840_v50 }
 0xb2c   :  { %5744 = vmatpush.bf16.msra.mxu3 %v11844_v21 }
 0xb96   :  { %v5491_v1 = vpop.xlane.xlu0 %5490 }
 0xb97   :  { %v5494_v54 = vmul.f32 %v5491_v1, %v19501_v59  ;;  %v13352_v1 = vld [vmem:[#allocation17 + $0xe0] sm:$0xf0] }
 0xb99   :  { %v17032_v57 = vsub.f32 %v5486_v58, %v5494_v54  ;;  %v11836_v58 = vor.u32 %v13355_v63, %v11835_v9  ;;  %v13351_v54 = vld [vmem:[#allocation17 + $0xdc] sm:$0xf] }
 0xb9b   :  { %v5498_v47 = vmul.f32 %v17032_v57, %v17032_v57  ;;  %5716 = vmatpush.bf16.msrb.mxu0 %v11836_v58 }
 0xb9d   :  { %5500 = vadd.xlane.f32.xlu0 %v5498_v47 }
 0xb9e   :  { %v5493_v56 = vpop.xlane.xlu2 %5492 }
 0xb9f   :  { %v5495_v37 = vmul.f32 %v5493_v56, %v19501_v59 }
 0xba1   :  { %v17037_v12 = vsub.f32 %v5487_v31, %v5495_v37  ;;  %v11823_v31 = vld [vmem:[#allocation17 + $0xd8] sm:$0xf]  ;;  %v11825_v37 = vld [vmem:[#allocation17 + $0xe4] sm:$0xf0] }
 0xba2   :  { %v11824_v56 = vor.u32 %v13352_v1, %v11823_v31  ;;  %v11828_v43 = vor.u32 %v13351_v54, %v11825_v37 }
 0xba3   :  { %v5499_v19 = vmul.f32 %v17037_v12, %v17037_v12 }
 0xba4   :  { %5717 = vmatpush.bf16.msrb.mxu0 %v11824_v56  ;;  %5731 = vmatpush.bf16.msrb.mxu2 %v11828_v43 }
 0xba5   :  { %5502 = vadd.xlane.f32.xlu2 %v5499_v19  ;;  %v11831_v19 = vld [vmem:[#allocation17 + $0xe0] sm:$0xf] }
 0xba6   :  { %v11832_v28 = vor.u32 %v13353_v48, %v11831_v19 }
 0xba8   :  { %5745 = vmatpush.bf16.msra.mxu3 %v11832_v28  ;;  %5718 = vmatpush.bf16.msrb.mxu0 %v11812_v62 }
 0xba9   :  { %5732 = vmatpush.bf16.msrb.mxu2 %v11816_v38  ;;  %v19502_v38 = vld [vmem:[#allocation44_spill] sm:$0xff] }
 0xbac   :  { %5746 = vmatpush.bf16.msra.mxu3 %v11820_v17 }
 0xc10   :  { %v5501_v47 = vpop.xlane.xlu0 %5500 }
 0xc11   :  { %v5504_v22 = vmul.f32 %v5501_v47, %v19501_v59 }
 0xc13   :  { %v5506_v60 = vadd.f32 1e-05, %v5504_v22 }
 0xc15   :  { %13970 = vrsqrt.f32 %v5506_v60  ;;  %vm5514_vm4 = vweird.f32 %v5506_v60 }
 0xc18   :  { %v5503_v4 = vpop.xlane.xlu2 %5502 }
 0xc19   :  { %v5505_v27 = vmul.f32 %v5503_v4, %v19501_v59 }
 0xc1b   :  { %v13971_v7 = vpop.eup %13970  ;;  %v5507_v30 = vadd.f32 1e-05, %v5505_v27 }
 0xc1c   :  { %v5509_v33 = vmul.f32 %v13971_v7, %v5506_v60  ;;  %vm5515_vm13 = vweird.f32 %v13971_v7 }
 0xc1d   :  { %13972 = vrsqrt.f32 %v5507_v30  ;;  %vm5516_vm5 = vmor %vm5514_vm4, %vm5515_vm13  ;;  %vm5524_vm7 = vweird.f32 %v5507_v30 }
 0xc1e   :  { %v5510_v13 = vmul.f32 %v13971_v7, %v5509_v33 }
 0xc20   :  { %v5511_v14 = vmul.f32 0.5, %v5510_v13  ;;  %v19503_v13 = vld [vmem:[#allocation45_spill] sm:$0xff] }
 0xc22   :  { %v5512_v49 = vsub.f32 1.5, %v5511_v14 }
 0xc23   :  { %v13973_v5 = vpop.eup %13972 }
 0xc24   :  { %v5513_v36 = vmul.f32 %v13971_v7, %v5512_v49  ;;  %v5519_v23 = vmul.f32 %v13973_v5, %v5507_v30  ;;  %vm5525_vm6 = vweird.f32 %v13973_v5 }
 0xc25   :  { %vm5526_vm8 = vmor %vm5524_vm7, %vm5525_vm6 }
 0xc26   :  { %v5520_v24 = vmul.f32 %v13973_v5, %v5519_v23  ;;  %v5517_v51 = vsel %vm5516_vm5, %v13971_v7, %v5513_v36 }
 0xc27   :  { %v5528_v6 = vmul.f32 %v5517_v51, %v17032_v57  ;;  %v5575_v57 = vld [vmem:[#allocation18 + $0x3] sm:$0x7] }
 0xc28   :  { %v5521_v61 = vmul.f32 0.5, %v5520_v24  ;;  %v5577_v26 = vperm.slane %v5575_v57, 0  ;;  %v5578_v18 = vperm.slane %v5575_v57, 1  ;;  %v5579_v63 = vperm.slane %v5575_v57, 2 }
 0xc29   :  { %v5533_v20 = vmul.f32 %v13822_v32, %v5528_v6 }
 0xc2a   :  { %v5522_v35 = vsub.f32 1.5, %v5521_v61 }
 0xc2b   :  { %v17045_v8 = vadd.f32 %v13823_v39, %v5533_v20 }
 0xc2c   :  { %v5523_v11 = vmul.f32 %v13973_v5, %v5522_v35 }
 0xc2e   :  { %v5527_v3 = vsel %vm5526_vm8, %v13973_v5, %v5523_v11 }
 0xc2f   :  { %v5529_v45 = vmul.f32 %v5527_v3, %v17037_v12 }
 0xc31   :  { %v5534_v41 = vmul.f32 %v13822_v32, %v5529_v45 }
 0xc33   :  { %v17047_v34 = vadd.f32 %v13823_v39, %v5534_v41 }
 0xc35   :  { %v5540_v25 = vpack.c.bf16 %v17047_v34, %v17045_v8 }
 0xc37   :  { %5719 = vmatmul.bf16.vlgmr.msrb.gmra.mxu0 %v5540_v25  ;;  %5733 = vmatmul.bf16.vlgmr.msrb.gmra.mxu2 %v5540_v25 }
 0xc38   :  { %5747 = vmatmul.bf16.vlgmr.msra.gmra.mxu3 %v5540_v25 }
 0xcb4   :  { %v5720_v44 = vpop.f32.mrf.mxu0 }
 0xcb5   :  { %v5721_v55 = vadd.f32 %v5720_v44, %v5577_v26 }
 0xcb7   :  { %5843 = vrot.lane.b32.xlu2 %v5721_v55, %s14619_s0 }
 0xcba   :  { %v5734_v10 = vpop.f32.mrf.mxu2 }
 0xcbb   :  { %v5735_v12 = vadd.f32 %v5734_v10, %v5578_v18  ;;  %v5748_v9 = vpop.f32.mrf.mxu3 }
 0xcbc   :  { %v5722_v42 = vpop.f32.mrf.mxu0  ;;  %v5749_v2 = vadd.f32 %v5748_v9, %v5579_v63 }
 0xcbd   :  { %5847 = vrot.lane.b32.xlu1 %v5735_v12, %s14619_s0  ;;  %v5723_v21 = vadd.f32 %v5722_v42, %v5577_v26 }
 0xcbf   :  { %6045 = vrot.lane.b32.xlu2 %v5721_v55, %s14620_s19 }
 0xcc2   :  { %v5736_v58 = vpop.f32.mrf.mxu2 }
 0xcc3   :  { %v5737_v40 = vadd.f32 %v5736_v58, %v5578_v18  ;;  %v5750_v29 = vpop.f32.mrf.mxu3 }
 0xcc4   :  { %v5751_v50 = vadd.f32 %v5750_v29, %v5579_v63 }
 0xcc5   :  { %5849 = vrot.lane.b32.xlu0 %v5737_v40, %s14619_s0  ;;  %11905 = vmatpush.xpose.msk.msra.mxu1 %vm775_vm11, %v5737_v40 }
 0xcc6   :  { %5834 = vmatpush.msra.mxu0 %v5751_v50  ;;  %6245 = vrot.lane.b32.xlu1 %v5721_v55, %s14595_s11  ;;  %v17057_v31 = vpack.i.bf16 %v5749_v2, %v5751_v50 }
 0xcc7   :  { %6047 = vrot.lane.b32.xlu2 %v5723_v21, %s14620_s19 }
 0xcc8   :  { %5835 = vmatpush.msra.mxu0 %v5749_v2 }
 0xcc9   :  { %11906 = vmatpush.xpose.msk.msra.mxu1 %vm775_vm11, %v5735_v12 }
 0xccc   :  { %11907 = vmatmul.msk.f32.vlgmr.msra.gmra.mxu1 %vm775_vm11, %v5721_v55 }
 0xccd   :  { %5845 = vrot.lane.b32.xlu0 %v5723_v21, %s14619_s0 }
 0xcce   :  { %6051 = vrot.lane.b32.xlu1 %v5737_v40, %s14620_s19 }
 0xccf   :  { %6249 = vrot.lane.b32.xlu2 %v5735_v12, %s14595_s11 }
 0xcd4   :  { %11908 = vmatmul.msk.f32.gmra.mxu1 %vm775_vm11, %v5723_v21 }
 0xcd5   :  { %6049 = vrot.lane.b32.xlu0 %v5735_v12, %s14620_s19 }
 0xcd6   :  { %5951 = vrot.lane.b32.xlu1 %v5737_v40, %s14621_s15 }
 0xcd7   :  { %6151 = vrot.lane.b32.xlu2 %v5737_v40, %s14602_s6 }
 0xcdd   :  { %5949 = vrot.lane.b32.xlu0 %v5735_v12, %s14621_s15 }
 0xcde   :  { %6251 = vrot.lane.b32.xlu1 %v5737_v40, %s14595_s11 }
 0xcdf   :  { %6451 = vrot.lane.b32.xlu2 %v5737_v40, %s14598_s25 }
 0xce5   :  { %5945 = vrot.lane.b32.xlu0 %v5721_v55, %s14621_s15 }
 0xce6   :  { %6149 = vrot.lane.b32.xlu1 %v5735_v12, %s14602_s6 }
 0xce7   :  { %6445 = vrot.lane.b32.xlu2 %v5721_v55, %s14598_s25 }
 0xced   :  { %5947 = vrot.lane.b32.xlu0 %v5723_v21, %s14621_s15 }
 0xcee   :  { %6145 = vrot.lane.b32.xlu1 %v5721_v55, %s14602_s6 }
 0xcef   :  { %6349 = vrot.lane.b32.xlu2 %v5735_v12, %s14623_s10 }
 0xcf5   :  { %6247 = vrot.lane.b32.xlu0 %v5723_v21, %s14595_s11 }
 0xcf6   :  { %6147 = vrot.lane.b32.xlu1 %v5723_v21, %s14602_s6 }
 0xcf7   :  { %6347 = vrot.lane.b32.xlu2 %v5723_v21, %s14623_s10 }
 0xcfd   :  { %6449 = vrot.lane.b32.xlu0 %v5735_v12, %s14598_s25 }
 0xcfe   :  { %6447 = vrot.lane.b32.xlu1 %v5723_v21, %s14598_s25 }
 0xcff   :  { %13743 = vrot.lane.b32.xlu2 %v17057_v31, %s14619_s0 }
 0xd05   :  { %6351 = vrot.lane.b32.xlu0 %v5737_v40, %s14623_s10 }
 0xd06   :  { %13753 = vrot.lane.b32.xlu1 %v17057_v31, %s14621_s15 }
 0xd0d   :  { %6345 = vrot.lane.b32.xlu0 %v5721_v55, %s14623_s10 }
 0xd11   :  { %v5844_v1 = vpop.permute.xlu2 %5843 }
 0xd15   :  { %13748 = vrot.lane.b32.xlu0 %v17057_v31, %s14620_s19 }
 0xd19   :  { %v6046_v54 = vpop.permute.xlu2 %6045 }
 0xd21   :  { %v6048_v47 = vpop.permute.xlu2 %6047 }
 0xd29   :  { %v6250_v56 = vpop.permute.xlu2 %6249 }
 0xd2f   :  { %v5848_v37 = vpop.permute.xlu1 %5847 }
 0xd31   :  { %v6152_v19 = vpop.permute.xlu2 %6151 }
 0xd37   :  { %v5850_v48 = vpop.permute.xlu0 %5849 }
 0xd38   :  { %v6246_v22 = vpop.permute.xlu1 %6245  ;;  %11911 = vmatpush.xpose.msk.msra.mxu2 %vm775_vm11, %v5850_v48 }
 0xd39   :  { %v6452_v43 = vpop.permute.xlu2 %6451 }
 0xd3c   :  { %11912 = vmatpush.xpose.msk.msra.mxu2 %vm775_vm11, %v5848_v37 }
 0xd3f   :  { %v5846_v28 = vpop.permute.xlu0 %5845  ;;  %11913 = vmatmul.msk.f32.vlgmr.msra.gmra.mxu2 %vm775_vm11, %v5844_v1 }
 0xd40   :  { %v6052_v60 = vpop.permute.xlu1 %6051 }
 0xd41   :  { %11923 = vmatpush.xpose.msk.msrb.mxu2 %vm775_vm11, %v6052_v60  ;;  %v6446_v52 = vpop.permute.xlu2 %6445 }
 0xd47   :  { %v6050_v0 = vpop.permute.xlu0 %6049  ;;  %11914 = vmatmul.msk.f32.gmra.mxu2 %vm775_vm11, %v5846_v28 }
 0xd48   :  { %v5952_v62 = vpop.permute.xlu1 %5951  ;;  %11924 = vmatpush.xpose.msk.msrb.mxu2 %vm775_vm11, %v6050_v0 }
 0xd49   :  { %11917 = vmatpush.xpose.msk.msrb.mxu1 %vm775_vm11, %v5952_v62  ;;  %v6350_v53 = vpop.permute.xlu2 %6349  ;;  %v5782_v16 = vpop.f32.mrf.mxu1 }
 0xd4a   :  { %v5788_v15 = vmul.f32 0.25, %v5782_v16 }
 0xd4c   :  { %v17099_v46 = vadd.f32 %v5788_v15, %v19502_v38 }
 0xd4e   :  { %v5792_v17 = vsel %vm775_vm11, %v17099_v46, -inf }
 0xd4f   :  { %v5950_v4 = vpop.permute.xlu0 %5949  ;;  %11925 = vmatmul.msk.f32.vlgmr.msrb.gmra.mxu2 %vm775_vm11, %v6046_v54  ;;  %5793 = vmax.xlane.f32.xlu0 %v5792_v17 }
 0xd50   :  { %v6252_v27 = vpop.permute.xlu1 %6251  ;;  %11918 = vmatpush.xpose.msk.msrb.mxu1 %vm775_vm11, %v5950_v4 }
 0xd51   :  { %11935 = vmatpush.xpose.msk.msra.mxu2 %vm775_vm11, %v6252_v27  ;;  %v6348_v7 = vpop.permute.xlu2 %6347  ;;  %v5785_v30 = vpop.f32.mrf.mxu1 }
 0xd52   :  { %v5789_v33 = vmul.f32 0.25, %v5785_v30 }
 0xd54   :  { %11929 = vmatpush.xpose.msk.msra.mxu1 %vm775_vm11, %v6152_v19  ;;  %v17108_v14 = vadd.f32 %v5789_v33, %v19503_v13 }
 0xd55   :  { %11936 = vmatpush.xpose.msk.msra.mxu2 %vm775_vm11, %v6250_v56 }
 0xd56   :  { %v5795_v49 = vsel %vm775_vm11, %v17108_v14, -inf }
 0xd57   :  { %v5946_v5 = vpop.permute.xlu0 %5945  ;;  %11926 = vmatmul.msk.f32.gmra.mxu2 %vm775_vm11, %v6048_v47  ;;  %5796 = vmax.xlane.f32.xlu1 %v5795_v49 }
 0xd58   :  { %v6150_v36 = vpop.permute.xlu1 %6149  ;;  %11919 = vmatmul.msk.f32.vlgmr.msrb.gmra.mxu1 %vm775_vm11, %v5946_v5 }
 0xd59   :  { %11947 = vmatpush.xpose.msk.msrb.mxu2 %vm775_vm11, %v6452_v43  ;;  %11930 = vmatpush.xpose.msk.msra.mxu1 %vm775_vm11, %v6150_v36  ;;  %v13744_v23 = vpop.permute.xlu2 %13743 }
 0xd5a   :  { %v13745_v24 = vunpack.i.l.bf16 %v13744_v23  ;;  %v13746_v51 = vunpack.i.h.bf16 %v13744_v23 }
 0xd5c   :  { %5936 = vmatpush.msrb.mxu3 %v13745_v24 }
 0xd5e   :  { %5937 = vmatpush.msrb.mxu3 %v13746_v51 }
 0xd5f   :  { %v5948_v61 = vpop.permute.xlu0 %5947  ;;  %11937 = vmatmul.msk.f32.vlgmr.msra.gmra.mxu2 %vm775_vm11, %v6246_v22 }
 0xd60   :  { %v6146_v35 = vpop.permute.xlu1 %6145  ;;  %11920 = vmatmul.msk.f32.gmra.mxu1 %vm775_vm11, %v5948_v61 }
 0xd67   :  { %v6248_v32 = vpop.permute.xlu0 %6247 }
 0xd68   :  { %v6148_v6 = vpop.permute.xlu1 %6147  ;;  %11931 = vmatmul.msk.f32.vlgmr.msra.gmra.mxu1 %vm775_vm11, %v6146_v35  ;;  %11938 = vmatmul.msk.f32.gmra.mxu2 %vm775_vm11, %v6248_v32 }
 0xd6f   :  { %v6450_v11 = vpop.permute.xlu0 %6449 }
 0xd70   :  { %v6448_v3 = vpop.permute.xlu1 %6447  ;;  %11932 = vmatmul.msk.f32.gmra.mxu1 %vm775_vm11, %v6148_v6  ;;  %11948 = vmatpush.xpose.msk.msrb.mxu2 %vm775_vm11, %v6450_v11 }
 0xd73   :  { %11949 = vmatmul.msk.f32.vlgmr.msrb.gmra.mxu2 %vm775_vm11, %v6446_v52 }
 0xd77   :  { %v6352_v39 = vpop.permute.xlu0 %6351 }
 0xd78   :  { %v13754_v20 = vpop.permute.xlu1 %13753  ;;  %11941 = vmatpush.xpose.msk.msrb.mxu1 %vm775_vm11, %v6352_v39 }
 0xd79   :  { %v13755_v45 = vunpack.i.l.bf16 %v13754_v20  ;;  %v13756_v41 = vunpack.i.h.bf16 %v13754_v20 }
 0xd7b   :  { %6036 = vmatpush.msrb.mxu0 %v13755_v45  ;;  %11950 = vmatmul.msk.f32.gmra.mxu2 %vm775_vm11, %v6448_v3 }
 0xd7c   :  { %11942 = vmatpush.xpose.msk.msrb.mxu1 %vm775_vm11, %v6350_v53 }
 0xd7d   :  { %6037 = vmatpush.msrb.mxu0 %v13756_v41 }
 0xd7f   :  { %v6346_v25 = vpop.permute.xlu0 %6345 }
 0xd80   :  { %11943 = vmatmul.msk.f32.vlgmr.msrb.gmra.mxu1 %vm775_vm11, %v6346_v25 }
 0xd87   :  { %v13749_v57 = vpop.permute.xlu0 %13748 }
 0xd88   :  { %v13750_v26 = vunpack.i.l.bf16 %v13749_v57  ;;  %11944 = vmatmul.msk.f32.gmra.mxu1 %vm775_vm11, %v6348_v7  ;;  %v13751_v44 = vunpack.i.h.bf16 %v13749_v57 }
 0xd8a   :  { %6136 = vmatpush.msra.mxu3 %v13750_v26 }
 0xd8c   :  { %6137 = vmatpush.msra.mxu3 %v13751_v44 }
 0xdc2   :  { %v5876_v55 = vpop.f32.mrf.mxu2  ;;  %v5794_v58 = vpop.xlane.xlu0 %5793 }
 0xdc3   :  { %v5882_v18 = vmul.f32 0.25, %v5876_v55  ;;  %v5798_v2 = vsub.f32 %v17099_v46, %v5794_v58 }
 0xdc5   :  { %v17130_v10 = vadd.f32 %v5882_v18, %v19502_v38  ;;  %v5800_v54 = vmul.f32 1.442695, %v5798_v2 }
 0xdc7   :  { %v5886_v12 = vsel %vm775_vm11, %v17130_v10, -inf  ;;  %13974 = vpow2.f32 %v5800_v54 }
 0xdc8   :  { %5887 = vmax.xlane.f32.xlu1 %v5886_v12 }
 0xdca   :  { %v5879_v9 = vpop.f32.mrf.mxu2  ;;  %v5797_v19 = vpop.xlane.xlu1 %5796 }
 0xdcb   :  { %v5883_v50 = vmul.f32 0.25, %v5879_v9  ;;  %v5799_v22 = vsub.f32 %v17108_v14, %v5797_v19 }
 0xdcd   :  { %v17141_v37 = vadd.f32 %v5883_v50, %v19503_v13  ;;  %v5802_v0 = vmul.f32 1.442695, %v5799_v22  ;;  %v17151_v53 = vpop.eup %13974 }
 0xdce   :  { %v5804_v46 = vsel %vm775_vm11, %v17151_v53, 0.0 }
 0xdcf   :  { %v5889_v43 = vsel %vm775_vm11, %v17141_v37, -inf  ;;  %13976 = vpow2.f32 %v5802_v0 }
 0xdd2   :  { %v6078_v63 = vpop.f32.mrf.mxu2 }
 0xdd3   :  { %v6084_v15 = vmul.f32 0.25, %v6078_v63 }
 0xdd5   :  { %v5978_v42 = vpop.f32.mrf.mxu1  ;;  %v17161_v30 = vadd.f32 %v6084_v15, %v19502_v38  ;;  %v17163_v33 = vpop.eup %13976 }
 0xdd6   :  { %v5984_v40 = vmul.f32 0.25, %v5978_v42  ;;  %v5807_v23 = vsel %vm775_vm11, %v17163_v33, 0.0 }
 0xdd7   :  { %v6088_v5 = vsel %vm775_vm11, %v17161_v30, -inf }
 0xdd8   :  { %v17135_v29 = vadd.f32 %v5984_v40, %v19502_v38 }
 0xdda   :  { %v6081_v21 = vpop.f32.mrf.mxu2  ;;  %v5988_v1 = vsel %vm775_vm11, %v17135_v29, -inf }
 0xddb   :  { %5989 = vmax.xlane.f32.xlu2 %v5988_v1  ;;  %v6085_v36 = vmul.f32 0.25, %v6081_v21 }
 0xddd   :  { %v5981_v47 = vpop.f32.mrf.mxu1  ;;  %v17175_v51 = vadd.f32 %v6085_v36, %v19503_v13 }
 0xdde   :  { %v5985_v56 = vmul.f32 0.25, %v5981_v47 }
 0xddf   :  { %v6091_v35 = vsel %vm775_vm11, %v17175_v51, -inf }
 0xde0   :  { %v17144_v48 = vadd.f32 %v5985_v56, %v19503_v13 }
 0xde2   :  { %v5991_v28 = vsel %vm775_vm11, %v17144_v48, -inf  ;;  %v6278_v60 = vpop.f32.mrf.mxu2 }
 0xde3   :  { %5890 = vmax.xlane.f32.xlu2 %v5889_v43  ;;  %5992 = vmax.xlane.f32.xlu0 %v5991_v28  ;;  %v6284_v20 = vmul.f32 0.25, %v6278_v60 }
 0xde5   :  { %v6178_v52 = vpop.f32.mrf.mxu1  ;;  %v17190_v44 = vadd.f32 %v6284_v20, %v19502_v38 }
 0xde6   :  { %v6184_v62 = vmul.f32 0.25, %v6178_v52 }
 0xde7   :  { %v6288_v9 = vsel %vm775_vm11, %v17190_v44, -inf }
 0xde8   :  { %v17154_v16 = vadd.f32 %v6184_v62, %v19502_v38 }
 0xdea   :  { %v6188_v17 = vsel %vm775_vm11, %v17154_v16, -inf }
 0xdeb   :  { %5805 = vadd.xlane.f32.xlu0 %v5804_v46  ;;  %6189 = vmax.xlane.f32.xlu1 %v6188_v17  ;;  %v6281_v27 = vpop.f32.mrf.mxu2 }
 0xdec   :  { %v6285_v12 = vmul.f32 0.25, %v6281_v27 }
 0xded   :  { %v6181_v4 = vpop.f32.mrf.mxu1 }
 0xdee   :  { %v6185_v7 = vmul.f32 0.25, %v6181_v4 }
 0xdf0   :  { %v17166_v14 = vadd.f32 %v6185_v7, %v19503_v13 }
 0xdf2   :  { %v6191_v49 = vsel %vm775_vm11, %v17166_v14, -inf }
 0xdf3   :  { %6192 = vmax.xlane.f32.xlu2 %v6191_v49  ;;  %6089 = vmax.xlane.f32.xlu0 %v6088_v5 }
 0xdf4   :  { %5808 = vadd.xlane.f32.xlu1 %v5807_v23 }
 0xdf6   :  { %v6478_v24 = vpop.f32.mrf.mxu2 }
 0xdf7   :  { %v6484_v61 = vmul.f32 0.25, %v6478_v24 }
 0xdf9   :  { %v17180_v11 = vadd.f32 %v6484_v61, %v19502_v38 }
 0xdfb   :  { %v6488_v25 = vsel %vm775_vm11, %v17180_v11, -inf }
 0xdfc   :  { %6092 = vmax.xlane.f32.xlu1 %v6091_v35 }
 0xdfd   :  { %v6378_v32 = vpop.f32.mrf.mxu1 }
 0xdfe   :  { %v6384_v6 = vmul.f32 0.25, %v6378_v32  ;;  %v6481_v3 = vpop.f32.mrf.mxu2 }
 0xdff   :  { %v6485_v41 = vmul.f32 0.25, %v6481_v3 }
 0xe00   :  { %v17183_v39 = vadd.f32 %v6384_v6, %v19502_v38  ;;  %v17205_v38 = vadd.f32 %v6285_v12, %v19503_v13 }
 0xe01   :  { %v17193_v55 = vadd.f32 %v6485_v41, %v19503_v13 }
 0xe02   :  { %v6388_v45 = vsel %vm775_vm11, %v17183_v39, -inf  ;;  %v6291_v58 = vsel %vm775_vm11, %v17205_v38, -inf }
 0xe03   :  { %6389 = vmax.xlane.f32.xlu2 %v6388_v45  ;;  %v6491_v42 = vsel %vm775_vm11, %v17193_v55, -inf }
 0xe04   :  { %6489 = vmax.xlane.f32.xlu1 %v6488_v25 }
 0xe05   :  { %v6381_v57 = vpop.f32.mrf.mxu1 }
 0xe06   :  { %v6385_v26 = vmul.f32 0.25, %v6381_v57 }
 0xe08   :  { %v17196_v18 = vadd.f32 %v6385_v26, %v19503_v13 }
 0xe0a   :  { %v6391_v63 = vsel %vm775_vm11, %v17196_v18, -inf }
 0xe0b   :  { %6289 = vmax.xlane.f32.xlu2 %v6288_v9  ;;  %6392 = vmax.xlane.f32.xlu0 %v6391_v63 }
 0xe0c   :  { %6492 = vmax.xlane.f32.xlu1 %v6491_v42 }
 0xe13   :  { %6292 = vmax.xlane.f32.xlu0 %v6291_v58 }
 0xe3b   :  { %v5888_v40 = vpop.xlane.xlu1 %5887 }
 0xe3c   :  { %v5892_v2 = vsub.f32 %v17130_v10, %v5888_v40 }
 0xe3e   :  { %v5894_v50 = vmul.f32 1.442695, %v5892_v2 }
 0xe40   :  { %13978 = vpow2.f32 %v5894_v50 }
 0xe46   :  { %v17210_v21 = vpop.eup %13978 }
 0xe47   :  { %v5898_v1 = vsel %vm775_vm11, %v17210_v21, 0.0 }
 0xe48   :  { %5899 = vadd.xlane.f32.xlu0 %v5898_v1 }
 0xe4e   :  { %v5990_v54 = vpop.xlane.xlu2 %5989 }
 0xe4f   :  { %v5994_v47 = vsub.f32 %v17135_v29, %v5990_v54 }
 0xe51   :  { %v5996_v13 = vmul.f32 1.442695, %v5994_v47 }
 0xe53   :  { %13980 = vpow2.f32 %v5996_v13 }
 0xe56   :  { %v5891_v56 = vpop.xlane.xlu2 %5890  ;;  %v5993_v19 = vpop.xlane.xlu0 %5992 }
 0xe57   :  { %v5893_v22 = vsub.f32 %v17141_v37, %v5891_v56  ;;  %v5995_v43 = vsub.f32 %v17144_v48, %v5993_v19 }
 0xe59   :  { %v17217_v10 = vpop.eup %13980  ;;  %v5896_v28 = vmul.f32 1.442695, %v5893_v22  ;;  %v5998_v60 = vmul.f32 1.442695, %v5995_v43 }
 0xe5a   :  { %v6000_v52 = vsel %vm775_vm11, %v17217_v10, 0.0 }
 0xe5b   :  { %13982 = vpow2.f32 %v5896_v28  ;;  %6001 = vadd.xlane.f32.xlu1 %v6000_v52 }
 0xe5c   :  { %13984 = vpow2.f32 %v5998_v60 }
 0xe5e   :  { %v5806_v0 = vpop.xlane.xlu0 %5805  ;;  %v6190_v29 = vpop.xlane.xlu1 %6189 }
 0xe5f   :  { %13986 = vrcp.f32 %v5806_v0  ;;  %v6194_v62 = vsub.f32 %v17154_v16, %v6190_v29 }
 0xe61   :  { %v17222_v15 = vpop.eup %13982  ;;  %v6196_v37 = vmul.f32 1.442695, %v6194_v62 }
 0xe62   :  { %v17224_v46 = vpop.eup %13984  ;;  %v5901_v48 = vsel %vm775_vm11, %v17222_v15, 0.0 }
 0xe63   :  { %13988 = vpow2.f32 %v6196_v37  ;;  %5902 = vadd.xlane.f32.xlu1 %v5901_v48  ;;  %v6003_v17 = vsel %vm775_vm11, %v17224_v46, 0.0 }
 0xe64   :  { %6004 = vadd.xlane.f32.xlu0 %v6003_v17 }
 0xe65   :  { %v13987_v4 = vpop.eup %13986 }
 0xe66   :  { %v5812_v27 = vmul.f32 %v13987_v4, %v17151_v53  ;;  %v6090_v7 = vpop.xlane.xlu0 %6089  ;;  %v6193_v61 = vpop.xlane.xlu2 %6192 }
 0xe67   :  { %v6094_v16 = vsub.f32 %v17161_v30, %v6090_v7  ;;  %v5809_v49 = vpop.xlane.xlu1 %5808  ;;  %v6195_v57 = vsub.f32 %v17166_v14, %v6193_v61 }
 0xe68   :  { %13990 = vrcp.f32 %v5809_v49  ;;  %11909 = vmatmul.msk.f32.vlgmr.msra.gmra.mxu0 %vm775_vm11, %v5812_v27 }
 0xe69   :  { %v17233_v5 = vpop.eup %13988  ;;  %v6096_v36 = vmul.f32 1.442695, %v6094_v16  ;;  %v6198_v12 = vmul.f32 1.442695, %v6195_v57 }
 0xe6a   :  { %v6200_v23 = vsel %vm775_vm11, %v17233_v5, 0.0 }
 0xe6b   :  { %6201 = vadd.xlane.f32.xlu2 %v6200_v23  ;;  %13992 = vpow2.f32 %v6096_v36 }
 0xe6e   :  { %v13991_v24 = vpop.eup %13990 }
 0xe6f   :  { %v6093_v35 = vpop.xlane.xlu1 %6092  ;;  %v5813_v53 = vmul.f32 %v13991_v24, %v17163_v33 }
 0xe70   :  { %v6095_v32 = vsub.f32 %v17175_v51, %v6093_v35 }
 0xe71   :  { %11910 = vmatmul.msk.f32.gmra.mxu0 %vm775_vm11, %v5813_v53  ;;  %v17240_v30 = vpop.eup %13992 }
 0xe72   :  { %v6098_v6 = vmul.f32 1.442695, %v6095_v32  ;;  %v6100_v3 = vsel %vm775_vm11, %v17240_v30, 0.0 }
 0xe73   :  { %6101 = vadd.xlane.f32.xlu0 %v6100_v3 }
 0xe74   :  { %13994 = vpow2.f32 %v6098_v6 }
 0xe76   :  { %v6390_v20 = vpop.xlane.xlu2 %6389 }
 0xe77   :  { %v6394_v58 = vsub.f32 %v17183_v39, %v6390_v20  ;;  %v6490_v47 = vpop.xlane.xlu1 %6489 }
 0xe78   :  { %v6494_v13 = vsub.f32 %v17180_v11, %v6490_v47 }
 0xe7a   :  { %v17244_v45 = vpop.eup %13994  ;;  %v6496_v56 = vmul.f32 1.442695, %v6494_v13 }
 0xe7b   :  { %v6103_v41 = vsel %vm775_vm11, %v17244_v45, 0.0 }
 0xe7c   :  { %6104 = vadd.xlane.f32.xlu2 %v6103_v41 }
 0xe7e   :  { %v6290_v33 = vpop.xlane.xlu2 %6289  ;;  %v6393_v25 = vpop.xlane.xlu0 %6392 }
 0xe7f   :  { %v6294_v51 = vsub.f32 %v17190_v44, %v6290_v33  ;;  %v6396_v44 = vmul.f32 1.442695, %v6394_v58  ;;  %v6395_v19 = vsub.f32 %v17196_v18, %v6393_v25  ;;  %v6493_v60 = vpop.xlane.xlu1 %6492 }
 0xe80   :  { %v6495_v52 = vsub.f32 %v17193_v55, %v6493_v60 }
 0xe81   :  { %v6296_v26 = vmul.f32 1.442695, %v6294_v51  ;;  %v6398_v22 = vmul.f32 1.442695, %v6395_v19 }
 0xe82   :  { %v6498_v29 = vmul.f32 1.442695, %v6495_v52 }
 0xe83   :  { %13996 = vpow2.f32 %v6296_v26 }
 0xe84   :  { %13998 = vpow2.f32 %v6198_v12 }
 0xe86   :  { %v6293_v9 = vpop.xlane.xlu0 %6292 }
 0xe87   :  { %v6295_v63 = vsub.f32 %v17205_v38, %v6293_v9 }
 0xe89   :  { %v17251_v42 = vpop.eup %13996  ;;  %v6298_v40 = vmul.f32 1.442695, %v6295_v63 }
 0xe8a   :  { %v6300_v2 = vsel %vm775_vm11, %v17251_v42, 0.0  ;;  %v17256_v50 = vpop.eup %13998 }
 0xe8b   :  { %14000 = vpow2.f32 %v6298_v40  ;;  %6301 = vadd.xlane.f32.xlu1 %v6300_v2  ;;  %v6203_v38 = vsel %vm775_vm11, %v17256_v50, 0.0 }
 0xe8c   :  { %14002 = vpow2.f32 %v6396_v44 }
 0xe8d   :  { %14004 = vpow2.f32 %v6496_v56 }
 0xe8e   :  { %14006 = vpow2.f32 %v6398_v22 }
 0xe91   :  { %v17258_v14 = vpop.eup %14000 }
 0xe92   :  { %v6303_v1 = vsel %vm775_vm11, %v17258_v14, 0.0  ;;  %v17266_v39 = vpop.eup %14002 }
 0xe93   :  { %6204 = vadd.xlane.f32.xlu1 %v6203_v38  ;;  %6304 = vadd.xlane.f32.xlu0 %v6303_v1  ;;  %v6400_v54 = vsel %vm775_vm11, %v17266_v39, 0.0  ;;  %v17276_v43 = vpop.eup %14004 }
 0xe94   :  { %13758 = vrot.lane.b32.xlu2 %v17057_v31, %s14595_s11  ;;  %v6500_v11 = vsel %vm775_vm11, %v17276_v43, 0.0  ;;  %v17283_v18 = vpop.eup %14006 }
 0xe95   :  { %v6403_v37 = vsel %vm775_vm11, %v17283_v18, 0.0 }
 0xe9b   :  { %6401 = vadd.xlane.f32.xlu1 %v6400_v54 }
 0xea7   :  { %13763 = vrot.lane.b32.xlu0 %v17057_v31, %s14602_s6 }
 0xeb4   :  { %13768 = vrot.lane.b32.xlu1 %v17057_v31, %s14598_s25 }
 0xebb   :  { %v5900_v28 = vpop.xlane.xlu0 %5899 }
 0xebc   :  { %14008 = vrcp.f32 %v5900_v28  ;;  %13773 = vrot.lane.b32.xlu1 %v17057_v31, %s14623_s10 }
 0xebd   :  { %6501 = vadd.xlane.f32.xlu2 %v6500_v11  ;;  %14010 = vpow2.f32 %v6498_v29 }
 0xec2   :  { %v14009_v0 = vpop.eup %14008 }
 0xec3   :  { %v5906_v62 = vmul.f32 %v14009_v0, %v17210_v21  ;;  %v17289_v31 = vpop.eup %14010 }
 0xec4   :  { %v6503_v55 = vsel %vm775_vm11, %v17289_v31, 0.0 }
 0xec5   :  { %6404 = vadd.xlane.f32.xlu2 %v6403_v37  ;;  %11915 = vmatmul.msk.f32.vlgmr.msrb.gmra.mxu3 %vm775_vm11, %v5906_v62 }
 0xece   :  { %v6002_v48 = vpop.xlane.xlu1 %6001 }
 0xecf   :  { %14012 = vrcp.f32 %v6002_v48 }
 0xed1   :  { %6504 = vadd.xlane.f32.xlu0 %v6503_v55 }
 0xed5   :  { %v14013_v17 = vpop.eup %14012 }
 0xed6   :  { %v6008_v4 = vmul.f32 %v14013_v17, %v17217_v10  ;;  %v5903_v27 = vpop.xlane.xlu1 %5902 }
 0xed7   :  { %v6005_v21 = vpop.xlane.xlu0 %6004  ;;  %14014 = vrcp.f32 %v5903_v27 }
 0xed8   :  { %14016 = vrcp.f32 %v6005_v21  ;;  %11921 = vmatmul.msk.f32.vlgmr.msrb.gmra.mxu0 %vm775_vm11, %v6008_v4 }
 0xedd   :  { %v14015_v7 = vpop.eup %14014 }
 0xede   :  { %v14017_v16 = vpop.eup %14016  ;;  %v5907_v49 = vmul.f32 %v14015_v7, %v17222_v15  ;;  %v6202_v23 = vpop.xlane.xlu2 %6201 }
 0xedf   :  { %v6009_v36 = vmul.f32 %v14017_v16, %v17224_v46 }
 0xee0   :  { %11916 = vmatmul.msk.f32.gmra.mxu3 %vm775_vm11, %v5907_v49 }
 0xee1   :  { %11922 = vmatmul.msk.f32.gmra.mxu0 %vm775_vm11, %v6009_v36 }
 0xee5   :  { %v5837_v28 = vpop.f32.mrf.mxu0 }
 0xee6   :  { %v6102_v24 = vpop.xlane.xlu0 %6101 }
 0xee7   :  { %14018 = vrcp.f32 %v6102_v24 }
 0xeed   :  { %v14019_v10 = vpop.eup %14018 }
 0xeee   :  { %v6108_v61 = vmul.f32 %v14019_v10, %v17240_v30  ;;  %v5840_v52 = vpop.f32.mrf.mxu0 }
 0xeef   :  { %v6105_v35 = vpop.xlane.xlu2 %6104 }
 0xef0   :  { %14020 = vrcp.f32 %v6105_v35  ;;  %11927 = vmatmul.msk.f32.vlgmr.msra.gmra.mxu3 %vm775_vm11, %v6108_v61  ;;  %v13379_v35 = vld [vmem:[%s19311_s13 + $0x78] sm:$0xff] }
 0xef1   :  { %6686 = vmatpush.bf16.msra.mxu1 %v13379_v35  ;;  %v12389_v35 = vld [vmem:[#allocation24 + $0x700] sm:$0xf] }
 0xef6   :  { %v14021_v53 = vpop.eup %14020 }
 0xef7   :  { %v13759_v32 = vpop.permute.xlu2 %13758  ;;  %v6109_v15 = vmul.f32 %v14021_v53, %v17244_v45  ;;  %v13378_v53 = vld [vmem:[%s19311_s13 + $0x70] sm:$0xff] }
 0xef8   :  { %v13760_v6 = vunpack.i.l.bf16 %v13759_v32  ;;  %v13761_v46 = vunpack.i.h.bf16 %v13759_v32  ;;  %6687 = vmatpush.bf16.msra.mxu1 %v13378_v53  ;;  %v13377_v32 = vld [vmem:[%s19311_s13 + $0x68] sm:$0xff] }
 0xef9   :  { %11928 = vmatmul.msk.f32.gmra.mxu3 %vm775_vm11, %v6109_v15  ;;  %v13376_v15 = vld [vmem:[%s19311_s13 + $0x60] sm:$0xff] }
 0xefa   :  { %6336 = vmatpush.msrb.mxu3 %v13760_v6  ;;  %v13375_v6 = vld [vmem:[%s19311_s13 + $0x58] sm:$0xff] }
 0xefc   :  { %6337 = vmatpush.msrb.mxu3 %v13761_v46  ;;  %6688 = vmatpush.bf16.msra.mxu1 %v13377_v32  ;;  %v13374_v46 = vld [vmem:[%s19311_s13 + $0x50] sm:$0xff]  ;;  %v13484_v32 = vld [vmem:[#allocation24 + $0x73c] sm:$0xf0] }
 0xefe   :  { %v6302_v3 = vpop.xlane.xlu1 %6301 }
 0xeff   :  { %14022 = vrcp.f32 %v6302_v3  ;;  %v13373_v3 = vld [vmem:[%s19311_s13 + $0x48] sm:$0xff] }
 0xf00   :  { %6689 = vmatpush.bf16.msra.mxu1 %v13376_v15  ;;  %v13476_v15 = vld [vmem:[#allocation24 + $0x704] sm:$0xf] }
 0xf04   :  { %6690 = vmatpush.bf16.msra.mxu1 %v13375_v6  ;;  %v12390_v6 = vor.u32 %v13484_v32, %v12389_v35  ;;  %v12141_v35 = vld [vmem:[#allocation24 + $0x508] sm:$0xf] }
 0xf05   :  { %v14023_v20 = vpop.eup %14022 }
 0xf06   :  { %v6308_v41 = vmul.f32 %v14023_v20, %v17251_v42  ;;  %v6305_v30 = vpop.xlane.xlu0 %6304  ;;  %v6205_v45 = vpop.xlane.xlu1 %6204  ;;  %v13372_v20 = vld [vmem:[%s19311_s13 + $0x40] sm:$0xff] }
 0xf07   :  { %14024 = vrcp.f32 %v6305_v30 }
 0xf08   :  { %11939 = vmatmul.msk.f32.vlgmr.msrb.gmra.mxu3 %vm775_vm11, %v6308_v41  ;;  %14026 = vrcp.f32 %v6202_v23  ;;  %6691 = vmatpush.bf16.msra.mxu1 %v13374_v46 }
 0xf09   :  { %14028 = vrcp.f32 %v6205_v45 }
 0xf0c   :  { %6692 = vmatpush.bf16.msra.mxu1 %v13373_v3  ;;  %v12397_v3 = vld [vmem:[#allocation24 + $0x708] sm:$0xf] }
 0xf0d   :  { %v14025_v33 = vpop.eup %14024 }
 0xf0e   :  { %v6309_v25 = vmul.f32 %v14025_v33, %v17258_v14  ;;  %v14027_v57 = vpop.eup %14026  ;;  %v6402_v63 = vpop.xlane.xlu1 %6401 }
 0xf0f   :  { %v6208_v9 = vmul.f32 %v14027_v57, %v17233_v5  ;;  %v14029_v42 = vpop.eup %14028  ;;  %14030 = vrcp.f32 %v6402_v63 }
 0xf10   :  { %11940 = vmatmul.msk.f32.gmra.mxu3 %vm775_vm11, %v6309_v25  ;;  %v6209_v58 = vmul.f32 %v14029_v42, %v17256_v50  ;;  %6693 = vmatpush.bf16.msra.mxu1 %v13372_v20  ;;  %v13485_v20 = vld [vmem:[#allocation24 + $0x744] sm:$0xf0] }
 0xf15   :  { %v14031_v38 = vpop.eup %14030 }
 0xf16   :  { %v6408_v47 = vmul.f32 %v14031_v38, %v17266_v39 }
 0xf19   :  { %v13764_v51 = vpop.permute.xlu0 %13763 }
 0xf1a   :  { %v13765_v26 = vunpack.i.l.bf16 %v13764_v51  ;;  %v13766_v12 = vunpack.i.h.bf16 %v13764_v51 }
 0xf1c   :  { %6236 = vmatpush.msra.mxu0 %v13765_v26 }
 0xf1e   :  { %6237 = vmatpush.msra.mxu0 %v13766_v12 }
 0xf1f   :  { %11933 = vmatmul.msk.f32.vlgmr.msra.gmra.mxu0 %vm775_vm11, %v6208_v9 }
 0xf26   :  { %v13769_v40 = vpop.permute.xlu1 %13768 }
 0xf27   :  { %v13770_v2 = vunpack.i.l.bf16 %v13769_v40  ;;  %11934 = vmatmul.msk.f32.gmra.mxu0 %vm775_vm11, %v6209_v58  ;;  %v13771_v44 = vunpack.i.h.bf16 %v13769_v40 }
 0xf29   :  { %6536 = vmatpush.msra.mxu3 %v13770_v2 }
 0xf2b   :  { %6537 = vmatpush.msra.mxu3 %v13771_v44 }
 0xf2e   :  { %v13774_v14 = vpop.permute.xlu1 %13773 }
 0xf2f   :  { %v13775_v1 = vunpack.i.l.bf16 %v13774_v14  ;;  %v13776_v5 = vunpack.i.h.bf16 %v13774_v14 }
 0xf30   :  { %v6502_v54 = vpop.xlane.xlu2 %6501 }
 0xf31   :  { %14032 = vrcp.f32 %v6502_v54  ;;  %6436 = vmatpush.msrb.mxu0 %v13775_v1 }
 0xf33   :  { %6437 = vmatpush.msrb.mxu0 %v13776_v5 }
 0xf34   :  { %11945 = vmatmul.msk.f32.vlgmr.msrb.gmra.mxu0 %vm775_vm11, %v6408_v47 }
 0xf37   :  { %v14033_v50 = vpop.eup %14032 }
 0xf38   :  { %v6508_v13 = vmul.f32 %v14033_v50, %v17276_v43  ;;  %v6405_v56 = vpop.xlane.xlu2 %6404 }
 0xf39   :  { %14034 = vrcp.f32 %v6405_v56 }
 0xf3a   :  { %11951 = vmatmul.msk.f32.vlgmr.msra.gmra.mxu3 %vm775_vm11, %v6508_v13 }
 0xf3f   :  { %v14035_v19 = vpop.eup %14034 }
 0xf40   :  { %v6409_v22 = vmul.f32 %v14035_v19, %v17283_v18 }
 0xf42   :  { %11946 = vmatmul.msk.f32.gmra.mxu0 %vm775_vm11, %v6409_v22 }
 0xf44   :  { %v6505_v60 = vpop.xlane.xlu0 %6504 }
 0xf45   :  { %14036 = vrcp.f32 %v6505_v60 }
 0xf48   :  { %v5939_v43 = vpop.f32.mrf.mxu3 }
 0xf4b   :  { %v14037_v11 = vpop.eup %14036 }
 0xf4c   :  { %v6509_v39 = vmul.f32 %v14037_v11, %v17289_v31 }
 0xf4e   :  { %11952 = vmatmul.msk.f32.gmra.mxu3 %vm775_vm11, %v6509_v39 }
 0xf55   :  { %v6039_v0 = vpop.f32.mrf.mxu0 }
 0xf5e   :  { %v6042_v29 = vpop.f32.mrf.mxu0 }
 0xf5f   :  { %v13777_v62 = vpack.i.bf16 %v6042_v29, %v6039_v0 }
 0xf61   :  { %13778 = vrot.lane.b32.xlu2 %v13777_v62, %s14623_s10 }
 0xf63   :  { %v5942_v37 = vpop.f32.mrf.mxu3 }
 0xf64   :  { %v13782_v48 = vpack.i.bf16 %v5942_v37, %v5939_v43  ;;  %v13824_v37 = vld [vmem:[#allocation20 + $0x1] ss:$0 sm:$0xff] }
 0xf66   :  { %13783 = vrot.lane.b32.xlu1 %v13782_v48, %s14598_s25 }
 0xf73   :  { %v6139_v18 = vpop.f32.mrf.mxu3 }
 0xf7c   :  { %v6142_v55 = vpop.f32.mrf.mxu3 }
 0xf7d   :  { %v13792_v17 = vpack.i.bf16 %v6142_v55, %v6139_v18 }
 0xf7f   :  { %13793 = vrot.lane.b32.xlu1 %v13792_v17, %s14595_s11 }
 0xf8b   :  { %v6339_v4 = vpop.f32.mrf.mxu3 }
 0xf93   :  { %v6342_v31 = vpop.f32.mrf.mxu3 }
 0xf94   :  { %v13797_v27 = vpack.i.bf16 %v6342_v31, %v6339_v4 }
 0xf96   :  { %13798 = vrot.lane.b32.xlu1 %v13797_v27, %s14620_s19  ;;  %v12453_v27 = vld [vmem:[#allocation24 + $0x780] sm:$0xf] }
 0xf9c   :  { %v6239_v21 = vpop.f32.mrf.mxu0 }
 0xfa4   :  { %v6242_v7 = vpop.f32.mrf.mxu0 }
 0xfa5   :  { %v13787_v16 = vpack.i.bf16 %v6242_v7, %v6239_v21  ;;  %v13500_v21 = vld [vmem:[#allocation24 + $0x7bc] sm:$0xf0]  ;;  %v13492_v7 = vld [vmem:[#allocation24 + $0x784] sm:$0xf] }
 0xfa7   :  { %13788 = vrot.lane.b32.xlu0 %v13787_v16, %s14602_s6  ;;  %v12454_v16 = vor.u32 %v13500_v21, %v12453_v27 }
 0xfa9   :  { %7563 = vmatpush.bf16.msra.mxu0 %v12454_v16 }
 0xfad   :  { %7564 = vmatpush.bf16.msra.mxu0 %v12390_v6  ;;  %v12143_v6 = vld [vmem:[#allocation24 + $0x548] sm:$0xf0] }
 0xfb1   :  { %v6439_v49 = vpop.f32.mrf.mxu0 }
 0xfbb   :  { %v13779_v45 = vpop.permute.xlu2 %13778 }
 0xfbc   :  { %v13781_v42 = vunpack.i.h.bf16 %v13779_v45  ;;  %v13780_v58 = vunpack.i.l.bf16 %v13779_v45  ;;  %v13468_v45 = vld [vmem:[#allocation24 + $0x6bc] sm:$0xf0] }
 0xfbd   :  { %v6539_v24 = vpop.f32.mrf.mxu3 }
 0xfbf   :  { %v6442_v36 = vpop.f32.mrf.mxu0 }
 0xfc0   :  { %v13802_v23 = vpack.i.bf16 %v6442_v36, %v6439_v49  ;;  %v12455_v49 = vld [vmem:[#allocation24 + $0x7c0] sm:$0xf0]  ;;  %v12461_v36 = vld [vmem:[#allocation24 + $0x788] sm:$0xf] }
 0xfc2   :  { %13803 = vrot.lane.b32.xlu1 %v13802_v23, %s14621_s15  ;;  %v13501_v23 = vld [vmem:[#allocation24 + $0x7c4] sm:$0xf0] }
 0xfd1   :  { %v6542_v10 = vpop.f32.mrf.mxu3 }
 0xfd2   :  { %v13807_v61 = vpack.i.bf16 %v6542_v10, %v6539_v24  ;;  %v12458_v24 = vor.u32 %v13492_v7, %v12455_v49  ;;  %v12462_v10 = vor.u32 %v13501_v23, %v12461_v36 }
 0xfd4   :  { %13808 = vrot.lane.b32.xlu2 %v13807_v61, %s14619_s0  ;;  %v12463_v61 = vld [vmem:[#allocation24 + $0x7c8] sm:$0xf0]  ;;  %7577 = vmatpush.bf16.msra.mxu2 %v12458_v24  ;;  %v12133_v24 = vld [vmem:[#allocation24 + $0x500] sm:$0xf] }
 0xfd5   :  { %7591 = vmatpush.bf16.msrb.mxu3 %v12462_v10  ;;  %v13412_v10 = vld [vmem:[#allocation24 + $0x504] sm:$0xf] }
 0xfd8   :  { %v13784_v41 = vpop.permute.xlu1 %13783 }
 0xfd9   :  { %v13786_v33 = vunpack.i.h.bf16 %v13784_v41  ;;  %v13785_v25 = vunpack.i.l.bf16 %v13784_v41  ;;  %v13477_v41 = vld [vmem:[#allocation24 + $0x70c] sm:$0xf] }
 0xfdb   :  { %v6602_v26 = vsel %vm775_vm11, %v5840_v52, %v13786_v33  ;;  %v6601_v12 = vsel %vm775_vm11, %v5837_v28, %v13785_v25  ;;  %v12399_v33 = vld [vmem:[#allocation24 + $0x748] sm:$0xf0]  ;;  %v12325_v25 = vld [vmem:[#allocation24 + $0x680] sm:$0xf] }
 0xfdc   :  { %v6603_v44 = vsel %vm1626_vm14, %v6601_v12, %v13780_v58  ;;  %v6604_v14 = vsel %vm1626_vm14, %v6602_v26, %v13781_v42  ;;  %v12327_v26 = vld [vmem:[#allocation24 + $0x6c0] sm:$0xf0]  ;;  %v12333_v12 = vld [vmem:[#allocation24 + $0x688] sm:$0xf]  ;;  %v13461_v42 = vld [vmem:[#allocation24 + $0x68c] sm:$0xf] }
 0xfdd   :  { %v12335_v58 = vld [vmem:[#allocation24 + $0x6c8] sm:$0xf0] }
 0xff1   :  { %v13794_v30 = vpop.permute.xlu1 %13793 }
 0xff2   :  { %v13796_v9 = vunpack.i.h.bf16 %v13794_v30  ;;  %v13795_v63 = vunpack.i.l.bf16 %v13794_v30  ;;  %v12398_v30 = vor.u32 %v13485_v20, %v12397_v3  ;;  %v13404_v3 = vld [vmem:[#allocation24 + $0x4bc] sm:$0xf0]  ;;  %v13396_v20 = vld [vmem:[#allocation24 + $0x484] sm:$0xf] }
 0xff4   :  { %v6605_v38 = vsel %vm1629_vm15, %v6603_v44, %v13795_v63  ;;  %v6606_v1 = vsel %vm1629_vm15, %v6604_v14, %v13796_v9  ;;  %v12326_v9 = vor.u32 %v13468_v45, %v12325_v25  ;;  %v13469_v63 = vld [vmem:[#allocation24 + $0x6c4] sm:$0xf0]  ;;  %7592 = vmatpush.bf16.msrb.mxu3 %v12398_v30  ;;  %v12261_v44 = vld [vmem:[#allocation24 + $0x600] sm:$0xf]  ;;  %v12071_v30 = vld [vmem:[#allocation24 + $0x4c0] sm:$0xf0] }
 0xff5   :  { %v13452_v14 = vld [vmem:[#allocation24 + $0x63c] sm:$0xf0]  ;;  %v13405_v25 = vld [vmem:[#allocation24 + $0x4c4] sm:$0xf0]  ;;  %v12074_v45 = vor.u32 %v13396_v20, %v12071_v30  ;;  %v12285_v30 = vld [vmem:[#allocation24 + $0x618] sm:$0xf] }
 0xff6   :  { %7565 = vmatpush.bf16.msra.mxu0 %v12326_v9  ;;  %v12005_v9 = vld [vmem:[#allocation24 + $0x400] sm:$0xf] }
0x1008   :  { %v13799_v51 = vpop.permute.xlu1 %13798 }
0x1009   :  { %v13801_v50 = vunpack.i.h.bf16 %v13799_v51  ;;  %v13800_v13 = vunpack.i.l.bf16 %v13799_v51  ;;  %v12402_v51 = vor.u32 %v13477_v41, %v12399_v33  ;;  %v12077_v33 = vld [vmem:[#allocation24 + $0x488] sm:$0xf] }
0x1019   :  { %v13789_v57 = vpop.permute.xlu0 %13788 }
0x101a   :  { %v13791_v40 = vunpack.i.h.bf16 %v13789_v57  ;;  %v13790_v2 = vunpack.i.l.bf16 %v13789_v57  ;;  %v13460_v57 = vld [vmem:[#allocation24 + $0x684] sm:$0xf] }
0x101c   :  { %v6607_v54 = vsel %vm1632_vm0, %v6605_v38, %v13790_v2  ;;  %v6608_v5 = vsel %vm1632_vm0, %v6606_v1, %v13791_v40  ;;  %v12330_v40 = vor.u32 %v13460_v57, %v12327_v26  ;;  %v12334_v2 = vor.u32 %v13469_v63, %v12333_v12  ;;  %v13444_v38 = vld [vmem:[#allocation24 + $0x604] sm:$0xf]  ;;  %v13397_v57 = vld [vmem:[#allocation24 + $0x48c] sm:$0xf]  ;;  %v13388_v63 = vld [vmem:[#allocation24 + $0x43c] sm:$0xf0] }
0x101d   :  { %v6609_v11 = vsel %vm1635_vm1, %v6607_v54, %v13800_v13  ;;  %v6610_v39 = vsel %vm1635_vm1, %v6608_v5, %v13801_v50  ;;  %v12338_v1 = vor.u32 %v13461_v42, %v12335_v58  ;;  %v12263_v54 = vld [vmem:[#allocation24 + $0x640] sm:$0xf0]  ;;  %v12269_v5 = vld [vmem:[#allocation24 + $0x608] sm:$0xf]  ;;  %v13445_v50 = vld [vmem:[#allocation24 + $0x60c] sm:$0xf]  ;;  %v12006_v58 = vor.u32 %v13388_v63, %v12005_v9 }
0x101e   :  { %v12271_v13 = vld [vmem:[#allocation24 + $0x648] sm:$0xf0]  ;;  %7593 = vmatpush.bf16.msrb.mxu3 %v12334_v2  ;;  %v13380_v42 = vld [vmem:[#allocation24 + $0x404] sm:$0xf]  ;;  %v12013_v2 = vld [vmem:[#allocation24 + $0x408] sm:$0xf] }
0x101f   :  { %v12079_v26 = vld [vmem:[#allocation24 + $0x4c8] sm:$0xf0]  ;;  %v13438_v9 = vld [vmem:[#allocation24 + $0x5cc] sm:$0xf0]  ;;  %v13430_v63 = vld [vmem:[#allocation24 + $0x594] sm:$0xf] }
0x1020   :  { %v12082_v12 = vor.u32 %v13397_v57, %v12079_v26  ;;  %v12287_v57 = vld [vmem:[#allocation24 + $0x658] sm:$0xf0] }
0x102e   :  { %v13809_v47 = vpop.permute.xlu2 %13808 }
0x102f   :  { %v13811_v28 = vunpack.i.h.bf16 %v13809_v47  ;;  %v13810_v60 = vunpack.i.l.bf16 %v13809_v47  ;;  %v13453_v47 = vld [vmem:[#allocation24 + $0x644] sm:$0xf0] }
0x1034   :  { %v13804_v56 = vpop.permute.xlu1 %13803 }
0x1035   :  { %v13806_v19 = vunpack.i.h.bf16 %v13804_v56  ;;  %v13805_v22 = vunpack.i.l.bf16 %v13804_v56  ;;  %v12262_v56 = vor.u32 %v13452_v14, %v12261_v44  ;;  %v13389_v44 = vld [vmem:[#allocation24 + $0x444] sm:$0xf0] }
0x1037   :  { %v6612_v52 = vsel %vm1638_vm2, %v6610_v39, %v13806_v19  ;;  %v6611_v0 = vsel %vm1638_vm2, %v6609_v11, %v13805_v22  ;;  %v12266_v19 = vor.u32 %v13444_v38, %v12263_v54  ;;  %v12270_v22 = vor.u32 %v13453_v47, %v12269_v5  ;;  %v13428_v11 = vld [vmem:[#allocation24 + $0x584] sm:$0xf]  ;;  %7566 = vmatpush.bf16.msra.mxu0 %v12262_v56  ;;  %v12015_v54 = vld [vmem:[#allocation24 + $0x448] sm:$0xf0]  ;;  %v12469_v5 = vld [vmem:[#allocation24 + $0x790] sm:$0xf] }
0x1038   :  { %v6613_v43 = vsel %vm1641_vm3, %v6611_v0, %v13810_v60  ;;  %v6614_v29 = vsel %vm1641_vm3, %v6612_v52, %v13811_v28  ;;  %v12197_v28 = vld [vmem:[#allocation24 + $0x580] sm:$0xf]  ;;  %v12274_v39 = vor.u32 %v13445_v50, %v12271_v13  ;;  %v12199_v52 = vld [vmem:[#allocation24 + $0x5c0] sm:$0xf0]  ;;  %v12205_v0 = vld [vmem:[#allocation24 + $0x588] sm:$0xf]  ;;  %v12014_v38 = vor.u32 %v13389_v44, %v12013_v2 }
0x1039   :  { %v6615_v62 = vpack.c.bf16 %v6614_v29, %v6613_v43  ;;  %v13436_v60 = vld [vmem:[#allocation24 + $0x5bc] sm:$0xf0]  ;;  %v13437_v43 = vld [vmem:[#allocation24 + $0x5c4] sm:$0xf0]  ;;  %v13429_v29 = vld [vmem:[#allocation24 + $0x58c] sm:$0xf]  ;;  %7594 = vmatpush.bf16.msrb.mxu3 %v12270_v22 }
0x103a   :  { %v13502_v50 = vld [vmem:[#allocation24 + $0x7cc] sm:$0xf0]  ;;  %v13494_v13 = vld [vmem:[#allocation24 + $0x794] sm:$0xf]  ;;  %v13439_v2 = vld [vmem:[#allocation24 + $0x5d4] sm:$0xf0] }
0x103b   :  { %6694 = vmatmul.bf16.vlgmr.msra.gmra.mxu1 %v6615_v62  ;;  %v12207_v62 = vld [vmem:[#allocation24 + $0x5c8] sm:$0xf0]  ;;  %v12471_v56 = vld [vmem:[#allocation24 + $0x7d0] sm:$0xf0] }
0x103c   :  { %v12474_v22 = vor.u32 %v13494_v13, %v12471_v56  ;;  %v12151_v56 = vld [vmem:[#allocation24 + $0x550] sm:$0xf0] }
0x10b8   :  { %v6695_v48 = vpop.f32.mrf.mxu1 }
0x10b9   :  { %v6696_v18 = vadd.f32 %v13824_v37, %v6695_v48  ;;  %v12202_v48 = vor.u32 %v13428_v11, %v12199_v52  ;;  %v13495_v11 = vld [vmem:[#allocation24 + $0x79c] sm:$0xf] }
0x10ba   :  { %v12479_v52 = vld [vmem:[#allocation24 + $0x7d8] sm:$0xf0] }
0x10bb   :  { %v17365_v55 = vadd.f32 %v6696_v18, %v17045_v8  ;;  %v13493_v8 = vld [vmem:[#allocation24 + $0x78c] sm:$0xf]  ;;  %v12206_v18 = vor.u32 %v13437_v43, %v12205_v0  ;;  %v12405_v0 = vld [vmem:[#allocation24 + $0x710] sm:$0xf] }
0x10bc   :  { %v12466_v53 = vor.u32 %v13493_v8, %v12463_v61  ;;  %v12135_v61 = vld [vmem:[#allocation24 + $0x540] sm:$0xf0]  ;;  %v13486_v43 = vld [vmem:[#allocation24 + $0x74c] sm:$0xf0] }
0x10bd   :  { %6706 = vadd.xlane.f32.xlu0 %v17365_v55  ;;  %7595 = vmatpush.bf16.msrb.mxu3 %v12206_v18  ;;  %v12138_v32 = vor.u32 %v13412_v10, %v12135_v61  ;;  %v12413_v18 = vld [vmem:[#allocation24 + $0x718] sm:$0xf] }
0x10be   :  { %7605 = vmatpush.bf16.msrb.mxu1 %v12466_v53  ;;  %v13421_v53 = vld [vmem:[#allocation24 + $0x544] sm:$0xf0]  ;;  %v12349_v61 = vld [vmem:[#allocation24 + $0x698] sm:$0xf] }
0x10c0   :  { %v6697_v17 = vpop.f32.mrf.mxu1 }
0x10c1   :  { %v6698_v4 = vadd.f32 %v13824_v37, %v6697_v17  ;;  %v12198_v37 = vor.u32 %v13436_v60, %v12197_v28  ;;  %v12477_v28 = vld [vmem:[#allocation24 + $0x798] sm:$0xf] }
0x10c2   :  { %7606 = vmatpush.bf16.msrb.mxu1 %v12402_v51  ;;  %v12078_v51 = vor.u32 %v13405_v25, %v12077_v33  ;;  %v13503_v60 = vld [vmem:[#allocation24 + $0x7d4] sm:$0xf0] }
0x10c3   :  { %v17369_v31 = vadd.f32 %v6698_v4, %v17047_v34  ;;  %v12391_v34 = vld [vmem:[#allocation24 + $0x740] sm:$0xf0]  ;;  %v12210_v4 = vor.u32 %v13429_v29, %v12207_v62  ;;  %7567 = vmatpush.bf16.msra.mxu0 %v12198_v37  ;;  %v12482_v29 = vor.u32 %v13495_v11, %v12479_v52  ;;  %v12406_v62 = vor.u32 %v13486_v43, %v12405_v0  ;;  %v13478_v37 = vld [vmem:[#allocation24 + $0x714] sm:$0xf]  ;;  %v13455_v33 = vld [vmem:[#allocation24 + $0x654] sm:$0xf0] }
0x10c4   :  { %v12394_v46 = vor.u32 %v13476_v15, %v12391_v34  ;;  %v12142_v15 = vor.u32 %v13421_v53, %v12141_v35  ;;  %v13413_v34 = vld [vmem:[#allocation24 + $0x50c] sm:$0xf]  ;;  %v13471_v35 = vld [vmem:[#allocation24 + $0x6d4] sm:$0xf0]  ;;  %v13415_v11 = vld [vmem:[#allocation24 + $0x51c] sm:$0xf] }
0x10c5   :  { %6708 = vadd.xlane.f32.xlu1 %v17369_v31  ;;  %v12085_v43 = vld [vmem:[#allocation24 + $0x490] sm:$0xf] }
0x10c6   :  { %7578 = vmatpush.bf16.msra.mxu2 %v12394_v46  ;;  %7607 = vmatpush.bf16.msrb.mxu1 %v12338_v1  ;;  %v12146_v46 = vor.u32 %v13413_v34, %v12143_v6  ;;  %v13381_v1 = vld [vmem:[#allocation24 + $0x40c] sm:$0xf]  ;;  %v12351_v34 = vld [vmem:[#allocation24 + $0x6d8] sm:$0xf0] }
0x10c7   :  { %7596 = vmatpush.bf16.msrb.mxu3 %v12142_v15  ;;  %v12018_v47 = vor.u32 %v13381_v1, %v12015_v54  ;;  %v13463_v15 = vld [vmem:[#allocation24 + $0x69c] sm:$0xf] }
0x10c8   :  { %v12354_v6 = vor.u32 %v13463_v15, %v12351_v34  ;;  %v12223_v1 = vld [vmem:[#allocation24 + $0x5d8] sm:$0xf0] }
0x10ca   :  { %7579 = vmatpush.bf16.msra.mxu2 %v12330_v40  ;;  %7608 = vmatpush.bf16.msrb.mxu1 %v12274_v39  ;;  %v12007_v40 = vld [vmem:[#allocation24 + $0x440] sm:$0xf0]  ;;  %v12478_v39 = vor.u32 %v13503_v60, %v12477_v28 }
0x10cb   :  { %7597 = vmatpush.bf16.msrb.mxu3 %v12078_v51  ;;  %v12010_v14 = vor.u32 %v13380_v42, %v12007_v40  ;;  %v13447_v51 = vld [vmem:[#allocation24 + $0x61c] sm:$0xf]  ;;  %v12221_v40 = vld [vmem:[#allocation24 + $0x598] sm:$0xf] }
0x10cc   :  { %v12290_v26 = vor.u32 %v13447_v51, %v12287_v57 }
0x10ce   :  { %7580 = vmatpush.bf16.msra.mxu2 %v12266_v19  ;;  %7609 = vmatpush.bf16.msrb.mxu1 %v12210_v4  ;;  %v12470_v19 = vor.u32 %v13502_v50, %v12469_v5  ;;  %v13487_v4 = vld [vmem:[#allocation24 + $0x754] sm:$0xf0]  ;;  %v12149_v5 = vld [vmem:[#allocation24 + $0x510] sm:$0xf]  ;;  %v13414_v50 = vld [vmem:[#allocation24 + $0x514] sm:$0xf] }
0x10cf   :  { %7598 = vmatpush.bf16.msrb.mxu3 %v12014_v38  ;;  %v13431_v38 = vld [vmem:[#allocation24 + $0x59c] sm:$0xf]  ;;  %v12154_v28 = vor.u32 %v13414_v50, %v12151_v56  ;;  %v13504_v50 = vld [vmem:[#allocation24 + $0x7dc] sm:$0xf0]  ;;  %v12487_v56 = vld [vmem:[#allocation24 + $0x7e0] sm:$0xf0] }
0x10d0   :  { %v12226_v54 = vor.u32 %v13431_v38, %v12223_v1  ;;  %v13826_v38 = vld [vmem:[#allocation23 + $0x1] ss:$0 sm:$0xff] }
0x10d2   :  { %7581 = vmatpush.bf16.msra.mxu2 %v12202_v48  ;;  %7610 = vmatpush.bf16.msrb.mxu1 %v12146_v46  ;;  %v12407_v48 = vld [vmem:[#allocation24 + $0x750] sm:$0xf0]  ;;  %v12277_v46 = vld [vmem:[#allocation24 + $0x610] sm:$0xf] }
0x10d3   :  { %7647 = vmatpush.bf16.msra.mxu3 %v12478_v39  ;;  %v12159_v39 = vld [vmem:[#allocation24 + $0x558] sm:$0xf0] }
0x10d4   :  { %v12162_v52 = vor.u32 %v13415_v11, %v12159_v39  ;;  %v13497_v11 = vld [vmem:[#allocation24 + $0x7ac] sm:$0xf] }
0x10d6   :  { %7582 = vmatpush.bf16.msra.mxu2 %v12138_v32  ;;  %7611 = vmatpush.bf16.msrb.mxu1 %v12082_v12  ;;  %v12350_v32 = vor.u32 %v13471_v35, %v12349_v61  ;;  %v12213_v12 = vld [vmem:[#allocation24 + $0x590] sm:$0xf]  ;;  %v12023_v35 = vld [vmem:[#allocation24 + $0x450] sm:$0xf0] }
0x10d7   :  { %v12214_v42 = vor.u32 %v13438_v9, %v12213_v12 }
0x10da   :  { %7583 = vmatpush.bf16.msra.mxu2 %v12074_v45  ;;  %7612 = vmatpush.bf16.msrb.mxu1 %v12018_v47  ;;  %v12286_v45 = vor.u32 %v13455_v33, %v12285_v30  ;;  %v13422_v47 = vld [vmem:[#allocation24 + $0x54c] sm:$0xf0] }
0x10db   :  { %v12150_v13 = vor.u32 %v13422_v47, %v12149_v5  ;;  %v12485_v47 = vld [vmem:[#allocation24 + $0x7a0] sm:$0xf] }
0x10de   :  { %7584 = vmatpush.bf16.msra.mxu2 %v12010_v14  ;;  %7661 = vmatpush.bf16.msra.mxu1 %v12482_v29  ;;  %v12222_v14 = vor.u32 %v13439_v2, %v12221_v40  ;;  %v13406_v29 = vld [vmem:[#allocation24 + $0x4cc] sm:$0xf0]  ;;  %v13825_v40 = vld [vmem:[#allocation21 + $0x1] ss:$0 sm:$0xff] }
0x10e2   :  { %7633 = vmatpush.bf16.msrb.mxu2 %v12474_v22  ;;  %v13423_v22 = vld [vmem:[#allocation24 + $0x554] sm:$0xf0] }
0x1130   :  { %v6707_v17 = vpop.xlane.xlu0 %6706 }
0x1131   :  { %v6710_v27 = vmul.f32 %v6707_v17, %v19501_v59  ;;  %v12410_v17 = vor.u32 %v13478_v37, %v12407_v48  ;;  %v12086_v48 = vor.u32 %v13406_v29, %v12085_v43  ;;  %v12421_v43 = vld [vmem:[#allocation24 + $0x720] sm:$0xf] }
0x1132   :  { %v13488_v29 = vld [vmem:[#allocation24 + $0x75c] sm:$0xf0] }
0x1133   :  { %v17374_v21 = vsub.f32 %v17365_v55, %v6710_v27  ;;  %v13420_v55 = vld [vmem:[#allocation24 + $0x53c] sm:$0xf0]  ;;  %v13479_v27 = vld [vmem:[#allocation24 + $0x71c] sm:$0xf]  ;;  %7634 = vmatpush.bf16.msrb.mxu2 %v12410_v17  ;;  %v12093_v17 = vld [vmem:[#allocation24 + $0x498] sm:$0xf] }
0x1134   :  { %v12134_v8 = vor.u32 %v13420_v55, %v12133_v24  ;;  %v13470_v24 = vld [vmem:[#allocation24 + $0x6cc] sm:$0xf0]  ;;  %v13462_v55 = vld [vmem:[#allocation24 + $0x694] sm:$0xf] }
0x1135   :  { %v6714_v7 = vmul.f32 %v17374_v21, %v17374_v21 }
0x1136   :  { %7568 = vmatpush.bf16.msra.mxu0 %v12134_v8  ;;  %v12343_v8 = vld [vmem:[#allocation24 + $0x6d0] sm:$0xf0] }
0x1137   :  { %6716 = vadd.xlane.f32.xlu2 %v6714_v7  ;;  %v12415_v7 = vld [vmem:[#allocation24 + $0x758] sm:$0xf0]  ;;  %v12346_v53 = vor.u32 %v13462_v55, %v12343_v8  ;;  %v12021_v55 = vld [vmem:[#allocation24 + $0x410] sm:$0xf]  ;;  %v13382_v8 = vld [vmem:[#allocation24 + $0x414] sm:$0xf] }
0x1138   :  { %v6709_v16 = vpop.xlane.xlu1 %6708  ;;  %v12026_v15 = vor.u32 %v13382_v8, %v12023_v35  ;;  %v12359_v8 = vld [vmem:[#allocation24 + $0x6e0] sm:$0xf0]  ;;  %v13473_v35 = vld [vmem:[#allocation24 + $0x6e4] sm:$0xf0] }
0x1139   :  { %v6711_v49 = vmul.f32 %v6709_v16, %v19501_v59  ;;  %v12414_v16 = vor.u32 %v13487_v4, %v12413_v18  ;;  %7635 = vmatpush.bf16.msrb.mxu2 %v12346_v53  ;;  %v12087_v18 = vld [vmem:[#allocation24 + $0x4d0] sm:$0xf0]  ;;  %v13407_v4 = vld [vmem:[#allocation24 + $0x4d4] sm:$0xf0] }
0x113a   :  { %v12029_v53 = vld [vmem:[#allocation24 + $0x418] sm:$0xf] }
0x113b   :  { %v17380_v36 = vsub.f32 %v17369_v31, %v6711_v49  ;;  %v12069_v31 = vld [vmem:[#allocation24 + $0x480] sm:$0xf]  ;;  %v12418_v49 = vor.u32 %v13479_v27, %v12415_v7  ;;  %7648 = vmatpush.bf16.msra.mxu3 %v12414_v16  ;;  %v12094_v7 = vor.u32 %v13407_v4, %v12093_v17  ;;  %v13399_v16 = vld [vmem:[#allocation24 + $0x49c] sm:$0xf]  ;;  %v13489_v17 = vld [vmem:[#allocation24 + $0x764] sm:$0xf0] }
0x113c   :  { %v12070_v41 = vor.u32 %v13404_v3, %v12069_v31  ;;  %v13454_v31 = vld [vmem:[#allocation24 + $0x64c] sm:$0xf0]  ;;  %v13446_v3 = vld [vmem:[#allocation24 + $0x614] sm:$0xf]  ;;  %v13481_v4 = vld [vmem:[#allocation24 + $0x72c] sm:$0xf] }
0x113d   :  { %v6715_v23 = vmul.f32 %v17380_v36, %v17380_v36  ;;  %7662 = vmatpush.bf16.msra.mxu1 %v12418_v49  ;;  %v12278_v20 = vor.u32 %v13454_v31, %v12277_v46  ;;  %v12095_v49 = vld [vmem:[#allocation24 + $0x4d8] sm:$0xf0] }
0x113e   :  { %7569 = vmatpush.bf16.msra.mxu0 %v12070_v41  ;;  %v12279_v41 = vld [vmem:[#allocation24 + $0x650] sm:$0xf0]  ;;  %v12031_v46 = vld [vmem:[#allocation24 + $0x458] sm:$0xf0] }
0x113f   :  { %6718 = vadd.xlane.f32.xlu0 %v6715_v23  ;;  %v12341_v23 = vld [vmem:[#allocation24 + $0x690] sm:$0xf]  ;;  %7649 = vmatpush.bf16.msra.mxu3 %v12350_v32  ;;  %v12282_v25 = vor.u32 %v13446_v3, %v12279_v41  ;;  %v13391_v32 = vld [vmem:[#allocation24 + $0x454] sm:$0xf0] }
0x1140   :  { %v12342_v10 = vor.u32 %v13470_v24, %v12341_v23  ;;  %v12098_v24 = vor.u32 %v13399_v16, %v12095_v49  ;;  %v12030_v34 = vor.u32 %v13391_v32, %v12029_v53  ;;  %v12357_v49 = vld [vmem:[#allocation24 + $0x6a0] sm:$0xf]  ;;  %v13465_v53 = vld [vmem:[#allocation24 + $0x6ac] sm:$0xf] }
0x1141   :  { %7663 = vmatpush.bf16.msra.mxu1 %v12354_v6  ;;  %7636 = vmatpush.bf16.msrb.mxu2 %v12282_v25  ;;  %v13383_v6 = vld [vmem:[#allocation24 + $0x41c] sm:$0xf]  ;;  %v12367_v32 = vld [vmem:[#allocation24 + $0x6e8] sm:$0xf0] }
0x1142   :  { %7570 = vmatpush.bf16.msra.mxu0 %v12006_v58  ;;  %v12215_v58 = vld [vmem:[#allocation24 + $0x5d0] sm:$0xf0]  ;;  %v12034_v31 = vor.u32 %v13383_v6, %v12031_v46  ;;  %v12293_v6 = vld [vmem:[#allocation24 + $0x620] sm:$0xf] }
0x1143   :  { %7650 = vmatpush.bf16.msra.mxu3 %v12286_v45  ;;  %v12218_v44 = vor.u32 %v13430_v63, %v12215_v58  ;;  %v13456_v46 = vld [vmem:[#allocation24 + $0x65c] sm:$0xf0] }
0x1145   :  { %7664 = vmatpush.bf16.msra.mxu1 %v12290_v26  ;;  %7637 = vmatpush.bf16.msrb.mxu2 %v12218_v44 }
0x1146   :  { %7619 = vmatpush.bf16.msrb.mxu0 %v12470_v19  ;;  %v12157_v19 = vld [vmem:[#allocation24 + $0x518] sm:$0xf] }
0x1147   :  { %7651 = vmatpush.bf16.msra.mxu3 %v12222_v14  ;;  %v12158_v60 = vor.u32 %v13423_v22, %v12157_v19  ;;  %v12493_v19 = vld [vmem:[#allocation24 + $0x7a8] sm:$0xf] }
0x1149   :  { %7665 = vmatpush.bf16.msra.mxu1 %v12226_v54  ;;  %7638 = vmatpush.bf16.msrb.mxu2 %v12154_v28 }
0x114a   :  { %7620 = vmatpush.bf16.msrb.mxu0 %v12406_v62  ;;  %v13398_v62 = vld [vmem:[#allocation24 + $0x494] sm:$0xf] }
0x114b   :  { %7652 = vmatpush.bf16.msra.mxu3 %v12158_v60  ;;  %v12090_v27 = vor.u32 %v13398_v62, %v12087_v18  ;;  %v13505_v60 = vld [vmem:[#allocation24 + $0x7e4] sm:$0xf0] }
0x114c   :  { %v12429_v18 = vld [vmem:[#allocation24 + $0x728] sm:$0xf] }
0x114d   :  { %7666 = vmatpush.bf16.msra.mxu1 %v12162_v52  ;;  %7639 = vmatpush.bf16.msrb.mxu2 %v12090_v27  ;;  %v12486_v52 = vor.u32 %v13504_v50, %v12485_v47  ;;  %v12431_v27 = vld [vmem:[#allocation24 + $0x768] sm:$0xf0] }
0x114e   :  { %7621 = vmatpush.bf16.msrb.mxu0 %v12342_v10  ;;  %v13390_v10 = vld [vmem:[#allocation24 + $0x44c] sm:$0xf0] }
0x114f   :  { %v12022_v61 = vor.u32 %v13390_v10, %v12021_v55  ;;  %7653 = vmatpush.bf16.msra.mxu3 %v12094_v7  ;;  %v12422_v7 = vor.u32 %v13488_v29, %v12421_v43  ;;  %v12434_v55 = vor.u32 %v13481_v4, %v12431_v27  ;;  %v13464_v10 = vld [vmem:[#allocation24 + $0x6a4] sm:$0xf]  ;;  %v13408_v43 = vld [vmem:[#allocation24 + $0x4dc] sm:$0xf0]  ;;  %v12111_v4 = vld [vmem:[#allocation24 + $0x4e8] sm:$0xf0] }
0x1150   :  { %v12037_v27 = vld [vmem:[#allocation24 + $0x420] sm:$0xf] }
0x1151   :  { %7667 = vmatpush.bf16.msra.mxu1 %v12098_v24  ;;  %7640 = vmatpush.bf16.msrb.mxu2 %v12026_v15  ;;  %v12430_v24 = vor.u32 %v13489_v17, %v12429_v18  ;;  %v13409_v18 = vld [vmem:[#allocation24 + $0x4e4] sm:$0xf0]  ;;  %v13401_v17 = vld [vmem:[#allocation24 + $0x4ac] sm:$0xf] }
0x1152   :  { %7622 = vmatpush.bf16.msrb.mxu0 %v12278_v20 }
0x1153   :  { %7654 = vmatpush.bf16.msra.mxu3 %v12030_v34  ;;  %v12362_v34 = vor.u32 %v13464_v10, %v12359_v8  ;;  %v12114_v10 = vor.u32 %v13401_v17, %v12111_v4  ;;  %v12045_v8 = vld [vmem:[#allocation24 + $0x428] sm:$0xf]  ;;  %v12319_v17 = vld [vmem:[#allocation24 + $0x678] sm:$0xf0] }
0x1155   :  { %7668 = vmatpush.bf16.msra.mxu1 %v12034_v31 }
0x1156   :  { %7623 = vmatpush.bf16.msrb.mxu0 %v12214_v42 }
0x115a   :  { %7624 = vmatpush.bf16.msrb.mxu0 %v12150_v13  ;;  %v13496_v13 = vld [vmem:[#allocation24 + $0x7a4] sm:$0xf] }
0x115e   :  { %7625 = vmatpush.bf16.msrb.mxu0 %v12086_v48  ;;  %v12423_v48 = vld [vmem:[#allocation24 + $0x760] sm:$0xf0] }
0x1162   :  { %7626 = vmatpush.bf16.msrb.mxu0 %v12022_v61  ;;  %v12365_v61 = vld [vmem:[#allocation24 + $0x6a8] sm:$0xf] }
0x1163   :  { %v12366_v31 = vor.u32 %v13473_v35, %v12365_v61  ;;  %v13393_v61 = vld [vmem:[#allocation24 + $0x464] sm:$0xf0]  ;;  %v13385_v35 = vld [vmem:[#allocation24 + $0x42c] sm:$0xf] }
0x11aa   :  { %v6717_v0 = vpop.xlane.xlu2 %6716 }
0x11ab   :  { %v6720_v37 = vmul.f32 %v6717_v0, %v19501_v59  ;;  %v12490_v0 = vor.u32 %v13496_v13, %v12487_v56  ;;  %v13416_v13 = vld [vmem:[#allocation24 + $0x524] sm:$0xf] }
0x11ac   :  { %v12167_v56 = vld [vmem:[#allocation24 + $0x560] sm:$0xf0] }
0x11ad   :  { %v6722_v23 = vadd.f32 1e-05, %v6720_v37  ;;  %v13480_v37 = vld [vmem:[#allocation24 + $0x724] sm:$0xf] }
0x11ae   :  { %v12426_v16 = vor.u32 %v13480_v37, %v12423_v48  ;;  %v12103_v37 = vld [vmem:[#allocation24 + $0x4e0] sm:$0xf0]  ;;  %v12109_v48 = vld [vmem:[#allocation24 + $0x4a8] sm:$0xf] }
0x11af   :  { %14038 = vrsqrt.f32 %v6722_v23  ;;  %vm6730_vm14 = vweird.f32 %v6722_v23 }
0x11b2   :  { %v6719_v3 = vpop.xlane.xlu0 %6718 }
0x11b3   :  { %v6721_v20 = vmul.f32 %v6719_v3, %v19501_v59  ;;  %v12370_v3 = vor.u32 %v13465_v53, %v12367_v32  ;;  %v12047_v53 = vld [vmem:[#allocation24 + $0x468] sm:$0xf0]  ;;  %v12501_v32 = vld [vmem:[#allocation24 + $0x7b0] sm:$0xf] }
0x11b5   :  { %v14039_v41 = vpop.eup %14038  ;;  %v6723_v30 = vadd.f32 1e-05, %v6721_v20  ;;  %v13448_v20 = vld [vmem:[#allocation24 + $0x624] sm:$0xf] }
0x11b6   :  { %v6725_v33 = vmul.f32 %v14039_v41, %v6722_v23  ;;  %vm6731_vm11 = vweird.f32 %v14039_v41  ;;  %v13472_v23 = vld [vmem:[#allocation24 + $0x6dc] sm:$0xf0] }
0x11b7   :  { %14040 = vrsqrt.f32 %v6723_v30  ;;  %vm6732_vm15 = vmor %vm6730_vm14, %vm6731_vm11  ;;  %vm6740_vm2 = vweird.f32 %v6723_v30  ;;  %v12358_v15 = vor.u32 %v13472_v23, %v12357_v49  ;;  %v13392_v49 = vld [vmem:[#allocation24 + $0x45c] sm:$0xf0]  ;;  %v13384_v23 = vld [vmem:[#allocation24 + $0x424] sm:$0xf] }
0x11b8   :  { %v6726_v25 = vmul.f32 %v14039_v41, %v6725_v33  ;;  %v13457_v33 = vld [vmem:[#allocation24 + $0x664] sm:$0xf0] }
0x11ba   :  { %v6727_v45 = vmul.f32 0.5, %v6726_v25  ;;  %v13449_v25 = vld [vmem:[#allocation24 + $0x62c] sm:$0xf] }
0x11bc   :  { %v6728_v51 = vsub.f32 1.5, %v6727_v45  ;;  %v12303_v45 = vld [vmem:[#allocation24 + $0x668] sm:$0xf0] }
0x11bd   :  { %v14041_v57 = vpop.eup %14040 }
0x11be   :  { %v6729_v26 = vmul.f32 %v14039_v41, %v6728_v51  ;;  %v6735_v12 = vmul.f32 %v14041_v57, %v6723_v30  ;;  %vm6741_vm1 = vweird.f32 %v14041_v57  ;;  %v12301_v30 = vld [vmem:[#allocation24 + $0x628] sm:$0xf]  ;;  %v12294_v51 = vor.u32 %v13456_v46, %v12293_v6  ;;  %v12503_v6 = vld [vmem:[#allocation24 + $0x7f0] sm:$0xf0]  ;;  %v12509_v46 = vld [vmem:[#allocation24 + $0x7b8] sm:$0xf] }
0x11bf   :  { %vm6742_vm3 = vmor %vm6740_vm2, %vm6741_vm1 }
0x11c0   :  { %v6736_v9 = vmul.f32 %v14041_v57, %v6735_v12  ;;  %v6733_v63 = vsel %vm6732_vm15, %v14039_v41, %v6729_v26  ;;  %v12295_v41 = vld [vmem:[#allocation24 + $0x660] sm:$0xf0]  ;;  %v12229_v26 = vld [vmem:[#allocation24 + $0x5a0] sm:$0xf] }
0x11c1   :  { %v6744_v2 = vmul.f32 %v6733_v63, %v17374_v21  ;;  %v12495_v21 = vld [vmem:[#allocation24 + $0x7e8] sm:$0xf0]  ;;  %v13440_v12 = vld [vmem:[#allocation24 + $0x5dc] sm:$0xf0]  ;;  %v12306_v63 = vor.u32 %v13449_v25, %v12303_v45  ;;  %v12050_v25 = vor.u32 %v13385_v35, %v12047_v53  ;;  %v12255_v35 = vld [vmem:[#allocation24 + $0x5f8] sm:$0xf0] }
0x11c2   :  { %v6737_v42 = vmul.f32 0.5, %v6736_v9  ;;  %v12498_v62 = vor.u32 %v13497_v11, %v12495_v21  ;;  %v12302_v9 = vor.u32 %v13457_v33, %v12301_v30  ;;  %v12175_v11 = vld [vmem:[#allocation24 + $0x568] sm:$0xf0]  ;;  %v12511_v30 = vld [vmem:[#allocation24 + $0x7f8] sm:$0xf0]  ;;  %v12046_v33 = vor.u32 %v13393_v61, %v12045_v8 }
0x11c3   :  { %v6749_v1 = vmul.f32 %v13825_v40, %v6744_v2  ;;  %v13441_v2 = vld [vmem:[#allocation24 + $0x5e4] sm:$0xf0]  ;;  %v13443_v8 = vld [vmem:[#allocation24 + $0x5f4] sm:$0xf0]  ;;  %v13435_v61 = vld [vmem:[#allocation24 + $0x5bc] sm:$0xf] }
0x11c4   :  { %v6738_v58 = vsub.f32 1.5, %v6737_v42  ;;  %v13432_v42 = vld [vmem:[#allocation24 + $0x5a4] sm:$0xf] }
0x11c5   :  { %v17388_v22 = vadd.f32 %v13826_v38, %v6749_v1 }
0x11c6   :  { %v6739_v44 = vmul.f32 %v14041_v57, %v6738_v58  ;;  %v12231_v58 = vld [vmem:[#allocation24 + $0x5e0] sm:$0xf0] }
0x11c7   :  { %v12234_v1 = vor.u32 %v13432_v42, %v12231_v58  ;;  %v12439_v42 = vld [vmem:[#allocation24 + $0x770] sm:$0xf0]  ;;  %v12445_v58 = vld [vmem:[#allocation24 + $0x738] sm:$0xf] }
0x11c8   :  { %v6743_v14 = vsel %vm6742_vm3, %v14041_v57, %v6739_v44  ;;  %v12298_v57 = vor.u32 %v13448_v20, %v12295_v41  ;;  %v13433_v44 = vld [vmem:[#allocation24 + $0x5ac] sm:$0xf]  ;;  %v13507_v20 = vld [vmem:[#allocation24 + $0x7f4] sm:$0xf0]  ;;  %v13499_v41 = vld [vmem:[#allocation24 + $0x7bc] sm:$0xf] }
0x11c9   :  { %v6745_v54 = vmul.f32 %v6743_v14, %v17380_v36  ;;  %v12494_v36 = vor.u32 %v13505_v60, %v12493_v19  ;;  %v12239_v14 = vld [vmem:[#allocation24 + $0x5e8] sm:$0xf0]  ;;  %v12173_v19 = vld [vmem:[#allocation24 + $0x528] sm:$0xf] }
0x11ca   :  { %v12242_v50 = vor.u32 %v13433_v44, %v12239_v14  ;;  %v13417_v60 = vld [vmem:[#allocation24 + $0x52c] sm:$0xf]  ;;  %v12447_v44 = vld [vmem:[#allocation24 + $0x778] sm:$0xf0] }
0x11cb   :  { %v6750_v5 = vmul.f32 %v13825_v40, %v6745_v54  ;;  %v12237_v40 = vld [vmem:[#allocation24 + $0x5a8] sm:$0xf]  ;;  %v12165_v54 = vld [vmem:[#allocation24 + $0x520] sm:$0xf] }
0x11cc   :  { %v12238_v47 = vor.u32 %v13441_v2, %v12237_v40  ;;  %v13491_v40 = vld [vmem:[#allocation24 + $0x774] sm:$0xf0]  ;;  %v13483_v2 = vld [vmem:[#allocation24 + $0x73c] sm:$0xf] }
0x11cd   :  { %v6755_v28 = vadd.f32 %v13826_v38, %v6750_v5  ;;  %v12230_v38 = vor.u32 %v13440_v12, %v12229_v26  ;;  %v13424_v5 = vld [vmem:[#allocation24 + $0x55c] sm:$0xf0]  ;;  %v13490_v26 = vld [vmem:[#allocation24 + $0x76c] sm:$0xf0]  ;;  %v12510_v12 = vor.u32 %v13507_v20, %v12509_v46  ;;  %v12258_v46 = vor.u32 %v13435_v61, %v12255_v35  ;;  %v12189_v20 = vld [vmem:[#allocation24 + $0x538] sm:$0xf] }
0x11ce   :  { %v12166_v21 = vor.u32 %v13424_v5, %v12165_v54  ;;  %v13474_v54 = vld [vmem:[#allocation24 + $0x6ec] sm:$0xf0]  ;;  %v12446_v5 = vor.u32 %v13491_v40, %v12445_v58  ;;  %v13411_v58 = vld [vmem:[#allocation24 + $0x4f4] sm:$0xf0]  ;;  %v13403_v40 = vld [vmem:[#allocation24 + $0x4bc] sm:$0xf] }
0x11cf   :  { %v17391_v39 = vpack.c.bf16 %v6755_v28, %v17388_v22  ;;  %v13425_v28 = vld [vmem:[#allocation24 + $0x564] sm:$0xf0] }
0x11d0   :  { %v12174_v29 = vor.u32 %v13425_v28, %v12173_v19  ;;  %v13475_v19 = vld [vmem:[#allocation24 + $0x6f4] sm:$0xf0]  ;;  %v13467_v28 = vld [vmem:[#allocation24 + $0x6bc] sm:$0xf] }
0x11d1   :  { %7571 = vmatmul.bf16.vlgmr.msra.gmra.mxu0 %v17391_v39  ;;  %7585 = vmatmul.bf16.vlgmr.msra.gmra.mxu2 %v17391_v39 }
0x11d2   :  { %7599 = vmatmul.bf16.vlgmr.msrb.gmra.mxu3 %v17391_v39  ;;  %7613 = vmatmul.bf16.vlgmr.msrb.gmra.mxu1 %v17391_v39 }
0x11d3   :  { %7675 = vmatpush.bf16.msra.mxu0 %v12486_v52  ;;  %7689 = vmatpush.bf16.msra.mxu2 %v12490_v0  ;;  %v12170_v52 = vor.u32 %v13416_v13, %v12167_v56  ;;  %v12101_v0 = vld [vmem:[#allocation24 + $0x4a0] sm:$0xf]  ;;  %v12375_v13 = vld [vmem:[#allocation24 + $0x6f0] sm:$0xf0]  ;;  %v12381_v56 = vld [vmem:[#allocation24 + $0x6b8] sm:$0xf] }
0x11d4   :  { %7703 = vmatpush.bf16.msrb.mxu3 %v12494_v36  ;;  %7717 = vmatpush.bf16.msrb.mxu1 %v12498_v62  ;;  %v12178_v36 = vor.u32 %v13417_v60, %v12175_v11  ;;  %v13400_v62 = vld [vmem:[#allocation24 + $0x4a4] sm:$0xf]  ;;  %v12383_v60 = vld [vmem:[#allocation24 + $0x6f8] sm:$0xf0] }
0x11d7   :  { %7676 = vmatpush.bf16.msra.mxu0 %v12422_v7  ;;  %7690 = vmatpush.bf16.msra.mxu2 %v12426_v16  ;;  %v12102_v7 = vor.u32 %v13408_v43, %v12101_v0  ;;  %v12106_v16 = vor.u32 %v13400_v62, %v12103_v37  ;;  %v13458_v0 = vld [vmem:[#allocation24 + $0x66c] sm:$0xf0]  ;;  %v12382_v43 = vor.u32 %v13475_v19, %v12381_v56  ;;  %v12311_v62 = vld [vmem:[#allocation24 + $0x670] sm:$0xf0]  ;;  %v12317_v37 = vld [vmem:[#allocation24 + $0x638] sm:$0xf] }
0x11d8   :  { %7704 = vmatpush.bf16.msrb.mxu3 %v12430_v24  ;;  %7718 = vmatpush.bf16.msrb.mxu1 %v12434_v55  ;;  %v12039_v24 = vld [vmem:[#allocation24 + $0x460] sm:$0xf0]  ;;  %v12110_v55 = vor.u32 %v13409_v18, %v12109_v48  ;;  %v13459_v48 = vld [vmem:[#allocation24 + $0x674] sm:$0xf0]  ;;  %v13451_v18 = vld [vmem:[#allocation24 + $0x63c] sm:$0xf] }
0x11d9   :  { %v13395_v56 = vld [vmem:[#allocation24 + $0x474] sm:$0xf0]  ;;  %v13387_v19 = vld [vmem:[#allocation24 + $0x43c] sm:$0xf] }
0x11db   :  { %7677 = vmatpush.bf16.msra.mxu0 %v12358_v15  ;;  %7691 = vmatpush.bf16.msra.mxu2 %v12362_v34  ;;  %v13506_v15 = vld [vmem:[#allocation24 + $0x7ec] sm:$0xf0]  ;;  %v13498_v34 = vld [vmem:[#allocation24 + $0x7b4] sm:$0xf] }
0x11dc   :  { %7705 = vmatpush.bf16.msrb.mxu3 %v12366_v31  ;;  %7719 = vmatpush.bf16.msrb.mxu1 %v12370_v3  ;;  %v12038_v31 = vor.u32 %v13392_v49, %v12037_v27  ;;  %v12042_v3 = vor.u32 %v13384_v23, %v12039_v24  ;;  %v12502_v45 = vor.u32 %v13506_v15, %v12501_v32  ;;  %v13434_v24 = vld [vmem:[#allocation24 + $0x5b4] sm:$0xf]  ;;  %v12181_v15 = vld [vmem:[#allocation24 + $0x530] sm:$0xf] }
0x11dd   :  { %v12318_v49 = vor.u32 %v13459_v48, %v12317_v37  ;;  %v12322_v23 = vor.u32 %v13451_v18, %v12319_v17 }
0x11df   :  { %7678 = vmatpush.bf16.msra.mxu0 %v12294_v51  ;;  %7692 = vmatpush.bf16.msra.mxu2 %v12298_v57  ;;  %v12506_v51 = vor.u32 %v13498_v34, %v12503_v6  ;;  %v12437_v57 = vld [vmem:[#allocation24 + $0x730] sm:$0xf] }
0x11e0   :  { %7706 = vmatpush.bf16.msrb.mxu3 %v12302_v9  ;;  %7720 = vmatpush.bf16.msrb.mxu1 %v12306_v63  ;;  %v12514_v9 = vor.u32 %v13499_v41, %v12511_v30  ;;  %v13482_v63 = vld [vmem:[#allocation24 + $0x734] sm:$0xf]  ;;  %v12438_v14 = vor.u32 %v13490_v26, %v12437_v57  ;;  %v13426_v34 = vld [vmem:[#allocation24 + $0x56c] sm:$0xf0]  ;;  %v13427_v41 = vld [vmem:[#allocation24 + $0x574] sm:$0xf0] }
0x11e1   :  { %7627 = vmatmul.bf16.vlgmr.msrb.gmra.mxu0 %v17391_v39  ;;  %7641 = vmatmul.bf16.vlgmr.msrb.gmra.mxu2 %v17391_v39  ;;  %v13419_v30 = vld [vmem:[#allocation24 + $0x53c] sm:$0xf]  ;;  %v13410_v57 = vld [vmem:[#allocation24 + $0x4ec] sm:$0xf0]  ;;  %v12190_v26 = vor.u32 %v13427_v41, %v12189_v20 }
0x11e2   :  { %7655 = vmatmul.bf16.vlgmr.msra.gmra.mxu3 %v17391_v39  ;;  %7669 = vmatmul.bf16.vlgmr.msra.gmra.mxu1 %v17391_v39  ;;  %v13514_v41 = vld [vmem:[#allocation26 + $0x430] sm:$0xff] }
0x11e3   :  { %7679 = vmatpush.bf16.msra.mxu0 %v12230_v38  ;;  %7693 = vmatpush.bf16.msra.mxu2 %v12234_v1  ;;  %v12442_v38 = vor.u32 %v13482_v63, %v12439_v42  ;;  %v12373_v1 = vld [vmem:[#allocation24 + $0x6b0] sm:$0xf]  ;;  %v12119_v63 = vld [vmem:[#allocation24 + $0x4f0] sm:$0xf0]  ;;  %v12125_v42 = vld [vmem:[#allocation24 + $0x4b8] sm:$0xf] }
0x11e4   :  { %7707 = vmatpush.bf16.msrb.mxu3 %v12238_v47  ;;  %7721 = vmatpush.bf16.msrb.mxu1 %v12242_v50  ;;  %v12450_v47 = vor.u32 %v13483_v2, %v12447_v44  ;;  %v13466_v50 = vld [vmem:[#allocation24 + $0x6b4] sm:$0xf]  ;;  %v12374_v11 = vor.u32 %v13474_v54, %v12373_v1  ;;  %v12127_v2 = vld [vmem:[#allocation24 + $0x4f8] sm:$0xf0]  ;;  %v13394_v1 = vld [vmem:[#allocation24 + $0x46c] sm:$0xf0]  ;;  %v12126_v54 = vor.u32 %v13411_v58, %v12125_v42 }
0x11e7   :  { %7680 = vmatpush.bf16.msra.mxu0 %v12166_v21  ;;  %7694 = vmatpush.bf16.msra.mxu2 %v12170_v52  ;;  %v12378_v21 = vor.u32 %v13466_v50, %v12375_v13  ;;  %v12309_v52 = vld [vmem:[#allocation24 + $0x630] sm:$0xf]  ;;  %v12055_v50 = vld [vmem:[#allocation24 + $0x470] sm:$0xf0]  ;;  %v12061_v13 = vld [vmem:[#allocation24 + $0x438] sm:$0xf] }
0x11e8   :  { %7708 = vmatpush.bf16.msrb.mxu3 %v12174_v29  ;;  %7722 = vmatpush.bf16.msrb.mxu1 %v12178_v36  ;;  %v12386_v29 = vor.u32 %v13467_v28, %v12383_v60  ;;  %v13450_v36 = vld [vmem:[#allocation24 + $0x634] sm:$0xf]  ;;  %v12310_v4 = vor.u32 %v13458_v0, %v12309_v52  ;;  %v12063_v28 = vld [vmem:[#allocation24 + $0x478] sm:$0xf0] }
0x11e9   :  { %v12314_v27 = vor.u32 %v13450_v36, %v12311_v62  ;;  %v12066_v52 = vor.u32 %v13387_v19, %v12063_v28  ;;  %v13515_v0 = vld [vmem:[#allocation26 + $0x438] sm:$0xff] }
0x11eb   :  { %7681 = vmatpush.bf16.msra.mxu0 %v12102_v7  ;;  %7695 = vmatpush.bf16.msra.mxu2 %v12106_v16  ;;  %v12245_v7 = vld [vmem:[#allocation24 + $0x5b0] sm:$0xf] }
0x11ec   :  { %7709 = vmatpush.bf16.msrb.mxu3 %v12110_v55  ;;  %7723 = vmatpush.bf16.msrb.mxu1 %v12114_v10  ;;  %v13442_v16 = vld [vmem:[#allocation24 + $0x5ec] sm:$0xf0]  ;;  %v12247_v55 = vld [vmem:[#allocation24 + $0x5f0] sm:$0xf0]  ;;  %v12253_v10 = vld [vmem:[#allocation24 + $0x5b8] sm:$0xf] }
0x11ed   :  { %v12246_v53 = vor.u32 %v13442_v16, %v12245_v7  ;;  %v12250_v32 = vor.u32 %v13434_v24, %v12247_v55  ;;  %v12254_v6 = vor.u32 %v13443_v8, %v12253_v10 }
0x11ef   :  { %7682 = vmatpush.bf16.msra.mxu0 %v12038_v31  ;;  %7696 = vmatpush.bf16.msra.mxu2 %v12042_v3  ;;  %v13418_v31 = vld [vmem:[#allocation24 + $0x534] sm:$0xf] }
0x11f0   :  { %7710 = vmatpush.bf16.msrb.mxu3 %v12046_v33  ;;  %7724 = vmatpush.bf16.msrb.mxu1 %v12050_v25  ;;  %v12183_v3 = vld [vmem:[#allocation24 + $0x570] sm:$0xf0]  ;;  %v12191_v33 = vld [vmem:[#allocation24 + $0x578] sm:$0xf0]  ;;  %v12182_v25 = vor.u32 %v13426_v34, %v12181_v15 }
0x11f2   :  { %7683 = vmatmul.bf16.vlgmr.msra.gmra.mxu0 %v17391_v39  ;;  %7697 = vmatmul.bf16.vlgmr.msra.gmra.mxu2 %v17391_v39 }
0x11f3   :  { %7731 = vmatpush.bf16.msrb.mxu0 %v12502_v45  ;;  %7745 = vmatpush.bf16.msrb.mxu2 %v12506_v51  ;;  %v12186_v45 = vor.u32 %v13418_v31, %v12183_v3  ;;  %v12117_v51 = vld [vmem:[#allocation24 + $0x4b0] sm:$0xf] }
0x11f4   :  { %7759 = vmatpush.bf16.msra.mxu3 %v12510_v12  ;;  %7773 = vmatpush.bf16.msra.mxu1 %v12514_v9  ;;  %v12194_v12 = vor.u32 %v13419_v30, %v12191_v33  ;;  %v13402_v9 = vld [vmem:[#allocation24 + $0x4b4] sm:$0xf]  ;;  %v12118_v44 = vor.u32 %v13410_v57, %v12117_v51  ;;  %v13523_v33 = vld [vmem:[#allocation26 + $0x478] sm:$0xff] }
0x11f5   :  { %7711 = vmatmul.bf16.vlgmr.msrb.gmra.mxu3 %v17391_v39  ;;  %7725 = vmatmul.bf16.vlgmr.msrb.gmra.mxu1 %v17391_v39  ;;  %v13538_v30 = vld [vmem:[#allocation26 + $0x4f0] sm:$0xff]  ;;  %v13531_v57 = vld [vmem:[#allocation26 + $0x4b8] sm:$0xff] }
0x11f7   :  { %7732 = vmatpush.bf16.msrb.mxu0 %v12438_v14  ;;  %7746 = vmatpush.bf16.msrb.mxu2 %v12442_v38  ;;  %v12122_v14 = vor.u32 %v13402_v9, %v12119_v63  ;;  %v12053_v38 = vld [vmem:[#allocation24 + $0x430] sm:$0xf] }
0x11f8   :  { %7760 = vmatpush.bf16.msra.mxu3 %v12446_v5  ;;  %7774 = vmatpush.bf16.msra.mxu1 %v12450_v47  ;;  %v12130_v5 = vor.u32 %v13403_v40, %v12127_v2  ;;  %v13386_v47 = vld [vmem:[#allocation24 + $0x434] sm:$0xf]  ;;  %v12054_v60 = vor.u32 %v13394_v1, %v12053_v38 }
0x11fb   :  { %7733 = vmatpush.bf16.msrb.mxu0 %v12374_v11  ;;  %7747 = vmatpush.bf16.msrb.mxu2 %v12378_v21  ;;  %v12058_v11 = vor.u32 %v13386_v47, %v12055_v50  ;;  %v12062_v21 = vor.u32 %v13395_v56, %v12061_v13 }
0x11fc   :  { %7761 = vmatpush.bf16.msra.mxu3 %v12382_v43  ;;  %7775 = vmatpush.bf16.msra.mxu1 %v12386_v29  ;;  %v13539_v43 = vld [vmem:[#allocation26 + $0x4f8] sm:$0xff]  ;;  %v17412_v29 = vld [vmem:[%s19316_s18 + $0x10] sm:$0xff] }
0x11fd   :  { %v6891_v36 = vperm.slane %v17412_v29, 0  ;;  %v6894_v62 = vperm.slane %v17412_v29, 3  ;;  %v6893_v7 = vperm.slane %v17412_v29, 2 }
0x11ff   :  { %7734 = vmatpush.bf16.msrb.mxu0 %v12310_v4  ;;  %7748 = vmatpush.bf16.msrb.mxu2 %v12314_v27  ;;  %v6892_v4 = vperm.slane %v17412_v29, 1 }
0x1200   :  { %7762 = vmatpush.bf16.msra.mxu3 %v12318_v49  ;;  %7776 = vmatpush.bf16.msra.mxu1 %v12322_v23 }
0x1203   :  { %7735 = vmatpush.bf16.msrb.mxu0 %v12246_v53  ;;  %7749 = vmatpush.bf16.msrb.mxu2 %v12250_v32 }
0x1204   :  { %7763 = vmatpush.bf16.msra.mxu3 %v12254_v6  ;;  %7777 = vmatpush.bf16.msra.mxu1 %v12258_v46 }
0x1207   :  { %7736 = vmatpush.bf16.msrb.mxu0 %v12182_v25  ;;  %7750 = vmatpush.bf16.msrb.mxu2 %v12186_v45 }
0x1208   :  { %7764 = vmatpush.bf16.msra.mxu3 %v12190_v26  ;;  %7778 = vmatpush.bf16.msra.mxu1 %v12194_v12 }
0x120b   :  { %7737 = vmatpush.bf16.msrb.mxu0 %v12118_v44  ;;  %7751 = vmatpush.bf16.msrb.mxu2 %v12122_v14 }
0x120c   :  { %7765 = vmatpush.bf16.msra.mxu3 %v12126_v54  ;;  %7779 = vmatpush.bf16.msra.mxu1 %v12130_v5 }
0x120f   :  { %7738 = vmatpush.bf16.msrb.mxu0 %v12054_v60  ;;  %7752 = vmatpush.bf16.msrb.mxu2 %v12058_v11 }
0x1210   :  { %7766 = vmatpush.bf16.msra.mxu3 %v12062_v21  ;;  %7780 = vmatpush.bf16.msra.mxu1 %v12066_v52 }
0x1212   :  { %7739 = vmatmul.bf16.vlgmr.msrb.gmra.mxu0 %v17391_v39  ;;  %7753 = vmatmul.bf16.vlgmr.msrb.gmra.mxu2 %v17391_v39 }
0x1213   :  { %7767 = vmatmul.bf16.vlgmr.msra.gmra.mxu3 %v17391_v39  ;;  %7781 = vmatmul.bf16.vlgmr.msra.gmra.mxu1 %v17391_v39 }
0x1214   :  { %10241 = vmatpush.bf16.msra.mxu0 %v13515_v0  ;;  %10280 = vmatpush.bf16.msrb.mxu1 %v13539_v43 }
0x1215   :  { %10254 = vmatpush.bf16.msra.mxu2 %v13523_v33  ;;  %10267 = vmatpush.bf16.msrb.mxu3 %v13531_v57 }
0x1218   :  { %10242 = vmatpush.bf16.msra.mxu0 %v13514_v41  ;;  %10281 = vmatpush.bf16.msrb.mxu1 %v13538_v30 }
0x124e   :  { %v7572_v37 = vpop.f32.mrf.mxu0 }
0x124f   :  { %v17416_v48 = vadd.f32 %v7572_v37, %v6891_v36  ;;  %v7614_v18 = vpop.f32.mrf.mxu1 }
0x1250   :  { %v17420_v39 = vadd.f32 %v7614_v18, %v6894_v62 }
0x1251   :  { %v17423_v17 = vmul.f32 0.70710677, %v17416_v48 }
0x1252   :  { %v17427_v27 = vmul.f32 0.70710677, %v17420_v39 }
0x1253   :  { %v7851_v16 = vmul.f32 %v17423_v17, %v17423_v17 }
0x1254   :  { %v7971_v49 = vmul.f32 %v17427_v27, %v17427_v27  ;;  %v7586_v23 = vpop.f32.mrf.mxu2 }
0x1255   :  { %v17434_v24 = vmin.f32 %v7851_v16, 16.0  ;;  %v17438_v55 = vadd.f32 %v7586_v23, %v6892_v4  ;;  %v7600_v10 = vpop.f32.mrf.mxu3 }
0x1256   :  { %v17440_v8 = vmin.f32 %v7971_v49, 16.0  ;;  %v17444_v61 = vadd.f32 %v7600_v10, %v6893_v7  ;;  %v7574_v42 = vpop.f32.mrf.mxu0 }
0x1257   :  { %v7864_v35 = vmul.f32 3.8918573e-05, %v17434_v24  ;;  %v17449_v32 = vmul.f32 0.70710677, %v17438_v55  ;;  %v7853_v15 = vmul.f32 2.1237322e-06, %v17434_v24  ;;  %v17470_v54 = vadd.f32 %v7574_v42, %v6891_v36 }
0x1258   :  { %v7984_v53 = vmul.f32 3.8918573e-05, %v17440_v8  ;;  %v7973_v6 = vmul.f32 2.1237322e-06, %v17440_v8  ;;  %v17456_v3 = vmul.f32 0.70710677, %v17444_v61 }
0x1259   :  { %v7865_v34 = vadd.f32 0.001143296, %v7864_v35  ;;  %v7891_v31 = vmul.f32 %v17449_v32, %v17449_v32  ;;  %v7854_v26 = vadd.f32 0.00028619796, %v7853_v15  ;;  %v17479_v21 = vmul.f32 0.70710677, %v17470_v54 }
0x125a   :  { %v7985_v46 = vadd.f32 0.001143296, %v7984_v53  ;;  %v7931_v51 = vmul.f32 %v17456_v3, %v17456_v3  ;;  %v7974_v9 = vadd.f32 0.00028619796, %v7973_v6 }
0x125b   :  { %v7866_v20 = vmul.f32 %v7865_v34, %v17434_v24  ;;  %v17460_v45 = vmin.f32 %v7891_v31, 16.0  ;;  %v7855_v14 = vmul.f32 %v7854_v26, %v17434_v24  ;;  %v8491_v49 = vmul.f32 %v17479_v21, %v17479_v21  ;;  %v7616_v34 = vpop.f32.mrf.mxu1 }
0x125c   :  { %v7986_v25 = vmul.f32 %v7985_v46, %v17440_v8  ;;  %v17466_v2 = vmin.f32 %v7931_v51, 16.0  ;;  %v7975_v5 = vmul.f32 %v7974_v9, %v17440_v8  ;;  %v7617_v33 = vadd.f32 %v7616_v34, %v6894_v62 }
0x125d   :  { %v7867_v12 = vadd.f32 0.014752088, %v7866_v20  ;;  %v7904_v40 = vmul.f32 3.8918573e-05, %v17460_v45  ;;  %v7893_v13 = vmul.f32 2.1237322e-06, %v17460_v45 }
0x125e   :  { %v7987_v63 = vadd.f32 0.014752088, %v7986_v25  ;;  %v7944_v19 = vmul.f32 3.8918573e-05, %v17466_v2  ;;  %v7856_v60 = vadd.f32 0.0036580483, %v7855_v14 }
0x125f   :  { %v7868_v58 = vmul.f32 %v7867_v12, %v17434_v24  ;;  %v7905_v1 = vadd.f32 0.001143296, %v7904_v40  ;;  %v7976_v52 = vadd.f32 0.0036580483, %v7975_v5  ;;  %v7894_v43 = vadd.f32 0.00028619796, %v7893_v13 }
0x1260   :  { %v7988_v44 = vmul.f32 %v7987_v63, %v17440_v8  ;;  %v7945_v37 = vadd.f32 0.001143296, %v7944_v19  ;;  %v7857_v16 = vmul.f32 %v7856_v60, %v17434_v24  ;;  %v7933_v46 = vmul.f32 2.1237322e-06, %v17466_v2  ;;  %v13513_v25 = vld [vmem:[#allocation26 + $0x428] sm:$0xff] }
0x1261   :  { %v7869_v38 = vadd.f32 0.112945676, %v7868_v58  ;;  %v7906_v56 = vmul.f32 %v7905_v1, %v17460_v45  ;;  %v7977_v53 = vmul.f32 %v7976_v52, %v17440_v8  ;;  %v7895_v15 = vmul.f32 %v7894_v43, %v17460_v45  ;;  %v13537_v12 = vld [vmem:[#allocation26 + $0x4e8] sm:$0xff]  ;;  %10243 = vmatpush.bf16.msra.mxu0 %v13513_v25 }
0x1262   :  { %v7989_v47 = vadd.f32 0.112945676, %v7988_v44  ;;  %v7946_v10 = vmul.f32 %v7945_v37, %v17466_v2  ;;  %v7858_v31 = vadd.f32 0.05243302, %v7857_v16  ;;  %v17491_v20 = vmin.f32 %v8491_v49, 16.0  ;;  %10282 = vmatpush.bf16.msrb.mxu1 %v13537_v12 }
0x1263   :  { %v7870_v50 = vmul.f32 %v7869_v38, %v17434_v24  ;;  %v7907_v11 = vadd.f32 0.014752088, %v7906_v56  ;;  %v7978_v57 = vadd.f32 0.05243302, %v7977_v53  ;;  %v7896_v26 = vadd.f32 0.0036580483, %v7895_v15  ;;  %v7588_v53 = vpop.f32.mrf.mxu2 }
0x1264   :  { %v7990_v28 = vmul.f32 %v7989_v47, %v17440_v8  ;;  %v7947_v30 = vadd.f32 0.014752088, %v7946_v10  ;;  %v7934_v63 = vadd.f32 0.00028619796, %v7933_v46  ;;  %v7859_v42 = vmul.f32 %v7858_v31, %v17434_v24 }
0x1265   :  { %v7871_v0 = vadd.f32 0.4994258, %v7870_v50  ;;  %v7908_v36 = vmul.f32 %v7907_v11, %v17460_v45  ;;  %v8504_v40 = vmul.f32 3.8918573e-05, %v17491_v20  ;;  %v17503_v14 = vmul.f32 0.70710677, %v7617_v33 }
0x1266   :  { %v7991_v18 = vadd.f32 0.4994258, %v7990_v28  ;;  %v7948_v58 = vmul.f32 %v7947_v30, %v17466_v2  ;;  %v7979_v62 = vmul.f32 %v7978_v57, %v17440_v8  ;;  %v7897_v38 = vmul.f32 %v7896_v26, %v17460_v45 }
0x1267   :  { %v7909_v23 = vadd.f32 0.112945676, %v7908_v36  ;;  %v7872_v35 = vmul.f32 %v7871_v0, %v17434_v24  ;;  %v7935_v1 = vmul.f32 %v7934_v63, %v17466_v2  ;;  %v7860_v5 = vadd.f32 0.18741608, %v7859_v42 }
0x1268   :  { %v7992_v6 = vmul.f32 %v7991_v18, %v17440_v8  ;;  %v7949_v47 = vadd.f32 0.112945676, %v7948_v58  ;;  %v8505_v50 = vadd.f32 0.001143296, %v8504_v40  ;;  %v8611_v56 = vmul.f32 %v17503_v14, %v17503_v14 }
0x1269   :  { %v7910_v41 = vmul.f32 %v7909_v23, %v17460_v45  ;;  %v17496_v51 = vadd.f32 1.0, %v7872_v35  ;;  %v7980_v19 = vadd.f32 0.18741608, %v7979_v62  ;;  %v7898_v28 = vadd.f32 0.05243302, %v7897_v38 }
0x126a   :  { %v17498_v9 = vadd.f32 1.0, %v7992_v6  ;;  %v7936_v60 = vadd.f32 0.0036580483, %v7935_v1  ;;  %v8506_v11 = vmul.f32 %v8505_v50, %v17491_v20  ;;  %v7861_v0 = vmul.f32 %v7860_v5, %v17434_v24 }
0x126b   :  { %v7911_v44 = vadd.f32 0.4994258, %v7910_v41  ;;  %14042 = vrcp.f32 %v17496_v51  ;;  %v7950_v43 = vmul.f32 %v7949_v47, %v17466_v2  ;;  %v8493_v18 = vmul.f32 2.1237322e-06, %v17491_v20 }
0x126c   :  { %14044 = vrcp.f32 %v17498_v9  ;;  %v8507_v16 = vadd.f32 0.014752088, %v8506_v11  ;;  %v17523_v49 = vmin.f32 %v8611_v56, 16.0  ;;  %v17526_v23 = vmul.f32 0.5, %v17416_v48 }
0x126d   :  { %v7912_v13 = vmul.f32 %v7911_v44, %v17460_v45  ;;  %v17529_v10 = vmul.f32 0.5, %v17420_v39  ;;  %v7981_v35 = vmul.f32 %v7980_v19, %v17440_v8  ;;  %v7899_v24 = vmul.f32 %v7898_v28, %v17460_v45 }
0x126e   :  { %v17536_v34 = vmul.f32 0.5, %v17438_v55  ;;  %v7937_v6 = vmul.f32 %v7936_v60, %v17466_v2  ;;  %v8508_v46 = vmul.f32 %v8507_v16, %v17491_v20  ;;  %v7862_v48 = vadd.f32 1.1283791, %v7861_v0 }
0x126f   :  { %v17520_v37 = vadd.f32 1.0, %v7912_v13  ;;  %v17543_v31 = vmul.f32 0.5, %v17444_v61  ;;  %v7951_v8 = vadd.f32 0.4994258, %v7950_v43  ;;  %v8494_v41 = vadd.f32 0.00028619796, %v8493_v18 }
0x1270   :  { %v8624_v30 = vmul.f32 3.8918573e-05, %v17523_v49  ;;  %v17549_v55 = vadd.f32 %v7588_v53, %v6892_v4  ;;  %v7982_v25 = vadd.f32 1.1283791, %v7981_v35  ;;  %v7900_v57 = vadd.f32 0.18741608, %v7899_v24 }
0x1271   :  { %v17514_v52 = vpop.eup %14042  ;;  %14046 = vrcp.f32 %v17520_v37  ;;  %v8509_v26 = vadd.f32 0.112945676, %v8508_v46  ;;  %v7938_v63 = vadd.f32 0.05243302, %v7937_v6  ;;  %v17552_v42 = vmul.f32 0.5, %v17470_v54  ;;  %v13522_v43 = vld [vmem:[#allocation26 + $0x470] sm:$0xff] }
0x1272   :  { %v17518_v36 = vpop.eup %14044  ;;  %v7875_v15 = vmul.f32 %v17514_v52, %v17496_v51  ;;  %v17554_v61 = vmul.f32 0.5, %v7617_v33  ;;  %v17557_v58 = vmul.f32 %v7862_v48, %v17423_v17  ;;  %v7952_v44 = vmul.f32 %v7951_v8, %v17466_v2  ;;  %10255 = vmatpush.bf16.msra.mxu2 %v13522_v43  ;;  %v13512_v48 = vld [vmem:[#allocation26 + $0x420] sm:$0xff] }
0x1273   :  { %v7995_v39 = vmul.f32 %v17518_v36, %v17498_v9  ;;  %v8510_v62 = vmul.f32 %v8509_v26, %v17491_v20  ;;  %vm7879_vm9 = vweird.f32 %v17496_v51  ;;  %v7883_v4 = vand.u32 2147483647, %v17496_v51  ;;  %10244 = vmatpush.bf16.msra.mxu0 %v13512_v48 }
0x1274   :  { %v7876_v12 = vsub.f32 1.0, %v7875_v15  ;;  %v8495_v38 = vmul.f32 %v8494_v41, %v17491_v20  ;;  %v8625_v1 = vadd.f32 0.001143296, %v8624_v30  ;;  %v17565_v54 = vmul.f32 0.70710677, %v17549_v55  ;;  %v7602_v30 = vpop.f32.mrf.mxu3 }
0x1275   :  { %v7996_v40 = vsub.f32 1.0, %v7995_v39  ;;  %v7885_v33 = vand.u32 2147483648, %v17496_v51  ;;  %v17569_v17 = vmul.f32 %v7982_v25, %v17427_v27  ;;  %v8003_v5 = vand.u32 2147483647, %v17498_v9  ;;  %v13536_v39 = vld [vmem:[#allocation26 + $0x4e0] sm:$0xff] }
0x1276   :  { %v7901_v47 = vmul.f32 %v7900_v57, %v17460_v45  ;;  %v7877_v13 = vmul.f32 %v17514_v52, %v7876_v12  ;;  %v8005_v56 = vand.u32 2147483648, %v17498_v9  ;;  %v7939_v19 = vmul.f32 %v7938_v63, %v17466_v2  ;;  %v13530_v45 = vld [vmem:[#allocation26 + $0x4b0] sm:$0xff]  ;;  %10283 = vmatpush.bf16.msrb.mxu1 %v13536_v39  ;;  %v13521_v12 = vld [vmem:[#allocation26 + $0x468] sm:$0xff] }
0x1277   :  { %v17573_v50 = vpop.eup %14046  ;;  %v8626_v28 = vmul.f32 %v8625_v1, %v17523_v49  ;;  %v7997_v60 = vmul.f32 %v17518_v36, %v7996_v40  ;;  %v17580_v11 = vadd.f32 1.0, %v7952_v44  ;;  %v8511_v27 = vadd.f32 0.4994258, %v8510_v62  ;;  %10268 = vmatpush.bf16.msrb.mxu3 %v13530_v45  ;;  %v13529_v63 = vld [vmem:[#allocation26 + $0x4a8] sm:$0xff]  ;;  %10256 = vmatpush.bf16.msra.mxu2 %v13521_v12  ;;  %v7670_v40 = vpop.f32.mrf.mxu1 }
0x1278   :  { %v8531_v0 = vmul.f32 %v17565_v54, %v17565_v54  ;;  %vm7999_vm10 = vweird.f32 %v17498_v9  ;;  %v8496_v18 = vadd.f32 0.0036580483, %v8495_v38  ;;  %v8613_v16 = vmul.f32 2.1237322e-06, %v17523_v49 }
0x1279   :  { %v8627_v35 = vadd.f32 0.014752088, %v8626_v28  ;;  %vm17586_vm12 = vcmp.eq.f32.partialorder %v7883_v4, 8.507059e+37  ;;  %v7886_v53 = vor.u32 1.1754944e-38, %v7885_v33  ;;  %v7902_v15 = vadd.f32 1.1283791, %v7901_v47 }
0x127a   :  { %v7915_v6 = vmul.f32 %v17573_v50, %v17520_v37  ;;  %v17592_v46 = vmin.f32 %v8531_v0, 16.0  ;;  %vm7880_vm13 = vweird.f32 %v17514_v52  ;;  %vm8000_vm4 = vweird.f32 %v17518_v36 }
0x127b   :  { %v7940_v8 = vadd.f32 0.18741608, %v7939_v19  ;;  %v8628_v41 = vmul.f32 %v8627_v35, %v17523_v49  ;;  %v7878_v25 = vadd.f32 %v17514_v52, %v7877_v13  ;;  %v7998_v57 = vadd.f32 %v17518_v36, %v7997_v60  ;;  %vm17610_vm6 = vmor %vm7879_vm9, %vm7880_vm13  ;;  %10269 = vmatpush.bf16.msrb.mxu3 %v13529_v63 }
0x127c   :  { %14048 = vrcp.f32 %v17580_v11  ;;  %v8512_v26 = vmul.f32 %v8511_v27, %v17491_v20  ;;  %vm17601_vm5 = vcmp.eq.f32.partialorder %v8003_v5, 8.507059e+37  ;;  %v8497_v44 = vmul.f32 %v8496_v18, %v17491_v20  ;;  %vm17623_vm7 = vmor %vm7999_vm10, %vm8000_vm4 }
0x127d   :  { %v8614_v62 = vadd.f32 0.00028619796, %v8613_v16  ;;  %v8629_v4 = vadd.f32 0.112945676, %v8628_v41  ;;  %v8006_v1 = vor.u32 1.1754944e-38, %v8005_v56  ;;  %v7916_v33 = vsub.f32 1.0, %v7915_v6  ;;  %v7628_v16 = vpop.f32.mrf.mxu0 }
0x127e   :  { %v8544_v47 = vmul.f32 3.8918573e-05, %v17592_v46  ;;  %v17617_v5 = vadd.f32 %v7602_v30, %v6893_v7  ;;  %v17628_v13 = vmul.f32 %v7902_v15, %v17449_v32  ;;  %v7941_v56 = vmul.f32 %v7940_v8, %v17466_v2 }
0x127f   :  { %v8630_v19 = vmul.f32 %v8629_v4, %v17523_v49  ;;  %v17633_v7 = vmul.f32 0.5, %v17549_v55  ;;  %v7882_v28 = vsel %vm17610_vm6, %v17514_v52, %v7878_v25  ;;  %v8002_v9 = vsel %vm17623_vm7, %v17518_v36, %v7998_v57 }
0x1280   :  { %v17641_v60 = vadd.f32 1.0, %v8512_v26  ;;  %v8545_v27 = vadd.f32 0.001143296, %v8544_v47  ;;  %v7923_v32 = vand.u32 2147483647, %v17520_v37  ;;  %v8615_v2 = vmul.f32 %v8614_v62, %v17523_v49 }
0x1281   :  { %v8498_v0 = vadd.f32 0.05243302, %v8497_v44  ;;  %v8631_v43 = vadd.f32 0.4994258, %v8630_v19  ;;  %v7917_v55 = vmul.f32 %v17573_v50, %v7916_v33  ;;  %v17650_v52 = vmul.f32 0.70710677, %v17617_v5 }
0x1282   :  { %v17645_v45 = vpop.eup %14048  ;;  %v8546_v18 = vmul.f32 %v8545_v27, %v17592_v46  ;;  %v6895_v36 = vperm.slane %v17412_v29, 4  ;;  %v7887_v35 = vsel %vm17586_vm12, %v7886_v53, %v7882_v28  ;;  %v8007_v15 = vsel %vm17601_vm5, %v8006_v1, %v8002_v9 }
0x1283   :  { %v7925_v6 = vand.u32 2147483648, %v17520_v37  ;;  %v7942_v48 = vadd.f32 1.1283791, %v7941_v56  ;;  %14050 = vrcp.f32 %v17641_v60  ;;  %v8632_v39 = vmul.f32 %v8631_v43, %v17523_v49 }
0x1284   :  { %v8547_v8 = vadd.f32 0.014752088, %v8546_v18  ;;  %v8571_v41 = vmul.f32 %v17650_v52, %v17650_v52  ;;  %v7955_v30 = vmul.f32 %v17645_v45, %v17580_v11  ;;  %v8499_v24 = vmul.f32 %v8498_v0, %v17491_v20 }
0x1285   :  { %v8616_v53 = vadd.f32 0.0036580483, %v8615_v2  ;;  %v17667_v25 = vadd.f32 %v7628_v16, %v6895_v36  ;;  %v7918_v57 = vadd.f32 %v17573_v50, %v7917_v55  ;;  %vm7920_vm8 = vweird.f32 %v17573_v50 }
0x1286   :  { %v8548_v26 = vmul.f32 %v8547_v8, %v17592_v46  ;;  %v17672_v12 = vmin.f32 %v8571_v41, 16.0  ;;  %v7888_v63 = vmul.f32 %v7887_v35, %v17557_v58  ;;  %vm7919_vm11 = vweird.f32 %v17520_v37  ;;  %v13511_v35 = vld [vmem:[#allocation26 + $0x418] sm:$0xff] }
0x1287   :  { %vm17676_vm14 = vcmp.eq.f32.partialorder %v7923_v32, 8.507059e+37  ;;  %v17681_v44 = vmul.f32 0.70710677, %v17667_v25  ;;  %v8008_v62 = vmul.f32 %v8007_v15, %v17569_v17  ;;  %v7926_v4 = vor.u32 1.1754944e-38, %v7925_v6  ;;  %vm17689_vm15 = vmor %vm7919_vm11, %vm7920_vm8  ;;  %v13535_v15 = vld [vmem:[#allocation26 + $0x4d8] sm:$0xff]  ;;  %10245 = vmatpush.bf16.msra.mxu0 %v13511_v35 }
0x1288   :  { %v17685_v38 = vmul.f32 %v7942_v48, %v17456_v3  ;;  %v17687_v1 = vadd.f32 1.0, %v8632_v39  ;;  %v7956_v37 = vsub.f32 1.0, %v7955_v30  ;;  %v8500_v58 = vadd.f32 0.18741608, %v8499_v24  ;;  %10284 = vmatpush.bf16.msrb.mxu1 %v13535_v15 }
0x1289   :  { %v8617_v47 = vmul.f32 %v8616_v53, %v17523_v49  ;;  %v8549_v51 = vadd.f32 0.112945676, %v8548_v26  ;;  %v17694_v56 = vpop.eup %14050  ;;  %v7922_v17 = vsel %vm17689_vm15, %v17573_v50, %v7918_v57  ;;  %v8533_v3 = vmul.f32 2.1237322e-06, %v17592_v46 }
0x128a   :  { %v8584_v19 = vmul.f32 3.8918573e-05, %v17672_v12  ;;  %v8011_v28 = vmul.f32 %v17681_v44, %v17681_v44  ;;  %v12515_v9 = vclamps-f32 %v7888_v63, 1.0  ;;  %vm7959_vm1 = vweird.f32 %v17580_v11 }
0x128b   :  { %v7963_v27 = vand.u32 2147483647, %v17580_v11  ;;  %v7965_v32 = vand.u32 2147483648, %v17580_v11  ;;  %14052 = vrcp.f32 %v17687_v1  ;;  %v8550_v0 = vmul.f32 %v8549_v51, %v17592_v46 }
0x128c   :  { %v8585_v2 = vadd.f32 0.001143296, %v8584_v19  ;;  %v17708_v50 = vmin.f32 %v8011_v28, 16.0  ;;  %v7927_v43 = vsel %vm17676_vm14, %v7926_v4, %v7922_v17  ;;  %v7957_v55 = vmul.f32 %v17645_v45, %v7956_v37 }
0x128d   :  { %v8501_v18 = vmul.f32 %v8500_v58, %v17491_v20  ;;  %v8515_v16 = vmul.f32 %v17694_v56, %v17641_v60  ;;  %v8618_v6 = vadd.f32 0.05243302, %v8617_v47  ;;  %v8534_v48 = vadd.f32 0.00028619796, %v8533_v3 }
0x128e   :  { %v8586_v39 = vmul.f32 %v8585_v2, %v17672_v12  ;;  %v8024_v8 = vmul.f32 3.8918573e-05, %v17708_v50  ;;  %v9131_v41 = vadd.f32 1.0, %v12515_v9  ;;  %v12518_v30 = vclamps-f32 %v8008_v62, 1.0 }
0x128f   :  { %v8573_v24 = vmul.f32 2.1237322e-06, %v17672_v12  ;;  %v6898_v53 = vperm.slane %v17412_v29, 7  ;;  %v7928_v20 = vmul.f32 %v7927_v43, %v17628_v13  ;;  %vm17721_vm2 = vcmp.eq.f32.partialorder %v7963_v27, 8.507059e+37 }
0x1290   :  { %v8551_v26 = vadd.f32 0.4994258, %v8550_v0  ;;  %v8587_v63 = vadd.f32 0.014752088, %v8586_v39  ;;  %v7958_v4 = vadd.f32 %v17645_v45, %v7957_v55  ;;  %vm7960_vm3 = vweird.f32 %v17645_v45 }
0x1291   :  { %v8516_v62 = vsub.f32 1.0, %v8515_v16  ;;  %v8025_v33 = vadd.f32 0.001143296, %v8024_v8  ;;  %v17727_v37 = vpop.eup %14052  ;;  %v8502_v58 = vadd.f32 1.1283791, %v8501_v18  ;;  %v8619_v47 = vmul.f32 %v8618_v6, %v17523_v49  ;;  %vm7961_vm9 = vmor %vm7959_vm1, %vm7960_vm3 }
0x1292   :  { %v8535_v13 = vmul.f32 %v8534_v48, %v17592_v46  ;;  %v8588_v51 = vmul.f32 %v8587_v63, %v17672_v12  ;;  %v7966_v17 = vor.u32 1.1754944e-38, %v7965_v32  ;;  %v8574_v3 = vadd.f32 0.00028619796, %v8573_v24 }
0x1293   :  { %v8026_v19 = vmul.f32 %v8025_v33, %v17708_v50  ;;  %v17735_v28 = vadd.f32 %v7670_v40, %v6898_v53  ;;  %v17738_v9 = vmul.f32 %v9131_v41, %v17526_v23  ;;  %v17740_v27 = vadd.f32 1.0, %v12518_v30 }
0x1294   :  { %v12516_v0 = vclamps-f32 %v7928_v20, 1.0  ;;  %v8552_v32 = vmul.f32 %v8551_v26, %v17592_v46  ;;  %v7962_v2 = vsel %vm7961_vm9, %v17645_v45, %v7958_v4  ;;  %v8517_v43 = vmul.f32 %v17694_v56, %v8516_v62 }
0x1295   :  { %v8635_v55 = vmul.f32 %v17727_v37, %v17687_v1  ;;  %v8589_v18 = vadd.f32 0.112945676, %v8588_v51  ;;  %v8503_v23 = vmul.f32 %v8502_v58, %v17479_v21  ;;  %v8620_v16 = vadd.f32 0.18741608, %v8619_v47  ;;  %v7642_v51 = vpop.f32.mrf.mxu2 }
0x1296   :  { %v8536_v35 = vadd.f32 0.0036580483, %v8535_v13  ;;  %v8027_v15 = vadd.f32 0.014752088, %v8026_v19  ;;  %v8523_v6 = vand.u32 2147483647, %v17641_v60  ;;  %v8575_v11 = vmul.f32 %v8574_v3, %v17672_v12 }
0x1297   :  { %v8590_v48 = vmul.f32 %v8589_v18, %v17672_v12  ;;  %v17756_v39 = vmul.f32 0.70710677, %v17735_v28  ;;  %v7967_v45 = vsel %vm17721_vm2, %v7966_v17, %v7962_v2  ;;  %v8525_v8 = vand.u32 2147483648, %v17641_v60 }
0x1298   :  { %v17761_v41 = vadd.f32 1.0, %v8552_v32  ;;  %v8028_v21 = vmul.f32 %v8027_v15, %v17708_v50  ;;  %v8518_v30 = vadd.f32 %v17694_v56, %v8517_v43  ;;  %vm8520_vm10 = vweird.f32 %v17694_v56  ;;  %v13520_v15 = vld [vmem:[#allocation26 + $0x460] sm:$0xff] }
0x1299   :  { %v8636_v24 = vsub.f32 1.0, %v8635_v55  ;;  %v8591_v20 = vadd.f32 0.4994258, %v8590_v48  ;;  %v8621_v26 = vmul.f32 %v8620_v16, %v17523_v49  ;;  %v8537_v63 = vmul.f32 %v8536_v35, %v17592_v46  ;;  %10257 = vmatpush.bf16.msra.mxu2 %v13520_v15 }
0x129a   :  { %v8029_v40 = vadd.f32 0.112945676, %v8028_v21  ;;  %v8131_v57 = vmul.f32 %v17756_v39, %v17756_v39  ;;  %vm8519_vm12 = vweird.f32 %v17641_v60  ;;  %v8576_v4 = vadd.f32 0.0036580483, %v8575_v11 }
0x129b   :  { %v8013_v62 = vmul.f32 2.1237322e-06, %v17708_v50  ;;  %v6896_v33 = vperm.slane %v17412_v29, 5  ;;  %v9132_v58 = vadd.f32 1.0, %v12516_v0  ;;  %v7968_v47 = vmul.f32 %v7967_v45, %v17685_v38  ;;  %vm17774_vm13 = vmor %vm8519_vm12, %vm8520_vm10 }
0x129c   :  { %vm17778_vm4 = vcmp.eq.f32.partialorder %v8523_v6, 8.507059e+37  ;;  %14054 = vrcp.f32 %v17761_v41  ;;  %v8522_v60 = vsel %vm17774_vm13, %v17694_v56, %v8518_v30  ;;  %v8526_v17 = vor.u32 1.1754944e-38, %v8525_v8  ;;  %v13528_v6 = vld [vmem:[#allocation26 + $0x4a0] sm:$0xff] }
0x129d   :  { %v8637_v3 = vmul.f32 %v17727_v37, %v8636_v24  ;;  %v8592_v38 = vmul.f32 %v8591_v20, %v17672_v12  ;;  %v8622_v19 = vadd.f32 1.1283791, %v8621_v26  ;;  %v8538_v0 = vadd.f32 0.05243302, %v8537_v63  ;;  %10270 = vmatpush.bf16.msrb.mxu3 %v13528_v6 }
0x129e   :  { %v8030_v32 = vmul.f32 %v8029_v40, %v17708_v50  ;;  %v17789_v2 = vmin.f32 %v8131_v57, 16.0  ;;  %v17792_v43 = vmul.f32 0.5, %v17617_v5  ;;  %v8577_v55 = vmul.f32 %v8576_v4, %v17672_v12 }
0x129f   :  { %v8014_v18 = vadd.f32 0.00028619796, %v8013_v62  ;;  %v17797_v56 = vadd.f32 %v7642_v51, %v6896_v33  ;;  %v12517_v16 = vclamps-f32 %v7968_v47, 1.0  ;;  %v8527_v35 = vsel %vm17778_vm4, %v8526_v17, %v8522_v60  ;;  %v7656_v62 = vpop.f32.mrf.mxu3  ;;  %v13510_v47 = vld [vmem:[#allocation26 + $0x410] sm:$0xff]  ;;  %v13519_v60 = vld [vmem:[#allocation26 + $0x458] sm:$0xff] }
0x12a0   :  { %vm8639_vm5 = vweird.f32 %v17687_v1  ;;  %vm8640_vm6 = vweird.f32 %v17727_v37  ;;  %v8638_v5 = vadd.f32 %v17727_v37, %v8637_v3  ;;  %v8643_v11 = vand.u32 2147483647, %v17687_v1  ;;  %v13534_v51 = vld [vmem:[#allocation26 + $0x4d0] sm:$0xff]  ;;  %v13527_v17 = vld [vmem:[#allocation26 + $0x498] sm:$0xff]  ;;  %10246 = vmatpush.bf16.msra.mxu0 %v13510_v47  ;;  %10258 = vmatpush.bf16.msra.mxu2 %v13519_v60 }
0x12a1   :  { %v8645_v48 = vand.u32 2147483648, %v17687_v1  ;;  %v17806_v45 = vadd.f32 1.0, %v8592_v38  ;;  %v8539_v21 = vmul.f32 %v8538_v0, %v17592_v46  ;;  %v8031_v30 = vadd.f32 0.4994258, %v8030_v32  ;;  %vm17817_vm7 = vmor %vm8639_vm5, %vm8640_vm6  ;;  %10285 = vmatpush.bf16.msrb.mxu1 %v13534_v51  ;;  %10271 = vmatpush.bf16.msrb.mxu3 %v13527_v17 }
0x12a2   :  { %v17808_v8 = vpop.eup %14054  ;;  %v8144_v24 = vmul.f32 3.8918573e-05, %v17789_v2  ;;  %v6897_v20 = vperm.slane %v17412_v29, 6  ;;  %v8528_v26 = vmul.f32 %v8527_v35, %v8503_v23  ;;  %v8578_v40 = vadd.f32 0.05243302, %v8577_v55 }
0x12a3   :  { %v8015_v57 = vmul.f32 %v8014_v18, %v17708_v50  ;;  %v17823_v4 = vmul.f32 0.70710677, %v17797_v56  ;;  %v17827_v13 = vmul.f32 %v17740_v27, %v17529_v10  ;;  %v17830_v23 = vmul.f32 %v9132_v58, %v17536_v34 }
0x12a4   :  { %v9133_v1 = vadd.f32 1.0, %v12517_v16  ;;  %v8145_v49 = vadd.f32 0.001143296, %v8144_v24  ;;  %v8642_v3 = vsel %vm17817_vm7, %v17727_v37, %v8638_v5  ;;  %v8555_v38 = vmul.f32 %v17808_v8, %v17761_v41 }
0x12a5   :  { %14056 = vrcp.f32 %v17806_v45  ;;  %v8133_v10 = vmul.f32 2.1237322e-06, %v17789_v2  ;;  %v8646_v27 = vor.u32 1.1754944e-38, %v8645_v48  ;;  %v8032_v34 = vmul.f32 %v8031_v30, %v17708_v50 }
0x12a6   :  { %v8146_v58 = vmul.f32 %v8145_v49, %v17789_v2  ;;  %v17843_v0 = vadd.f32 %v7656_v62, %v6897_v20  ;;  %v12531_v37 = vclamps-f32 %v8528_v26, 1.0  ;;  %v8540_v32 = vadd.f32 0.18741608, %v8539_v21 }
0x12a7   :  { %v8016_v55 = vadd.f32 0.0036580483, %v8015_v57  ;;  %v8051_v18 = vmul.f32 %v17823_v4, %v17823_v4  ;;  %v8623_v16 = vmul.f32 %v8622_v19, %v17503_v14  ;;  %vm8644_vm8 = vcmp.eq.f32.partialorder %v8643_v11, 8.507059e+37 }
0x12a8   :  { %v8579_v35 = vmul.f32 %v8578_v40, %v17672_v12  ;;  %v8147_v15 = vadd.f32 0.014752088, %v8146_v58  ;;  %v8647_v6 = vsel %vm8644_vm8, %v8646_v27, %v8642_v3  ;;  %v8556_v5 = vsub.f32 1.0, %v8555_v38 }
0x12a9   :  { %v8134_v48 = vadd.f32 0.00028619796, %v8133_v10  ;;  %v17849_v30 = vmin.f32 %v8051_v18, 16.0  ;;  %v17852_v24 = vmul.f32 %v9133_v1, %v17543_v31  ;;  %v17854_v21 = vadd.f32 1.0, %v8032_v34  ;;  %v7630_v34 = vpop.f32.mrf.mxu0 }
0x12aa   :  { %v8148_v26 = vmul.f32 %v8147_v15, %v17789_v2  ;;  %v17858_v63 = vmul.f32 0.70710677, %v17843_v0  ;;  %v9147_v19 = vadd.f32 1.0, %v12531_v37  ;;  %v8541_v11 = vmul.f32 %v8540_v32, %v17592_v46 }
0x12ab   :  { %v17860_v14 = vpop.eup %14056  ;;  %v8017_v40 = vmul.f32 %v8016_v55, %v17708_v50  ;;  %v8064_v57 = vmul.f32 3.8918573e-05, %v17849_v30  ;;  %v8648_v62 = vmul.f32 %v8647_v6, %v8623_v16  ;;  %v17866_v31 = vmul.f32 0.5, %v17667_v25 }
0x12ac   :  { %v17869_v47 = vmul.f32 0.5, %v17735_v28  ;;  %v8149_v1 = vadd.f32 0.112945676, %v8148_v26  ;;  %v8557_v49 = vmul.f32 %v17808_v8, %v8556_v5  ;;  %v8580_v51 = vadd.f32 0.18741608, %v8579_v35 }
0x12ad   :  { %v8135_v60 = vmul.f32 %v8134_v48, %v17789_v2  ;;  %v8065_v17 = vadd.f32 0.001143296, %v8064_v57  ;;  %v8595_v46 = vmul.f32 %v17860_v14, %v17806_v45  ;;  %14058 = vrcp.f32 %v17854_v21 }
0x12ae   :  { %v8150_v3 = vmul.f32 %v8149_v1, %v17789_v2  ;;  %v8091_v25 = vmul.f32 %v17858_v63, %v17858_v63  ;;  %v17880_v28 = vmul.f32 %v9147_v19, %v17552_v42  ;;  %v8542_v38 = vadd.f32 1.1283791, %v8541_v11 }
0x12af   :  { %v8018_v10 = vadd.f32 0.05243302, %v8017_v40  ;;  %v8066_v27 = vmul.f32 %v8065_v17, %v17849_v30  ;;  %v12534_v58 = vclamps-f32 %v8648_v62, 1.0  ;;  %vm8560_vm11 = vweird.f32 %v17808_v8 }
0x12b0   :  { %v8563_v37 = vand.u32 2147483647, %v17761_v41  ;;  %v8565_v32 = vand.u32 2147483648, %v17761_v41  ;;  %v8558_v55 = vadd.f32 %v17808_v8, %v8557_v49  ;;  %v8151_v18 = vadd.f32 0.4994258, %v8150_v3 }
0x12b1   :  { %v8067_v16 = vadd.f32 0.014752088, %v8066_v27  ;;  %v17887_v35 = vmin.f32 %v8091_v25, 16.0  ;;  %v8581_v42 = vmul.f32 %v8580_v51, %v17672_v12  ;;  %v8596_v15 = vsub.f32 1.0, %v8595_v46  ;;  %v7672_v51 = vpop.f32.mrf.mxu1 }
0x12b2   :  { %v8136_v6 = vadd.f32 0.0036580483, %v8135_v60  ;;  %v17892_v5 = vadd.f32 %v7630_v34, %v6895_v36  ;;  %v8543_v48 = vmul.f32 %v8542_v38, %v17565_v54  ;;  %vm8559_vm14 = vweird.f32 %v17761_v41 }
0x12b3   :  { %v8019_v26 = vmul.f32 %v8018_v10, %v17708_v50  ;;  %v8068_v19 = vmul.f32 %v8067_v16, %v17849_v30  ;;  %v17898_v11 = vpop.eup %14058  ;;  %vm17902_vm15 = vmor %vm8559_vm14, %vm8560_vm11  ;;  %vm17906_vm1 = vcmp.eq.f32.partialorder %v8563_v37, 8.507059e+37  ;;  %v8566_v36 = vor.u32 1.1754944e-38, %v8565_v32 }
0x12b4   :  { %v8053_v54 = vmul.f32 2.1237322e-06, %v17849_v30  ;;  %v8104_v41 = vmul.f32 3.8918573e-05, %v17887_v35  ;;  %v9150_v57 = vadd.f32 1.0, %v12534_v58  ;;  %v8562_v62 = vsel %vm17902_vm15, %v17808_v8, %v8558_v55 }
0x12b5   :  { %v8152_v1 = vmul.f32 %v8151_v18, %v17789_v2  ;;  %v8069_v49 = vadd.f32 0.112945676, %v8068_v19  ;;  %v8582_v60 = vadd.f32 1.1283791, %v8581_v42  ;;  %v8597_v17 = vmul.f32 %v17860_v14, %v8596_v15 }
0x12b6   :  { %v8137_v46 = vmul.f32 %v8136_v6, %v17789_v2  ;;  %v17919_v3 = vmul.f32 0.70710677, %v17892_v5  ;;  %v8020_v25 = vadd.f32 0.18741608, %v8019_v26  ;;  %v8035_v38 = vmul.f32 %v17898_v11, %v17854_v21  ;;  %v13533_v6 = vld [vmem:[#allocation26 + $0x4c8] sm:$0xff] }
0x12b7   :  { %v17924_v10 = vmul.f32 0.5, %v17797_v56  ;;  %v8070_v8 = vmul.f32 %v8069_v49, %v17849_v30  ;;  %v8567_v27 = vsel %vm17906_vm1, %v8566_v36, %v8562_v62  ;;  %v8054_v34 = vadd.f32 0.00028619796, %v8053_v54  ;;  %v13509_v56 = vld [vmem:[#allocation26 + $0x408] sm:$0xff]  ;;  %10286 = vmatpush.bf16.msrb.mxu1 %v13533_v6 }
0x12b8   :  { %v8105_v58 = vadd.f32 0.001143296, %v8104_v41  ;;  %v17931_v37 = vadd.f32 %v7672_v51, %v6898_v53  ;;  %vm8599_vm2 = vweird.f32 %v17806_v45  ;;  %vm8600_vm3 = vweird.f32 %v17860_v14  ;;  %10247 = vmatpush.bf16.msra.mxu0 %v13509_v56 }
0x12b9   :  { %v8603_v32 = vand.u32 2147483647, %v17806_v45  ;;  %v17936_v55 = vadd.f32 1.0, %v8152_v1  ;;  %v8598_v18 = vadd.f32 %v17860_v14, %v8597_v17  ;;  %v8138_v16 = vadd.f32 0.05243302, %v8137_v46  ;;  %vm17957_vm9 = vmor %vm8599_vm2, %vm8600_vm3  ;;  %v7726_v29 = vpop.f32.mrf.mxu1 }
0x12ba   :  { %v8106_v42 = vmul.f32 %v8105_v58, %v17887_v35  ;;  %v8651_v15 = vmul.f32 %v17919_v3, %v17919_v3  ;;  %v8568_v53 = vmul.f32 %v8567_v27, %v8543_v48  ;;  %v8605_v26 = vand.u32 2147483648, %v17806_v45 }
0x12bb   :  { %v8036_v19 = vsub.f32 1.0, %v8035_v38  ;;  %v8071_v12 = vadd.f32 0.4994258, %v8070_v8  ;;  %v8055_v40 = vmul.f32 %v8054_v34, %v17849_v30  ;;  %v17947_v41 = vmul.f32 0.70710677, %v17931_v37 }
0x12bc   :  { %v8107_v36 = vadd.f32 0.014752088, %v8106_v42  ;;  %v17944_v54 = vmin.f32 %v8651_v15, 16.0  ;;  %v17950_v62 = vmul.f32 %v9150_v57, %v17554_v61  ;;  %v8583_v1 = vmul.f32 %v8582_v60, %v17650_v52 }
0x12bd   :  { %14060 = vrcp.f32 %v17936_v55  ;;  %v8093_v49 = vmul.f32 2.1237322e-06, %v17887_v35  ;;  %v8602_v51 = vsel %vm17957_vm9, %v17860_v14, %v8598_v18  ;;  %v8139_v61 = vmul.f32 %v8138_v16, %v17789_v2 }
0x12be   :  { %v8108_v52 = vmul.f32 %v8107_v36, %v17887_v35  ;;  %v8664_v57 = vmul.f32 3.8918573e-05, %v17944_v54  ;;  %v8606_v60 = vor.u32 1.1754944e-38, %v8605_v26  ;;  %v8021_v45 = vmul.f32 %v8020_v25, %v17708_v50 }
0x12bf   :  { %v8037_v17 = vmul.f32 %v17898_v11, %v8036_v19  ;;  %v8072_v46 = vmul.f32 %v8071_v12, %v17849_v30  ;;  %v12532_v38 = vclamps-f32 %v8568_v53, 1.0  ;;  %vm8604_vm10 = vcmp.eq.f32.partialorder %v8603_v32, 8.507059e+37 }
0x12c0   :  { %v8056_v8 = vadd.f32 0.0036580483, %v8055_v40  ;;  %v8771_v27 = vmul.f32 %v17947_v41, %v17947_v41  ;;  %v8607_v14 = vsel %vm8604_vm10, %v8606_v60, %v8602_v51  ;;  %v8094_v34 = vadd.f32 0.00028619796, %v8093_v49  ;;  %v13571_v49 = vld [vmem:[#allocation26 + $0x5f8] sm:$0xff] }
0x12c1   :  { %v8109_v58 = vadd.f32 0.112945676, %v8108_v52  ;;  %v8665_v56 = vadd.f32 0.001143296, %v8664_v57  ;;  %vm8040_vm12 = vweird.f32 %v17898_v11  ;;  %v8043_v18 = vand.u32 2147483647, %v17854_v21 }
0x12c2   :  { %v8140_v16 = vadd.f32 0.18741608, %v8139_v61  ;;  %v17976_v50 = vmin.f32 %v8771_v27, 16.0  ;;  %v8038_v42 = vadd.f32 %v17898_v11, %v8037_v17  ;;  %v17981_v32 = vadd.f32 1.0, %v8072_v46 }
0x12c3   :  { %v17978_v25 = vpop.eup %14060  ;;  %v8110_v15 = vmul.f32 %v8109_v58, %v17887_v35  ;;  %v8666_v6 = vmul.f32 %v8665_v56, %v17944_v54  ;;  %v9148_v53 = vadd.f32 1.0, %v12532_v38  ;;  %v8608_v26 = vmul.f32 %v8607_v14, %v8583_v1  ;;  %v7644_v38 = vpop.f32.mrf.mxu2 }
0x12c4   :  { %v8045_v19 = vand.u32 2147483648, %v17854_v21  ;;  %v8057_v12 = vmul.f32 %v8056_v8, %v17849_v30  ;;  %v8022_v40 = vadd.f32 1.1283791, %v8021_v45  ;;  %vm8039_vm13 = vweird.f32 %v17854_v21 }
0x12c5   :  { %v8095_v36 = vmul.f32 %v8094_v34, %v17887_v35  ;;  %v8667_v48 = vadd.f32 0.014752088, %v8666_v6  ;;  %vm17991_vm4 = vmor %vm8039_vm13, %vm8040_vm12  ;;  %vm17995_vm5 = vcmp.eq.f32.partialorder %v8043_v18, 8.507059e+37  ;;  %v8141_v1 = vmul.f32 %v8140_v16, %v17789_v2  ;;  %v13518_v18 = vld [vmem:[#allocation26 + $0x450] sm:$0xff] }
0x12c6   :  { %v8155_v61 = vmul.f32 %v17978_v25, %v17936_v55  ;;  %v8784_v21 = vmul.f32 3.8918573e-05, %v17976_v50  ;;  %v8042_v52 = vsel %vm17991_vm4, %v17898_v11, %v8038_v42  ;;  %14062 = vrcp.f32 %v17981_v32  ;;  %v13526_v16 = vld [vmem:[#allocation26 + $0x490] sm:$0xff]  ;;  %10259 = vmatpush.bf16.msra.mxu2 %v13518_v18 }
0x12c7   :  { %v8111_v57 = vadd.f32 0.4994258, %v8110_v15  ;;  %v8668_v60 = vmul.f32 %v8667_v48, %v17944_v54  ;;  %v18009_v45 = vmul.f32 %v9148_v53, %v17633_v7  ;;  %v12533_v17 = vclamps-f32 %v8608_v26, 1.0  ;;  %10272 = vmatpush.bf16.msrb.mxu3 %v13526_v16  ;;  %v13508_v26 = vld [vmem:[#allocation26 + $0x400] sm:$0xff]  ;;  %v13547_v48 = vld [vmem:[#allocation26 + $0x538] sm:$0xff] }
0x12c8   :  { %v8046_v46 = vor.u32 1.1754944e-38, %v8045_v19  ;;  %v8058_v2 = vadd.f32 0.05243302, %v8057_v12  ;;  %v9195_v8 = vpack.c.bf16 %v17880_v28, %v17738_v9  ;;  %v8096_v27 = vadd.f32 0.0036580483, %v8095_v36  ;;  %10248 = vmatpush.bf16.msra.mxu0 %v13508_v26 }
0x12c9   :  { %v8653_v14 = vmul.f32 2.1237322e-06, %v17944_v54  ;;  %v8669_v34 = vadd.f32 0.112945676, %v8668_v60  ;;  %v9198_v11 = vpack.c.bf16 %v17950_v62, %v17827_v13  ;;  %v8156_v56 = vsub.f32 1.0, %v8155_v61 }
0x12ca   :  { %v8047_v58 = vsel %vm17995_vm5, %v8046_v46, %v8042_v52  ;;  %v8785_v7 = vadd.f32 0.001143296, %v8784_v21  ;;  %v8023_v42 = vmul.f32 %v8022_v40, %v17681_v44  ;;  %v8142_v15 = vadd.f32 1.1283791, %v8141_v1  ;;  %v13532_v44 = vld [vmem:[#allocation26 + $0x4c0] sm:$0xff]  ;;  %v13517_v21 = vld [vmem:[#allocation26 + $0x448] sm:$0xff] }
0x12cb   :  { %v8112_v6 = vmul.f32 %v8111_v57, %v17887_v35  ;;  %v18022_v9 = vadd.f32 %v7644_v38, %v6896_v33  ;;  %v9196_v28 = vpack.c.bf16 %v18009_v45, %v17830_v23  ;;  %v9149_v13 = vadd.f32 1.0, %v12533_v17  ;;  %10287 = vmatpush.bf16.msrb.mxu1 %v13532_v44  ;;  %v13525_v17 = vld [vmem:[#allocation26 + $0x488] sm:$0xff]  ;;  %10260 = vmatpush.bf16.msra.mxu2 %v13517_v21 }
0x12cc   :  { %v18027_v62 = vmul.f32 0.5, %v17843_v0  ;;  %v8670_v53 = vmul.f32 %v8669_v34, %v17944_v54  ;;  %v18030_v19 = vpop.eup %14062  ;;  %v8048_v12 = vmul.f32 %v8047_v58, %v8023_v42  ;;  %v8059_v40 = vmul.f32 %v8058_v2, %v17849_v30  ;;  %10293 = vmatpush.bf16.msrb.mxu0 %v13547_v48  ;;  %10273 = vmatpush.bf16.msrb.mxu3 %v13525_v17 }
0x12cd   :  { %v18034_v33 = vmul.f32 0.5, %v17892_v5  ;;  %v8786_v36 = vmul.f32 %v8785_v7, %v17976_v50  ;;  %v8157_v0 = vmul.f32 %v17978_v25, %v8156_v56  ;;  %v8163_v51 = vand.u32 2147483647, %v17936_v55  ;;  %v7658_v56 = vpop.f32.mrf.mxu3  ;;  %10249 = vmatmul.bf16.vlgmr.msra.gmra.mxu0 %v9195_v8 }
0x12ce   :  { %v8097_v1 = vmul.f32 %v8096_v27, %v17887_v35  ;;  %v8654_v61 = vadd.f32 0.00028619796, %v8653_v14  ;;  %v18041_v52 = vmul.f32 %v8142_v15, %v17756_v39  ;;  %v18043_v57 = vadd.f32 1.0, %v8112_v6  ;;  %10288 = vmatmul.bf16.vlgmr.msrb.gmra.mxu1 %v9198_v11 }
0x12cf   :  { %v8787_v5 = vadd.f32 0.014752088, %v8786_v36  ;;  %v18046_v60 = vmul.f32 0.70710677, %v18022_v9  ;;  %10332 = vmatpush.bf16.msra.mxu1 %v13571_v49  ;;  %v18049_v46 = vmul.f32 %v9149_v13, %v17792_v43  ;;  %v8165_v2 = vand.u32 2147483648, %v17936_v55 }
0x12d0   :  { %v8075_v38 = vmul.f32 %v18030_v19, %v17981_v32  ;;  %v8671_v27 = vadd.f32 0.4994258, %v8670_v53  ;;  %v12519_v39 = vclamps-f32 %v8048_v12, 1.0  ;;  %v8060_v14 = vadd.f32 0.18741608, %v8059_v40 }
0x12d1   :  { %v8788_v34 = vmul.f32 %v8787_v5, %v17976_v50  ;;  %v8691_v58 = vmul.f32 %v18046_v60, %v18046_v60  ;;  %v8158_v43 = vadd.f32 %v17978_v25, %v8157_v0  ;;  %vm8160_vm6 = vweird.f32 %v17978_v25 }
0x12d2   :  { %v8098_v7 = vadd.f32 0.05243302, %v8097_v1  ;;  %v8655_v18 = vmul.f32 %v8654_v61, %v17944_v54  ;;  %14064 = vrcp.f32 %v18043_v57  ;;  %v8773_v16 = vmul.f32 2.1237322e-06, %v17976_v50 }
0x12d3   :  { %v8789_v42 = vadd.f32 0.112945676, %v8788_v34  ;;  %v18062_v15 = vmin.f32 %v8691_v58, 16.0  ;;  %vm8159_vm7 = vweird.f32 %v17936_v55  ;;  %v8076_v6 = vsub.f32 1.0, %v8075_v38  ;;  %v18080_v55 = vld [vmem:[%s19316_s18 + $0x18] sm:$0xff]  ;;  %v7684_v38 = vpop.f32.mrf.mxu0 }
0x12d4   :  { %v8672_v8 = vmul.f32 %v8671_v27, %v17944_v54  ;;  %v18068_v13 = vadd.f32 %v7658_v56, %v6897_v20  ;;  %v9135_v11 = vadd.f32 1.0, %v12519_v39  ;;  %vm18072_vm8 = vcmp.eq.f32.partialorder %v8163_v51, 8.507059e+37  ;;  %vm18084_vm11 = vmor %vm8159_vm7, %vm8160_vm6 }
0x12d5   :  { %v8061_v44 = vmul.f32 %v8060_v14, %v17849_v30  ;;  %v8166_v20 = vor.u32 1.1754944e-38, %v8165_v2  ;;  %v8099_v12 = vmul.f32 %v8098_v7, %v17887_v35  ;;  %v8656_v40 = vadd.f32 0.0036580483, %v8655_v18 }
0x12d6   :  { %v8790_v36 = vmul.f32 %v8789_v42, %v17976_v50  ;;  %v8162_v30 = vsel %vm18084_vm11, %v17978_v25, %v8158_v43  ;;  %v18094_v48 = vmul.f32 0.5, %v17931_v37  ;;  %v8774_v49 = vadd.f32 0.00028619796, %v8773_v16 }
0x12d7   :  { %v8704_v0 = vmul.f32 3.8918573e-05, %v18062_v15  ;;  %v8077_v51 = vmul.f32 %v18030_v19, %v8076_v6  ;;  %v18098_v1 = vadd.f32 1.0, %v8672_v8  ;;  %v18101_v61 = vmul.f32 0.70710677, %v18068_v13 }
0x12d8   :  { %v19352_v21 = vperm.slane %v18080_v55, 0  ;;  %v18104_v5 = vpop.eup %14064  ;;  %v18107_v17 = vmul.f32 %v9135_v11, %v17866_v31  ;;  %v8062_v25 = vadd.f32 1.1283791, %v8061_v44  ;;  %v8791_v37 = vadd.f32 0.4994258, %v8790_v36 }
0x12d9   :  { %v8705_v2 = vadd.f32 0.001143296, %v8704_v0  ;;  %v8083_v27 = vand.u32 2147483647, %v17981_v32  ;;  %v8100_v39 = vadd.f32 0.18741608, %v8099_v12  ;;  %v8657_v14 = vmul.f32 %v8656_v40, %v17944_v54 }
0x12da   :  { %v8731_v34 = vmul.f32 %v18101_v61, %v18101_v61  ;;  %v8167_v58 = vsel %vm18072_vm8, %v8166_v20, %v8162_v30  ;;  %vm8080_vm14 = vweird.f32 %v18030_v19  ;;  %v8775_v31 = vmul.f32 %v8774_v49, %v17976_v50 }
0x12db   :  { %v8706_v56 = vmul.f32 %v8705_v2, %v18062_v15  ;;  %v8078_v43 = vadd.f32 %v18030_v19, %v8077_v51  ;;  %v8115_v7 = vmul.f32 %v18104_v5, %v18043_v57  ;;  %14066 = vrcp.f32 %v18098_v1 }
0x12dc   :  { %v18124_v18 = vadd.f32 %v7684_v38, %v19352_v21  ;;  %v8792_v16 = vmul.f32 %v8791_v37, %v17976_v50  ;;  %v18127_v6 = vmin.f32 %v8731_v34, 16.0  ;;  %v19351_v8 = vperm.slane %v18080_v55, 3 }
0x12dd   :  { %v8707_v42 = vadd.f32 0.014752088, %v8706_v56  ;;  %v8168_v11 = vmul.f32 %v8167_v58, %v18041_v52  ;;  %vm8079_vm15 = vweird.f32 %v17981_v32  ;;  %v8085_v26 = vand.u32 2147483648, %v17981_v32 }
0x12de   :  { %v8658_v44 = vadd.f32 0.05243302, %v8657_v14  ;;  %v8063_v20 = vmul.f32 %v8062_v25, %v17823_v4  ;;  %vm18136_vm1 = vmor %vm8079_vm15, %vm8080_vm14  ;;  %vm18140_vm2 = vcmp.eq.f32.partialorder %v8083_v27, 8.507059e+37  ;;  %v8101_v52 = vmul.f32 %v8100_v39, %v17887_v35 }
0x12df   :  { %v8776_v36 = vadd.f32 0.0036580483, %v8775_v31  ;;  %v8082_v32 = vsel %vm18136_vm1, %v18030_v19, %v8078_v43  ;;  %v8116_v30 = vsub.f32 1.0, %v8115_v7  ;;  %v8708_v4 = vmul.f32 %v8707_v42, %v18062_v15 }
0x12e0   :  { %v18150_v49 = vmul.f32 0.70710677, %v18124_v18  ;;  %v18152_v0 = vadd.f32 1.0, %v8792_v16  ;;  %v8693_v51 = vmul.f32 2.1237322e-06, %v18062_v15  ;;  %v18158_v35 = vadd.f32 %v7726_v29, %v19351_v8  ;;  %v13545_v8 = vld [vmem:[#allocation26 + $0x528] sm:$0xff] }
0x12e1   :  { %v8744_v25 = vmul.f32 3.8918573e-05, %v18127_v6  ;;  %v18160_v37 = vpop.eup %14066  ;;  %v12522_v2 = vclamps-f32 %v8168_v11, 1.0  ;;  %v8086_v19 = vor.u32 1.1754944e-38, %v8085_v26  ;;  %v8659_v38 = vmul.f32 %v8658_v44, %v17944_v54  ;;  %v13570_v26 = vld [vmem:[#allocation26 + $0x5f0] sm:$0xff] }
0x12e2   :  { %v8709_v27 = vadd.f32 0.112945676, %v8708_v4  ;;  %v8102_v39 = vadd.f32 1.1283791, %v8101_v52  ;;  %v8777_v14 = vmul.f32 %v8776_v36, %v17976_v50  ;;  %v18165_v34 = vmul.f32 0.5, %v18022_v9  ;;  %v13546_v9 = vld [vmem:[#allocation26 + $0x530] sm:$0xff]  ;;  %10333 = vmatpush.bf16.msra.mxu1 %v13570_v26 }
0x12e3   :  { %v8745_v58 = vadd.f32 0.001143296, %v8744_v25  ;;  %v8087_v31 = vsel %vm18140_vm2, %v8086_v19, %v8082_v32  ;;  %v8117_v56 = vmul.f32 %v18104_v5, %v8116_v30  ;;  %v8171_v7 = vmul.f32 %v18150_v49, %v18150_v49  ;;  %10294 = vmatpush.bf16.msrb.mxu0 %v13546_v9 }
0x12e4   :  { %v8710_v43 = vmul.f32 %v8709_v27, %v18062_v15  ;;  %14068 = vrcp.f32 %v18152_v0  ;;  %v8694_v16 = vadd.f32 0.00028619796, %v8693_v51  ;;  %v18176_v11 = vmul.f32 0.70710677, %v18158_v35 }
0x12e5   :  { %v8746_v42 = vmul.f32 %v8745_v58, %v18127_v6  ;;  %v9138_v44 = vadd.f32 1.0, %v12522_v2  ;;  %v8123_v29 = vand.u32 2147483647, %v18043_v57  ;;  %v8660_v12 = vadd.f32 0.18741608, %v8659_v38 }
0x12e6   :  { %v8675_v40 = vmul.f32 %v18160_v37, %v18098_v1  ;;  %v8088_v52 = vmul.f32 %v8087_v31, %v8063_v20  ;;  %v8778_v36 = vadd.f32 0.05243302, %v8777_v14  ;;  %v8711_v32 = vadd.f32 0.4994258, %v8710_v43 }
0x12e7   :  { %v8747_v30 = vadd.f32 0.014752088, %v8746_v42  ;;  %vm8120_vm3 = vweird.f32 %v18104_v5  ;;  %v8125_v4 = vand.u32 2147483648, %v18043_v57  ;;  %v8733_v51 = vmul.f32 2.1237322e-06, %v18127_v6  ;;  %10295 = vmatpush.bf16.msrb.mxu0 %v13545_v8 }
0x12e8   :  { %v18184_v25 = vmin.f32 %v8171_v7, 16.0  ;;  %v8118_v2 = vadd.f32 %v18104_v5, %v8117_v56  ;;  %v8695_v19 = vmul.f32 %v8694_v16, %v18062_v15  ;;  %v8291_v20 = vmul.f32 %v18176_v11, %v18176_v11 }
0x12e9   :  { %v8748_v38 = vmul.f32 %v8747_v30, %v18127_v6  ;;  %v8103_v27 = vmul.f32 %v8102_v39, %v17858_v63  ;;  %v8661_v14 = vmul.f32 %v8660_v12, %v17944_v54  ;;  %v8676_v58 = vsub.f32 1.0, %v8675_v40 }
0x12ea   :  { %v8712_v31 = vmul.f32 %v8711_v32, %v18062_v15  ;;  %v18194_v43 = vpop.eup %14068  ;;  %v18197_v7 = vmul.f32 %v9138_v44, %v17869_v47  ;;  %v12520_v56 = vclamps-f32 %v8088_v52, 1.0  ;;  %vm8119_vm9 = vweird.f32 %v18043_v57 }
0x12eb   :  { %v8779_v16 = vmul.f32 %v8778_v36, %v17976_v50  ;;  %vm18203_vm10 = vmor %vm8119_vm9, %vm8120_vm3  ;;  %vm18207_vm12 = vcmp.eq.f32.partialorder %v8123_v29, 8.507059e+37  ;;  %v8126_v54 = vor.u32 1.1754944e-38, %v8125_v4  ;;  %v8734_v39 = vadd.f32 0.00028619796, %v8733_v51 }
0x12ec   :  { %v8184_v47 = vmul.f32 3.8918573e-05, %v18184_v25  ;;  %v8122_v57 = vsel %vm18203_vm10, %v18104_v5, %v8118_v2  ;;  %v8696_v9 = vadd.f32 0.0036580483, %v8695_v19  ;;  %v8749_v26 = vadd.f32 0.112945676, %v8748_v38 }
0x12ed   :  { %v18215_v44 = vmin.f32 %v8291_v20, 16.0  ;;  %v8662_v12 = vadd.f32 1.1283791, %v8661_v14  ;;  %v8677_v40 = vmul.f32 %v18160_v37, %v8676_v58  ;;  %v8795_v29 = vmul.f32 %v18194_v43, %v18152_v0 }
0x12ee   :  { %v18220_v52 = vadd.f32 1.0, %v8712_v31  ;;  %v18222_v36 = vadd.f32 1.0, %v12520_v56  ;;  %v8683_v32 = vand.u32 2147483647, %v18098_v1  ;;  %v8685_v30 = vand.u32 2147483648, %v18098_v1 }
0x12ef   :  { %v8780_v4 = vadd.f32 0.18741608, %v8779_v16  ;;  %v8127_v5 = vsel %vm18207_vm12, %v8126_v54, %v8122_v57  ;;  %vm8680_vm13 = vweird.f32 %v18160_v37  ;;  %v8735_v51 = vmul.f32 %v8734_v39, %v18127_v6 }
0x12f0   :  { %v8185_v2 = vadd.f32 0.001143296, %v8184_v47  ;;  %v8697_v19 = vmul.f32 %v8696_v9, %v18062_v15  ;;  %v8750_v38 = vmul.f32 %v8749_v26, %v18127_v6  ;;  %v8173_v20 = vmul.f32 2.1237322e-06, %v18184_v25  ;;  %v7698_v9 = vpop.f32.mrf.mxu2 }
0x12f1   :  { %v8304_v14 = vmul.f32 3.8918573e-05, %v18215_v44  ;;  %v8678_v58 = vadd.f32 %v18160_v37, %v8677_v40  ;;  %v8796_v31 = vsub.f32 1.0, %v8795_v29  ;;  %14070 = vrcp.f32 %v18220_v52 }
0x12f2   :  { %v8186_v56 = vmul.f32 %v8185_v2, %v18184_v25  ;;  %v18237_v16 = vmul.f32 %v8127_v5, %v8103_v27  ;;  %v8781_v42 = vmul.f32 %v8780_v4, %v17976_v50  ;;  %v19350_v54 = vperm.slane %v18080_v55, 1  ;;  %v13516_v50 = vld [vmem:[#allocation26 + $0x440] sm:$0xff] }
0x12f3   :  { %v8305_v63 = vadd.f32 0.001143296, %v8304_v14  ;;  %vm8679_vm4 = vweird.f32 %v18098_v1  ;;  %vm18242_vm5 = vcmp.eq.f32.partialorder %v8683_v32, 8.507059e+37  ;;  %v18247_v47 = vmul.f32 0.5, %v18068_v13  ;;  %10261 = vmatpush.bf16.msra.mxu2 %v13516_v50  ;;  %v7712_v50 = vpop.f32.mrf.mxu3 }
0x12f4   :  { %v8736_v57 = vadd.f32 0.0036580483, %v8735_v51  ;;  %v8663_v26 = vmul.f32 %v8662_v12, %v17919_v3  ;;  %vm18252_vm6 = vmor %vm8679_vm4, %vm8680_vm13  ;;  %v8751_v27 = vadd.f32 0.4994258, %v8750_v38  ;;  %v8174_v40 = vadd.f32 0.00028619796, %v8173_v20 }
0x12f5   :  { %v8187_v1 = vadd.f32 0.014752088, %v8186_v56  ;;  %v8682_v29 = vsel %vm18252_vm6, %v18160_v37, %v8678_v58  ;;  %v8797_v13 = vmul.f32 %v18194_v43, %v8796_v31  ;;  %v8698_v32 = vadd.f32 0.05243302, %v8697_v19 }
0x12f6   :  { %v8306_v4 = vmul.f32 %v8305_v63, %v18215_v44  ;;  %v8686_v12 = vor.u32 1.1754944e-38, %v8685_v30  ;;  %v8782_v5 = vadd.f32 1.1283791, %v8781_v42  ;;  %v18264_v51 = vadd.f32 %v7698_v9, %v19350_v54  ;;  %10262 = vmatmul.bf16.vlgmr.msra.gmra.mxu2 %v9196_v28  ;;  %v7686_v28 = vpop.f32.mrf.mxu0 }
0x12f7   :  { %v18266_v2 = vpop.eup %14070  ;;  %vm8799_vm7 = vweird.f32 %v18152_v0  ;;  %v8805_v38 = vand.u32 2147483648, %v18152_v0  ;;  %v8737_v37 = vmul.f32 %v8736_v57, %v18127_v6  ;;  %v8188_v19 = vmul.f32 %v8187_v1, %v18184_v25 }
0x12f8   :  { %v8687_v20 = vsel %vm18242_vm5, %v8686_v12, %v8682_v29  ;;  %v8752_v30 = vmul.f32 %v8751_v27, %v18127_v6  ;;  %v8175_v14 = vmul.f32 %v8174_v40, %v18184_v25  ;;  %v8307_v58 = vadd.f32 0.014752088, %v8306_v4  ;;  %v13524_v27 = vld [vmem:[#allocation26 + $0x480] sm:$0xff]  ;;  %v13563_v4 = vld [vmem:[#allocation26 + $0x5b8] sm:$0xff] }
0x12f9   :  { %v8798_v31 = vadd.f32 %v18194_v43, %v8797_v13  ;;  %vm8800_vm8 = vweird.f32 %v18194_v43  ;;  %v8699_v56 = vmul.f32 %v8698_v32, %v18062_v15  ;;  %v8189_v42 = vadd.f32 0.112945676, %v8188_v19  ;;  %v13555_v32 = vld [vmem:[#allocation26 + $0x578] sm:$0xff]  ;;  %10274 = vmatpush.bf16.msrb.mxu3 %v13524_v27 }
0x12fa   :  { %v8715_v63 = vmul.f32 %v18266_v2, %v18220_v52  ;;  %v8293_v57 = vmul.f32 2.1237322e-06, %v18215_v44  ;;  %v8308_v39 = vmul.f32 %v8307_v58, %v18215_v44  ;;  %v18284_v9 = vmul.f32 0.70710677, %v18264_v51  ;;  %vm18292_vm11 = vmor %vm8799_vm7, %vm8800_vm8  ;;  %10306 = vmatpush.bf16.msrb.mxu2 %v13555_v32 }
0x12fb   :  { %v8688_v40 = vmul.f32 %v8687_v20, %v8663_v26  ;;  %v8803_v1 = vand.u32 2147483647, %v18152_v0  ;;  %v8738_v29 = vadd.f32 0.05243302, %v8737_v37  ;;  %v8190_v13 = vmul.f32 %v8189_v42, %v18184_v25 }
0x12fc   :  { %v18296_v19 = vadd.f32 1.0, %v8752_v30  ;;  %v8176_v58 = vadd.f32 0.0036580483, %v8175_v14  ;;  %v8309_v54 = vadd.f32 0.112945676, %v8308_v39  ;;  %v8211_v26 = vmul.f32 %v18284_v9, %v18284_v9  ;;  %v13569_v30 = vld [vmem:[#allocation26 + $0x5e8] sm:$0xff] }
0x12fd   :  { %v8802_v37 = vsel %vm18292_vm11, %v18194_v43, %v8798_v31  ;;  %v8806_v20 = vor.u32 1.1754944e-38, %v8805_v38  ;;  %v8700_v42 = vadd.f32 0.18741608, %v8699_v56  ;;  %v6901_v0 = vperm.slane %v18080_v55, 2  ;;  %10319 = vmatpush.bf16.msra.mxu3 %v13563_v4  ;;  %10334 = vmatpush.bf16.msra.mxu1 %v13569_v30  ;;  %v13554_v38 = vld [vmem:[#allocation26 + $0x570] sm:$0xff] }
0x12fe   :  { %v8716_v21 = vsub.f32 1.0, %v8715_v63  ;;  %v8294_v14 = vadd.f32 0.00028619796, %v8293_v57  ;;  %v8310_v39 = vmul.f32 %v8309_v54, %v18215_v44  ;;  %v18305_v3 = vmin.f32 %v8211_v26, 16.0  ;;  %v13562_v31 = vld [vmem:[#allocation26 + $0x5b0] sm:$0xff]  ;;  %10307 = vmatpush.bf16.msrb.mxu2 %v13554_v38 }
0x12ff   :  { %v12535_v27 = vclamps-f32 %v8688_v40, 1.0  ;;  %v8783_v53 = vmul.f32 %v8782_v5, %v17947_v41  ;;  %vm8804_vm14 = vcmp.eq.f32.partialorder %v8803_v1, 8.507059e+37  ;;  %v8191_v43 = vadd.f32 0.4994258, %v8190_v13 }
0x1300   :  { %v8807_v56 = vsel %vm8804_vm14, %v8806_v20, %v8802_v37  ;;  %v8739_v32 = vmul.f32 %v8738_v29, %v18127_v6  ;;  %14072 = vrcp.f32 %v18296_v19  ;;  %v8177_v63 = vmul.f32 %v8176_v58, %v18184_v25 }
0x1301   :  { %v19552_v41 = vpack.c.bf16 %v18049_v46, %v17852_v24  ;;  %v8701_v8 = vmul.f32 %v8700_v42, %v18062_v15  ;;  %v8311_v54 = vadd.f32 0.4994258, %v8310_v39  ;;  %v8224_v5 = vmul.f32 3.8918573e-05, %v18305_v3  ;;  %10320 = vmatpush.bf16.msra.mxu3 %v13562_v31  ;;  %v7728_v31 = vpop.f32.mrf.mxu1 }
0x1302   :  { %v18321_v57 = vadd.f32 %v7712_v50, %v6901_v0  ;;  %v19553_v40 = vclamps-f32 %v18237_v16, 1.0  ;;  %v8717_v23 = vmul.f32 %v18266_v2, %v8716_v21  ;;  %v18327_v45 = vmul.f32 0.5, %v18124_v18 }
0x1303   :  { %10275 = vmatmul.bf16.vlgmr.msrb.gmra.mxu3 %v19552_v41  ;;  %v8295_v24 = vmul.f32 %v8294_v14, %v18215_v44  ;;  %v9151_v46 = vadd.f32 1.0, %v12535_v27  ;;  %v8808_v15 = vmul.f32 %v8807_v56, %v8783_v53  ;;  %v8723_v29 = vand.u32 2147483647, %v18220_v52 }
0x1304   :  { %v9137_v1 = vadd.f32 1.0, %v19553_v40  ;;  %v8192_v13 = vmul.f32 %v8191_v43, %v18184_v25  ;;  %v18334_v4 = vmul.f32 %v18222_v36, %v17924_v10  ;;  %v8740_v16 = vadd.f32 0.18741608, %v8739_v32 }
0x1305   :  { %v8178_v12 = vadd.f32 0.05243302, %v8177_v63  ;;  %v8225_v58 = vadd.f32 0.001143296, %v8224_v5  ;;  %v8702_v21 = vadd.f32 1.1283791, %v8701_v8  ;;  %v8312_v18 = vmul.f32 %v8311_v54, %v18215_v44 }
0x1306   :  { %v18338_v26 = vmul.f32 0.70710677, %v18321_v57  ;;  %v19554_v37 = vperm.slane %v18080_v55, 0  ;;  %v18344_v20 = vpop.eup %14072  ;;  %v8718_v42 = vadd.f32 %v18266_v2, %v8717_v23  ;;  %vm8720_vm15 = vweird.f32 %v18266_v2 }
0x1307   :  { %v8725_v10 = vand.u32 2147483648, %v18220_v52  ;;  %v8296_v36 = vadd.f32 0.0036580483, %v8295_v24  ;;  %v18350_v30 = vmul.f32 %v9151_v46, %v18034_v33  ;;  %v12538_v14 = vclamps-f32 %v8808_v15, 1.0 }
0x1308   :  { %v18342_v53 = vadd.f32 %v7686_v28, %v19554_v37  ;;  %vm8719_vm1 = vweird.f32 %v18220_v52  ;;  %v18353_v39 = vadd.f32 1.0, %v8192_v13  ;;  %vm18355_vm2 = vcmp.eq.f32.partialorder %v8723_v29, 8.507059e+37 }
0x1309   :  { %v8741_v27 = vmul.f32 %v8740_v16, %v18127_v6  ;;  %v8179_v43 = vmul.f32 %v8178_v12, %v18184_v25  ;;  %v8226_v38 = vmul.f32 %v8225_v58, %v18305_v3  ;;  %vm18362_vm3 = vmor %vm8719_vm1, %vm8720_vm15  ;;  %v8755_v33 = vmul.f32 %v18344_v20, %v18296_v19 }
0x130a   :  { %v18368_v52 = vadd.f32 1.0, %v8312_v18  ;;  %v8251_v56 = vmul.f32 %v18338_v26, %v18338_v26  ;;  %v18373_v32 = vmul.f32 0.70710677, %v18342_v53  ;;  %v8722_v6 = vsel %vm18362_vm3, %v18266_v2, %v8718_v42 }
0x130b   :  { %v8726_v63 = vor.u32 1.1754944e-38, %v8725_v10  ;;  %v8297_v41 = vmul.f32 %v8296_v36, %v18215_v44  ;;  %v8227_v8 = vadd.f32 0.014752088, %v8226_v38  ;;  %v9154_v54 = vadd.f32 1.0, %v12538_v14  ;;  %v13544_v36 = vld [vmem:[#allocation26 + $0x520] sm:$0xff] }
0x130c   :  { %14074 = vrcp.f32 %v18353_v39  ;;  %v8213_v5 = vmul.f32 2.1237322e-06, %v18305_v3  ;;  %v18381_v40 = vmin.f32 %v8251_v56, 16.0  ;;  %v8742_v23 = vadd.f32 1.1283791, %v8741_v27  ;;  %v13568_v14 = vld [vmem:[#allocation26 + $0x5e0] sm:$0xff]  ;;  %10296 = vmatpush.bf16.msrb.mxu0 %v13544_v36 }
0x130d   :  { %v8180_v24 = vadd.f32 0.18741608, %v8179_v43  ;;  %v8228_v28 = vmul.f32 %v8227_v8, %v18305_v3  ;;  %v8811_v46 = vmul.f32 %v18373_v32, %v18373_v32  ;;  %v8727_v2 = vsel %vm18355_vm2, %v8726_v63, %v8722_v6  ;;  %10335 = vmatpush.bf16.msra.mxu1 %v13568_v14 }
0x130e   :  { %v8756_v15 = vsub.f32 1.0, %v8755_v33  ;;  %14076 = vrcp.f32 %v18368_v52  ;;  %v8264_v29 = vmul.f32 3.8918573e-05, %v18381_v40  ;;  %v8703_v13 = vmul.f32 %v8702_v21, %v18046_v60  ;;  %v13561_v33 = vld [vmem:[#allocation26 + $0x5a8] sm:$0xff] }
0x130f   :  { %v18392_v16 = vmul.f32 0.5, %v18158_v35  ;;  %v8298_v12 = vadd.f32 0.05243302, %v8297_v41  ;;  %v8229_v58 = vadd.f32 0.112945676, %v8228_v28  ;;  %v18395_v18 = vmul.f32 %v9137_v1, %v18027_v62  ;;  %10321 = vmatpush.bf16.msra.mxu3 %v13561_v33 }
0x1310   :  { %v9199_v37 = vpack.c.bf16 %v18350_v30, %v18107_v17  ;;  %v8214_v42 = vadd.f32 0.00028619796, %v8213_v5  ;;  %v8265_v10 = vadd.f32 0.001143296, %v8264_v29  ;;  %v18400_v50 = vmul.f32 %v9154_v54, %v18094_v48  ;;  %v13553_v48 = vld [vmem:[#allocation26 + $0x568] sm:$0xff] }
0x1311   :  { %v8728_v27 = vmul.f32 %v8727_v2, %v8703_v13  ;;  %v8230_v60 = vmul.f32 %v8229_v58, %v18305_v3  ;;  %v18403_v35 = vmin.f32 %v8811_v46, 16.0  ;;  %v18408_v62 = vmul.f32 %v8742_v23, %v18101_v61  ;;  %10308 = vmatpush.bf16.msrb.mxu2 %v13553_v48  ;;  %v13543_v2 = vld [vmem:[#allocation26 + $0x518] sm:$0xff]  ;;  %v13552_v58 = vld [vmem:[#allocation26 + $0x560] sm:$0xff] }
0x1312   :  { %v18405_v21 = vpop.eup %14074  ;;  %v8757_v1 = vmul.f32 %v18344_v20, %v8756_v15  ;;  %v8181_v43 = vmul.f32 %v8180_v24, %v18184_v25  ;;  %v8253_v38 = vmul.f32 2.1237322e-06, %v18381_v40  ;;  %vm8759_vm9 = vweird.f32 %v18296_v19  ;;  %v13567_v15 = vld [vmem:[#allocation26 + $0x5d8] sm:$0xff]  ;;  %10297 = vmatpush.bf16.msrb.mxu0 %v13543_v2 }
0x1313   :  { %v8763_v56 = vand.u32 2147483647, %v18296_v19  ;;  %v8765_v6 = vand.u32 2147483648, %v18296_v19  ;;  %v8266_v61 = vmul.f32 %v8265_v10, %v18381_v40  ;;  %v8299_v41 = vmul.f32 %v8298_v12, %v18215_v44  ;;  %10336 = vmatpush.bf16.msra.mxu1 %v13567_v15 }
0x1314   :  { %v18417_v63 = vpop.eup %14076  ;;  %v8215_v25 = vmul.f32 %v8214_v42, %v18305_v3  ;;  %v8231_v8 = vadd.f32 0.4994258, %v8230_v60  ;;  %v8824_v54 = vmul.f32 3.8918573e-05, %v18403_v35  ;;  %v9202_v5 = vpack.c.bf16 %v18400_v50, %v18197_v7  ;;  %v13560_v42 = vld [vmem:[#allocation26 + $0x5a0] sm:$0xff] }
0x1315   :  { %v12536_v23 = vclamps-f32 %v8728_v27, 1.0  ;;  %v8195_v24 = vmul.f32 %v18405_v21, %v18353_v39  ;;  %v19559_v28 = vperm.slane %v18080_v55, 3  ;;  %v8758_v29 = vadd.f32 %v18344_v20, %v8757_v1  ;;  %10309 = vmatpush.bf16.msrb.mxu2 %v13552_v58  ;;  %10322 = vmatpush.bf16.msra.mxu3 %v13560_v42 }
0x1316   :  { %vm8760_vm10 = vweird.f32 %v18344_v20  ;;  %v8182_v13 = vadd.f32 1.1283791, %v8181_v43  ;;  %v8254_v12 = vadd.f32 0.00028619796, %v8253_v38  ;;  %vm18432_vm12 = vcmp.eq.f32.partialorder %v8763_v56, 8.507059e+37  ;;  %v13542_v43 = vld [vmem:[#allocation26 + $0x510] sm:$0xff] }
0x1317   :  { %v18428_v46 = vadd.f32 %v7728_v31, %v19559_v28  ;;  %v8315_v36 = vmul.f32 %v18417_v63, %v18368_v52  ;;  %v8267_v14 = vadd.f32 0.014752088, %v8266_v61  ;;  %v8825_v27 = vadd.f32 0.001143296, %v8824_v54  ;;  %vm18443_vm13 = vmor %vm8759_vm9, %vm8760_vm10  ;;  %10298 = vmatpush.bf16.msrb.mxu0 %v13542_v43  ;;  %v7700_v43 = vpop.f32.mrf.mxu2 }
0x1318   :  { %v8766_v60 = vor.u32 1.1754944e-38, %v8765_v6  ;;  %v8300_v31 = vadd.f32 0.18741608, %v8299_v41  ;;  %v8216_v1 = vadd.f32 0.0036580483, %v8215_v25  ;;  %v8232_v48 = vmul.f32 %v8231_v8, %v18305_v3  ;;  %v13566_v41 = vld [vmem:[#allocation26 + $0x5d0] sm:$0xff] }
0x1319   :  { %v9152_v38 = vadd.f32 1.0, %v12536_v23  ;;  %v8196_v56 = vsub.f32 1.0, %v8195_v24  ;;  %v18448_v61 = vmul.f32 0.5, %v18264_v51  ;;  %v18451_v6 = vmul.f32 0.70710677, %v18428_v46  ;;  %v13551_v23 = vld [vmem:[#allocation26 + $0x558] sm:$0xff]  ;;  %10337 = vmatpush.bf16.msra.mxu1 %v13566_v41 }
0x131a   :  { %v8762_v25 = vsel %vm18443_vm13, %v18344_v20, %v8758_v29  ;;  %v18457_v8 = vmul.f32 %v8182_v13, %v18150_v49  ;;  %v8255_v19 = vmul.f32 %v8254_v12, %v18381_v40  ;;  %v18461_v54 = vmul.f32 0.5, %v18342_v53  ;;  %v13559_v24 = vld [vmem:[#allocation26 + $0x598] sm:$0xff]  ;;  %10310 = vmatpush.bf16.msrb.mxu2 %v13551_v23  ;;  %v13541_v13 = vld [vmem:[#allocation26 + $0x508] sm:$0xff] }
0x131b   :  { %v8316_v51 = vsub.f32 1.0, %v8315_v36  ;;  %v8268_v28 = vmul.f32 %v8267_v14, %v18381_v40  ;;  %v8813_v2 = vmul.f32 2.1237322e-06, %v18403_v35  ;;  %v8826_v15 = vmul.f32 %v8825_v27, %v18403_v35  ;;  %10323 = vmatpush.bf16.msra.mxu3 %v13559_v24  ;;  %10299 = vmatpush.bf16.msrb.mxu0 %v13541_v13 }
0x131c   :  { %v8301_v20 = vmul.f32 %v8300_v31, %v18215_v44  ;;  %v8217_v49 = vmul.f32 %v8216_v1, %v18305_v3  ;;  %v18468_v29 = vadd.f32 1.0, %v8232_v48  ;;  %v18471_v53 = vmul.f32 0.5, %v18321_v57  ;;  %v13565_v44 = vld [vmem:[#allocation26 + $0x5c8] sm:$0xff] }
0x131d   :  { %v18474_v12 = vmul.f32 %v9152_v38, %v18165_v34  ;;  %v8197_v58 = vmul.f32 %v18405_v21, %v8196_v56  ;;  %v8827_v42 = vadd.f32 0.014752088, %v8826_v15  ;;  %v8931_v36 = vmul.f32 %v18451_v6, %v18451_v6  ;;  %10338 = vmatpush.bf16.msra.mxu1 %v13565_v44  ;;  %v7714_v15 = vpop.f32.mrf.mxu3 }
0x131e   :  { %v8767_v14 = vsel %vm18432_vm12, %v8766_v60, %v8762_v25  ;;  %vm8199_vm4 = vweird.f32 %v18353_v39  ;;  %v8203_v57 = vand.u32 2147483647, %v18353_v39  ;;  %v8256_v27 = vadd.f32 0.0036580483, %v8255_v19 }
0x131f   :  { %v8317_v31 = vmul.f32 %v18417_v63, %v8316_v51  ;;  %v8269_v1 = vadd.f32 0.112945676, %v8268_v28  ;;  %v8814_v34 = vadd.f32 0.00028619796, %v8813_v2  ;;  %v8828_v48 = vmul.f32 %v8827_v42, %v18403_v35 }
0x1320   :  { %v8205_v38 = vand.u32 2147483648, %v18353_v39  ;;  %v8218_v33 = vadd.f32 0.05243302, %v8217_v49  ;;  %14078 = vrcp.f32 %v18468_v29  ;;  %v18487_v10 = vmin.f32 %v8931_v36, 16.0 }
0x1321   :  { %v8768_v60 = vmul.f32 %v8767_v14, %v18408_v62  ;;  %v8198_v56 = vadd.f32 %v18405_v21, %v8197_v58  ;;  %vm8200_vm5 = vweird.f32 %v18405_v21  ;;  %v8302_v41 = vadd.f32 1.1283791, %v8301_v20 }
0x1322   :  { %vm18492_vm6 = vcmp.eq.f32.partialorder %v8203_v57, 8.507059e+37  ;;  %vm8320_vm7 = vweird.f32 %v18417_v63  ;;  %v8257_v19 = vmul.f32 %v8256_v27, %v18381_v40  ;;  %v19566_v23 = vperm.slane %v18080_v55, 1  ;;  %vm18507_vm8 = vmor %vm8199_vm4, %vm8200_vm5  ;;  %v13549_v57 = vld [vmem:[#allocation26 + $0x548] sm:$0xff] }
0x1323   :  { %v8318_v51 = vadd.f32 %v18417_v63, %v8317_v31  ;;  %v8270_v62 = vmul.f32 %v8269_v1, %v18381_v40  ;;  %v8815_v28 = vmul.f32 %v8814_v34, %v18403_v35  ;;  %v8829_v2 = vadd.f32 0.112945676, %v8828_v48 }
0x1324   :  { %v18500_v24 = vadd.f32 %v7700_v43, %v19566_v23  ;;  %v8206_v49 = vor.u32 1.1754944e-38, %v8205_v38  ;;  %v8325_v13 = vand.u32 2147483648, %v18368_v52  ;;  %v8219_v58 = vmul.f32 %v8218_v33, %v18305_v3  ;;  %v13550_v38 = vld [vmem:[#allocation26 + $0x550] sm:$0xff] }
0x1325   :  { %v8944_v42 = vmul.f32 3.8918573e-05, %v18487_v10  ;;  %v12537_v36 = vclamps-f32 %v8768_v60, 1.0  ;;  %v8202_v44 = vsel %vm18507_vm8, %v18405_v21, %v8198_v56  ;;  %vm8319_vm11 = vweird.f32 %v18368_v52  ;;  %v13558_v33 = vld [vmem:[#allocation26 + $0x590] sm:$0xff]  ;;  %10311 = vmatpush.bf16.msrb.mxu2 %v13550_v38 }
0x1326   :  { %v8323_v39 = vand.u32 2147483647, %v18368_v52  ;;  %v18519_v14 = vpop.eup %14078  ;;  %vm18523_vm14 = vmor %vm8319_vm11, %vm8320_vm7  ;;  %v8258_v27 = vadd.f32 0.05243302, %v8257_v19  ;;  %v18528_v1 = vmul.f32 0.70710677, %v18500_v24  ;;  %v18532_v21 = vadd.f32 %v7714_v15, %v6901_v0  ;;  %10324 = vmatpush.bf16.msra.mxu3 %v13558_v33 }
0x1327   :  { %v8945_v31 = vadd.f32 0.001143296, %v8944_v42  ;;  %v8322_v52 = vsel %vm18523_vm14, %v18417_v63, %v8318_v51  ;;  %v8271_v34 = vadd.f32 0.4994258, %v8270_v62  ;;  %v8816_v48 = vadd.f32 0.0036580483, %v8815_v28 }
0x1328   :  { %v8830_v43 = vmul.f32 %v8829_v2, %v18403_v35  ;;  %v8326_v60 = vor.u32 1.1754944e-38, %v8325_v13  ;;  %v8220_v56 = vadd.f32 0.18741608, %v8219_v58  ;;  %v8851_v23 = vmul.f32 %v18528_v1, %v18528_v1  ;;  %v13540_v51 = vld [vmem:[#allocation26 + $0x500] sm:$0xff]  ;;  %v13579_v58 = vld [vmem:[#allocation26 + $0x638] sm:$0xff] }
0x1329   :  { %v8946_v19 = vmul.f32 %v8945_v31, %v18487_v10  ;;  %v8207_v15 = vsel %vm18492_vm6, %v8206_v49, %v8202_v44  ;;  %vm8324_vm15 = vcmp.eq.f32.partialorder %v8323_v39, 8.507059e+37  ;;  %v8235_v63 = vmul.f32 %v18519_v14, %v18468_v29  ;;  %v13564_v62 = vld [vmem:[#allocation26 + $0x5c0] sm:$0xff]  ;;  %v13603_v42 = vld [vmem:[#allocation26 + $0x6f8] sm:$0xff]  ;;  %10300 = vmatpush.bf16.msrb.mxu0 %v13540_v51  ;;  %v13557_v31 = vld [vmem:[#allocation26 + $0x588] sm:$0xff]  ;;  %10312 = vmatpush.bf16.msrb.mxu2 %v13549_v57 }
0x132a   :  { %v8327_v28 = vsel %vm8324_vm15, %v8326_v60, %v8322_v52  ;;  %v8259_v2 = vmul.f32 %v8258_v27, %v18381_v40  ;;  %v18549_v13 = vmul.f32 0.70710677, %v18532_v21  ;;  %v8272_v25 = vmul.f32 %v8271_v34, %v18381_v40  ;;  %10339 = vmatpush.bf16.msra.mxu1 %v13564_v62  ;;  %10325 = vmatpush.bf16.msra.mxu3 %v13557_v31 }
0x132b   :  { %v8947_v20 = vadd.f32 0.014752088, %v8946_v19  ;;  %v8817_v49 = vmul.f32 %v8816_v48, %v18403_v35  ;;  %v8831_v44 = vadd.f32 0.4994258, %v8830_v43  ;;  %v18553_v39 = vmin.f32 %v8851_v23, 16.0 }
0x132c   :  { %v9153_v52 = vadd.f32 1.0, %v12537_v36  ;;  %v8208_v27 = vmul.f32 %v8207_v15, %v18457_v8  ;;  %v8303_v38 = vmul.f32 %v8302_v41, %v18176_v11  ;;  %v8221_v33 = vmul.f32 %v8220_v56, %v18305_v3  ;;  %10301 = vmatmul.bf16.vlgmr.msrb.gmra.mxu0 %v9199_v37 }
0x132d   :  { %10345 = vmatpush.bf16.msra.mxu0 %v13579_v58  ;;  %v8236_v60 = vsub.f32 1.0, %v8235_v63  ;;  %v18559_v34 = vmul.f32 0.5, %v18428_v46  ;;  %v8933_v48 = vmul.f32 2.1237322e-06, %v18487_v10  ;;  %v8948_v43 = vmul.f32 %v8947_v20, %v18487_v10  ;;  %10340 = vmatmul.bf16.vlgmr.msra.gmra.mxu1 %v9202_v5 }
0x132e   :  { %10384 = vmatpush.bf16.msrb.mxu1 %v13603_v42  ;;  %v8328_v19 = vmul.f32 %v8327_v28, %v8303_v38  ;;  %v8260_v36 = vadd.f32 0.18741608, %v8259_v2  ;;  %v8864_v8 = vmul.f32 3.8918573e-05, %v18553_v39  ;;  %v8891_v11 = vmul.f32 %v18549_v13, %v18549_v13 }
0x132f   :  { %v18572_v3 = vadd.f32 1.0, %v8272_v25  ;;  %v8818_v46 = vadd.f32 0.05243302, %v8817_v49  ;;  %v8832_v41 = vmul.f32 %v8831_v44, %v18403_v35  ;;  %v8949_v56 = vadd.f32 0.112945676, %v8948_v43 }
0x1330   :  { %v18576_v23 = vmul.f32 %v9153_v52, %v18247_v47  ;;  %v12523_v15 = vclamps-f32 %v8208_v27, 1.0  ;;  %v8222_v63 = vadd.f32 1.1283791, %v8221_v33  ;;  %v8865_v51 = vadd.f32 0.001143296, %v8864_v8 }
0x1331   :  { %v8237_v62 = vmul.f32 %v18519_v14, %v8236_v60  ;;  %vm8239_vm1 = vweird.f32 %v18468_v29  ;;  %v8934_v17 = vadd.f32 0.00028619796, %v8933_v48  ;;  %v8950_v7 = vmul.f32 %v8949_v56, %v18487_v10  ;;  %v7740_v48 = vpop.f32.mrf.mxu0 }
0x1332   :  { %v12526_v30 = vclamps-f32 %v8328_v19, 1.0  ;;  %v8243_v37 = vand.u32 2147483647, %v18468_v29  ;;  %v8866_v50 = vmul.f32 %v8865_v51, %v18553_v39  ;;  %v18583_v5 = vmin.f32 %v8891_v11, 16.0 }
0x1333   :  { %v8261_v47 = vmul.f32 %v8260_v36, %v18381_v40  ;;  %14080 = vrcp.f32 %v18572_v3  ;;  %v8819_v28 = vmul.f32 %v8818_v46, %v18403_v35  ;;  %v18588_v2 = vadd.f32 1.0, %v8832_v41 }
0x1334   :  { %v9139_v20 = vadd.f32 1.0, %v12523_v15  ;;  %v8245_v58 = vand.u32 2147483648, %v18468_v29  ;;  %v8951_v42 = vadd.f32 0.4994258, %v8950_v7  ;;  %v8867_v25 = vadd.f32 0.014752088, %v8866_v50 }
0x1335   :  { %v8238_v49 = vadd.f32 %v18519_v14, %v8237_v62  ;;  %vm8240_vm2 = vweird.f32 %v18519_v14  ;;  %v8935_v44 = vmul.f32 %v8934_v17, %v18487_v10  ;;  %v8853_v57 = vmul.f32 2.1237322e-06, %v18553_v39 }
0x1336   :  { %v8952_v40 = vmul.f32 %v8951_v42, %v18487_v10  ;;  %v8868_v31 = vmul.f32 %v8867_v25, %v18553_v39  ;;  %v8904_v52 = vmul.f32 3.8918573e-05, %v18583_v5  ;;  %v19355_v27 = vperm.slane %v18080_v55, 4  ;;  %vm18605_vm3 = vmor %vm8239_vm1, %vm8240_vm2 }
0x1337   :  { %v9142_v38 = vadd.f32 1.0, %v12526_v30  ;;  %v8262_v33 = vadd.f32 1.1283791, %v8261_v47  ;;  %v8820_v60 = vadd.f32 0.18741608, %v8819_v28  ;;  %14082 = vrcp.f32 %v18588_v2 }
0x1338   :  { %v8223_v19 = vmul.f32 %v8222_v63, %v18284_v9  ;;  %vm8244_vm9 = vcmp.eq.f32.partialorder %v8243_v37, 8.507059e+37  ;;  %v8869_v8 = vadd.f32 0.112945676, %v8868_v31  ;;  %v8242_v46 = vsel %vm18605_vm3, %v18519_v14, %v8238_v49 }
0x1339   :  { %v18609_v11 = vpop.eup %14080  ;;  %v18614_v41 = vadd.f32 1.0, %v8952_v40  ;;  %v8854_v56 = vadd.f32 0.00028619796, %v8853_v57  ;;  %v8905_v15 = vadd.f32 0.001143296, %v8904_v52  ;;  %v18617_v9 = vmul.f32 %v9139_v20, %v18327_v45  ;;  %v18652_v57 = vld [vmem:[%s19316_s18 + $0x18] sm:$0xff] }
0x133a   :  { %v8246_v29 = vor.u32 1.1754944e-38, %v8245_v58  ;;  %v8936_v63 = vadd.f32 0.0036580483, %v8935_v44  ;;  %v18621_v51 = vadd.f32 %v7740_v48, %v19355_v27  ;;  %v18624_v62 = vmul.f32 %v9142_v38, %v18392_v16 }
0x133b   :  { %v18627_v17 = vmul.f32 %v8262_v33, %v18338_v26  ;;  %v8821_v14 = vmul.f32 %v8820_v60, %v18403_v35  ;;  %v8870_v7 = vmul.f32 %v8869_v8, %v18553_v39  ;;  %v8275_v45 = vmul.f32 %v18609_v11, %v18572_v3 }
0x133c   :  { %v8247_v30 = vsel %vm8244_vm9, %v8246_v29, %v8242_v46  ;;  %v8285_v37 = vand.u32 2147483648, %v18572_v3  ;;  %v8906_v50 = vmul.f32 %v8905_v15, %v18583_v5  ;;  %14084 = vrcp.f32 %v18614_v41 }
0x133d   :  { %v18635_v47 = vpop.eup %14082  ;;  %v8855_v16 = vmul.f32 %v8854_v56, %v18553_v39  ;;  %v8871_v26 = vadd.f32 0.4994258, %v8870_v7  ;;  %v8893_v28 = vmul.f32 2.1237322e-06, %v18583_v5  ;;  %v8283_v35 = vand.u32 2147483647, %v18572_v3 }
0x133e   :  { %v8937_v20 = vmul.f32 %v8936_v63, %v18487_v10  ;;  %v8907_v58 = vadd.f32 0.014752088, %v8906_v50  ;;  %v18643_v42 = vmul.f32 0.70710677, %v18621_v51  ;;  %v8822_v25 = vadd.f32 1.1283791, %v8821_v14 }
0x133f   :  { %v18646_v49 = vmul.f32 0.5, %v18500_v24  ;;  %v8872_v44 = vmul.f32 %v8871_v26, %v18553_v39  ;;  %v19354_v40 = vperm.slane %v18652_v57, 7  ;;  %v8248_v31 = vmul.f32 %v8247_v30, %v8223_v19  ;;  %v7782_v24 = vpop.f32.mrf.mxu1  ;;  %v7754_v30 = vpop.f32.mrf.mxu2 }
0x1340   :  { %v8835_v52 = vmul.f32 %v18635_v47, %v18588_v2  ;;  %v8908_v38 = vmul.f32 %v8907_v58, %v18583_v5  ;;  %v8331_v33 = vmul.f32 %v18643_v42, %v18643_v42  ;;  %v8276_v60 = vsub.f32 1.0, %v8275_v45 }
0x1341   :  { %v18660_v48 = vor.u32 1.1754944e-38, %v8285_v37  ;;  %v8856_v36 = vadd.f32 0.0036580483, %v8855_v16  ;;  %v8894_v8 = vadd.f32 0.00028619796, %v8893_v28  ;;  %v19353_v19 = vperm.slane %v18652_v57, 5 }
0x1342   :  { %v8938_v46 = vadd.f32 0.05243302, %v8937_v20  ;;  %v8909_v56 = vadd.f32 0.112945676, %v8908_v38  ;;  %v18662_v15 = vmin.f32 %v8331_v33, 16.0  ;;  %v18665_v29 = vpop.eup %14084  ;;  %vm8280_vm10 = vweird.f32 %v18609_v11 }
0x1343   :  { %v18668_v63 = vadd.f32 1.0, %v8872_v44  ;;  %v18671_v14 = vmul.f32 0.5, %v18532_v21  ;;  %v18675_v7 = vadd.f32 %v7782_v24, %v19354_v40  ;;  %v12524_v45 = vclamps-f32 %v8248_v31, 1.0 }
0x1344   :  { %v18678_v37 = vmul.f32 %v8822_v25, %v18373_v32  ;;  %v8836_v50 = vsub.f32 1.0, %v8835_v52  ;;  %v8843_v16 = vand.u32 2147483647, %v18588_v2  ;;  %v8277_v26 = vmul.f32 %v18609_v11, %v8276_v60 }
0x1345   :  { %vm8279_vm12 = vweird.f32 %v18572_v3  ;;  %v8857_v28 = vmul.f32 %v8856_v36, %v18553_v39  ;;  %v8895_v21 = vmul.f32 %v8894_v8, %v18583_v5  ;;  %v8910_v20 = vmul.f32 %v8909_v56, %v18583_v5 }
0x1346   :  { %v8939_v58 = vmul.f32 %v8938_v46, %v18487_v10  ;;  %v8955_v44 = vmul.f32 %v18665_v29, %v18614_v41  ;;  %v8344_v32 = vmul.f32 3.8918573e-05, %v18662_v15  ;;  %v18692_v25 = vadd.f32 %v7754_v30, %v19353_v19  ;;  %vm18736_vm7 = vmor %vm8279_vm12, %vm8280_vm10 }
0x1347   :  { %14086 = vrcp.f32 %v18668_v63  ;;  %v8911_v31 = vadd.f32 0.4994258, %v8910_v20  ;;  %v8333_v52 = vmul.f32 2.1237322e-06, %v18662_v15  ;;  %v18697_v38 = vmul.f32 0.70710677, %v18675_v7 }
0x1348   :  { %v8837_v33 = vmul.f32 %v18635_v47, %v8836_v50  ;;  %vm8839_vm13 = vweird.f32 %v18588_v2  ;;  %v8845_v24 = vand.u32 2147483648, %v18588_v2  ;;  %v8345_v60 = vadd.f32 0.001143296, %v8344_v32 }
0x1349   :  { %v8858_v36 = vadd.f32 0.05243302, %v8857_v28  ;;  %v8896_v8 = vadd.f32 0.0036580483, %v8895_v21  ;;  %v8912_v46 = vmul.f32 %v8911_v31, %v18583_v5  ;;  %v8451_v56 = vmul.f32 %v18697_v38, %v18697_v38 }
0x134a   :  { %v9140_v30 = vadd.f32 1.0, %v12524_v45  ;;  %vm18705_vm4 = vcmp.eq.f32.partialorder %v8283_v35, 8.507059e+37  ;;  %v8956_v19 = vsub.f32 1.0, %v8955_v44  ;;  %v8346_v50 = vmul.f32 %v8345_v60, %v18662_v15 }
0x134b   :  { %v18711_v40 = vmul.f32 0.70710677, %v18692_v25  ;;  %v8278_v32 = vadd.f32 %v18609_v11, %v8277_v26  ;;  %vm18714_vm5 = vcmp.eq.f32.partialorder %v8843_v16, 8.507059e+37  ;;  %v8940_v21 = vadd.f32 0.18741608, %v8939_v58 }
0x134c   :  { %v18718_v31 = vadd.f32 1.0, %v8912_v46  ;;  %v8334_v45 = vadd.f32 0.00028619796, %v8333_v52  ;;  %vm8840_vm6 = vweird.f32 %v18635_v47  ;;  %v8846_v35 = vor.u32 1.1754944e-38, %v8845_v24 }
0x134d   :  { %v8347_v27 = vadd.f32 0.014752088, %v8346_v50  ;;  %v18721_v44 = vmin.f32 %v8451_v56, 16.0  ;;  %v18723_v60 = vpop.eup %14086  ;;  %v8838_v43 = vadd.f32 %v18635_v47, %v8837_v33  ;;  %v8859_v26 = vmul.f32 %v8858_v36, %v18553_v39  ;;  %vm18754_vm8 = vmor %vm8839_vm13, %vm8840_vm6 }
0x134e   :  { %v8897_v16 = vmul.f32 %v8896_v8, %v18583_v5  ;;  %14088 = vrcp.f32 %v18718_v31  ;;  %v18730_v58 = vmul.f32 %v9140_v30, %v18448_v61  ;;  %v8957_v24 = vmul.f32 %v18665_v29, %v8956_v19 }
0x134f   :  { %v8348_v33 = vmul.f32 %v8347_v27, %v18662_v15  ;;  %v8371_v36 = vmul.f32 %v18711_v40, %v18711_v40  ;;  %v8282_v61 = vsel %vm18736_vm7, %v18609_v11, %v8278_v32  ;;  %v8941_v8 = vmul.f32 %v8940_v21, %v18487_v10 }
0x1350   :  { %v8335_v46 = vmul.f32 %v8334_v45, %v18662_v15  ;;  %v8464_v3 = vmul.f32 3.8918573e-05, %v18721_v44  ;;  %v8963_v27 = vand.u32 2147483647, %v18614_v41  ;;  %v8965_v56 = vand.u32 2147483648, %v18614_v41 }
0x1351   :  { %v8875_v11 = vmul.f32 %v18723_v60, %v18668_v63  ;;  %v8349_v10 = vadd.f32 0.112945676, %v8348_v33  ;;  %v8842_v30 = vsel %vm18754_vm8, %v18635_v47, %v8838_v43  ;;  %v8860_v50 = vadd.f32 0.18741608, %v8859_v26 }
0x1352   :  { %v8898_v32 = vadd.f32 0.05243302, %v8897_v16  ;;  %v8465_v21 = vadd.f32 0.001143296, %v8464_v3  ;;  %v8958_v2 = vadd.f32 %v18665_v29, %v8957_v24  ;;  %vm8960_vm11 = vweird.f32 %v18665_v29  ;;  %v13578_v24 = vld [vmem:[#allocation26 + $0x630] sm:$0xff]  ;;  %v13601_v3 = vld [vmem:[#allocation26 + $0x6e8] sm:$0xff] }
0x1353   :  { %v8350_v45 = vmul.f32 %v8349_v10, %v18662_v15  ;;  %v18768_v52 = vmin.f32 %v8371_v36, 16.0  ;;  %v8287_v33 = vsel %vm18705_vm4, %v18660_v48, %v8282_v61  ;;  %v8942_v59 = vadd.f32 1.1283791, %v8941_v8  ;;  %v13602_v36 = vld [vmem:[#allocation26 + $0x6f0] sm:$0xff]  ;;  %10346 = vmatpush.bf16.msra.mxu0 %v13578_v24  ;;  %v7768_v24 = vpop.f32.mrf.mxu3 }
0x1354   :  { %v18770_v0 = vpop.eup %14088  ;;  %v8336_v19 = vadd.f32 0.0036580483, %v8335_v46  ;;  %v8466_v43 = vmul.f32 %v8465_v21, %v18721_v44  ;;  %v8847_v47 = vsel %vm18714_vm5, %v8846_v35, %v8842_v30  ;;  %vm8959_vm14 = vweird.f32 %v18614_v41  ;;  %10385 = vmatpush.bf16.msrb.mxu1 %v13602_v36 }
0x1355   :  { %v8876_v26 = vsub.f32 1.0, %v8875_v11  ;;  %v8453_v16 = vmul.f32 2.1237322e-06, %v18721_v44  ;;  %vm18780_vm15 = vmor %vm8959_vm14, %vm8960_vm11  ;;  %vm18784_vm1 = vcmp.eq.f32.partialorder %v8963_v27, 8.507059e+37  ;;  %v8861_v20 = vmul.f32 %v8860_v50, %v18553_v39  ;;  %v13548_v27 = vld [vmem:[#allocation26 + $0x540] sm:$0xff] }
0x1356   :  { %v8899_v28 = vmul.f32 %v8898_v32, %v18583_v5  ;;  %v8351_v35 = vadd.f32 0.4994258, %v8350_v45  ;;  %v8962_v41 = vsel %vm18780_vm15, %v18665_v29, %v8958_v2  ;;  %v8966_v61 = vor.u32 1.1754944e-38, %v8965_v56  ;;  %v13556_v50 = vld [vmem:[#allocation26 + $0x580] sm:$0xff]  ;;  %v13587_v32 = vld [vmem:[#allocation26 + $0x678] sm:$0xff]  ;;  %10313 = vmatpush.bf16.msrb.mxu2 %v13548_v27 }
0x1357   :  { %v8915_v8 = vmul.f32 %v18770_v0, %v18718_v31  ;;  %v8384_v46 = vmul.f32 3.8918573e-05, %v18768_v52  ;;  %v18797_v11 = vmul.f32 %v8287_v33, %v18627_v17  ;;  %v8337_v39 = vmul.f32 %v8336_v19, %v18662_v15  ;;  %v13595_v29 = vld [vmem:[#allocation26 + $0x6b8] sm:$0xff]  ;;  %10326 = vmatpush.bf16.msra.mxu3 %v13556_v50 }
0x1358   :  { %v8467_v10 = vadd.f32 0.014752088, %v8466_v43  ;;  %v6905_v30 = vperm.slane %v18652_v57, 6  ;;  %v18802_v56 = vmul.f32 %v8847_v47, %v18678_v37  ;;  %v8877_v21 = vmul.f32 %v18723_v60, %v8876_v26  ;;  %10386 = vmatpush.bf16.msrb.mxu1 %v13601_v3 }
0x1359   :  { %v8454_v2 = vadd.f32 0.00028619796, %v8453_v16  ;;  %v8385_v45 = vadd.f32 0.001143296, %v8384_v46  ;;  %v8967_v17 = vsel %vm18784_vm1, %v8966_v61, %v8962_v41  ;;  %v8862_v33 = vadd.f32 1.1283791, %v8861_v20 }
0x135a   :  { %v8900_v19 = vadd.f32 0.18741608, %v8899_v28  ;;  %v8352_v43 = vmul.f32 %v8351_v35, %v18662_v15  ;;  %10358 = vmatpush.bf16.msra.mxu2 %v13587_v32  ;;  %v8943_v36 = vmul.f32 %v8942_v59, %v18451_v6  ;;  %v8883_v37 = vand.u32 2147483647, %v18668_v63  ;;  %v13577_v16 = vld [vmem:[#allocation26 + $0x628] sm:$0xff] }
0x135b   :  { %v8885_v47 = vand.u32 2147483648, %v18668_v63  ;;  %v8916_v26 = vsub.f32 1.0, %v8915_v8  ;;  %10371 = vmatpush.bf16.msrb.mxu3 %v13595_v29  ;;  %v8338_v46 = vadd.f32 0.05243302, %v8337_v39  ;;  %v8468_v48 = vmul.f32 %v8467_v10, %v18721_v44  ;;  %10347 = vmatpush.bf16.msra.mxu0 %v13577_v16 }
0x135c   :  { %v8386_v20 = vmul.f32 %v8385_v45, %v18768_v52  ;;  %v18815_v28 = vadd.f32 %v7768_v24, %v6905_v30  ;;  %v19585_v59 = vpack.c.bf16 %v18474_v12, %v18334_v4  ;;  %v8968_v6 = vmul.f32 %v8967_v17, %v8943_v36  ;;  %v7742_v24 = vpop.f32.mrf.mxu0 }
0x135d   :  { %v8878_v35 = vadd.f32 %v18723_v60, %v8877_v21  ;;  %vm8880_vm2 = vweird.f32 %v18723_v60  ;;  %v8455_v41 = vmul.f32 %v8454_v2, %v18721_v44  ;;  %v12539_v61 = vclamps-f32 %v18802_v56, 1.0 }
0x135e   :  { %10314 = vmatmul.bf16.vlgmr.msrb.gmra.mxu2 %v19585_v59  ;;  %v8863_v8 = vmul.f32 %v8862_v33, %v18528_v1  ;;  %vm8879_vm3 = vweird.f32 %v18668_v63  ;;  %v18826_v27 = vadd.f32 1.0, %v8352_v43  ;;  %v19586_v4 = vpack.c.bf16 %v18576_v23, %v18395_v18 }
0x135f   :  { %vm18831_vm9 = vcmp.eq.f32.partialorder %v8883_v37, 8.507059e+37  ;;  %v8901_v39 = vmul.f32 %v8900_v19, %v18583_v5  ;;  %v8917_v10 = vmul.f32 %v18770_v0, %v8916_v26  ;;  %v8373_v50 = vmul.f32 2.1237322e-06, %v18768_v52  ;;  %vm18838_vm10 = vmor %vm8879_vm3, %vm8880_vm2 }
0x1360   :  { %10327 = vmatmul.bf16.vlgmr.msra.gmra.mxu3 %v19586_v4  ;;  %v8339_v63 = vmul.f32 %v8338_v46, %v18662_v15  ;;  %v8469_v32 = vadd.f32 0.112945676, %v8468_v48  ;;  %v8387_v29 = vadd.f32 0.014752088, %v8386_v20  ;;  %v18844_v18 = vmul.f32 0.70710677, %v18815_v28  ;;  %v7784_v48 = vpop.f32.mrf.mxu1 }
0x1361   :  { %v12542_v23 = vclamps-f32 %v8968_v6, 1.0  ;;  %v8882_v5 = vsel %vm18838_vm10, %v18723_v60, %v8878_v35  ;;  %v8886_v56 = vor.u32 1.1754944e-38, %v8885_v47  ;;  %v8456_v21 = vadd.f32 0.0036580483, %v8455_v41  ;;  %v7756_v41 = vpop.f32.mrf.mxu2 }
0x1362   :  { %vm8919_vm12 = vweird.f32 %v18718_v31  ;;  %14090 = vrcp.f32 %v18826_v27  ;;  %v8388_v2 = vmul.f32 %v8387_v29, %v18768_v52  ;;  %v8411_v45 = vmul.f32 %v18844_v18, %v18844_v18 }
0x1363   :  { %v8918_v17 = vadd.f32 %v18770_v0, %v8917_v10  ;;  %vm8920_vm13 = vweird.f32 %v18770_v0  ;;  %v8923_v33 = vand.u32 2147483647, %v18718_v31  ;;  %v8374_v19 = vadd.f32 0.00028619796, %v8373_v50 }
0x1364   :  { %v8887_v60 = vsel %vm18831_vm9, %v8886_v56, %v8882_v5  ;;  %v8925_v43 = vand.u32 2147483648, %v18718_v31  ;;  %v8340_v36 = vadd.f32 0.18741608, %v8339_v63  ;;  %v8470_v37 = vmul.f32 %v8469_v32, %v18721_v44  ;;  %vm18873_vm4 = vmor %vm8919_vm12, %vm8920_vm13  ;;  %v13586_v5 = vld [vmem:[#allocation26 + $0x670] sm:$0xff] }
0x1365   :  { %v8457_v47 = vmul.f32 %v8456_v21, %v18721_v44  ;;  %v8389_v26 = vadd.f32 0.112945676, %v8388_v2  ;;  %v18862_v16 = vmin.f32 %v8411_v45, 16.0  ;;  %v19591_v3 = vperm.slane %v18080_v55, 4  ;;  %10359 = vmatpush.bf16.msra.mxu2 %v13586_v5 }
0x1366   :  { %v12525_v20 = vclamps-f32 %v18797_v11, 1.0  ;;  %v9155_v59 = vadd.f32 1.0, %v12539_v61  ;;  %v9158_v6 = vadd.f32 1.0, %v12542_v23  ;;  %v8902_v35 = vadd.f32 1.1283791, %v8901_v39 }
0x1367   :  { %v18866_v46 = vadd.f32 %v7742_v24, %v19591_v3  ;;  %v8888_v4 = vmul.f32 %v8887_v60, %v8863_v8  ;;  %v8922_v55 = vsel %vm18873_vm4, %v18770_v0, %v8918_v17  ;;  %vm8924_vm5 = vcmp.eq.f32.partialorder %v8923_v33, 8.507059e+37  ;;  %v13594_v24 = vld [vmem:[#allocation26 + $0x6b0] sm:$0xff]  ;;  %v13600_v60 = vld [vmem:[#allocation26 + $0x6e0] sm:$0xff] }
0x1368   :  { %v8375_v12 = vmul.f32 %v8374_v19, %v18768_v52  ;;  %v18881_v11 = vpop.eup %14090  ;;  %v8926_v61 = vor.u32 1.1754944e-38, %v8925_v43  ;;  %v8341_v39 = vmul.f32 %v8340_v36, %v18662_v15  ;;  %v8471_v10 = vadd.f32 0.4994258, %v8470_v37  ;;  %10372 = vmatpush.bf16.msrb.mxu3 %v13594_v24  ;;  %10387 = vmatpush.bf16.msrb.mxu1 %v13600_v60  ;;  %v13592_v24 = vld [vmem:[#allocation26 + $0x6a0] sm:$0xff]  ;;  %v13574_v60 = vld [vmem:[#allocation26 + $0x610] sm:$0xff] }
0x1369   :  { %v19594_v31 = vperm.slane %v18652_v57, 7  ;;  %v8458_v1 = vadd.f32 0.05243302, %v8457_v47  ;;  %v8390_v8 = vmul.f32 %v8389_v26, %v18768_v52  ;;  %v8424_v63 = vmul.f32 3.8918573e-05, %v18862_v16 }
0x136a   :  { %v18891_v0 = vmul.f32 0.70710677, %v18866_v46  ;;  %v9141_v32 = vadd.f32 1.0, %v12525_v20  ;;  %v18894_v29 = vmul.f32 %v9155_v59, %v18461_v54  ;;  %v8903_v23 = vmul.f32 %v8902_v35, %v18549_v13  ;;  %v13576_v13 = vld [vmem:[#allocation26 + $0x620] sm:$0xff] }
0x136b   :  { %v18886_v50 = vadd.f32 %v7784_v48, %v19594_v31  ;;  %v8927_v15 = vsel %vm8924_vm5, %v8926_v61, %v8922_v55  ;;  %v12540_v56 = vclamps-f32 %v8888_v4, 1.0  ;;  %v8355_v21 = vmul.f32 %v18881_v11, %v18826_v27  ;;  %10348 = vmatpush.bf16.msra.mxu0 %v13576_v13  ;;  %v13593_v4 = vld [vmem:[#allocation26 + $0x6a8] sm:$0xff]  ;;  %v13575_v61 = vld [vmem:[#allocation26 + $0x618] sm:$0xff] }
0x136c   :  { %v8376_v2 = vadd.f32 0.0036580483, %v8375_v12  ;;  %v8971_v45 = vmul.f32 %v18891_v0, %v18891_v0  ;;  %v18902_v17 = vmul.f32 %v9158_v6, %v18559_v34  ;;  %v8342_v33 = vadd.f32 1.1283791, %v8341_v39  ;;  %v13599_v39 = vld [vmem:[#allocation26 + $0x6d8] sm:$0xff]  ;;  %10373 = vmatpush.bf16.msrb.mxu3 %v13593_v4 }
0x136d   :  { %v8472_v54 = vmul.f32 %v8471_v10, %v18721_v44  ;;  %v18906_v19 = vmul.f32 0.70710677, %v18886_v50  ;;  %v8928_v43 = vmul.f32 %v8927_v15, %v8903_v23  ;;  %v8459_v36 = vmul.f32 %v8458_v1, %v18721_v44  ;;  %10388 = vmatpush.bf16.msrb.mxu1 %v13599_v39  ;;  %v13591_v4 = vld [vmem:[#allocation26 + $0x698] sm:$0xff] }
0x136e   :  { %v8391_v37 = vadd.f32 0.4994258, %v8390_v8  ;;  %v8425_v47 = vadd.f32 0.001143296, %v8424_v63  ;;  %v18910_v26 = vmul.f32 %v9141_v32, %v18471_v53  ;;  %v18913_v34 = vmul.f32 0.5, %v18621_v51  ;;  %v13585_v53 = vld [vmem:[#allocation26 + $0x668] sm:$0xff] }
0x136f   :  { %v18916_v3 = vmul.f32 0.5, %v18675_v7  ;;  %v18918_v48 = vmin.f32 %v8971_v45, 16.0  ;;  %v9203_v20 = vpack.c.bf16 %v18894_v29, %v18617_v9  ;;  %v9156_v59 = vadd.f32 1.0, %v12540_v56  ;;  %10360 = vmatpush.bf16.msra.mxu2 %v13585_v53  ;;  %10349 = vmatpush.bf16.msra.mxu0 %v13575_v61  ;;  %v13584_v45 = vld [vmem:[#allocation26 + $0x660] sm:$0xff]  ;;  %v13583_v53 = vld [vmem:[#allocation26 + $0x658] sm:$0xff] }
0x1370   :  { %v8356_v6 = vsub.f32 1.0, %v8355_v21  ;;  %v8377_v35 = vmul.f32 %v8376_v2, %v18768_v52  ;;  %v9206_v51 = vpack.c.bf16 %v18902_v17, %v18624_v62  ;;  %v18926_v7 = vmul.f32 %v8342_v33, %v18643_v42  ;;  %10374 = vmatpush.bf16.msrb.mxu3 %v13592_v24  ;;  %v13590_v24 = vld [vmem:[#allocation26 + $0x690] sm:$0xff]  ;;  %v13588_v9 = vld [vmem:[#allocation26 + $0x680] sm:$0xff]  ;;  %v13619_v62 = vld [vmem:[#allocation26 + $0x778] sm:$0xff] }
0x1371   :  { %v18928_v55 = vadd.f32 1.0, %v8472_v54  ;;  %v9091_v12 = vmul.f32 %v18906_v19, %v18906_v19  ;;  %v12541_v10 = vclamps-f32 %v8928_v43, 1.0  ;;  %v8460_v31 = vadd.f32 0.18741608, %v8459_v36  ;;  %v13627_v17 = vld [vmem:[#allocation26 + $0x7b8] sm:$0xff] }
0x1372   :  { %v8392_v1 = vmul.f32 %v8391_v37, %v18768_v52  ;;  %v8426_v8 = vmul.f32 %v8425_v47, %v18862_v16  ;;  %v8363_v63 = vand.u32 2147483647, %v18826_v27  ;;  %v8973_v42 = vmul.f32 2.1237322e-06, %v18918_v48  ;;  %v13598_v47 = vld [vmem:[#allocation26 + $0x6d0] sm:$0xff] }
0x1373   :  { %v8984_v32 = vmul.f32 3.8918573e-05, %v18918_v48  ;;  %v19595_v23 = vperm.slane %v18652_v57, 5  ;;  %v18942_v5 = vmul.f32 %v9156_v59, %v18646_v49  ;;  %v8357_v56 = vmul.f32 %v18881_v11, %v8356_v6  ;;  %10361 = vmatpush.bf16.msra.mxu2 %v13584_v45  ;;  %10350 = vmatpush.bf16.msra.mxu0 %v13574_v60  ;;  %v13582_v45 = vld [vmem:[#allocation26 + $0x650] sm:$0xff] }
0x1374   :  { %v8378_v21 = vadd.f32 0.05243302, %v8377_v35  ;;  %v8413_v2 = vmul.f32 2.1237322e-06, %v18862_v16  ;;  %14092 = vrcp.f32 %v18928_v55  ;;  %v8974_v33 = vadd.f32 0.00028619796, %v8973_v42  ;;  %10389 = vmatpush.bf16.msrb.mxu1 %v13598_v47  ;;  %10375 = vmatpush.bf16.msrb.mxu3 %v13591_v4 }
0x1375   :  { %v18939_v15 = vadd.f32 %v7756_v41, %v19595_v23  ;;  %v8985_v54 = vadd.f32 0.001143296, %v8984_v32  ;;  %v18947_v13 = vmin.f32 %v9091_v12, 16.0  ;;  %v9157_v43 = vadd.f32 1.0, %v12541_v10  ;;  %v13573_v23 = vld [vmem:[#allocation26 + $0x608] sm:$0xff]  ;;  %v13572_v4 = vld [vmem:[#allocation26 + $0x600] sm:$0xff] }
0x1376   :  { %v8461_v36 = vmul.f32 %v8460_v31, %v18721_v44  ;;  %v18950_v37 = vadd.f32 1.0, %v8392_v1  ;;  %v8427_v49 = vadd.f32 0.014752088, %v8426_v8  ;;  %v8975_v59 = vmul.f32 %v8974_v33, %v18918_v48 }
0x1377   :  { %v8986_v6 = vmul.f32 %v8985_v54, %v18918_v48  ;;  %v9093_v35 = vmul.f32 2.1237322e-06, %v18947_v13  ;;  %v18956_v41 = vmul.f32 0.70710677, %v18939_v15  ;;  %v8358_v44 = vadd.f32 %v18881_v11, %v8357_v56  ;;  %10362 = vmatpush.bf16.msra.mxu2 %v13583_v53  ;;  %v13597_v56 = vld [vmem:[#allocation26 + $0x6c8] sm:$0xff]  ;;  %10351 = vmatpush.bf16.msra.mxu0 %v13573_v23  ;;  %v13635_v23 = vld [vmem:[#allocation26 + $0x7f8] sm:$0xff] }
0x1378   :  { %vm8360_vm6 = vweird.f32 %v18881_v11  ;;  %v8365_v12 = vand.u32 2147483648, %v18826_v27  ;;  %v8414_v61 = vadd.f32 0.00028619796, %v8413_v2  ;;  %vm8359_vm7 = vweird.f32 %v18826_v27  ;;  %10390 = vmatpush.bf16.msrb.mxu1 %v13597_v56  ;;  %10376 = vmatpush.bf16.msrb.mxu3 %v13590_v24  ;;  %v13581_v56 = vld [vmem:[#allocation26 + $0x648] sm:$0xff] }
0x1379   :  { %vm18962_vm8 = vcmp.eq.f32.partialorder %v8363_v63, 8.507059e+37  ;;  %v8976_v10 = vadd.f32 0.0036580483, %v8975_v59  ;;  %v8987_v31 = vadd.f32 0.014752088, %v8986_v6  ;;  %v18967_v1 = vmul.f32 %v9157_v43, %v18671_v14  ;;  %vm18974_vm11 = vmor %vm8359_vm7, %vm8360_vm6 }
0x137a   :  { %v8462_v8 = vadd.f32 1.1283791, %v8461_v36  ;;  %v8379_v42 = vmul.f32 %v8378_v21, %v18768_v52  ;;  %v9094_v32 = vadd.f32 0.00028619796, %v9093_v35  ;;  %v18970_v2 = vpop.eup %14092  ;;  %14094 = vrcp.f32 %v18950_v37 }
0x137b   :  { %v8428_v14 = vmul.f32 %v8427_v49, %v18862_v16  ;;  %v8988_v63 = vmul.f32 %v8987_v31, %v18918_v48  ;;  %v9011_v21 = vmul.f32 %v18956_v41, %v18956_v41  ;;  %v8362_v33 = vsel %vm18974_vm11, %v18881_v11, %v8358_v44  ;;  %10363 = vmatpush.bf16.msra.mxu2 %v13582_v45  ;;  %v13596_v44 = vld [vmem:[#allocation26 + $0x6c0] sm:$0xff] }
0x137c   :  { %v8366_v54 = vor.u32 1.1754944e-38, %v8365_v12  ;;  %v8415_v60 = vmul.f32 %v8414_v61, %v18862_v16  ;;  %v8977_v43 = vmul.f32 %v8976_v10, %v18918_v48  ;;  %v8485_v36 = vand.u32 2147483648, %v18928_v55  ;;  %v13611_v12 = vld [vmem:[#allocation26 + $0x738] sm:$0xff]  ;;  %10352 = vmatpush.bf16.msra.mxu0 %v13572_v4  ;;  %10391 = vmatpush.bf16.msrb.mxu1 %v13596_v44  ;;  %v13634_v44 = vld [vmem:[#allocation26 + $0x7f0] sm:$0xff] }
0x137d   :  { %v8989_v49 = vadd.f32 0.112945676, %v8988_v63  ;;  %v9095_v47 = vmul.f32 %v9094_v32, %v18947_v13  ;;  %v9104_v59 = vmul.f32 3.8918573e-05, %v18947_v13  ;;  %v9204_v6 = vpack.c.bf16 %v18942_v5, %v18730_v58 }
0x137e   :  { %v8475_v11 = vmul.f32 %v18970_v2, %v18928_v55  ;;  %v8380_v35 = vadd.f32 0.18741608, %v8379_v42  ;;  %v18996_v53 = vmul.f32 0.5, %v18866_v46  ;;  %v8367_v61 = vsel %vm18962_vm8, %v8366_v54, %v8362_v33  ;;  %v13589_v42 = vld [vmem:[#allocation26 + $0x688] sm:$0xff] }
0x137f   :  { %v19001_v10 = vmul.f32 %v8462_v8, %v18697_v38  ;;  %v8429_v31 = vadd.f32 0.112945676, %v8428_v14  ;;  %v19003_v32 = vmin.f32 %v9011_v21, 16.0  ;;  %v8483_v46 = vand.u32 2147483647, %v18928_v55  ;;  %10364 = vmatpush.bf16.msra.mxu2 %v13581_v56  ;;  %10377 = vmatpush.bf16.msrb.mxu3 %v13589_v42 }
0x1380   :  { %v8416_v27 = vadd.f32 0.0036580483, %v8415_v60  ;;  %v8978_v63 = vadd.f32 0.05243302, %v8977_v43  ;;  %v8990_v45 = vmul.f32 %v8989_v49, %v18918_v48  ;;  %v19007_v24 = vpop.eup %14094  ;;  %v9205_v39 = vpack.c.bf16 %v18967_v1, %v18910_v26  ;;  %10397 = vmatpush.bf16.msrb.mxu0 %v13611_v12  ;;  %10436 = vmatpush.bf16.msra.mxu1 %v13635_v23  ;;  %v13580_v12 = vld [vmem:[#allocation26 + $0x640] sm:$0xff]  ;;  %v13617_v1 = vld [vmem:[#allocation26 + $0x768] sm:$0xff] }
0x1381   :  { %v19011_v38 = vor.u32 1.1754944e-38, %v8485_v36  ;;  %v9096_v8 = vadd.f32 0.0036580483, %v9095_v47  ;;  %v9105_v14 = vadd.f32 0.001143296, %v9104_v59  ;;  %v19014_v21 = vmul.f32 %v8367_v61, %v18926_v7  ;;  %v7770_v59 = vpop.f32.mrf.mxu3  ;;  %10353 = vmatmul.bf16.vlgmr.msra.gmra.mxu0 %v9203_v20  ;;  %v13610_v7 = vld [vmem:[#allocation26 + $0x730] sm:$0xff]  ;;  %10392 = vmatmul.bf16.vlgmr.msrb.gmra.mxu1 %v9206_v51 }
0x1382   :  { %v8476_v33 = vsub.f32 1.0, %v8475_v11  ;;  %v8381_v54 = vmul.f32 %v8380_v35, %v18768_v52  ;;  %v8991_v60 = vadd.f32 0.4994258, %v8990_v45  ;;  %v8430_v43 = vmul.f32 %v8429_v31, %v18862_v16  ;;  %v13609_v51 = vld [vmem:[#allocation26 + $0x728] sm:$0xff] }
0x1383   :  { %v9106_v49 = vmul.f32 %v9105_v14, %v18947_v13  ;;  %v9013_v36 = vmul.f32 2.1237322e-06, %v19003_v32  ;;  %v9024_v47 = vmul.f32 3.8918573e-05, %v19003_v32  ;;  %vm8479_vm14 = vweird.f32 %v18928_v55  ;;  %10365 = vmatpush.bf16.msra.mxu2 %v13580_v12  ;;  %10378 = vmatpush.bf16.msrb.mxu3 %v13588_v9 }
0x1384   :  { %v8395_v52 = vmul.f32 %v19007_v24, %v18950_v37  ;;  %v8417_v11 = vmul.f32 %v8416_v27, %v18862_v16  ;;  %v8979_v35 = vmul.f32 %v8978_v63, %v18918_v48  ;;  %v8992_v4 = vmul.f32 %v8991_v60, %v18918_v48  ;;  %10398 = vmatpush.bf16.msrb.mxu0 %v13610_v7  ;;  %v13626_v60 = vld [vmem:[#allocation26 + $0x7b0] sm:$0xff] }
0x1385   :  { %v9097_v29 = vmul.f32 %v9096_v8, %v18947_v13  ;;  %v9107_v20 = vadd.f32 0.014752088, %v9106_v49  ;;  %v9014_v61 = vadd.f32 0.00028619796, %v9013_v36  ;;  %v9025_v31 = vadd.f32 0.001143296, %v9024_v47  ;;  %10437 = vmatpush.bf16.msra.mxu1 %v13634_v44 }
0x1386   :  { %v8477_v23 = vmul.f32 %v18970_v2, %v8476_v33  ;;  %v8382_v56 = vadd.f32 1.1283791, %v8381_v54  ;;  %v19036_v42 = vmul.f32 0.5, %v18886_v50  ;;  %v19040_v27 = vadd.f32 %v7770_v59, %v6905_v30  ;;  %v13633_v33 = vld [vmem:[#allocation26 + $0x7e8] sm:$0xff]  ;;  %v13618_v54 = vld [vmem:[#allocation26 + $0x770] sm:$0xff]  ;;  %10366 = vmatmul.bf16.vlgmr.msra.gmra.mxu2 %v9204_v6  ;;  %10379 = vmatmul.bf16.vlgmr.msrb.gmra.mxu3 %v9205_v39 }
0x1387   :  { %v8431_v63 = vadd.f32 0.4994258, %v8430_v43  ;;  %v19042_v45 = vadd.f32 1.0, %v8992_v4  ;;  %v9108_v8 = vmul.f32 %v9107_v20, %v18947_v13  ;;  %v9015_v14 = vmul.f32 %v9014_v61, %v19003_v32  ;;  %10410 = vmatpush.bf16.msrb.mxu2 %v13619_v62  ;;  %10423 = vmatpush.bf16.msra.mxu3 %v13627_v17  ;;  %v13625_v39 = vld [vmem:[#allocation26 + $0x7a8] sm:$0xff]  ;;  %v13631_v62 = vld [vmem:[#allocation26 + $0x7d8] sm:$0xff] }
0x1388   :  { %vm8480_vm15 = vweird.f32 %v18970_v2  ;;  %v8396_v50 = vsub.f32 1.0, %v8395_v52  ;;  %v8980_v57 = vadd.f32 0.18741608, %v8979_v35  ;;  %v9026_v30 = vmul.f32 %v9025_v31, %v19003_v32  ;;  %10399 = vmatpush.bf16.msrb.mxu0 %v13609_v51 }
0x1389   :  { %v12527_v43 = vclamps-f32 %v19014_v21, 1.0  ;;  %vm19051_vm1 = vcmp.eq.f32.partialorder %v8483_v46, 8.507059e+37  ;;  %v8418_v36 = vadd.f32 0.05243302, %v8417_v11  ;;  %14096 = vrcp.f32 %v19042_v45  ;;  %10438 = vmatpush.bf16.msra.mxu1 %v13633_v33  ;;  %v13608_v46 = vld [vmem:[#allocation26 + $0x720] sm:$0xff]  ;;  %vm19080_vm3 = vmor %vm8479_vm14, %vm8480_vm15 }
0x138a   :  { %v9098_v47 = vadd.f32 0.05243302, %v9097_v29  ;;  %v8478_v59 = vadd.f32 %v18970_v2, %v8477_v23  ;;  %v19061_v7 = vmul.f32 %v8382_v56, %v18711_v40  ;;  %v9109_v21 = vadd.f32 0.112945676, %v9108_v8  ;;  %v13632_v11 = vld [vmem:[#allocation26 + $0x7e0] sm:$0xff]  ;;  %v13607_v56 = vld [vmem:[#allocation26 + $0x718] sm:$0xff] }
0x138b   :  { %v9016_v52 = vadd.f32 0.0036580483, %v9015_v14  ;;  %vm8399_vm2 = vweird.f32 %v18950_v37  ;;  %v8403_v35 = vand.u32 2147483647, %v18950_v37  ;;  %v8432_v58 = vmul.f32 %v8431_v63, %v18862_v16  ;;  %10411 = vmatpush.bf16.msrb.mxu2 %v13618_v54  ;;  %10424 = vmatpush.bf16.msra.mxu3 %v13626_v60 }
0x138c   :  { %v9027_v5 = vadd.f32 0.014752088, %v9026_v30  ;;  %v19070_v6 = vmul.f32 0.70710677, %v19040_v27  ;;  %v8397_v40 = vmul.f32 %v19007_v24, %v8396_v50  ;;  %v8405_v4 = vand.u32 2147483648, %v18950_v37  ;;  %10400 = vmatpush.bf16.msrb.mxu0 %v13608_v46  ;;  %v13624_v30 = vld [vmem:[#allocation26 + $0x7a0] sm:$0xff] }
0x138d   :  { %v8981_v44 = vmul.f32 %v8980_v57, %v18918_v48  ;;  %v9110_v26 = vmul.f32 %v9109_v21, %v18947_v13  ;;  %v9099_v9 = vmul.f32 %v9098_v47, %v18947_v13  ;;  %v9017_v29 = vmul.f32 %v9016_v52, %v19003_v32  ;;  %10439 = vmatpush.bf16.msra.mxu1 %v13632_v11  ;;  %v13616_v57 = vld [vmem:[#allocation26 + $0x760] sm:$0xff]  ;;  %v13606_v46 = vld [vmem:[#allocation26 + $0x710] sm:$0xff]  ;;  %v13613_v37 = vld [vmem:[#allocation26 + $0x748] sm:$0xff] }
0x138e   :  { %v9028_v48 = vmul.f32 %v9027_v5, %v19003_v32  ;;  %v9051_v20 = vmul.f32 %v19070_v6, %v19070_v6  ;;  %v19089_v61 = vadd.f32 1.0, %v12527_v43  ;;  %v8482_v55 = vsel %vm19080_vm3, %v18970_v2, %v8478_v59  ;;  %v13630_v11 = vld [vmem:[#allocation26 + $0x7d0] sm:$0xff] }
0x138f   :  { %v8419_v31 = vmul.f32 %v8418_v36, %v18862_v16  ;;  %v9111_v23 = vadd.f32 0.4994258, %v9110_v26  ;;  %v19095_v17 = vpop.eup %14096  ;;  %vm8400_vm9 = vweird.f32 %v19007_v24  ;;  %v19098_v51 = vadd.f32 1.0, %v8432_v58  ;;  %10412 = vmatpush.bf16.msrb.mxu2 %v13617_v1  ;;  %10425 = vmatpush.bf16.msra.mxu3 %v13625_v39  ;;  %v13615_v26 = vld [vmem:[#allocation26 + $0x758] sm:$0xff] }
0x1390   :  { %v9029_v63 = vadd.f32 0.112945676, %v9028_v48  ;;  %v19100_v8 = vmin.f32 %v9051_v20, 16.0  ;;  %v19103_v14 = vadd.f32 %v19007_v24, %v8397_v40  ;;  %v8982_v33 = vadd.f32 1.1283791, %v8981_v44  ;;  %10401 = vmatpush.bf16.msrb.mxu0 %v13607_v56  ;;  %vm19123_vm10 = vmor %vm8399_vm2, %vm8400_vm9  ;;  %v13623_v1 = vld [vmem:[#allocation26 + $0x798] sm:$0xff] }
0x1391   :  { %v8995_v2 = vmul.f32 %v19095_v17, %v19042_v45  ;;  %v9112_v50 = vmul.f32 %v9111_v23, %v18947_v13  ;;  %v9100_v54 = vadd.f32 0.18741608, %v9099_v9  ;;  %v9018_v60 = vadd.f32 0.05243302, %v9017_v29  ;;  %10440 = vmatpush.bf16.msra.mxu1 %v13631_v62  ;;  %v13605_v23 = vld [vmem:[#allocation26 + $0x708] sm:$0xff] }
0x1392   :  { %v9030_v43 = vmul.f32 %v9029_v63, %v19003_v32  ;;  %v9053_v36 = vmul.f32 2.1237322e-06, %v19100_v8  ;;  %v8487_v47 = vsel %vm19051_vm1, %v19011_v38, %v8482_v55  ;;  %v9064_v52 = vmul.f32 3.8918573e-05, %v19100_v8  ;;  %v13629_v56 = vld [vmem:[#allocation26 + $0x7c8] sm:$0xff] }
0x1393   :  { %v8996_v59 = vsub.f32 1.0, %v8995_v2  ;;  %v19113_v21 = vadd.f32 1.0, %v9112_v50  ;;  %14098 = vrcp.f32 %v19098_v51  ;;  %v9003_v58 = vand.u32 2147483647, %v19042_v45  ;;  %10413 = vmatpush.bf16.msrb.mxu2 %v13616_v57  ;;  %10426 = vmatpush.bf16.msra.mxu3 %v13624_v30  ;;  %v13622_v2 = vld [vmem:[#allocation26 + $0x790] sm:$0xff] }
0x1394   :  { %v9005_v5 = vand.u32 2147483648, %v19042_v45  ;;  %v9031_v40 = vadd.f32 0.4994258, %v9030_v43  ;;  %vm9000_vm12 = vweird.f32 %v19095_v17  ;;  %v9054_v44 = vadd.f32 0.00028619796, %v9053_v36  ;;  %10402 = vmatpush.bf16.msrb.mxu0 %v13606_v46  ;;  %v13604_v36 = vld [vmem:[#allocation26 + $0x700] sm:$0xff] }
0x1395   :  { %v8997_v49 = vmul.f32 %v19095_v17, %v8996_v59  ;;  %14100 = vrcp.f32 %v19113_v21  ;;  %v8488_v39 = vmul.f32 %v8487_v47, %v19001_v10  ;;  %v8402_v12 = vsel %vm19123_vm10, %v19007_v24, %v19103_v14  ;;  %10441 = vmatpush.bf16.msra.mxu1 %v13630_v11  ;;  %v13628_v47 = vld [vmem:[#allocation26 + $0x7c0] sm:$0xff] }
0x1396   :  { %v8420_v9 = vadd.f32 0.18741608, %v8419_v31  ;;  %v9032_v29 = vmul.f32 %v9031_v40, %v19003_v32  ;;  %vm8999_vm13 = vweird.f32 %v19042_v45  ;;  %v9019_v20 = vmul.f32 %v9018_v60, %v19003_v32 }
0x1397   :  { %v8998_v48 = vadd.f32 %v19095_v17, %v8997_v49  ;;  %v9065_v55 = vadd.f32 0.001143296, %v9064_v52  ;;  %v8983_v10 = vmul.f32 %v8982_v33, %v18891_v0  ;;  %vm19142_vm4 = vmor %vm8999_vm13, %vm9000_vm12  ;;  %v9006_v31 = vor.u32 1.1754944e-38, %v9005_v5  ;;  %10414 = vmatpush.bf16.msrb.mxu2 %v13615_v26  ;;  %10427 = vmatpush.bf16.msra.mxu3 %v13623_v1  ;;  %v13614_v33 = vld [vmem:[#allocation26 + $0x750] sm:$0xff]  ;;  %v13621_v49 = vld [vmem:[#allocation26 + $0x788] sm:$0xff] }
0x1398   :  { %v9101_v62 = vmul.f32 %v9100_v54, %v18947_v13  ;;  %v19147_v63 = vadd.f32 1.0, %v9032_v29  ;;  %vm9004_vm5 = vcmp.eq.f32.partialorder %v9003_v58, 8.507059e+37  ;;  %v9055_v14 = vmul.f32 %v9054_v44, %v19100_v8  ;;  %10403 = vmatpush.bf16.msrb.mxu0 %v13605_v23  ;;  %v13612_v23 = vld [vmem:[#allocation26 + $0x740] sm:$0xff] }
0x1399   :  { %v9002_v45 = vsel %vm19142_vm4, %v19095_v17, %v8998_v48  ;;  %v9066_v0 = vmul.f32 %v9065_v55, %v19100_v8  ;;  %v19154_v50 = vpop.eup %14098  ;;  %v12530_v57 = vclamps-f32 %v8488_v39, 1.0  ;;  %v8406_v13 = vor.u32 1.1754944e-38, %v8405_v4  ;;  %10442 = vmatpush.bf16.msra.mxu1 %v13629_v56 }
0x139a   :  { %v9007_v30 = vsel %vm9004_vm5, %v9006_v31, %v9002_v45  ;;  %14102 = vrcp.f32 %v19147_v63  ;;  %v9175_v54 = vmul.f32 %v19089_v61, %v18913_v34  ;;  %vm8404_vm6 = vcmp.eq.f32.partialorder %v8403_v35, 8.507059e+37 }
0x139b   :  { %v14101_v17 = vpop.eup %14100  ;;  %v9008_v60 = vmul.f32 %v9007_v30, %v8983_v10  ;;  %v9020_v43 = vadd.f32 0.18741608, %v9019_v20  ;;  %v8407_v59 = vsel %vm8404_vm6, %v8406_v13, %v8402_v12  ;;  %v9102_v52 = vadd.f32 1.1283791, %v9101_v62  ;;  %10415 = vmatpush.bf16.msrb.mxu2 %v13614_v33  ;;  %10428 = vmatpush.bf16.msra.mxu3 %v13622_v2  ;;  %v10250_v13 = vpop.f32.mrf.mxu0 }
0x139c   :  { %v9115_v4 = vmul.f32 %v14101_v17, %v19113_v21  ;;  %v9067_v46 = vadd.f32 0.014752088, %v9066_v0  ;;  %v19165_v11 = vmul.f32 %v8420_v9, %v18862_v16  ;;  %v8435_v58 = vmul.f32 %v19154_v50, %v19098_v51  ;;  %10404 = vmatpush.bf16.msrb.mxu0 %v13604_v36  ;;  %v10289_v30 = vpop.f32.mrf.mxu1  ;;  %v10263_v36 = vpop.f32.mrf.mxu2 }
0x139d   :  { %v12543_v34 = vclamps-f32 %v9008_v60, 1.0  ;;  %v9056_v61 = vadd.f32 0.0036580483, %v9055_v14  ;;  %v19169_v35 = vadd.f32 1.0, %v12530_v57  ;;  %v9123_v40 = vand.u32 2147483647, %v19113_v21  ;;  %10443 = vmatpush.bf16.msra.mxu1 %v13628_v47  ;;  %v10276_v47 = vpop.f32.mrf.mxu3 }
0x139e   :  { %v9116_v5 = vsub.f32 1.0, %v9115_v4  ;;  %v9068_v38 = vmul.f32 %v9067_v46, %v19100_v8  ;;  %v19174_v16 = vmul.f32 %v8407_v59, %v19061_v7  ;;  %v9125_v26 = vand.u32 2147483648, %v19113_v21  ;;  %v13827_v57 = vld [vmem:[#allocation27 + $0x1] ss:$0 sm:$0xff] }
0x139f   :  { %v9159_v44 = vadd.f32 1.0, %v12543_v34  ;;  %v9021_v1 = vmul.f32 %v9020_v43, %v19003_v32  ;;  %v9103_v12 = vmul.f32 %v9102_v52, %v18906_v19  ;;  %vm9120_vm7 = vweird.f32 %v14101_v17  ;;  %10416 = vmatpush.bf16.msrb.mxu2 %v13613_v37  ;;  %10429 = vmatpush.bf16.msra.mxu3 %v13621_v49  ;;  %v13620_v19 = vld [vmem:[#allocation26 + $0x780] sm:$0xff] }
0x13a0   :  { %v14103_v39 = vpop.eup %14102  ;;  %v9117_v9 = vmul.f32 %v14101_v17, %v9116_v5  ;;  %v9069_v29 = vadd.f32 0.112945676, %v9068_v38  ;;  %v8436_v48 = vsub.f32 1.0, %v8435_v58  ;;  %v9057_v7 = vmul.f32 %v9056_v61, %v19100_v8 }
0x13a1   :  { %v9191_v20 = vmul.f32 %v9159_v44, %v18996_v53  ;;  %v9035_v55 = vmul.f32 %v14103_v39, %v19147_v63  ;;  %vm9119_vm8 = vweird.f32 %v19113_v21  ;;  %vm9124_vm11 = vcmp.eq.f32.partialorder %v9123_v40, 8.507059e+37 }
0x13a2   :  { %v9118_v56 = vadd.f32 %v14101_v17, %v9117_v9  ;;  %v9070_v32 = vmul.f32 %v9069_v29, %v19100_v8  ;;  %vm9121_vm14 = vmor %vm9119_vm8, %vm9120_vm7  ;;  %v9126_v24 = vor.u32 1.1754944e-38, %v9125_v26  ;;  %v9022_v31 = vadd.f32 1.1283791, %v9021_v1 }
0x13a3   :  { %v9207_v10 = vpack.c.bf16 %v9191_v20, %v9175_v54  ;;  %v9036_v53 = vsub.f32 1.0, %v9035_v55  ;;  %v9043_v45 = vand.u32 2147483647, %v19147_v63  ;;  %v9045_v14 = vand.u32 2147483648, %v19147_v63  ;;  %10417 = vmatpush.bf16.msrb.mxu2 %v13612_v23  ;;  %10430 = vmatpush.bf16.msra.mxu3 %v13620_v19 }
0x13a4   :  { %v9122_v62 = vsel %vm9121_vm14, %v14101_v17, %v9118_v56  ;;  %v9071_v0 = vadd.f32 0.4994258, %v9070_v32  ;;  %vm9040_vm15 = vweird.f32 %v14103_v39  ;;  %v9058_v21 = vadd.f32 0.05243302, %v9057_v7  ;;  %v10265_v7 = vpop.f32.mrf.mxu2 }
0x13a5   :  { %v9127_v33 = vsel %vm9124_vm11, %v9126_v24, %v9122_v62  ;;  %v9037_v2 = vmul.f32 %v14103_v39, %v9036_v53  ;;  %10405 = vmatmul.bf16.vlgmr.msrb.gmra.mxu0 %v9207_v10  ;;  %v12528_v54 = vclamps-f32 %v19174_v16, 1.0  ;;  %v8437_v60 = vmul.f32 %v19154_v50, %v8436_v48  ;;  %v10278_v23 = vpop.f32.mrf.mxu3 }
0x13a6   :  { %v9128_v43 = vmul.f32 %v9127_v33, %v9103_v12  ;;  %v9072_v17 = vmul.f32 %v9071_v0, %v19100_v8  ;;  %vm8440_vm1 = vweird.f32 %v19154_v50  ;;  %vm9039_vm2 = vweird.f32 %v19147_v63 }
0x13a7   :  { %v9038_v59 = vadd.f32 %v14103_v39, %v9037_v2  ;;  %v10251_v52 = vadd.f32 %v13827_v57, %v10250_v13  ;;  %v9023_v46 = vmul.f32 %v9022_v31, %v18956_v41  ;;  %vm9041_vm3 = vmor %vm9039_vm2, %vm9040_vm15  ;;  %v9046_v58 = vor.u32 1.1754944e-38, %v9045_v14 }
0x13a8   :  { %v12546_v4 = vclamps-f32 %v9128_v43, 1.0  ;;  %v9073_v34 = vadd.f32 1.0, %v9072_v17  ;;  %vm9044_vm9 = vcmp.eq.f32.partialorder %v9043_v45, 8.507059e+37  ;;  %v9059_v37 = vmul.f32 %v9058_v21, %v19100_v8 }
0x13a9   :  { %v9042_v61 = vsel %vm9041_vm3, %v14103_v39, %v9038_v59  ;;  %v10264_v5 = vadd.f32 %v10263_v36, %v10251_v52  ;;  %v8438_v40 = vadd.f32 %v19154_v50, %v8437_v60  ;;  %v9178_v63 = vmul.f32 %v19169_v35, %v18916_v3  ;;  %v10252_v3 = vpop.f32.mrf.mxu0  ;;  %v10291_v35 = vpop.f32.mrf.mxu1 }
0x13aa   :  { %v9162_v38 = vadd.f32 1.0, %v12546_v4  ;;  %v9047_v49 = vsel %vm9044_vm9, %v9046_v58, %v9042_v61  ;;  %14104 = vrcp.f32 %v9073_v34  ;;  %v8445_v16 = vand.u32 2147483648, %v19098_v51 }
0x13ab   :  { %v9048_v41 = vmul.f32 %v9047_v49, %v9023_v46  ;;  %v10277_v44 = vadd.f32 %v10276_v47, %v10264_v5  ;;  %v9144_v26 = vadd.f32 1.0, %v12528_v54  ;;  %vm8439_vm10 = vweird.f32 %v19098_v51 }
0x13ac   :  { %v8443_v1 = vand.u32 2147483647, %v19098_v51  ;;  %v9194_v39 = vmul.f32 %v9162_v38, %v19036_v42  ;;  %vm19204_vm12 = vmor %vm8439_vm10, %vm8440_vm1  ;;  %v9060_v29 = vadd.f32 0.18741608, %v9059_v37  ;;  %v7800_v20 = vmul.f32 0.5, %v18692_v25 }
0x13ad   :  { %v12544_v9 = vclamps-f32 %v9048_v41, 1.0  ;;  %v10290_v48 = vadd.f32 %v10289_v30, %v10277_v44  ;;  %v8422_v55 = vadd.f32 1.1283791, %v19165_v11  ;;  %v8442_v51 = vsel %vm19204_vm12, %v19154_v50, %v8438_v40 }
0x13ae   :  { %v9210_v42 = vpack.c.bf16 %v9194_v39, %v9178_v63  ;;  %v8446_v56 = vor.u32 1.1754944e-38, %v8445_v16  ;;  %v7816_v32 = vmul.f32 0.5, %v18939_v15  ;;  %v9176_v24 = vmul.f32 %v9144_v26, %v7800_v20 }
0x13af   :  { %v9160_v19 = vadd.f32 1.0, %v12544_v9  ;;  %vm8444_vm13 = vcmp.eq.f32.partialorder %v8443_v1, 8.507059e+37  ;;  %v9061_v25 = vmul.f32 %v9060_v29, %v19100_v8  ;;  %v8423_v62 = vmul.f32 %v8422_v55, %v18844_v18 }
0x13b0   :  { %v14105_v10 = vpop.eup %14104  ;;  %10444 = vmatmul.bf16.vlgmr.msra.gmra.mxu1 %v9210_v42  ;;  %v8447_v31 = vsel %vm8444_vm13, %v8446_v56, %v8442_v51  ;;  %v9085_v0 = vand.u32 2147483648, %v9073_v34  ;;  %v9083_v15 = vand.u32 2147483647, %v9073_v34  ;;  %vm9079_vm5 = vweird.f32 %v9073_v34 }
0x13b1   :  { %v9192_v53 = vmul.f32 %v9160_v19, %v7816_v32  ;;  %v9075_v11 = vmul.f32 %v14105_v10, %v9073_v34  ;;  %v8448_v14 = vmul.f32 %v8447_v31, %v8423_v62  ;;  %v9062_v33 = vadd.f32 1.1283791, %v9061_v25  ;;  %v10302_v21 = vpop.f32.mrf.mxu0  ;;  %v10341_v57 = vpop.f32.mrf.mxu1  ;;  %v10496_v25 = vld [vmem:[%s19610_s12 + $0x70] sm:$0xff] }
0x13b2   :  { %vm9080_vm4 = vweird.f32 %v14105_v10  ;;  %v10303_v13 = vadd.f32 %v10302_v21, %v10290_v48  ;;  %v9086_v54 = vor.u32 1.1754944e-38, %v9085_v0  ;;  %vm9084_vm7 = vcmp.eq.f32.partialorder %v9083_v15, 8.507059e+37  ;;  %v19611_v62 = vld [vmem:[#allocation43_spill] sm:$0xff]  ;;  %v10494_v0 = vld [vmem:[%s19610_s12 + $0x60] sm:$0xff] }
0x13b3   :  { %v9208_v45 = vpack.c.bf16 %v9192_v53, %v9176_v24  ;;  %v9076_v50 = vsub.f32 1.0, %v9075_v11  ;;  %vm9081_vm6 = vmor %vm9079_vm5, %vm9080_vm4  ;;  %v12529_v8 = vclamps-f32 %v8448_v14, 1.0  ;;  %v9063_v60 = vmul.f32 %v9062_v33, %v19070_v6  ;;  %v10497_v53 = vld [vmem:[%s19610_s12 + $0x78] sm:$0xff]  ;;  %v10491_v15 = vld [vmem:[%s19610_s12 + $0x48] sm:$0xff] }
0x13b4   :  { %v7801_v4 = vmul.f32 0.5, %v18815_v28  ;;  %v7817_v46 = vmul.f32 0.5, %v19040_v27  ;;  %10502 = vmatpush.msra.mxu0 %v10497_v53  ;;  %v10493_v33 = vld [vmem:[%s19610_s12 + $0x58] sm:$0xff]  ;;  %v10490_v21 = vld [vmem:[%s19610_s12 + $0x40] sm:$0xff]  ;;  %vm10558_vm15 = vcmask 1024  }
0x13b5   :  { %v9077_v2 = vmul.f32 %v14105_v10, %v9076_v50  ;;  %10418 = vmatmul.bf16.vlgmr.msrb.gmra.mxu2 %v9208_v45  ;;  %v9145_v36 = vadd.f32 1.0, %v12529_v8  ;;  %v10485_v8 = vld [vmem:[%s19610_s12 + $0x18] sm:$0xff] }
0x13b6   :  { %10503 = vmatpush.msra.mxu0 %v10496_v25 }
0x13b7   :  { %v9078_v30 = vadd.f32 %v14105_v10, %v9077_v2  ;;  %v9177_v61 = vmul.f32 %v9145_v36, %v7801_v4  ;;  %v10492_v2 = vld [vmem:[%s19610_s12 + $0x50] sm:$0xff]  ;;  %v10527_v4 = vld [vmem:[%s19612_s16 + $0x20] sm:$0xff] }
0x13b8   :  { %v10529_v36 = vld [vmem:[%s19612_s16 + $0x30] sm:$0xff] }
0x13b9   :  { %v9082_v18 = vsel %vm9081_vm6, %v14105_v10, %v9078_v30  ;;  %v10304_v59 = vpop.f32.mrf.mxu0  ;;  %v10343_v52 = vpop.f32.mrf.mxu1  ;;  %v10487_v30 = vld [vmem:[%s19610_s12 + $0x28] sm:$0xff] }
0x13ba   :  { %v9087_v43 = vsel %vm9084_vm7, %v9086_v54, %v9082_v18  ;;  %v10486_v54 = vld [vmem:[%s19610_s12 + $0x20] sm:$0xff]  ;;  %v10483_v18 = vld [vmem:[%s19610_s12 + $0x8] sm:$0xff] }
0x13bb   :  { %v9088_v17 = vmul.f32 %v9087_v43, %v9063_v60  ;;  %v10484_v60 = vld [vmem:[%s19610_s12 + $0x10] sm:$0xff]  ;;  %v10482_v43 = vld [vmem:[%s19610_s12] sm:$0xff] }
0x13bd   :  { %v12545_v47 = vclamps-f32 %v9088_v17, 1.0  ;;  %v10530_v17 = vld [vmem:[%s19612_s16 + $0x38] sm:$0xff] }
0x13be   :  { %10546 = vmatpush.msra.mxu2 %v10530_v17 }
0x13bf   :  { %v9161_v58 = vadd.f32 1.0, %v12545_v47  ;;  %v10528_v47 = vld [vmem:[%s19612_s16 + $0x28] sm:$0xff] }
0x13c0   :  { %10547 = vmatpush.msra.mxu2 %v10529_v36 }
0x13c1   :  { %v9193_v34 = vmul.f32 %v9161_v58, %v7817_v46  ;;  %v10526_v58 = vld [vmem:[%s19612_s16 + $0x18] sm:$0xff] }
0x13c2   :  { %10548 = vmatpush.msra.mxu2 %v10528_v47 }
0x13c3   :  { %v9209_v37 = vpack.c.bf16 %v9193_v34, %v9177_v61  ;;  %v10525_v61 = vld [vmem:[%s19612_s16 + $0x10] sm:$0xff] }
0x13c4   :  { %10549 = vmatpush.msra.mxu2 %v10527_v4 }
0x13c5   :  { %10431 = vmatmul.bf16.vlgmr.msra.gmra.mxu3 %v9209_v37 }
0x13c6   :  { %10550 = vmatpush.msra.mxu2 %v10526_v58 }
0x13c8   :  { %10551 = vmatpush.msra.mxu2 %v10525_v61 }
0x13e1   :  { %v10315_v5 = vpop.f32.mrf.mxu2 }
0x13e2   :  { %v10316_v40 = vadd.f32 %v10315_v5, %v10303_v13  ;;  %v10488_v13 = vld [vmem:[%s19610_s12 + $0x30] sm:$0xff] }
0x13e3   :  { %v10328_v6 = vpop.f32.mrf.mxu3 }
0x13e4   :  { %v10329_v38 = vadd.f32 %v10328_v6, %v10316_v40 }
0x13e6   :  { %v10342_v49 = vadd.f32 %v10341_v57, %v10329_v38  ;;  %v10489_v57 = vld [vmem:[%s19610_s12 + $0x38] sm:$0xff] }
0x13e9   :  { %v10317_v63 = vpop.f32.mrf.mxu2 }
0x13eb   :  { %v10330_v16 = vpop.f32.mrf.mxu3 }
0x13fe   :  { %v10354_v41 = vpop.f32.mrf.mxu0  ;;  %v10393_v44 = vpop.f32.mrf.mxu1 }
0x13ff   :  { %v10355_v39 = vadd.f32 %v10354_v41, %v10342_v49  ;;  %v13828_v49 = vld [vmem:[#allocation29 + $0x1] ss:$0 sm:$0xff]  ;;  %v13829_v41 = vld [vmem:[#allocation30 + $0x1] ss:$0 sm:$0xff] }
0x1406   :  { %v10356_v26 = vpop.f32.mrf.mxu0  ;;  %v10395_v1 = vpop.f32.mrf.mxu1 }
0x1407   :  { %v10524_v1 = vld [vmem:[%s19612_s16 + $0x8] sm:$0xff] }
0x1408   :  { %10552 = vmatpush.msra.mxu2 %v10524_v1 }
0x1409   :  { %v10367_v28 = vpop.f32.mrf.mxu2  ;;  %v10380_v27 = vpop.f32.mrf.mxu3 }
0x140a   :  { %v10368_v12 = vadd.f32 %v10367_v28, %v10355_v39  ;;  %v10523_v39 = vld [vmem:[%s19612_s16] sm:$0xff]  ;;  %v13830_v28 = vld [vmem:[#allocation32] ss:$0 sm:$0xff] }
0x140b   :  { %10553 = vmatpush.msra.mxu2 %v10523_v39 }
0x140c   :  { %v10381_v9 = vadd.f32 %v10380_v27, %v10368_v12 }
0x140e   :  { %v10394_v29 = vadd.f32 %v10393_v44, %v10381_v9 }
0x1411   :  { %v10369_v3 = vpop.f32.mrf.mxu2  ;;  %v10382_v35 = vpop.f32.mrf.mxu3 }
0x1422   :  { %v10406_v48 = vpop.f32.mrf.mxu0 }
0x1423   :  { %v10407_v23 = vadd.f32 %v10406_v48, %v10394_v29  ;;  %v13831_v29 = vld [vmem:[#allocation3] ss:$0 sm:$0xff] }
0x142a   :  { %v10408_v20 = vpop.f32.mrf.mxu0 }
0x142d   :  { %v10445_v55 = vpop.f32.mrf.mxu1 }
0x1435   :  { %v10447_v51 = vpop.f32.mrf.mxu1 }
0x1438   :  { %v10419_v42 = vpop.f32.mrf.mxu2 }
0x1439   :  { %v10420_v56 = vadd.f32 %v10419_v42, %v10407_v23 }
0x1440   :  { %v10421_v7 = vpop.f32.mrf.mxu2 }
0x1448   :  { %v10432_v32 = vpop.f32.mrf.mxu3 }
0x1449   :  { %v10433_v19 = vadd.f32 %v10432_v32, %v10420_v56 }
0x144b   :  { %v10446_v10 = vadd.f32 %v10445_v55, %v10433_v19 }
0x144d   :  { %v10449_v24 = vadd.f32 %v10446_v10, %v17388_v22  ;;  %v10495_v22 = vld [vmem:[%s19610_s12 + $0x68] sm:$0xff] }
0x144e   :  { %10504 = vmatpush.msra.mxu0 %v10495_v22 }
0x144f   :  { %10454 = vadd.xlane.f32.xlu1 %v10449_v24 }
0x1450   :  { %v10434_v31 = vpop.f32.mrf.mxu3  ;;  %10505 = vmatpush.msra.mxu0 %v10494_v0 }
0x1452   :  { %10506 = vmatpush.msra.mxu0 %v10493_v33 }
0x1454   :  { %10507 = vmatpush.msra.mxu0 %v10492_v2 }
0x1456   :  { %10508 = vmatpush.msra.mxu0 %v10491_v15 }
0x1458   :  { %10509 = vmatpush.msra.mxu0 %v10490_v21 }
0x145a   :  { %10510 = vmatpush.msra.mxu0 %v10489_v57 }
0x145c   :  { %10511 = vmatpush.msra.mxu0 %v10488_v13 }
0x145e   :  { %10512 = vmatpush.msra.mxu0 %v10487_v30 }
0x1460   :  { %10513 = vmatpush.msra.mxu0 %v10486_v54 }
0x1462   :  { %10514 = vmatpush.msra.mxu0 %v10485_v8 }
0x1464   :  { %10515 = vmatpush.msra.mxu0 %v10484_v60 }
0x1466   :  { %10516 = vmatpush.msra.mxu0 %v10483_v18 }
0x1468   :  { %10517 = vmatpush.msra.mxu0 %v10482_v43 }
0x14c2   :  { %v10455_v11 = vpop.xlane.xlu1 %10454 }
0x14c3   :  { %v10456_v45 = vmul.f32 %v10455_v11, %v19611_v62 }
0x14c5   :  { %v10457_v50 = vsub.f32 %v10449_v24, %v10456_v45 }
0x14c7   :  { %v10458_v14 = vmul.f32 %v10457_v50, %v10457_v50 }
0x14c9   :  { %10459 = vadd.xlane.f32.xlu2 %v10458_v14 }
0x153c   :  { %v10460_v59 = vpop.xlane.xlu2 %10459 }
0x153d   :  { %v10461_v52 = vmul.f32 %v10460_v59, %v19611_v62 }
0x153f   :  { %v10462_v46 = vadd.f32 1e-05, %v10461_v52 }
0x1541   :  { %14106 = vrsqrt.f32 %v10462_v46  ;;  %vm10469_vm11 = vweird.f32 %v10462_v46 }
0x1547   :  { %v14107_v34 = vpop.eup %14106 }
0x1548   :  { %v10464_v37 = vmul.f32 %v14107_v34, %v10462_v46  ;;  %vm10470_vm8 = vweird.f32 %v14107_v34 }
0x1549   :  { %vm10471_vm14 = vmor %vm10469_vm11, %vm10470_vm8 }
0x154a   :  { %v10465_v5 = vmul.f32 %v14107_v34, %v10464_v37 }
0x154c   :  { %v10466_v40 = vmul.f32 0.5, %v10465_v5 }
0x154e   :  { %v10467_v6 = vsub.f32 1.5, %v10466_v40 }
0x1550   :  { %v10468_v38 = vmul.f32 %v14107_v34, %v10467_v6 }
0x1552   :  { %v10472_v63 = vsel %vm10471_vm14, %v14107_v34, %v10468_v38 }
0x1553   :  { %v10473_v16 = vmul.f32 %v10472_v63, %v10457_v50 }
0x1555   :  { %v10477_v44 = vmul.f32 %v13828_v49, %v10473_v16 }
0x1557   :  { %v10481_v26 = vadd.f32 %v13829_v41, %v10477_v44 }
0x1559   :  { %10518 = vmatmul.f32.vlgmr.msra.gmra.mxu0 %v10481_v26 }
0x15d6   :  { %v10519_v12 = vpop.f32.mrf.mxu0 }
0x15d7   :  { %v10520_v27 = vadd.f32 %v13830_v28, %v10519_v12 }
0x15d9   :  { %v10522_v9 = vmax.f32 %v10520_v27, 0.0 }
0x15db   :  { %13059 = vmatmul.msk.f32.vlgmr.msra.gmra.mxu2 %vm1632_vm0, %v10522_v9 }
0x165e   :  { %v10555_v3 = vpop.f32.mrf.mxu2 }
0x165f   :  { %v10556_v35 = vadd.f32 %v13831_v29, %v10555_v3 }
0x1661   :  { %10559 = vst.msk [vmem:[%s19613_s1] sm:$0x3] %vm10558_vm15, %v10556_v35 }
0x1662   :  { %10564 = vsyncpa [#allocation5], 1 }
0x1663   :  { %10565 = vsyncpa [#allocation7], 1 }
0x1664   :  { %10566 = vsyncpa [#allocation10], 1 }
0x1665   :  { %10567 = vsyncpa [#allocation13], 1 }
0x1666   :  { %10568 = vsyncpa [#allocation16], 1 }
0x1667   :  { %10569 = vsyncpa [#allocation19], 1 }
0x1668   :  { %10570 = vsyncpa [#allocation22], 1 }
0x1669   :  { %10571 = vsyncpa [#allocation25], 1 }
0x166a   :  { %10572 = vsyncpa [#allocation28], 1 }
0x166b   :  { %10573 = vsyncpa [#allocation31], 1 }

</bundles_post_ra>
